<compile_context>
chip_gen: v7x
topology: tpu7x:2x2x1
jax: 0.10.0
libtpu: 0.0.40
codegen_flags: <defaults>
</compile_context>

<pallas_src>
import jax
import jax.numpy as jnp
from jax import lax
from jax.experimental import pallas as pl
from jax.experimental.pallas import tpu as pltpu


# ---------------------------------------------------------------------------
# Pallas kernel: `Nb` batch images per grid step (grid axis 0 = batch blocks).
# ---------------------------------------------------------------------------
def _bottleneck_kernel(x_ref, w1_ref, b1_ref, w2_ref, b2_ref, w3_ref, b3_ref,
                       o_ref, h1p_ref):
    # x_ref : (Nb, H, W, Cin)            f32   input block (cast to bf16 here)
    # w1_ref: (Cin, Cmid)                bf16  1x1 conv, BN1 scale folded in
    # b1_ref: (1, Cmid)                  f32
    # w2_ref: (NC, 9*Cc, Cc)             bf16  grouped 3x3 conv packed into
    #                                          MXU-tile chunks, im2col layout
    #                                          (tap-major rows), BN2 folded in
    # b2_ref: (1, Cmid)                  f32
    # w3_ref: (Cmid, Cout)               bf16  1x1 conv, BN3 scale folded in
    # b3_ref: (1, Cout)                  f32   conv3 bias folded through BN3
    # o_ref : (Nb, H, W, Cout)           f32 (or bf16)
    # h1p_ref: (Nb, (H+3)*(W+2), Cmid)   bf16  zero-padded stage-1 activations
    Nb, H, W, Cin = x_ref.shape
    Wp = W + 2
    HWp = H * Wp
    Cmid = w1_ref.shape[1]
    NC = w2_ref.shape[0]
    Cc = w2_ref.shape[2]
    Cout = w3_ref.shape[1]
    M = Nb * H * W

    # The furthest tap slab read ends at flat row 2*Wp + 2 + HWp; the +3 image
    # rows in the scratch exist exactly so this stays in bounds (VMEM OOB has
    # no runtime check -- keep this assert if the scratch shape changes).
    assert 2 * Wp + 2 + HWp <= h1p_ref.shape[1]

    x_f32 = x_ref[...].reshape(M, Cin)                 # residual stays f32
    xb = x_f32.astype(jnp.bfloat16)

    # ---- stage 1: 1x1 conv + bias + ReLU (BN1 folded into w1/b1) ----------
    h1 = jnp.dot(xb, w1_ref[...], preferred_element_type=jnp.float32)
    h1 = jnp.maximum(h1 + b1_ref[...], 0.0).astype(jnp.bfloat16)
    h1_4d = h1.reshape(Nb, H, W, Cmid)                 # (Nb, H, W, Cmid) bf16

    # ---- write the zero-padded map into the bf16 scratch -------------------
    # Flat layout per image: padded row r occupies flat rows [r*Wp, (r+1)*Wp);
    # image row i sits at r = i + 1, interior columns are j = 1..W.
    # Zero only the halo border; the interior is rewritten every grid step.
    h1p_ref[:, 0:Wp + 1, :] = jnp.zeros((Nb, Wp + 1, Cmid), jnp.bfloat16)
    tail_start = H * Wp + W + 1                        # right pad of last row
    tail_end = (H + 3) * Wp                            # ... through extra rows
    h1p_ref[:, tail_start:tail_end, :] = jnp.zeros(
        (Nb, tail_end - tail_start, Cmid), jnp.bfloat16)
    zero_pair = jnp.zeros((Nb, 2, Cmid), jnp.bfloat16)
    for r in range(1, H):                              # right pad r / left pad r+1
        s = r * Wp + W + 1
        h1p_ref[:, s:s + 2, :] = zero_pair
    for i in range(H):                                 # unrolled interior rows
        s = (i + 1) * Wp + 1
        h1p_ref[:, s:s + W, :] = h1_4d[:, i]

    # ---- stage 2: grouped 3x3 conv + bias + ReLU ---------------------------
    # Output (i, j) with flat q = i*Wp + j needs padded rows hp[q + ky*Wp + kx]
    # for the nine taps -> each tap is one contiguous slab sliced straight off
    # the scratch ref.  The 9 taps are concatenated along lanes (im2col) and
    # contracted in a single K = 9*Cc matmul per weight chunk.
    chunk_outs = []
    for c in range(NC):
        taps = []
        for ky in range(3):
            for kx in range(3):
                s = ky * Wp + kx
                taps.append(h1p_ref[:, s:s + HWp, c * Cc:(c + 1) * Cc])
        lhs = jnp.concatenate(taps, axis=-1).reshape(Nb * HWp, 9 * Cc)
        chunk_outs.append(
            jnp.dot(lhs, w2_ref[c], preferred_element_type=jnp.float32))
    h2 = chunk_outs[0] if NC == 1 else jnp.concatenate(chunk_outs, axis=-1)
    h2 = jnp.maximum(h2 + b2_ref[...], 0.0).astype(jnp.bfloat16)
    # Drop the Wp-W junk columns (centres sitting in the right padding).
    h2 = h2.reshape(Nb, H, Wp, Cmid)[:, :, 0:W, :].reshape(M, Cmid)

    # ---- stage 3: 1x1 conv + bias (BN3 folded), residual add, ReLU ---------
    h3 = jnp.dot(h2, w3_ref[...], preferred_element_type=jnp.float32)
    out = jnp.maximum(h3 + b3_ref[...] + x_f32, 0.0)   # identity shortcut (f32)
    o_ref[...] = out.reshape(Nb, H, W, Cout).astype(o_ref.dtype)


# ---------------------------------------------------------------------------
# Wrappers.
# ---------------------------------------------------------------------------
def bottleneck_c_nhwc(x_nhwc, params, *, batch_block=None,
                      out_dtype=jnp.float32):
    """NHWC entry point (preferred: avoids NCHW<->NHWC HBM relayouts)."""
    n, h, w, cin = x_nhwc.shape
    cmid = params["w1"].shape[1]
    nchunk, nine_cc, cc = params["w2"].shape
    cout = params["w3"].shape[1]
    if cin != cout:
        raise ValueError(
            "identity shortcut requires in_channel == expansion*out_channel "
            f"(got {cin} vs {cout}); projection shortcut not implemented")

    if batch_block is None:
        # Target >= 256 matmul rows per grid step (fills a 256-row MXU and
        # amortizes the ~0.35us/step grid overhead).
        nb = 1
        while nb < n and nb * h * w < 256:
            nb *= 2
        while n % nb:
            nb -= 1
        batch_block = nb
    nb = batch_block
    if n % nb:
        raise ValueError("batch_block must divide the batch size")

    def _pinned(shape):
        nd = len(shape)
        return pl.BlockSpec(shape, lambda b, nd=nd: (0,) * nd)

    return pl.pallas_call(
        _bottleneck_kernel,
        out_shape=jax.ShapeDtypeStruct((n, h, w, cout), out_dtype),
        grid=(n // nb,),
        in_specs=[
            pl.BlockSpec((nb, h, w, cin), lambda b: (b, 0, 0, 0)),
            _pinned((cin, cmid)),            # w1 (BN1 folded)
            _pinned((1, cmid)),              # b1
            _pinned((nchunk, nine_cc, cc)),  # w2 (chunked, im2col layout)
            _pinned((1, cmid)),              # b2
            _pinned((cmid, cout)),           # w3 (BN3 folded)
            _pinned((1, cout)),              # b3
        ],
        out_specs=pl.BlockSpec((nb, h, w, cout), lambda b: (b, 0, 0, 0)),
        scratch_shapes=[pltpu.VMEM((nb, (h + 3) * (w + 2), cmid),
                                   jnp.bfloat16)],
        compiler_params=pltpu.CompilerParams(
            dimension_semantics=("parallel",),
            vmem_limit_bytes=32 * 1024 * 1024),
    )(x_nhwc, params["w1"], params["b1"], params["w2"], params["b2"],
      params["w3"], params["b3"])


@jax.jit
def bottleneck_c(x_nchw, params):
    """NCHW wrapper matching the PyTorch module interface.

    # TODO(synk): keep the surrounding network NHWC end-to-end and call
    # bottleneck_c_nhwc directly to avoid the two boundary HBM relayouts.
    """
    x_nhwc = jnp.transpose(x_nchw, (0, 2, 3, 1))
    out_nhwc = bottleneck_c_nhwc(x_nhwc, params)
    return jnp.transpose(out_nhwc, (0, 3, 1, 2))


# ---------------------------------------------------------------------------
# Parameter construction (BN folded, grouped weight packed for the MXU).
# ---------------------------------------------------------------------------
def _default_chunk_channels():
    """128-wide grouped-conv chunks on 128x128-MXU chips (<= v5), 256 on v6e/v7x."""
    try:
        kind = jax.devices()[0].device_kind.lower()
    except Exception:
        return 128
    for tag in ("v2", "v3", "v4", "v5"):
        if tag in kind:
            return 128
    return 256


def make_params(key, in_channel, out_channel, cardinality, base_width=64,
                expansion=4, eps=1e-5, chunk_channels=None):
    if chunk_channels is None:
        chunk_channels = _default_chunk_channels()
    mid = int(out_channel * (base_width / 64.0)) * cardinality
    cg = mid // cardinality
    exp_out = expansion * out_channel
    ks = jax.random.split(key, 8)

    w1 = 0.1 * jax.random.normal(ks[0], (in_channel, mid), jnp.float32)
    wg = 0.1 * jax.random.normal(ks[1], (3, 3, cardinality, cg, cg), jnp.float32)
    w3 = 0.1 * jax.random.normal(ks[2], (mid, exp_out), jnp.float32)
    b3_conv = 0.1 * jax.random.normal(ks[3], (exp_out,), jnp.float32)

    def bn(k, c):
        k1, k2, k3, k4 = jax.random.split(k, 4)
        gamma = jax.random.uniform(k1, (c,), jnp.float32, 0.5, 1.5)
        beta = 0.1 * jax.random.normal(k2, (c,), jnp.float32)
        mean = 0.1 * jax.random.normal(k3, (c,), jnp.float32)
        var = jax.random.uniform(k4, (c,), jnp.float32, 0.5, 1.5)
        return gamma, beta, mean, var

    bn1, bn2, bn3 = bn(ks[4], mid), bn(ks[5], mid), bn(ks[6], exp_out)

    def fold(g, b, m, v):                    # inference-mode BN -> scale, bias
        s = g / jnp.sqrt(v + eps)
        return s, b - m * s

    s1, b1 = fold(*bn1)
    s2, b2 = fold(*bn2)
    s3, b3 = fold(*bn3)
    b3 = b3 + b3_conv * s3                   # fold conv_3 bias through BN3

    # Fold BN scales into the conv weights (per output channel).
    w1f = w1 * s1[None, :]
    wgf = wg * s2.reshape(cardinality, cg)[None, None, :, None, :]
    w3f = w3 * s3[None, :]

    # Pack groups into MXU-tile-sized chunks (block-diagonal inside a chunk),
    # im2col weight layout: rows are tap-major, (9*Cc, Cc) per chunk.
    if cg < chunk_channels:
        gpc = max(1, min(cardinality, chunk_channels // cg))
    else:
        gpc = 1
    while cardinality % gpc:
        gpc -= 1
    nchunk = cardinality // gpc
    cc = gpc * cg
    wgf9 = wgf.reshape(9, cardinality, cg, cg)
    w2c = jnp.zeros((nchunk, 9, cc, cc), jnp.float32)
    for g in range(cardinality):
        n_, gl = divmod(g, gpc)
        w2c = w2c.at[n_, :, gl * cg:(gl + 1) * cg,
                     gl * cg:(gl + 1) * cg].set(wgf9[:, g])
    w2c = w2c.reshape(nchunk, 9 * cc, cc)

    kernel_params = dict(
        w1=w1f.astype(jnp.bfloat16), b1=b1[None, :],
        w2=w2c.astype(jnp.bfloat16), b2=b2[None, :],
        w3=w3f.astype(jnp.bfloat16), b3=b3[None, :],
    )
    torch_params = dict(
        w1_oihw=jnp.transpose(w1)[:, :, None, None],
        w2_oihw=jnp.transpose(wg, (2, 4, 3, 0, 1)).reshape(mid, cg, 3, 3),
        w3_oihw=jnp.transpose(w3)[:, :, None, None],
        b3_conv=b3_conv, bn1=bn1, bn2=bn2, bn3=bn3, eps=eps,
        cardinality=cardinality,
    )
    return kernel_params, torch_params


# ---------------------------------------------------------------------------
# Pure-JAX references.
# ---------------------------------------------------------------------------
def ref_forward_folded(x_nhwc, kp):
    """Same folded-BN / bf16 math as the kernel, implemented with plain XLA."""
    f32 = jnp.float32
    N, H, W, Cin = x_nhwc.shape
    xb = x_nhwc.astype(jnp.bfloat16)
    h1 = jnp.einsum('nhwc,cm->nhwm', xb, kp['w1'], preferred_element_type=f32)
    h1 = jnp.maximum(h1 + kp['b1'][0], 0.0).astype(jnp.bfloat16)
    hp = jnp.pad(h1, ((0, 0), (1, 1), (1, 1), (0, 0)))
    NC, _, Cc = kp['w2'].shape
    chunks = []
    for c in range(NC):
        acc = None
        for dy in range(3):
            for dx in range(3):
                t = dy * 3 + dx
                patch = hp[:, dy:dy + H, dx:dx + W, c * Cc:(c + 1) * Cc]
                wt = kp['w2'][c, t * Cc:(t + 1) * Cc, :]
                y = jnp.einsum('nhwc,cd->nhwd', patch, wt,
                               preferred_element_type=f32)
                acc = y if acc is None else acc + y
        chunks.append(acc)
    h2 = chunks[0] if NC == 1 else jnp.concatenate(chunks, axis=-1)
    h2 = jnp.maximum(h2 + kp['b2'][0], 0.0).astype(jnp.bfloat16)
    h3 = jnp.einsum('nhwc,co->nhwo', h2, kp['w3'],
                    preferred_element_type=f32) + kp['b3'][0]
    return jnp.maximum(h3 + x_nhwc.astype(f32), 0.0)


def ref_forward(x, tp):
    """PyTorch-faithful forward (f32, unfolded BN, NCHW lax convs)."""
    dn = ("NCHW", "OIHW", "NCHW")
    hi = lax.Precision.HIGHEST
    eps = tp["eps"]

    def bn(y, params):
        g, b, m, v = params
        inv = g / jnp.sqrt(v + eps)
        return (y - m[None, :, None, None]) * inv[None, :, None, None] \
            + b[None, :, None, None]

    y = lax.conv_general_dilated(x, tp["w1_oihw"], (1, 1), "VALID",
                                 dimension_numbers=dn, precision=hi)
    y = jnp.maximum(bn(y, tp["bn1"]), 0.0)
    y = lax.conv_general_dilated(y, tp["w2_oihw"], (1, 1), ((1, 1), (1, 1)),
                                 dimension_numbers=dn,
                                 feature_group_count=tp["cardinality"],
                                 precision=hi)
    y = jnp.maximum(bn(y, tp["bn2"]), 0.0)
    y = lax.conv_general_dilated(y, tp["w3_oihw"], (1, 1), "VALID",
                                 dimension_numbers=dn, precision=hi)
    y = y + tp["b3_conv"][None, :, None, None]
    y = bn(y, tp["bn3"])
    y = y + x                                   # shortcut is None
    return jnp.maximum(y, 0.0)


if __name__ == "__main__":
    # Small but lane-dense config (all channel dims multiples of 128):
    #   in_channel=128, out_channel=32, cardinality=8, base_width=64
    #   -> mid_channel = 256 (8 groups of 32), expansion*out_channel = 128.
    # With N=8, H=W=8 the auto batch block is 4 images/step -> M=256 rows.
    N, H, W = 8, 8, 8
    IN_CH, OUT_CH, CARD = 128, 32, 8

    key = jax.random.PRNGKey(0)
    k_x, k_p = jax.random.split(key)
    x_nhwc = jax.random.normal(k_x, (N, H, W, IN_CH), jnp.float32)

    kparams, tparams = make_params(k_p, IN_CH, OUT_CH, CARD)

    fwd = jax.jit(bottleneck_c_nhwc)
    out = jax.block_until_ready(fwd(x_nhwc, kparams))
    assert out.shape == (N, H, W, 4 * OUT_CH), out.shape

    # Tight check: identical folded/bf16 math implemented with plain XLA.
    ref_bf16 = jax.block_until_ready(ref_forward_folded(x_nhwc, kparams))
    err_tight = float(jnp.max(jnp.abs(out - ref_bf16)))

    # Sanity check vs. the PyTorch-faithful f32 graph (unfolded BN, f32
    # weights); remaining difference is bf16 rounding only.
    x_nchw = jnp.transpose(x_nhwc, (0, 3, 1, 2))
    ref_f32 = jnp.transpose(ref_forward(x_nchw, tparams), (0, 2, 3, 1))
    diff = jnp.abs(out - ref_f32)
    err_f32_max = float(jnp.max(diff))
    err_f32_mean = float(jnp.mean(diff))

    # NCHW wrapper (API parity with the PyTorch module).
    out_nchw = jax.block_until_ready(bottleneck_c(x_nchw, kparams))
    assert out_nchw.shape == (N, 4 * OUT_CH, H, W), out_nchw.shape

    assert err_tight < 5e-2, f"folded-bf16 reference mismatch: {err_tight}"
    assert err_f32_max < 0.5 and err_f32_mean < 0.03, (
        f"f32 reference mismatch: max={err_f32_max} mean={err_f32_mean}")
    print("KERNEL_OK")
</pallas_src>

<mosaic_0001>
module attributes {stable_mosaic.version = 11 : i64} {
  func.func @_bottleneck_kernel(%arg0: i32, %arg1: memref<4x8x8x128xf32, #tpu.memory_space<vmem>>, %arg2: memref<128x256xbf16, #tpu.memory_space<vmem>>, %arg3: memref<1x256xf32, #tpu.memory_space<vmem>>, %arg4: memref<1x2304x256xbf16, #tpu.memory_space<vmem>>, %arg5: memref<1x256xf32, #tpu.memory_space<vmem>>, %arg6: memref<256x128xbf16, #tpu.memory_space<vmem>>, %arg7: memref<1x128xf32, #tpu.memory_space<vmem>>, %arg8: memref<4x8x8x128xf32, #tpu.memory_space<vmem>>, %arg9: memref<4x110x256xbf16, #tpu.memory_space<vmem>>) attributes {dimension_semantics = [#tpu.dimension_semantics<parallel>], iteration_bounds = array<i64: 2>, scalar_prefetch = 0 : i64, scratch_operands = 1 : i64, tpu.core_type = #tpu.core_type<tc>, window_params = [{transform_indices = @transform_0, window_bounds = array<i64: 4, 8, 8, 128>}, {pipeline_mode = #tpu.pipeline_mode<synchronous>, transform_indices = @transform_1, window_bounds = array<i64: 128, 256>}, {pipeline_mode = #tpu.pipeline_mode<synchronous>, transform_indices = @transform_2, window_bounds = array<i64: 1, 256>}, {pipeline_mode = #tpu.pipeline_mode<synchronous>, transform_indices = @transform_3, window_bounds = array<i64: 1, 2304, 256>}, {pipeline_mode = #tpu.pipeline_mode<synchronous>, transform_indices = @transform_4, window_bounds = array<i64: 1, 256>}, {pipeline_mode = #tpu.pipeline_mode<synchronous>, transform_indices = @transform_5, window_bounds = array<i64: 256, 128>}, {pipeline_mode = #tpu.pipeline_mode<synchronous>, transform_indices = @transform_6, window_bounds = array<i64: 1, 128>}, {transform_indices = @transform_7, window_bounds = array<i64: 4, 8, 8, 128>}]} {
    %c0 = arith.constant 0 : index
    %c0_0 = arith.constant 0 : index
    %c0_1 = arith.constant 0 : index
    %c0_2 = arith.constant 0 : index
    %0 = vector.load %arg1[%c0, %c0_0, %c0_1, %c0_2] : memref<4x8x8x128xf32, #tpu.memory_space<vmem>>, vector<4x8x8x128xf32>
    %1 = vector.shape_cast %0 : vector<4x8x8x128xf32> to vector<256x128xf32>
    %2 = arith.truncf %1 : vector<256x128xf32> to vector<256x128xbf16>
    %c0_3 = arith.constant 0 : index
    %c0_4 = arith.constant 0 : index
    %3 = vector.load %arg2[%c0_3, %c0_4] : memref<128x256xbf16, #tpu.memory_space<vmem>>, vector<128x256xbf16>
    %cst = arith.constant dense<0.000000e+00> : vector<256x256xf32>
    %4 = tpu.matmul %2, %3, %cst {dimension_numbers = #tpu.dot_dimension_numbers<[1], [0], [0], [1], [0, 0, 1, 1], [], []>} : vector<256x128xbf16>, vector<128x256xbf16>, vector<256x256xf32> -> vector<256x256xf32>
    %c0_5 = arith.constant 0 : index
    %c0_6 = arith.constant 0 : index
    %5 = vector.load %arg3[%c0_5, %c0_6] : memref<1x256xf32, #tpu.memory_space<vmem>>, vector<1x256xf32>
    %6 = vector.broadcast %5 : vector<1x256xf32> to vector<256x256xf32>
    %7 = arith.addf %4, %6 : vector<256x256xf32>
    %cst_7 = arith.constant 0.000000e+00 : f32
    %8 = vector.broadcast %cst_7 : f32 to vector<256x256xf32>
    %9 = arith.maximumf %7, %8 : vector<256x256xf32>
    %10 = arith.truncf %9 : vector<256x256xf32> to vector<256x256xbf16>
    %11 = vector.shape_cast %10 : vector<256x256xbf16> to vector<4x8x8x256xbf16>
    %cst_8 = arith.constant 0.000000e+00 : bf16
    %12 = vector.broadcast %cst_8 : bf16 to vector<4x11x256xbf16>
    %c0_9 = arith.constant 0 : index
    %c0_10 = arith.constant 0 : index
    %c0_11 = arith.constant 0 : index
    %13 = vector.load %arg9[%c0_9, %c0_10, %c0_11] : memref<4x110x256xbf16, #tpu.memory_space<vmem>>, vector<4x11x256xbf16>
    tpu.vector_store %arg9[%c0_9, %c0_10, %c0_11], %12 {strides = array<i32>} : memref<4x110x256xbf16, #tpu.memory_space<vmem>>, vector<4x11x256xbf16>,
    %cst_12 = arith.constant 0.000000e+00 : bf16
    %14 = vector.broadcast %cst_12 : bf16 to vector<4x21x256xbf16>
    %c0_13 = arith.constant 0 : index
    %c89 = arith.constant 89 : index
    %c0_14 = arith.constant 0 : index
    %15 = vector.load %arg9[%c0_13, %c89, %c0_14] : memref<4x110x256xbf16, #tpu.memory_space<vmem>>, vector<4x21x256xbf16>
    tpu.vector_store %arg9[%c0_13, %c89, %c0_14], %14 {strides = array<i32>} : memref<4x110x256xbf16, #tpu.memory_space<vmem>>, vector<4x21x256xbf16>,
    %cst_15 = arith.constant 0.000000e+00 : bf16
    %16 = vector.broadcast %cst_15 : bf16 to vector<4x2x256xbf16>
    %c0_16 = arith.constant 0 : index
    %c19 = arith.constant 19 : index
    %c0_17 = arith.constant 0 : index
    %17 = vector.load %arg9[%c0_16, %c19, %c0_17] : memref<4x110x256xbf16, #tpu.memory_space<vmem>>, vector<4x2x256xbf16>
    tpu.vector_store %arg9[%c0_16, %c19, %c0_17], %16 {strides = array<i32>} : memref<4x110x256xbf16, #tpu.memory_space<vmem>>, vector<4x2x256xbf16>,
    %c0_18 = arith.constant 0 : index
    %c29 = arith.constant 29 : index
    %c0_19 = arith.constant 0 : index
    %18 = vector.load %arg9[%c0_18, %c29, %c0_19] : memref<4x110x256xbf16, #tpu.memory_space<vmem>>, vector<4x2x256xbf16>
    tpu.vector_store %arg9[%c0_18, %c29, %c0_19], %16 {strides = array<i32>} : memref<4x110x256xbf16, #tpu.memory_space<vmem>>, vector<4x2x256xbf16>,
    %c0_20 = arith.constant 0 : index
    %c39 = arith.constant 39 : index
    %c0_21 = arith.constant 0 : index
    %19 = vector.load %arg9[%c0_20, %c39, %c0_21] : memref<4x110x256xbf16, #tpu.memory_space<vmem>>, vector<4x2x256xbf16>
    tpu.vector_store %arg9[%c0_20, %c39, %c0_21], %16 {strides = array<i32>} : memref<4x110x256xbf16, #tpu.memory_space<vmem>>, vector<4x2x256xbf16>,
    %c0_22 = arith.constant 0 : index
    %c49 = arith.constant 49 : index
    %c0_23 = arith.constant 0 : index
    %20 = vector.load %arg9[%c0_22, %c49, %c0_23] : memref<4x110x256xbf16, #tpu.memory_space<vmem>>, vector<4x2x256xbf16>
    tpu.vector_store %arg9[%c0_22, %c49, %c0_23], %16 {strides = array<i32>} : memref<4x110x256xbf16, #tpu.memory_space<vmem>>, vector<4x2x256xbf16>,
    %c0_24 = arith.constant 0 : index
    %c59 = arith.constant 59 : index
    %c0_25 = arith.constant 0 : index
    %21 = vector.load %arg9[%c0_24, %c59, %c0_25] : memref<4x110x256xbf16, #tpu.memory_space<vmem>>, vector<4x2x256xbf16>
    tpu.vector_store %arg9[%c0_24, %c59, %c0_25], %16 {strides = array<i32>} : memref<4x110x256xbf16, #tpu.memory_space<vmem>>, vector<4x2x256xbf16>,
    %c0_26 = arith.constant 0 : index
    %c69 = arith.constant 69 : index
    %c0_27 = arith.constant 0 : index
    %22 = vector.load %arg9[%c0_26, %c69, %c0_27] : memref<4x110x256xbf16, #tpu.memory_space<vmem>>, vector<4x2x256xbf16>
    tpu.vector_store %arg9[%c0_26, %c69, %c0_27], %16 {strides = array<i32>} : memref<4x110x256xbf16, #tpu.memory_space<vmem>>, vector<4x2x256xbf16>,
    %c0_28 = arith.constant 0 : index
    %c79 = arith.constant 79 : index
    %c0_29 = arith.constant 0 : index
    %23 = vector.load %arg9[%c0_28, %c79, %c0_29] : memref<4x110x256xbf16, #tpu.memory_space<vmem>>, vector<4x2x256xbf16>
    tpu.vector_store %arg9[%c0_28, %c79, %c0_29], %16 {strides = array<i32>} : memref<4x110x256xbf16, #tpu.memory_space<vmem>>, vector<4x2x256xbf16>,
    %24 = vector.extract_strided_slice %11 {offsets = [0, 0, 0, 0], sizes = [4, 1, 8, 256], strides = [1, 1, 1, 1]} : vector<4x8x8x256xbf16> to vector<4x1x8x256xbf16>
    %25 = vector.shape_cast %24 : vector<4x1x8x256xbf16> to vector<4x8x256xbf16>
    %c0_30 = arith.constant 0 : index
    %c11 = arith.constant 11 : index
    %c0_31 = arith.constant 0 : index
    %26 = vector.load %arg9[%c0_30, %c11, %c0_31] : memref<4x110x256xbf16, #tpu.memory_space<vmem>>, vector<4x8x256xbf16>
    tpu.vector_store %arg9[%c0_30, %c11, %c0_31], %25 {strides = array<i32>} : memref<4x110x256xbf16, #tpu.memory_space<vmem>>, vector<4x8x256xbf16>,
    %27 = vector.extract_strided_slice %11 {offsets = [0, 1, 0, 0], sizes = [4, 1, 8, 256], strides = [1, 1, 1, 1]} : vector<4x8x8x256xbf16> to vector<4x1x8x256xbf16>
    %28 = vector.shape_cast %27 : vector<4x1x8x256xbf16> to vector<4x8x256xbf16>
    %c0_32 = arith.constant 0 : index
    %c21 = arith.constant 21 : index
    %c0_33 = arith.constant 0 : index
    %29 = vector.load %arg9[%c0_32, %c21, %c0_33] : memref<4x110x256xbf16, #tpu.memory_space<vmem>>, vector<4x8x256xbf16>
    tpu.vector_store %arg9[%c0_32, %c21, %c0_33], %28 {strides = array<i32>} : memref<4x110x256xbf16, #tpu.memory_space<vmem>>, vector<4x8x256xbf16>,
    %30 = vector.extract_strided_slice %11 {offsets = [0, 2, 0, 0], sizes = [4, 1, 8, 256], strides = [1, 1, 1, 1]} : vector<4x8x8x256xbf16> to vector<4x1x8x256xbf16>
    %31 = vector.shape_cast %30 : vector<4x1x8x256xbf16> to vector<4x8x256xbf16>
    %c0_34 = arith.constant 0 : index
    %c31 = arith.constant 31 : index
    %c0_35 = arith.constant 0 : index
    %32 = vector.load %arg9[%c0_34, %c31, %c0_35] : memref<4x110x256xbf16, #tpu.memory_space<vmem>>, vector<4x8x256xbf16>
    tpu.vector_store %arg9[%c0_34, %c31, %c0_35], %31 {strides = array<i32>} : memref<4x110x256xbf16, #tpu.memory_space<vmem>>, vector<4x8x256xbf16>,
    %33 = vector.extract_strided_slice %11 {offsets = [0, 3, 0, 0], sizes = [4, 1, 8, 256], strides = [1, 1, 1, 1]} : vector<4x8x8x256xbf16> to vector<4x1x8x256xbf16>
    %34 = vector.shape_cast %33 : vector<4x1x8x256xbf16> to vector<4x8x256xbf16>
    %c0_36 = arith.constant 0 : index
    %c41 = arith.constant 41 : index
    %c0_37 = arith.constant 0 : index
    %35 = vector.load %arg9[%c0_36, %c41, %c0_37] : memref<4x110x256xbf16, #tpu.memory_space<vmem>>, vector<4x8x256xbf16>
    tpu.vector_store %arg9[%c0_36, %c41, %c0_37], %34 {strides = array<i32>} : memref<4x110x256xbf16, #tpu.memory_space<vmem>>, vector<4x8x256xbf16>,
    %36 = vector.extract_strided_slice %11 {offsets = [0, 4, 0, 0], sizes = [4, 1, 8, 256], strides = [1, 1, 1, 1]} : vector<4x8x8x256xbf16> to vector<4x1x8x256xbf16>
    %37 = vector.shape_cast %36 : vector<4x1x8x256xbf16> to vector<4x8x256xbf16>
    %c0_38 = arith.constant 0 : index
    %c51 = arith.constant 51 : index
    %c0_39 = arith.constant 0 : index
    %38 = vector.load %arg9[%c0_38, %c51, %c0_39] : memref<4x110x256xbf16, #tpu.memory_space<vmem>>, vector<4x8x256xbf16>
    tpu.vector_store %arg9[%c0_38, %c51, %c0_39], %37 {strides = array<i32>} : memref<4x110x256xbf16, #tpu.memory_space<vmem>>, vector<4x8x256xbf16>,
    %39 = vector.extract_strided_slice %11 {offsets = [0, 5, 0, 0], sizes = [4, 1, 8, 256], strides = [1, 1, 1, 1]} : vector<4x8x8x256xbf16> to vector<4x1x8x256xbf16>
    %40 = vector.shape_cast %39 : vector<4x1x8x256xbf16> to vector<4x8x256xbf16>
    %c0_40 = arith.constant 0 : index
    %c61 = arith.constant 61 : index
    %c0_41 = arith.constant 0 : index
    %41 = vector.load %arg9[%c0_40, %c61, %c0_41] : memref<4x110x256xbf16, #tpu.memory_space<vmem>>, vector<4x8x256xbf16>
    tpu.vector_store %arg9[%c0_40, %c61, %c0_41], %40 {strides = array<i32>} : memref<4x110x256xbf16, #tpu.memory_space<vmem>>, vector<4x8x256xbf16>,
    %42 = vector.extract_strided_slice %11 {offsets = [0, 6, 0, 0], sizes = [4, 1, 8, 256], strides = [1, 1, 1, 1]} : vector<4x8x8x256xbf16> to vector<4x1x8x256xbf16>
    %43 = vector.shape_cast %42 : vector<4x1x8x256xbf16> to vector<4x8x256xbf16>
    %c0_42 = arith.constant 0 : index
    %c71 = arith.constant 71 : index
    %c0_43 = arith.constant 0 : index
    %44 = vector.load %arg9[%c0_42, %c71, %c0_43] : memref<4x110x256xbf16, #tpu.memory_space<vmem>>, vector<4x8x256xbf16>
    tpu.vector_store %arg9[%c0_42, %c71, %c0_43], %43 {strides = array<i32>} : memref<4x110x256xbf16, #tpu.memory_space<vmem>>, vector<4x8x256xbf16>,
    %45 = vector.extract_strided_slice %11 {offsets = [0, 7, 0, 0], sizes = [4, 1, 8, 256], strides = [1, 1, 1, 1]} : vector<4x8x8x256xbf16> to vector<4x1x8x256xbf16>
    %46 = vector.shape_cast %45 : vector<4x1x8x256xbf16> to vector<4x8x256xbf16>
    %c0_44 = arith.constant 0 : index
    %c81 = arith.constant 81 : index
    %c0_45 = arith.constant 0 : index
    %47 = vector.load %arg9[%c0_44, %c81, %c0_45] : memref<4x110x256xbf16, #tpu.memory_space<vmem>>, vector<4x8x256xbf16>
    tpu.vector_store %arg9[%c0_44, %c81, %c0_45], %46 {strides = array<i32>} : memref<4x110x256xbf16, #tpu.memory_space<vmem>>, vector<4x8x256xbf16>,
    %c0_46 = arith.constant 0 : index
    %c0_47 = arith.constant 0 : index
    %c0_48 = arith.constant 0 : index
    %48 = vector.load %arg9[%c0_46, %c0_47, %c0_48] : memref<4x110x256xbf16, #tpu.memory_space<vmem>>, vector<4x80x256xbf16>
    %c0_49 = arith.constant 0 : index
    %c1 = arith.constant 1 : index
    %c0_50 = arith.constant 0 : index
    %49 = vector.load %arg9[%c0_49, %c1, %c0_50] : memref<4x110x256xbf16, #tpu.memory_space<vmem>>, vector<4x80x256xbf16>
    %c0_51 = arith.constant 0 : index
    %c2 = arith.constant 2 : index
    %c0_52 = arith.constant 0 : index
    %50 = vector.load %arg9[%c0_51, %c2, %c0_52] : memref<4x110x256xbf16, #tpu.memory_space<vmem>>, vector<4x80x256xbf16>
    %c0_53 = arith.constant 0 : index
    %c10 = arith.constant 10 : index
    %c0_54 = arith.constant 0 : index
    %51 = vector.load %arg9[%c0_53, %c10, %c0_54] : memref<4x110x256xbf16, #tpu.memory_space<vmem>>, vector<4x80x256xbf16>
    %c0_55 = arith.constant 0 : index
    %c11_56 = arith.constant 11 : index
    %c0_57 = arith.constant 0 : index
    %52 = vector.load %arg9[%c0_55, %c11_56, %c0_57] : memref<4x110x256xbf16, #tpu.memory_space<vmem>>, vector<4x80x256xbf16>
    %c0_58 = arith.constant 0 : index
    %c12 = arith.constant 12 : index
    %c0_59 = arith.constant 0 : index
    %53 = vector.load %arg9[%c0_58, %c12, %c0_59] : memref<4x110x256xbf16, #tpu.memory_space<vmem>>, vector<4x80x256xbf16>
    %c0_60 = arith.constant 0 : index
    %c20 = arith.constant 20 : index
    %c0_61 = arith.constant 0 : index
    %54 = vector.load %arg9[%c0_60, %c20, %c0_61] : memref<4x110x256xbf16, #tpu.memory_space<vmem>>, vector<4x80x256xbf16>
    %c0_62 = arith.constant 0 : index
    %c21_63 = arith.constant 21 : index
    %c0_64 = arith.constant 0 : index
    %55 = vector.load %arg9[%c0_62, %c21_63, %c0_64] : memref<4x110x256xbf16, #tpu.memory_space<vmem>>, vector<4x80x256xbf16>
    %c0_65 = arith.constant 0 : index
    %c22 = arith.constant 22 : index
    %c0_66 = arith.constant 0 : index
    %56 = vector.load %arg9[%c0_65, %c22, %c0_66] : memref<4x110x256xbf16, #tpu.memory_space<vmem>>, vector<4x80x256xbf16>
    %57 = tpu.concatenate %48, %49, %50, %51, %52, %53, %54, %55, %56 in 2 : vector<4x80x256xbf16>, vector<4x80x256xbf16>, vector<4x80x256xbf16>, vector<4x80x256xbf16>, vector<4x80x256xbf16>, vector<4x80x256xbf16>, vector<4x80x256xbf16>, vector<4x80x256xbf16>, vector<4x80x256xbf16> -> vector<4x80x2304xbf16>
    %58 = vector.shape_cast %57 : vector<4x80x2304xbf16> to vector<320x2304xbf16>
    %c0_67 = arith.constant 0 : index
    %c0_68 = arith.constant 0 : index
    %c0_69 = arith.constant 0 : index
    %59 = vector.load %arg4[%c0_67, %c0_68, %c0_69] : memref<1x2304x256xbf16, #tpu.memory_space<vmem>>, vector<1x2304x256xbf16>
    %60 = vector.shape_cast %59 : vector<1x2304x256xbf16> to vector<2304x256xbf16>
    %cst_70 = arith.constant dense<0.000000e+00> : vector<320x256xf32>
    %61 = tpu.matmul %58, %60, %cst_70 {dimension_numbers = #tpu.dot_dimension_numbers<[1], [0], [0], [1], [0, 0, 1, 1], [], []>} : vector<320x2304xbf16>, vector<2304x256xbf16>, vector<320x256xf32> -> vector<320x256xf32>
    %c0_71 = arith.constant 0 : index
    %c0_72 = arith.constant 0 : index
    %62 = vector.load %arg5[%c0_71, %c0_72] : memref<1x256xf32, #tpu.memory_space<vmem>>, vector<1x256xf32>
    %63 = vector.broadcast %62 : vector<1x256xf32> to vector<320x256xf32>
    %64 = arith.addf %61, %63 : vector<320x256xf32>
    %cst_73 = arith.constant 0.000000e+00 : f32
    %65 = vector.broadcast %cst_73 : f32 to vector<320x256xf32>
    %66 = arith.maximumf %64, %65 : vector<320x256xf32>
    %67 = arith.truncf %66 : vector<320x256xf32> to vector<320x256xbf16>
    %68 = vector.shape_cast %67 : vector<320x256xbf16> to vector<4x8x10x256xbf16>
    %69 = vector.extract_strided_slice %68 {offsets = [0, 0, 0, 0], sizes = [4, 8, 8, 256], strides = [1, 1, 1, 1]} : vector<4x8x10x256xbf16> to vector<4x8x8x256xbf16>
    %70 = vector.shape_cast %69 : vector<4x8x8x256xbf16> to vector<256x256xbf16>
    %c0_74 = arith.constant 0 : index
    %c0_75 = arith.constant 0 : index
    %71 = vector.load %arg6[%c0_74, %c0_75] : memref<256x128xbf16, #tpu.memory_space<vmem>>, vector<256x128xbf16>
    %cst_76 = arith.constant dense<0.000000e+00> : vector<256x128xf32>
    %72 = tpu.matmul %70, %71, %cst_76 {dimension_numbers = #tpu.dot_dimension_numbers<[1], [0], [0], [1], [0, 0, 1, 1], [], []>} : vector<256x256xbf16>, vector<256x128xbf16>, vector<256x128xf32> -> vector<256x128xf32>
    %c0_77 = arith.constant 0 : index
    %c0_78 = arith.constant 0 : index
    %73 = vector.load %arg7[%c0_77, %c0_78] : memref<1x128xf32, #tpu.memory_space<vmem>>, vector<1x128xf32>
    %74 = vector.broadcast %73 : vector<1x128xf32> to vector<256x128xf32>
    %75 = arith.addf %72, %74 : vector<256x128xf32>
    %76 = arith.addf %75, %1 : vector<256x128xf32>
    %cst_79 = arith.constant 0.000000e+00 : f32
    %77 = vector.broadcast %cst_79 : f32 to vector<256x128xf32>
    %78 = arith.maximumf %76, %77 : vector<256x128xf32>
    %79 = vector.shape_cast %78 : vector<256x128xf32> to vector<4x8x8x128xf32>
    %c0_80 = arith.constant 0 : index
    %c0_81 = arith.constant 0 : index
    %c0_82 = arith.constant 0 : index
    %c0_83 = arith.constant 0 : index
    %80 = vector.load %arg8[%c0_80, %c0_81, %c0_82, %c0_83] : memref<4x8x8x128xf32, #tpu.memory_space<vmem>>, vector<4x8x8x128xf32>
    tpu.vector_store %arg8[%c0_80, %c0_81, %c0_82, %c0_83], %79 {strides = array<i32>} : memref<4x8x8x128xf32, #tpu.memory_space<vmem>>, vector<4x8x8x128xf32>,
    return
  }
  func.func @transform_0(%arg0: i32) -> (i32, i32, i32, i32) {
    %c0_i32 = arith.constant 0 : i32
    %c0_i32_0 = arith.constant 0 : i32
    %c0_i32_1 = arith.constant 0 : i32
    %c0_i32_2 = arith.constant 0 : i32
    return %arg0, %c0_i32, %c0_i32_0, %c0_i32_1 : i32, i32, i32, i32
  }
  func.func @transform_1(%arg0: i32) -> (i32, i32) {
    %c0_i32 = arith.constant 0 : i32
    %c0_i32_0 = arith.constant 0 : i32
    %c0_i32_1 = arith.constant 0 : i32
    return %c0_i32, %c0_i32_0 : i32, i32
  }
  func.func @transform_2(%arg0: i32) -> (i32, i32) {
    %c0_i32 = arith.constant 0 : i32
    %c0_i32_0 = arith.constant 0 : i32
    %c0_i32_1 = arith.constant 0 : i32
    return %c0_i32, %c0_i32_0 : i32, i32
  }
  func.func @transform_3(%arg0: i32) -> (i32, i32, i32) {
    %c0_i32 = arith.constant 0 : i32
    %c0_i32_0 = arith.constant 0 : i32
    %c0_i32_1 = arith.constant 0 : i32
    %c0_i32_2 = arith.constant 0 : i32
    return %c0_i32, %c0_i32_0, %c0_i32_1 : i32, i32, i32
  }
  func.func @transform_4(%arg0: i32) -> (i32, i32) {
    %c0_i32 = arith.constant 0 : i32
    %c0_i32_0 = arith.constant 0 : i32
    %c0_i32_1 = arith.constant 0 : i32
    return %c0_i32, %c0_i32_0 : i32, i32
  }
  func.func @transform_5(%arg0: i32) -> (i32, i32) {
    %c0_i32 = arith.constant 0 : i32
    %c0_i32_0 = arith.constant 0 : i32
    %c0_i32_1 = arith.constant 0 : i32
    return %c0_i32, %c0_i32_0 : i32, i32
  }
  func.func @transform_6(%arg0: i32) -> (i32, i32) {
    %c0_i32 = arith.constant 0 : i32
    %c0_i32_0 = arith.constant 0 : i32
    %c0_i32_1 = arith.constant 0 : i32
    return %c0_i32, %c0_i32_0 : i32, i32
  }
  func.func @transform_7(%arg0: i32) -> (i32, i32, i32, i32) {
    %c0_i32 = arith.constant 0 : i32
    %c0_i32_0 = arith.constant 0 : i32
    %c0_i32_1 = arith.constant 0 : i32
    %c0_i32_2 = arith.constant 0 : i32
    return %arg0, %c0_i32, %c0_i32_0, %c0_i32_1 : i32, i32, i32, i32
  }
}

</mosaic_0001>

<bundles_post_ra>
// kernel: bottleneck_c_nhwc.1
= control target key start
LH: loop header
LB: loop body
LE: loop exit
PB: predicated region body
PF: predicated region fallthrough
CT: control target
= control target key end

     0   :  { %s17037_s0 = inlined_call_operand.hbm [shape: f32[8,8,8,128], index: 0, kind: input, shape index: {}]   ;;  %s17038_s1 = inlined_call_operand.hbm [shape: bf16[128,256], index: 1, kind: input, shape index: {}]   ;;  %s17039_s2 = inlined_call_operand.hbm [shape: f32[1,256], index: 2, kind: input, shape index: {}]   ;;  %s17040_s3 = inlined_call_operand.hbm [shape: bf16[1,2304,256], index: 3, kind: input, shape index: {}]   ;;  %s17041_s4 = inlined_call_operand.hbm [shape: f32[1,256], index: 4, kind: input, shape index: {}]   ;;  %s17042_s5 = inlined_call_operand.hbm [shape: bf16[256,128], index: 5, kind: input, shape index: {}]   ;;  %s17043_s6 = inlined_call_operand.hbm [shape: f32[1,128], index: 6, kind: input, shape index: {}]   ;;  %s17044_s7 = inlined_call_operand.hbm [shape: f32[8,8,8,128], index: 7, kind: output, shape index: {}]  }
   0x1   :  { %17276 = sst [smem:[#allocation136_spill]] %s17038_s1 }
   0x2   :  { %12 = vsyncpa [#allocation4], 0 }
   0x3   :  { %14 = vsyncpa [#allocation4 + $0x1], 0 }
   0x4   :  { %15 = vsyncpa [#allocation7], 0 }
   0x5   :  { %16 = vsyncpa [#allocation10], 0 }
   0x6   :  { %17 = vsyncpa [#allocation13], 0 }
   0x7   :  { %18 = vsyncpa [#allocation5], 0 }
   0x8   :  { %20 = vsyncpa [#allocation5 + $0x1], 0  ;;  %s13312_s24 = smov 0   ;;  %s13314_s25 = smov 0  }
   0x9   :  { %s13316_s26 = smov 0   ;;  %s13318_s27 = smov 0  }
   0xa LB: > { %s13256_s28 = smov [#allocation6]   ;;  %s13333_s30 = sadd.s32 4294967295, %s13254_s27   ;;  %s13254_s27 = sphi %s13318_s27, %s17979_s27   ;;  %s13250_s26 = sphi %s13316_s26, %s17978_s26   ;;  %s13246_s25 = sphi %s13314_s25, %s17977_s25   ;;  %s13242_s24 = sphi %s13312_s24, %s17976_s24  }
   0xb   : > { %s221_s29 = sshll.u32 %s13256_s28, 4  ;;  %p10708_p0 = scmp.ge.s32.totalorder %s13254_s27, 1  ;;  %s13338_s29 = int_to_ptr.vmem [resolvable:$true] %s221_s29 }
   0xc   : > { %p17047_p1 = scmp.eq.s32.totalorder %s13333_s30, 0  ;;  %p209_p2 = scmp.lt.s32.totalorder %s13254_s27, 3 }
   0xd   : > { %s13257_s9 = smov [#allocation9]   ;;  %s13258_s12 = smov [#allocation12]  }
   0xe   : > { %p13340_p3 = pnand %p10708_p0, %p209_p2  ;;  %s245_s10 = sshll.u32 %s13257_s9, 4  ;;  %s13353_s10 = int_to_ptr.vmem [resolvable:$true] %s245_s10 }
   0xf   : > { %s269_s13 = sshll.u32 %s13258_s12, 4  ;;  %s17279_s1 = sld [smem:[#allocation136_spill]]  ;;  %s13355_s13 = int_to_ptr.vmem [resolvable:$true] %s269_s13 }
  0x10   : > { %s17277_s8 = scalar_select %p13340_p3, 1, 0 }
  0x11   : > { %p12232_p5 = pneg %p13340_p3 }
  0x13   : > { %p13349_p6 = pnand %p12232_p5, %p17047_p1 }
  0x15   : > { %s12978_s16 = scalar_lea.hbm %s17279_s1, 2048  ;;  %p13365_p8 = pneg %p13349_p6 }
  0x16   : > { %p12979_p7 = scmp.ne.s32.totalorder %s17279_s1, %s12978_s16  ;;  %p12985_p11 = scmp.lt.u32.totalorder %s12978_s16, %s17279_s1 }
  0x18   : > { %p12981_p9 = pnand %p13365_p8, %p12979_p7 }
  0x1a   : > { %p12982_p10 = pneg %p12981_p9 }
  0x1c   : > { %p12987_p12 = pnand %p12985_p11, %p12982_p10 }
  0x1e   : > { %12990 = shalt.err (!%p12987_p12)
}
  0x1f   : > { %s12991_s22 = scalar_lea.vmem %s13338_s29, 2048  ;;  %p12999_p5 = scmp.lt.s32.totalorder %s13338_s29, %s13338_s29 }
  0x20   : > { %p12992_p13 = scmp.ne.s32.totalorder %s13338_s29, %s12991_s22  ;;  %p13000_p4 = scmp.lt.s32.totalorder %s12991_s22, %s12991_s22 }
  0x22   : > { %p12994_p0 = pnand %p12992_p13, %p13365_p8  ;;  %p13001_p7 = por %p13000_p4, %p12999_p5 }
  0x24   : > { %p12995_p2 = pneg %p12994_p0 }
  0x26   : > { %p13002_p9 = pnand %p13001_p7, %p12995_p2 }
  0x28   : > { %13005 = shalt.err (!%p13002_p9)
}
  0x29   : > { %s17045_s23 = smov 128   ;;  %s17046_s28 = smov 8  }
  0x2a   : > { %12235 = dma.hbm_to_vmem [thread:$0]  (!%p13349_p6), %s17279_s1, 2048, %s13338_s29, [#allocation7], %s17045_s23, %s17045_s23, %s17046_s28  }
  0x2b   : > { %s13006_s16 = scalar_lea.hbm %s17040_s3, 36864 }
  0x2c   : > { %p13007_p4 = scmp.ne.s32.totalorder %s17040_s3, %s13006_s16  ;;  %p13013_p12 = scmp.lt.u32.totalorder %s13006_s16, %s17040_s3 }
  0x2e   : > { %p13009_p10 = pnand %p13007_p4, %p13365_p8 }
  0x30   : > { %p13010_p11 = pneg %p13009_p10 }
  0x32   : > { %p13015_p13 = pnand %p13013_p12, %p13010_p11 }
  0x34   : > { %13018 = shalt.err (!%p13015_p13)
}
  0x35   : > { %s13019_s29 = scalar_lea.vmem %s13353_s10, 36864  ;;  %p13027_p7 = scmp.lt.s32.totalorder %s13353_s10, %s13353_s10 }
  0x36   : > { %p13020_p0 = scmp.ne.s32.totalorder %s13353_s10, %s13019_s29  ;;  %p13028_p9 = scmp.lt.s32.totalorder %s13019_s29, %s13019_s29 }
  0x38   : > { %p13022_p2 = pnand %p13020_p0, %p13365_p8  ;;  %p13029_p4 = por %p13028_p9, %p13027_p7 }
  0x3a   : > { %p13023_p5 = pneg %p13022_p2 }
  0x3c   : > { %p13030_p10 = pnand %p13029_p4, %p13023_p5 }
  0x3e   : > { %13033 = shalt.err (!%p13030_p10)
}
  0x3f   : > { %12241 = dma.hbm_to_vmem [thread:$0]  (!%p13349_p6), %s17040_s3, 36864, %s13353_s10, [#allocation10], %s17045_s23, %s17045_s23, %s17046_s28  }
  0x40   : > { %s13034_s15 = scalar_lea.hbm %s17042_s5, 2048 }
  0x41   : > { %p13035_p11 = scmp.ne.s32.totalorder %s17042_s5, %s13034_s15  ;;  %p13041_p0 = scmp.lt.u32.totalorder %s13034_s15, %s17042_s5 }
  0x43   : > { %p13037_p12 = pnand %p13035_p11, %p13365_p8 }
  0x45   : > { %p13038_p13 = pneg %p13037_p12 }
  0x47   : > { %p13043_p2 = pnand %p13041_p0, %p13038_p13 }
  0x49   : > { %13046 = shalt.err (!%p13043_p2)
}
  0x4a   : > { %s13047_s10 = scalar_lea.vmem %s13355_s13, 2048  ;;  %p13055_p4 = scmp.lt.s32.totalorder %s13355_s13, %s13355_s13 }
  0x4b   : > { %p13048_p5 = scmp.ne.s32.totalorder %s13355_s13, %s13047_s10  ;;  %p13056_p10 = scmp.lt.s32.totalorder %s13047_s10, %s13047_s10 }
  0x4d   : > { %p13050_p7 = pnand %p13048_p5, %p13365_p8  ;;  %p13057_p11 = por %p13056_p10, %p13055_p4 }
  0x4f   : > { %p13051_p9 = pneg %p13050_p7 }
  0x51   : > { %p13058_p12 = pnand %p13057_p11, %p13051_p9 }
  0x53   : > { %13061 = shalt.err (!%p13058_p12)
}
  0x54   : > { %s13261_s21 = smov 64   ;;  %s13262_s29 = smov 4  }
  0x55   : > { %12247 = dma.hbm_to_vmem [thread:$0]  (!%p13349_p6), %s17042_s5, 2048, %s13355_s13, [#allocation13], %s13261_s21, %s13261_s21, %s13262_s29  }
  0x56   : > { %s13263_s12 = smov [#allocation8]   ;;  %s13264_s15 = smov [#allocation11]  }
  0x57   : > { %s235_s14 = sshll.u32 %s13263_s12, 4  ;;  %s259_s16 = sshll.u32 %s13264_s15, 4  ;;  %s236_s14 = int_to_ptr.vmem [resolvable:$true] %s235_s14  ;;  %s260_s16 = int_to_ptr.vmem [resolvable:$true] %s259_s16 }
  0x58   : > { %s13062_s20 = scalar_lea.hbm %s17039_s2, 32 }
  0x59   : > { %p13063_p13 = scmp.ne.s32.totalorder %s17039_s2, %s13062_s20  ;;  %p13069_p5 = scmp.lt.u32.totalorder %s13062_s20, %s17039_s2 }
  0x5b   : > { %p13065_p0 = pnand %p13063_p13, %p13365_p8 }
  0x5d   : > { %p13066_p2 = pneg %p13065_p0 }
  0x5f   : > { %p13071_p7 = pnand %p13069_p5, %p13066_p2 }
  0x61   : > { %13074 = shalt.err (!%p13071_p7)
}
  0x62   : > { %s13075_s13 = scalar_lea.vmem %s236_s14, 32  ;;  %p13083_p11 = scmp.lt.s32.totalorder %s236_s14, %s236_s14 }
  0x63   : > { %p13076_p9 = scmp.ne.s32.totalorder %s236_s14, %s13075_s13  ;;  %p13084_p12 = scmp.lt.s32.totalorder %s13075_s13, %s13075_s13 }
  0x65   : > { %p13078_p4 = pnand %p13076_p9, %p13365_p8  ;;  %p13085_p1 = por %p13084_p12, %p13083_p11 }
  0x67   : > { %p13079_p10 = pneg %p13078_p4 }
  0x69   : > { %p13086_p3 = pnand %p13085_p1, %p13079_p10 }
  0x6b   : > { %13089 = shalt.err (!%p13086_p3)
}
  0x6c   : > { %12238 = dma.hbm_to_vmem [thread:$0]  (!%p13349_p6), %s17039_s2, 32, %s236_s14, [#allocation7]  }
  0x6d   : > { %s13090_s29 = scalar_lea.hbm %s17041_s4, 32 }
  0x6e   : > { %p13091_p13 = scmp.ne.s32.totalorder %s17041_s4, %s13090_s29  ;;  %p13097_p3 = scmp.lt.u32.totalorder %s13090_s29, %s17041_s4 }
  0x70   : > { %p13093_p0 = pnand %p13091_p13, %p13365_p8 }
  0x72   : > { %p13094_p1 = pneg %p13093_p0 }
  0x74   : > { %p13099_p2 = pnand %p13097_p3, %p13094_p1 }
  0x76   : > { %13102 = shalt.err (!%p13099_p2)
}
  0x77   : > { %s13103_s17 = scalar_lea.vmem %s260_s16, 32  ;;  %p13111_p4 = scmp.lt.s32.totalorder %s260_s16, %s260_s16 }
  0x78   : > { %p13104_p5 = scmp.ne.s32.totalorder %s260_s16, %s13103_s17  ;;  %p13112_p10 = scmp.lt.s32.totalorder %s13103_s17, %s13103_s17 }
  0x7a   : > { %p13106_p7 = pnand %p13104_p5, %p13365_p8  ;;  %p13113_p11 = por %p13112_p10, %p13111_p4 }
  0x7c   : > { %p13107_p9 = pneg %p13106_p7 }
  0x7e   : > { %p13114_p12 = pnand %p13113_p11, %p13107_p9 }
  0x80   : > { %13117 = shalt.err (!%p13114_p12)
}
  0x81   : > { %12244 = dma.hbm_to_vmem [thread:$0]  (!%p13349_p6), %s17041_s4, 32, %s260_s16, [#allocation10]  }
  0x82   : > { %s13265_s20 = smov [#allocation14]   ;;  %s13118_s21 = scalar_lea.hbm %s17043_s6, 16 }
  0x83   : > { %s283_s10 = sshll.u32 %s13265_s20, 4  ;;  %p13119_p13 = scmp.ne.s32.totalorder %s17043_s6, %s13118_s21  ;;  %s284_s10 = int_to_ptr.vmem [resolvable:$true] %s283_s10 }
  0x84   : > { %p13125_p3 = scmp.lt.u32.totalorder %s13118_s21, %s17043_s6 }
  0x85   : > { %p13121_p0 = pnand %p13119_p13, %p13365_p8 }
  0x87   : > { %p13122_p1 = pneg %p13121_p0 }
  0x89   : > { %p13127_p2 = pnand %p13125_p3, %p13122_p1 }
  0x8b   : > { %13130 = shalt.err (!%p13127_p2)
}
  0x8c   : > { %s13131_s16 = scalar_lea.vmem %s284_s10, 16  ;;  %s13138_s9 = scalar_lea.vmem %s284_s10, 32 }
  0x8d   : > { %p13132_p5 = scmp.ne.s32.totalorder %s284_s10, %s13131_s16  ;;  %p13139_p4 = scmp.lt.s32.totalorder %s284_s10, %s284_s10 }
  0x8e   : > { %p13140_p10 = scmp.lt.s32.totalorder %s13138_s9, %s13131_s16 }
  0x8f   : > { %p13134_p7 = pnand %p13132_p5, %p13365_p8 }
  0x90   : > { %p13141_p11 = por %p13140_p10, %p13139_p4 }
  0x91   : > { %p13135_p9 = pneg %p13134_p7 }
  0x93   : > { %p13142_p12 = pnand %p13141_p11, %p13135_p9 }
  0x95   : > { %13145 = shalt.err (!%p13142_p12)
}
  0x96   : > { %12250 = dma.hbm_to_vmem [thread:$0]  (!%p13349_p6), %s17043_s6, 16, %s284_s10, [#allocation13]  }
  0x97   : > { %s10707_s19 = sadd.s32 4294967294, %s13254_s27   ;;  %s13494_s11 = sadd.s32 1, %s13254_s27  }
  0x98   : > { %s30_s17 = ssub.s32 %s13254_s27, %s13494_s11  ;;  %s33_s14 = sadd.s32 1, %s13250_s26 }
  0x99   : > { %p31_p8 = scmp.eq.s32.totalorder %s30_s17, 0  ;;  %p40_p13 = scmp.ne.s32.totalorder %s13250_s26, %s13246_s25 }
  0x9a   : > { %p41_p0 = scmp.eq.s32.totalorder %s13254_s27, 0  ;;  %p46_p1 = scmp.ne.s32.totalorder %s13246_s25, %s13242_s24 }
  0x9b   : > { %s13505_s18 = scalar_select %p31_p8, %s13250_s26, %s33_s14  }
  0x9c   : > { %p13507_p3 = por %p41_p0, %p40_p13  ;;  %p17282_p2 = scmp.eq.s32.totalorder %s13333_s30, 0 }
  0x9d   : > { %p196_p5 = scmp.eq.s32.totalorder %s13333_s30, 1  ;;  %p202_p7 = scmp.eq.s32.totalorder %s10707_s19, 1 }
  0x9e   : > { %p13513_p6 = por %p17282_p2, %p46_p1  ;;  %p12265_p9 = scmp.lt.s32.totalorder %s13254_s27, 2 }
  0x9f   : > { %s294_s13 = sand.u32 1, %s13250_s26   ;;  %p13520_p4 = por %p196_p5, %p40_p13 }
  0xa0   : > { %p13524_p10 = por %p202_p7, %p46_p1  ;;  %s10716_s1 = sshll.u32 %s294_s13, 8 }
  0xa1   : > { %s17284_s23 = scalar_select %p13520_p4, 1, 0 }
  0xa2   : > { %s17285_s21 = scalar_select %p13524_p10, 1, 0 }
  0xa3   : > { %s11305_s28 = sshll.u32 %s13254_s27, 12  ;;  %s298_s9 = scalar_lea.vmem [#allocation3], %s10716_s1 }
  0xa4   : > { %s13532_s16 = scalar_lea.hbm %s17037_s0, %s11305_s28  ;;  %s306_s12 = sshll.u32 %s298_s9, 4  ;;  %s13534_s12 = int_to_ptr.vmem [resolvable:$true] %s306_s12 }
  0xa5   : > { %p13538_p11 = pnand %p12265_p9, %p13507_p3  ;;  %s13542_s19 = scalar_lea.sflag [#allocation4], %s294_s13 }
  0xa6   : > { %s13146_s17 = scalar_lea.hbm %s13532_s16, 4096  ;;  %s13151_s20 = scalar_lea.hbm %s17037_s0, 8192 }
  0xa7   : > { %p13147_p12 = scmp.ne.s32.totalorder %s13532_s16, %s13146_s17  ;;  %p13148_p8 = pneg %p13538_p11 }
  0xa8   : > { %p13152_p1 = scmp.lt.u32.totalorder %s13532_s16, %s17037_s0  ;;  %p13153_p3 = scmp.lt.u32.totalorder %s13151_s20, %s13146_s17 }
  0xa9   : > { %p13149_p13 = pnand %p13148_p8, %p13147_p12  ;;  %p13155_p5 = scmp.lt.u32.totalorder %s13146_s17, %s13532_s16 }
  0xaa   : > { %p13154_p2 = por %p13153_p3, %p13152_p1 }
  0xab   : > { %p13150_p0 = pneg %p13149_p13 }
  0xac   : > { %p13156_p7 = por %p13155_p5, %p13154_p2 }
  0xae   : > { %p13157_p9 = pnand %p13156_p7, %p13150_p0 }
  0xb0   : > { %13160 = shalt.err (!%p13157_p9)
}
  0xb1   : > { %s13161_s13 = scalar_lea.vmem %s13534_s12, 4096  ;;  %s13266_s22 = smov [#allocation3]  }
  0xb2   : > { %p13162_p12 = scmp.ne.s32.totalorder %s13534_s12, %s13161_s13  ;;  %s13166_s9 = sshll.u32 %s13266_s22, 4  ;;  %s13167_s9 = int_to_ptr.vmem [resolvable:$false] %s13166_s9 }
  0xb3   : > { %s13168_s14 = scalar_lea.vmem %s13167_s9, 8192  ;;  %p13169_p4 = scmp.lt.s32.totalorder %s13534_s12, %s13167_s9 }
  0xb4   : > { %p13164_p13 = pnand %p13162_p12, %p13148_p8  ;;  %p13170_p1 = scmp.lt.s32.totalorder %s13168_s14, %s13161_s13 }
  0xb6   : > { %p13165_p10 = pneg %p13164_p13  ;;  %p13171_p3 = por %p13170_p1, %p13169_p4 }
  0xb8   : > { %p13172_p2 = pnand %p13171_p3, %p13165_p10 }
  0xba   : > { %13175 = shalt.err (!%p13172_p2)
}
  0xbb   : > { %s17287_s17 = smov 8   ;;  %s17288_s1 = smov 128  }
  0xbc   : > { %12254 = dma.hbm_to_vmem [thread:$0]  (!%p13538_p11), %s13532_s16, 4096, %s13534_s12, %s13542_s19, %s17288_s1, %s17288_s1, %s17287_s17  }
  0xbd   : > { %p17289_p8 = scmp.ne.s32.totalorder %s17277_s8, 0 }
  0xbf   : > { %318 = sbr.rel (%p17289_p8) target bundleno = 1813 (0x715), region = 48 }
  0xc6   : > { %s13576_s20 = sand.u32 1, %s13246_s25  }
  0xc7   : > { %s10721_s28 = sshll.u32 %s13576_s20, 8  ;;  %s321_s29 = scalar_lea.sflag [#allocation4], %s13576_s20 }
  0xc8   : > { %s13582_s15 = scalar_lea.vmem [#allocation3], %s10721_s28 }
  0xc9   : > { %13221 = dma.done.wait (%p13513_p6), %s321_s29, 4096  }
  0xca   : > { %13223 = vsyncadd (%p13513_p6), %s321_s29, 4294963200  ;;  %p17290_p4 = scmp.eq.s32.totalorder %s13333_s30, 0 }
  0xcc   : > { %13225 = dma.done.wait (%p17290_p4), [#allocation7], 2080   ;;  %p17291_p10 = pmov %p17290_p4 }
  0xcd   : > { %p17292_p11 = pmov %p17290_p4 }
  0xce   : > { %13227 = vsyncadd (%p17291_p10), [#allocation7], 4294965216 }
  0xcf   : > { %13229 = dma.done.wait (%p17292_p11), [#allocation10], 36896   ;;  %p17293_p0 = pmov %p17290_p4 }
  0xd1   : > { %13231 = vsyncadd (%p17293_p0), [#allocation10], 4294930400  ;;  %p17294_p5 = pmov %p17293_p0 }
  0xd2   : > { %p17295_p7 = pmov %p17293_p0 }
  0xd3   : > { %13233 = dma.done.wait (%p17294_p5), [#allocation13], 2064  }
  0xd4   : > { %13235 = vsyncadd (%p17295_p7), [#allocation13], 4294965232  ;;  %v13267_v0 = vmov 0   ;;  %v12319_v1 = vld [vmem:[#allocation6 + $0x4] ss:$8 sps:$4 sm:$0xff]   ;;  %v384_v28 = vld [vmem:[%s13582_s15 + $0x10] sm:$0xff] }
  0xd5   : > { %570 = vmatprep.mubr.bf16.mxu0 %v13267_v0  ;;  %955 = vst [vmem:[#allocation2] sm:$0xff] %v13267_v0  ;;  %966 = vst [vmem:[#allocation2 + $0x70] sm:$0xff] %v13267_v0  ;;  %v12321_v2 = vld [vmem:[#allocation6] ss:$8 sps:$4 sm:$0xff]   ;;  %538 = vmatprep.subr.bf16.mxu0 %v12319_v1  ;;  %v12322_v3 = vld [vmem:[#allocation6 + $0x14] ss:$8 sps:$4 sm:$0xff]  }
  0xd6   : > { %970 = vst [vmem:[#allocation2 + $0xe0] sm:$0xff] %v13267_v0  ;;  %974 = vst [vmem:[#allocation2 + $0x150] sm:$0xff] %v13267_v0  ;;  %539 = vmatpush1.bf16.msra.mxu0 %v12321_v2  ;;  %v12324_v4 = vld [vmem:[#allocation6 + $0x10] ss:$8 sps:$4 sm:$0xff]   ;;  %v12325_v5 = vld [vmem:[#allocation6 + $0x24] ss:$8 sps:$4 sm:$0xff]  }
  0xd7   : > { %988 = vst [vmem:[#allocation2 + $0x60] sm:$0xff] %v13267_v0  ;;  %993 = vst [vmem:[#allocation2 + $0xd0] sm:$0xff] %v13267_v0  ;;  %540 = vmatprep.subr.bf16.mxu0 %v12322_v3  ;;  %v12327_v6 = vld [vmem:[#allocation6 + $0x20] ss:$8 sps:$4 sm:$0xff]   ;;  %v12328_v7 = vld [vmem:[#allocation6 + $0x34] ss:$8 sps:$4 sm:$0xff]  }
  0xd8   : > { %998 = vst [vmem:[#allocation2 + $0x140] sm:$0xff] %v13267_v0  ;;  %1003 = vst [vmem:[#allocation2 + $0x1b0] sm:$0xff] %v13267_v0  ;;  %v12330_v8 = vld [vmem:[#allocation6 + $0x30] ss:$8 sps:$4 sm:$0xff]   ;;  %v12331_v9 = vld [vmem:[#allocation6 + $0x44] ss:$8 sps:$4 sm:$0xff]  }
  0xd9   : > { %v12333_v10 = vld [vmem:[#allocation6 + $0x40] ss:$8 sps:$4 sm:$0xff]   ;;  %v12334_v11 = vld [vmem:[#allocation6 + $0x54] ss:$8 sps:$4 sm:$0xff]   ;;  %v12336_v12 = vld [vmem:[#allocation6 + $0x50] ss:$8 sps:$4 sm:$0xff]  }
  0xda   : > { %541 = vmatpush1.bf16.msra.mxu0 %v12324_v4  ;;  %v12337_v13 = vld [vmem:[#allocation6 + $0x64] ss:$8 sps:$4 sm:$0xff]   ;;  %v12339_v14 = vld [vmem:[#allocation6 + $0x60] ss:$8 sps:$4 sm:$0xff]   ;;  %v12340_v15 = vld [vmem:[#allocation6 + $0x74] ss:$8 sps:$4 sm:$0xff]  }
  0xdb   : > { %542 = vmatprep.subr.bf16.mxu0 %v12325_v5  ;;  %v12342_v16 = vld [vmem:[#allocation6 + $0x70] ss:$8 sps:$4 sm:$0xff]   ;;  %v382_v17 = vld [vmem:[%s13582_s15] sm:$0xff]  ;;  %v383_v18 = vld [vmem:[%s13582_s15 + $0x8] sm:$0xff]  ;;  %vm17052_vm0 = vcmask 1041408   ;;  %vm17051_vm2 = vcmask 1045508  }
  0xdc   : > { %v12345_v19 = vld [vmem:[#allocation9 + $0x4] ss:$8 sps:$4 sm:$0xff]   ;;  %v12357_v21 = vld [vmem:[#allocation9 + $0x300] ss:$8 sps:$4 sm:$0xff]   ;;  %v414_v22 = vpack.c.bf16 %v383_v18, %v382_v17  ;;  %v12361_v23 = vld [vmem:[#allocation9 + $0x314] ss:$8 sps:$4 sm:$0xff]  }
  0xdd   : > { %v12355_v20 = vld [vmem:[#allocation9 + $0x304] ss:$8 sps:$4 sm:$0xff]   ;;  %v12343_v24 = vld [vmem:[#allocation9] ss:$8 sps:$4 sm:$0xff]   ;;  %v12348_v25 = vld [vmem:[#allocation9 + $0x14] ss:$8 sps:$4 sm:$0xff]  }
  0xde   : > { %543 = vmatpush1.bf16.msra.mxu0 %v12327_v6  ;;  %6540 = vmatprep.subr.bf16.mxu1 %v12355_v20  ;;  %v12363_v26 = vld [vmem:[#allocation9 + $0x310] ss:$8 sps:$4 sm:$0xff]   ;;  %v12367_v27 = vld [vmem:[#allocation9 + $0x324] ss:$8 sps:$4 sm:$0xff]   ;;  %v12369_v32 = vld [vmem:[#allocation9 + $0x320] ss:$8 sps:$4 sm:$0xff]  }
  0xdf   : > { %544 = vmatprep.subr.bf16.mxu0 %v12328_v7  ;;  %6541 = vmatpush1.bf16.msra.mxu1 %v12357_v21  ;;  %v385_v29 = vld [vmem:[%s13582_s15 + $0x18] sm:$0xff]  ;;  %v12351_v31 = vld [vmem:[#allocation9 + $0x24] ss:$8 sps:$4 sm:$0xff]   ;;  %v12349_v35 = vld [vmem:[#allocation9 + $0x20] ss:$8 sps:$4 sm:$0xff]   ;;  %vm1005_vm6 = vcmask 1042433  }
  0xe0   : > { %6542 = vmatprep.subr.bf16.mxu1 %v12361_v23  ;;  %v12346_v30 = vld [vmem:[#allocation9 + $0x10] ss:$8 sps:$4 sm:$0xff]   ;;  %v12373_v33 = vld [vmem:[#allocation9 + $0x334] ss:$8 sps:$4 sm:$0xff]   ;;  %v415_v34 = vpack.c.bf16 %v385_v29, %v384_v28  ;;  %v12379_v39 = vld [vmem:[#allocation9 + $0x344] ss:$8 sps:$4 sm:$0xff]  }
  0xe1   : > { %v12354_v36 = vld [vmem:[#allocation9 + $0x34] ss:$8 sps:$4 sm:$0xff]   ;;  %v12375_v37 = vld [vmem:[#allocation9 + $0x330] ss:$8 sps:$4 sm:$0xff]   ;;  %v387_v40 = vld [vmem:[%s13582_s15 + $0x28] sm:$0xff]  ;;  %vm1008_vm8 = vcmask 1046533  }
  0xe2   : > { %545 = vmatpush1.bf16.msra.mxu0 %v12330_v8  ;;  %v386_v38 = vld [vmem:[%s13582_s15 + $0x20] sm:$0xff]  ;;  %v12352_v41 = vld [vmem:[#allocation9 + $0x30] ss:$8 sps:$4 sm:$0xff]   ;;  %v391_v59 = vld [vmem:[%s13582_s15 + $0x48] sm:$0xff]  ;;  %vm957_vm1 = vsmask.f32 1280 }
  0xe3   : > { %546 = vmatprep.subr.bf16.mxu0 %v12331_v9  ;;  %6543 = vmatpush1.bf16.msra.mxu1 %v12363_v26  ;;  %v12360_v42 = vld [vmem:[#allocation9 + $0x44] ss:$8 sps:$4 sm:$0xff]   ;;  %v12381_v43 = vld [vmem:[#allocation9 + $0x340] ss:$8 sps:$4 sm:$0xff]   ;;  %v12385_v44 = vld [vmem:[#allocation9 + $0x354] ss:$8 sps:$4 sm:$0xff]   ;;  %v416_v46 = vpack.c.bf16 %v387_v40, %v386_v38 }
  0xe4   : > { %6544 = vmatprep.subr.bf16.mxu1 %v12367_v27  ;;  %v12358_v45 = vld [vmem:[#allocation9 + $0x40] ss:$8 sps:$4 sm:$0xff]   ;;  %v12366_v47 = vld [vmem:[#allocation9 + $0x54] ss:$8 sps:$4 sm:$0xff]   ;;  %v12387_v48 = vld [vmem:[#allocation9 + $0x350] ss:$8 sps:$4 sm:$0xff]  }
  0xe5   : > { %v12391_v49 = vld [vmem:[#allocation9 + $0x364] ss:$8 sps:$4 sm:$0xff]   ;;  %v389_v51 = vld [vmem:[%s13582_s15 + $0x38] sm:$0xff]  ;;  %v12393_v54 = vld [vmem:[#allocation9 + $0x360] ss:$8 sps:$4 sm:$0xff]   ;;  %vm1024_vm12 = vcmask 1043458  }
  0xe6   : > { %547 = vmatpush1.bf16.msra.mxu0 %v12333_v10  ;;  %v388_v50 = vld [vmem:[%s13582_s15 + $0x30] sm:$0xff]  ;;  %v12370_v55 = vld [vmem:[#allocation9 + $0x60] ss:$8 sps:$4 sm:$0xff]   ;;  %v393_v3 = vld [vmem:[%s13582_s15 + $0x58] sm:$0xff]  ;;  %vm17050_vm3 = vsmask.f32 5376 }
  0xe7   : > { %548 = vmatprep.subr.bf16.mxu0 %v12334_v11  ;;  %6545 = vmatpush1.bf16.msra.mxu1 %v12369_v32  ;;  %v12364_v52 = vld [vmem:[#allocation9 + $0x50] ss:$8 sps:$4 sm:$0xff]   ;;  %v12372_v53 = vld [vmem:[#allocation9 + $0x64] ss:$8 sps:$4 sm:$0xff]   ;;  %v417_v56 = vpack.c.bf16 %v389_v51, %v388_v50  ;;  %v12378_v57 = vld [vmem:[#allocation9 + $0x74] ss:$8 sps:$4 sm:$0xff]  }
  0xe8   : > { %6546 = vmatprep.subr.bf16.mxu1 %v12373_v33  ;;  %v390_v58 = vld [vmem:[%s13582_s15 + $0x40] sm:$0xff]  ;;  %v12376_v60 = vld [vmem:[#allocation9 + $0x70] ss:$8 sps:$4 sm:$0xff]   ;;  %v395_v7 = vld [vmem:[%s13582_s15 + $0x68] sm:$0xff]  ;;  %vm1006_vm7 = vsmask.f32 2310 }
  0xe9   : > { %v12384_v61 = vld [vmem:[#allocation9 + $0x84] ss:$8 sps:$4 sm:$0xff]   ;;  %v12382_v62 = vld [vmem:[#allocation9 + $0x80] ss:$8 sps:$4 sm:$0xff]   ;;  %v418_v63 = vpack.c.bf16 %v391_v59, %v390_v58  ;;  %v12390_v1 = vld [vmem:[#allocation9 + $0x94] ss:$8 sps:$4 sm:$0xff]  }
  0xea   : > { %549 = vmatpush1.bf16.msra.mxu0 %v12336_v12  ;;  %v392_v2 = vld [vmem:[%s13582_s15 + $0x50] sm:$0xff]  ;;  %v394_v6 = vld [vmem:[%s13582_s15 + $0x60] sm:$0xff]  ;;  %v397_v10 = vld [vmem:[%s13582_s15 + $0x78] sm:$0xff]  ;;  %vm1009_vm10 = vsmask.f32 6422  ;;  %vm1027_vm15 = vcmask 1047558  }
  0xeb   : > { %550 = vmatprep.subr.bf16.mxu0 %v12337_v13  ;;  %6547 = vmatpush1.bf16.msra.mxu1 %v12375_v37  ;;  %v12388_v4 = vld [vmem:[#allocation9 + $0x90] ss:$8 sps:$4 sm:$0xff]   ;;  %v419_v5 = vpack.c.bf16 %v393_v3, %v392_v2  ;;  %v420_v8 = vpack.c.bf16 %v395_v7, %v394_v6  ;;  %v398_v12 = vld [vmem:[%s13582_s15 + $0x80] sm:$0xff]  ;;  %v399_v13 = vld [vmem:[%s13582_s15 + $0x88] sm:$0xff]  ;;  %vm1025_vm13 = vsmask.f32 3338 }
  0xec   : > { %6548 = vmatprep.subr.bf16.mxu1 %v12379_v39  ;;  %v396_v9 = vld [vmem:[%s13582_s15 + $0x70] sm:$0xff]  ;;  %v402_v18 = vld [vmem:[%s13582_s15 + $0xa0] sm:$0xff]  ;;  %vm958_vm4 = vmand %vm17052_vm0, %vm957_vm1  ;;  %vm1028_vm1 = vsmask.f32 7450  ;;  %s16892_s8 = scalar_lea.vmem [#allocation15], %s10721_s28  ;;  %s11339_s10 = sshll.u32 %s13333_s30, 12 }
  0xed   : > { %v421_v11 = vpack.c.bf16 %v397_v10, %v396_v9  ;;  %v404_v21 = vld [vmem:[%s13582_s15 + $0xb0] sm:$0xff]  ;;  %v12394_v27 = vld [vmem:[#allocation9 + $0xa0] ss:$8 sps:$4 sm:$0xff]   ;;  %vm961_vm5 = vmand %vm17051_vm2, %vm17050_vm3  ;;  %vm982_vm3 = vsmask.f32 7954  ;;  %s10577_s16 = sshll.u32 %s16892_s8, 4  ;;  %s16989_s13 = scalar_lea.hbm %s17044_s7, %s11339_s10  ;;  %s16991_s16 = int_to_ptr.vmem [resolvable:$true] %s10577_s16 }
  0xee   : > { %551 = vmatpush1.bf16.msra.mxu0 %v12339_v14  ;;  %v422_v14 = vpack.c.bf16 %v399_v13, %v398_v12  ;;  %v12397_v23 = vld [vmem:[#allocation9 + $0x374] ss:$8 sps:$4 sm:$0xff]   ;;  %v12403_v28 = vld [vmem:[#allocation9 + $0x384] ss:$8 sps:$4 sm:$0xff]   ;;  %v12405_v29 = vld [vmem:[#allocation9 + $0x380] ss:$8 sps:$4 sm:$0xff]  }
  0xef   : > { %552 = vmatprep.subr.bf16.mxu0 %v12340_v15  ;;  %6549 = vmatpush1.bf16.msra.mxu1 %v12381_v43  ;;  %v400_v15 = vld [vmem:[%s13582_s15 + $0x90] sm:$0xff]  ;;  %v963_v32 = vld [vmem:[#allocation2 + $0x8] sm:$0x33]  ;;  %vm13649_vm9 = vmor %vm961_vm5, %vm958_vm4  ;;  %s10563_s22 = scalar_lea.sflag [#allocation5], %s13576_s20  ;;  %s13176_s9 = scalar_lea.vmem %s16991_s16, 4096 }
  0xf0   : > { %6550 = vmatprep.subr.bf16.mxu1 %v12385_v44  ;;  %vm1007_vm11 = vmand %vm1005_vm6, %vm1006_vm7  ;;  %v1012_v37 = vld [vmem:[#allocation2 + $0x10] sm:$0x66]  ;;  %v1031_v40 = vld [vmem:[#allocation2 + $0x18] sm:$0xcc]  ;;  %p13177_p6 = scmp.ne.s32.totalorder %s16991_s16, %s13176_s9  ;;  %p17973_p9 = scmp.ne.s32.totalorder %s17284_s23, 0 }
  0xf1   : > { %vm1010_vm14 = vmand %vm1008_vm8, %vm1009_vm10  ;;  %v12409_v38 = vld [vmem:[#allocation9 + $0x394] ss:$8 sps:$4 sm:$0xff]   ;;  %v12408_v44 = vld [vmem:[#allocation9 + $0xc4] ss:$8 sps:$4 sm:$0xff]   ;;  %vm1265_vm8 = vsmask.f32 7946 }
  0xf2   : > { %553 = vmatpush1.bf16.msra.mxu0 %v12342_v16  ;;  %v401_v16 = vld [vmem:[%s13582_s15 + $0x98] sm:$0xff]  ;;  %vm13656_vm4 = vmor %vm1010_vm14, %vm1007_vm11  ;;  %vm1267_vm10 = vsmask.f32 7962  ;;  %v408_v50 = vld [vmem:[%s13582_s15 + $0xd0] sm:$0xff]  ;;  %p13178_p12 = pnand %p13177_p6, %p17973_p9  ;;  %s13269_s30 = smov [#allocation15]  }
  0xf3   : > { %5841 = vmatprep.subr.bf16.mxu0 %v12345_v19  ;;  %6551 = vmatpush1.bf16.msra.mxu1 %v12387_v48  ;;  %v423_v17 = vpack.c.bf16 %v401_v16, %v400_v15  ;;  %v403_v19 = vld [vmem:[%s13582_s15 + $0xa8] sm:$0xff]  ;;  %v1013_v43 = vsel %vm13656_vm4, 0, %v1012_v37  ;;  %vm1026_vm5 = vmand %vm1024_vm12, %vm1025_vm13  ;;  %v409_v51 = vld [vmem:[%s13582_s15 + $0xd8] sm:$0xff]  ;;  %v17312_v15 = vmov 0  ;;  %s13180_s14 = sshll.u32 %s13269_s30, 4  ;;  %s13181_s14 = int_to_ptr.vmem [resolvable:$false] %s13180_s14 }
  0xf4   : > { %6552 = vmatprep.subr.bf16.mxu1 %v12391_v49  ;;  %v424_v20 = vpack.c.bf16 %v403_v19, %v402_v18  ;;  %1014 = vst [vmem:[#allocation2 + $0x10] sm:$0x66] %v1013_v43  ;;  %vm1029_vm6 = vmand %vm1027_vm15, %vm1028_vm1  ;;  %v12417_v49 = vld [vmem:[#allocation9 + $0x3a0] ss:$8 sps:$4 sm:$0xff]   ;;  %vm17053_vm1 = vcmask 1043456   ;;  %v412_v12 = vld [vmem:[%s13582_s15 + $0xf0] sm:$0xff]  ;;  %p13179_p13 = pneg %p13178_p12  ;;  %p13183_p1 = scmp.lt.s32.totalorder %s16991_s16, %s13181_s14 }
  0xf5   : > { %571 = vmatmul.mubr.bf16.vlgmr.msra.gmra.mrb[0].mxu0 %v414_v22  ;;  %v405_v22 = vld [vmem:[%s13582_s15 + $0xb8] sm:$0xff]  ;;  %vm13664_vm7 = vmor %vm1029_vm6, %vm1026_vm5  ;;  %vm979_vm5 = vsmask.f32 7938  ;;  %vm17054_vm6 = vcmask 1047556   ;;  %v1050_v58 = vld [vmem:[#allocation2 + $0x20] sm:$0x88] }
  0xf6   : > { %580 = vmatprep.mubr.bf16.mxu0 %v13267_v0  ;;  %5842 = vmatpush1.bf16.msra.mxu0 %v12343_v24  ;;  %v12399_v24 = vld [vmem:[#allocation9 + $0x370] ss:$8 sps:$4 sm:$0xff]   ;;  %v425_v26 = vpack.c.bf16 %v405_v22, %v404_v21  ;;  %v1032_v48 = vsel %vm13664_vm7, 0, %v1031_v40  ;;  %vm1266_vm11 = vmand %vm1024_vm12, %vm1265_vm8  ;;  %vm1043_vm12 = vcmask 1043459   ;;  %vm1044_vm8 = vsmask.f32 7950 }
  0xf7   : > { %5843 = vmatprep.subr.bf16.mxu0 %v12348_v25  ;;  %6553 = vmatpush1.bf16.msra.mxu1 %v12393_v54  ;;  %v12396_v25 = vld [vmem:[#allocation9 + $0xa4] ss:$8 sps:$4 sm:$0xff]   ;;  %1033 = vst [vmem:[#allocation2 + $0x18] sm:$0xcc] %v1032_v48  ;;  %vm1268_vm13 = vmand %vm1027_vm15, %vm1267_vm10  ;;  %vm1046_vm15 = vcmask 1047559   ;;  %v413_v13 = vld [vmem:[%s13582_s15 + $0xf8] sm:$0xff] }
  0xf8   : > { %6554 = vmatprep.subr.bf16.mxu1 %v12397_v23  ;;  %vm13675_vm14 = vmor %vm1268_vm13, %vm1266_vm11  ;;  %v410_v54 = vld [vmem:[%s13582_s15 + $0xe0] sm:$0xff]  ;;  %vm1047_vm11 = vsmask.f32 7966  ;;  %vm1348_vm13 = vsmask.f32 3328  ;;  %s13182_s17 = scalar_lea.vmem %s13181_s14, 8192 }
  0xf9   : > { %vm13682_vm2 = vmand %vm17053_vm1, %vm979_vm5  ;;  %v12414_v59 = vld [vmem:[#allocation9 + $0xd4] ss:$8 sps:$4 sm:$0xff]   ;;  %v1110_v3 = vld [vmem:[#allocation2 + $0x40] sm:$0xcc]  ;;  %p13184_p3 = scmp.lt.s32.totalorder %s13182_s17, %s13176_s9 }
  0xfa   : > { %5844 = vmatpush1.bf16.msra.mxu0 %v12346_v30  ;;  %v406_v30 = vld [vmem:[%s13582_s15 + $0xc0] sm:$0xff]  ;;  %vm983_vm10 = vmand %vm17054_vm6, %vm982_vm3  ;;  %vm17058_vm6 = vsmask.f32 7424  ;;  %v1111_v7 = vsel %vm13664_vm7, 0, %v1110_v3  ;;  %v1060_v16 = vld [vmem:[#allocation2 + $0x28] sm:$0x11] }
  0xfb   : > { %5845 = vmatprep.subr.bf16.mxu0 %v12351_v31  ;;  %6555 = vmatpush1.bf16.msra.mxu1 %v12399_v24  ;;  %v407_v31 = vld [vmem:[%s13582_s15 + $0xc8] sm:$0xff]  ;;  %vm1045_vm5 = vmand %vm1043_vm12, %vm1044_vm8  ;;  %1112 = vst [vmem:[#allocation2 + $0x40] sm:$0xcc] %v1111_v7  ;;  %v12432_v19 = vld [vmem:[#allocation9 + $0x3d0] ss:$8 sps:$4 sm:$0xff]   ;;  %v429_v24 = vpack.c.bf16 %v413_v13, %v412_v12  ;;  %p13185_p2 = por %p13184_p3, %p13183_p1 }
  0xfc   : > { %6556 = vmatprep.subr.bf16.mxu1 %v12403_v28  ;;  %vm13694_vm1 = vmor %vm983_vm10, %vm13682_vm2  ;;  %v12418_v6 = vld [vmem:[#allocation9 + $0xe0] ss:$8 sps:$4 sm:$0xff]   ;;  %vm17310_vm2 = vcmask 1043456   ;;  %v12427_v10 = vld [vmem:[#allocation9 + $0x3c4] ss:$8 sps:$4 sm:$0xff]   ;;  %vm17311_vm10 = vcmask 1047556  }
  0xfd   : > { %581 = vmatmul.mubr.bf16.gmra.mrb[4].mxu0 %v415_v34  ;;  %v12400_v34 = vld [vmem:[#allocation9 + $0xb0] ss:$8 sps:$4 sm:$0xff]   ;;  %vm1048_vm3 = vmand %vm1046_vm15, %vm1047_vm11  ;;  %vm1053_vm15 = vcmask 1040384   ;;  %v1122_v18 = vld [vmem:[#allocation2 + $0x48] sm:$0x88]  ;;  %p13186_p8 = pnand %p13185_p2, %p13179_p13 }
  0xfe   : > { %590 = vmatprep.mubr.bf16.mxu0 %v13267_v0  ;;  %5846 = vmatpush1.bf16.msra.mxu0 %v12349_v35  ;;  %v12402_v35 = vld [vmem:[#allocation9 + $0xb4] ss:$8 sps:$4 sm:$0xff]   ;;  %vm13699_vm12 = vmor %vm1048_vm3, %vm1045_vm5  ;;  %vm1056_vm5 = vcmask 1044484   ;;  %vm1057_vm3 = vsmask.f32 4352 }
  0xff   : > { %5847 = vmatprep.subr.bf16.mxu0 %v12354_v36  ;;  %6557 = vmatpush1.bf16.msra.mxu1 %v12405_v29  ;;  %v964_v36 = vsel %vm13649_vm9, 0, %v963_v32  ;;  %v1051_v9 = vsel %vm13699_vm12, 0, %v1050_v58  ;;  %vm1349_vm8 = vmand %vm17310_vm2, %vm1348_vm13  ;;  %vm17314_vm13 = vsmask.f32 256  ;;  %v1086_v21 = vld [vmem:[#allocation2 + $0x30] sm:$0x33] }
 0x100   : > { %965 = vst [vmem:[#allocation2 + $0x8] sm:$0x33] %v964_v36  ;;  %6558 = vmatprep.subr.bf16.mxu1 %v12409_v38  ;;  %1052 = vst [vmem:[#allocation2 + $0x20] sm:$0x88] %v1051_v9  ;;  %v1123_v22 = vsel %vm13699_vm12, 0, %v1122_v18  ;;  %v990_v58 = vld [vmem:[#allocation2 + $0xc8] sm:$0xff] }
 0x101   : > { %vm1351_vm11 = vmand %vm17311_vm10, %vm17058_vm6  ;;  %vm1083_vm10 = vsmask.f32 5394  ;;  %v12433_v23 = vld [vmem:[#allocation9 + $0x3e4] ss:$8 sps:$4 sm:$0xff]   ;;  %1124 = vst [vmem:[#allocation2 + $0x48] sm:$0x88] %v1123_v22 }
 0x102   : > { %5848 = vmatpush1.bf16.msra.mxu0 %v12352_v41  ;;  %v12411_v41 = vld [vmem:[#allocation9 + $0x390] ss:$8 sps:$4 sm:$0xff]   ;;  %vm13713_vm0 = vmor %vm1351_vm11, %vm1349_vm8  ;;  %v1015_v38 = vld [vmem:[#allocation2 + $0x80] sm:$0x66]  ;;  %vm1276_vm6 = vcmask 1046532  }
 0x103   : > { %5849 = vmatprep.subr.bf16.mxu0 %v12360_v42  ;;  %v426_v42 = vpack.c.bf16 %v407_v31, %v406_v30  ;;  %6559 = vmatpush1.bf16.msra.mxu1 %v12411_v41  ;;  %v17313_v15 = vsel %vm13713_vm0, 4294967295, %v17312_v15  ;;  %vm1055_vm2 = vmand %vm1053_vm15, %vm17314_vm13  ;;  %vm17317_vm15 = vcmask 1041408   ;;  %v12436_v31 = vld [vmem:[#allocation9 + $0x3e0] ss:$8 sps:$4 sm:$0xff]   ;;  %v967_v36 = vld [vmem:[#allocation2 + $0x78] sm:$0x33] }
 0x104   : > { %v968_v37 = vsel %vm13649_vm9, 0, %v967_v36  ;;  %v1016_v40 = vsel %vm13656_vm4, 0, %v1015_v38  ;;  %v1034_v41 = vld [vmem:[#allocation2 + $0x88] sm:$0xcc]  ;;  %v1089_v48 = vld [vmem:[#allocation2 + $0xa0] sm:$0x33] }
 0x105   : > { %591 = vmatmul.mubr.bf16.gmra.mrb[8].mxu0 %v416_v46  ;;  %v12415_v46 = vld [vmem:[#allocation9 + $0x3a4] ss:$8 sps:$4 sm:$0xff]   ;;  %969 = vst [vmem:[#allocation2 + $0x78] sm:$0x33] %v968_v37  ;;  %1017 = vst [vmem:[#allocation2 + $0x80] sm:$0x66] %v1016_v40 }
 0x106   : > { %600 = vmatprep.mubr.bf16.mxu0 %v13267_v0  ;;  %5850 = vmatpush1.bf16.msra.mxu0 %v12358_v45  ;;  %v12406_v45 = vld [vmem:[#allocation9 + $0xc0] ss:$8 sps:$4 sm:$0xff]   ;;  %v12444_v43 = vld [vmem:[#allocation9 + $0x404] ss:$8 sps:$4 sm:$0xff]   ;;  %vm1191_vm13 = vsmask.f32 7942 }
 0x107   : > { %5851 = vmatprep.subr.bf16.mxu0 %v12366_v47  ;;  %v17300_v47 = vmov 0  ;;  %6560 = vmatprep.subr.bf16.mxu1 %v12415_v46  ;;  %v1066_v46 = vld [vmem:[#allocation2 + $0x98] sm:$0x11]  ;;  %v1069_v7 = vld [vmem:[#allocation2 + $0x100] sm:$0x88] }
 0x108   : > { %v17301_v47 = vsel %vm13664_vm7, 4294967295, %v17300_v47  ;;  %6561 = vmatpush1.bf16.msra.mxu1 %v12417_v49  ;;  %vm1058_vm7 = vmand %vm1056_vm5, %vm1057_vm3  ;;  %v1072_v9 = vld [vmem:[#allocation2 + $0x108] sm:$0x11]  ;;  %v1134_v18 = vld [vmem:[#allocation2 + $0x128] sm:$0x88] }
 0x109   : > { %vm13720_vm8 = vmor %vm1058_vm7, %vm1055_vm2  ;;  %vm17318_vm7 = vcmask 1045508   ;;  %v1137_v22 = vld [vmem:[#allocation2 + $0x130] sm:$0x11]  ;;  %v1040_v37 = vld [vmem:[#allocation2 + $0x168] sm:$0xcc]  ;;  %vm1190_vm2 = vcmask 1043457  }
 0x10a   : > { %5852 = vmatpush1.bf16.msra.mxu0 %v12364_v52  ;;  %v427_v52 = vpack.c.bf16 %v409_v51, %v408_v50  ;;  %vm1084_vm5 = vmand %vm17318_vm7, %vm1083_vm10  ;;  %v1067_v49 = vsel %vm13720_vm8, 0, %v1066_v46  ;;  %v1101_v51 = vld [vmem:[#allocation2 + $0xa8] sm:$0x66]  ;;  %v1073_v12 = vsel %vm13720_vm8, 0, %v1072_v9  ;;  %v1078_v46 = vld [vmem:[#allocation2 + $0x178] sm:$0x11] }
 0x10b   : > { %5853 = vmatprep.subr.bf16.mxu0 %v12372_v53  ;;  %v17302_v53 = vmov 0  ;;  %1068 = vst [vmem:[#allocation2 + $0x98] sm:$0x11] %v1067_v49  ;;  %1074 = vst [vmem:[#allocation2 + $0x108] sm:$0x11] %v1073_v12  ;;  %vm1193_vm10 = vcmask 1047557  }
 0x10c   : > { %v17303_v53 = vsel %vm13675_vm14, 4294967295, %v17302_v53  ;;  %vm1081_vm14 = vsmask.f32 1282  ;;  %vm1277_vm0 = vsmask.f32 6400 }
 0x10d   : > { %601 = vmatmul.mubr.bf16.gmra.mrb[12].mxu0 %v417_v56  ;;  %v12412_v56 = vld [vmem:[#allocation9 + $0xd0] ss:$8 sps:$4 sm:$0xff]   ;;  %vm1082_vm11 = vmand %vm17317_vm15, %vm1081_vm14  ;;  %vm17321_vm14 = vnez %v17301_v47  ;;  %vm1194_vm15 = vsmask.f32 7958 }
 0x10e   : > { %610 = vmatprep.mubr.bf16.mxu0 %v13267_v0  ;;  %5854 = vmatpush1.bf16.msra.mxu0 %v12370_v55  ;;  %v411_v55 = vld [vmem:[%s13582_s15 + $0xe8] sm:$0xff]  ;;  %vm13736_vm3 = vmor %vm1084_vm5, %vm1082_vm11  ;;  %v1041_v40 = vsel %vm17321_vm14, 0, %v1040_v37  ;;  %vm1273_vm5 = vcmask 1042432   ;;  %v1119_v37 = vld [vmem:[#allocation2 + $0x190] sm:$0xcc] }
 0x10f   : > { %5855 = vmatprep.subr.bf16.mxu0 %v12378_v57  ;;  %v13686_v57 = vld [vmem:[#allocation2] sm:$0xff]  ;;  %v1087_v32 = vsel %vm13736_vm3, 0, %v1086_v21  ;;  %v1090_v50 = vsel %vm13736_vm3, 0, %v1089_v48  ;;  %v995_v21 = vld [vmem:[#allocation2 + $0x138] sm:$0xff]  ;;  %1042 = vst [vmem:[#allocation2 + $0x168] sm:$0xcc] %v1041_v40  ;;  %vm13818_vm11 = vmand %vm1190_vm2, %vm1191_vm13 }
 0x110   : > { %1088 = vst [vmem:[#allocation2 + $0x30] sm:$0x33] %v1087_v32  ;;  %1091 = vst [vmem:[#allocation2 + $0xa0] sm:$0x33] %v1090_v50  ;;  %v1079_v50 = vsel %vm13720_vm8, 0, %v1078_v46 }
 0x111   : > { %1080 = vst [vmem:[#allocation2 + $0x178] sm:$0x11] %v1079_v50  ;;  %vm1195_vm7 = vmand %vm1193_vm10, %vm1194_vm15  ;;  %v1280_v46 = vld [vmem:[#allocation2 + $0x18] sm:$0x77]  ;;  %vm2426_vm15 = vcmask 1046528  }
 0x112   : > { %5856 = vmatpush1.bf16.msra.mxu0 %v12376_v60  ;;  %v1098_v60 = vld [vmem:[#allocation2 + $0x38] sm:$0x66]  ;;  %vm1278_vm2 = vmand %vm1276_vm6, %vm1277_vm0  ;;  %vm17331_vm6 = vnez %v17303_v53 }
 0x113   : > { %5857 = vmatprep.subr.bf16.mxu0 %v12384_v61  ;;  %v1099_v61 = vsel %vm13656_vm4, 0, %v1098_v60  ;;  %v991_v60 = vsel %vm13694_vm1, 0, %v990_v58 }
 0x114   : > { %1100 = vst [vmem:[#allocation2 + $0x38] sm:$0x66] %v1099_v61  ;;  %992 = vst [vmem:[#allocation2 + $0xc8] sm:$0xff] %v991_v60 }
 0x115   : > { %611 = vmatmul.mubr.bf16.gmra.mrb[16].mxu0 %v418_v63  ;;  %v12421_v63 = vld [vmem:[#allocation9 + $0x3b4] ss:$8 sps:$4 sm:$0xff]  }
 0x116   : > { %620 = vmatprep.mubr.bf16.mxu0 %v13267_v0  ;;  %5858 = vmatpush1.bf16.msra.mxu0 %v12382_v62  ;;  %v12420_v62 = vld [vmem:[#allocation9 + $0xe4] ss:$8 sps:$4 sm:$0xff]  }
 0x117   : > { %5859 = vmatprep.subr.bf16.mxu0 %v12390_v1  ;;  %v428_v1 = vpack.c.bf16 %v411_v55, %v410_v54  ;;  %6562 = vmatprep.subr.bf16.mxu1 %v12421_v63  ;;  %v1113_v54 = vld [vmem:[#allocation2 + $0xb0] sm:$0xcc] }
 0x118   : > { %v1114_v55 = vsel %vm17321_vm14, 0, %v1113_v54  ;;  %v1018_v63 = vld [vmem:[#allocation2 + $0xf0] sm:$0x66] }
 0x119   : > { %1115 = vst [vmem:[#allocation2 + $0xb0] sm:$0xcc] %v1114_v55  ;;  %v1019_v3 = vsel %vm13656_vm4, 0, %v1018_v63  ;;  %v1095_v55 = vld [vmem:[#allocation2 + $0x180] sm:$0x33] }
 0x11a   : > { %5860 = vmatpush1.bf16.msra.mxu0 %v12388_v4  ;;  %v12423_v4 = vld [vmem:[#allocation9 + $0x3b0] ss:$8 sps:$4 sm:$0xff]   ;;  %1020 = vst [vmem:[#allocation2 + $0xf0] sm:$0x66] %v1019_v3  ;;  %v1096_v58 = vsel %vm13736_vm3, 0, %v1095_v55 }
 0x11b   : > { %5861 = vmatprep.subr.bf16.mxu0 %v12396_v25  ;;  %6563 = vmatpush1.bf16.msra.mxu1 %v12423_v4  ;;  %v1061_v25 = vsel %vm13720_vm8, 0, %v1060_v16  ;;  %v1037_v4 = vld [vmem:[#allocation2 + $0xf8] sm:$0xcc]  ;;  %v1116_v16 = vld [vmem:[#allocation2 + $0x120] sm:$0xcc] }
 0x11c   : > { %6564 = vmatprep.subr.bf16.mxu1 %v12427_v10  ;;  %1062 = vst [vmem:[#allocation2 + $0x28] sm:$0x11] %v1061_v25  ;;  %v1092_v10 = vld [vmem:[#allocation2 + $0x110] sm:$0x33]  ;;  %v448_v25 = vlaneseq  ;;  %1097 = vst [vmem:[#allocation2 + $0x180] sm:$0x33] %v1096_v58 }
 0x11d   : > { %621 = vmatmul.mubr.bf16.gmra.mrb[20].mxu0 %v419_v5  ;;  %v1093_v13 = vsel %vm13736_vm3, 0, %v1092_v10  ;;  %vm1274_vm3 = vsmask.f32 2304 }
 0x11e   : > { %630 = vmatprep.mubr.bf16.mxu0 %v13267_v0  ;;  %5862 = vmatpush1.bf16.msra.mxu0 %v12394_v27  ;;  %v1125_v27 = vld [vmem:[#allocation2 + $0x50] sm:$0x11]  ;;  %1094 = vst [vmem:[#allocation2 + $0x110] sm:$0x33] %v1093_v13  ;;  %vm13831_vm13 = vmand %vm1273_vm5, %vm1274_vm3 }
 0x11f   : > { %5863 = vmatprep.subr.bf16.mxu0 %v12402_v35  ;;  %v1126_v29 = vsel %vm13720_vm8, 0, %v1125_v27  ;;  %v12440_v35 = vld [vmem:[#allocation9 + $0x3f0] ss:$8 sps:$4 sm:$0xff]   ;;  %vm13844_vm10 = vmor %vm1278_vm2, %vm13831_vm13 }
 0x120   : > { %1127 = vst [vmem:[#allocation2 + $0x50] sm:$0x11] %v1126_v29  ;;  %v1021_v29 = vld [vmem:[#allocation2 + $0x160] sm:$0x66] }
 0x122   : > { %5864 = vmatpush1.bf16.msra.mxu0 %v12400_v34  ;;  %v12438_v34 = vld [vmem:[#allocation9 + $0x3f4] ss:$8 sps:$4 sm:$0xff]  }
 0x123   : > { %5865 = vmatprep.subr.bf16.mxu0 %v12408_v44  ;;  %v1063_v44 = vld [vmem:[#allocation2 + $0x90] sm:$0x88] }
 0x125   : > { %631 = vmatmul.mubr.bf16.gmra.mrb[24].mxu0 %v420_v8  ;;  %v12426_v8 = vld [vmem:[#allocation9 + $0xf4] ss:$8 sps:$4 sm:$0xff]  }
 0x126   : > { %640 = vmatprep.mubr.bf16.mxu0 %v13267_v0  ;;  %5866 = vmatpush1.bf16.msra.mxu0 %v12406_v45  ;;  %v1064_v45 = vsel %vm13699_vm12, 0, %v1063_v44 }
 0x127   : > { %5867 = vmatprep.subr.bf16.mxu0 %v12414_v59  ;;  %1065 = vst [vmem:[#allocation2 + $0x90] sm:$0x88] %v1064_v45  ;;  %v1131_v59 = vld [vmem:[#allocation2 + $0xc0] sm:$0x11] }
 0x128   : > { %v1132_v61 = vsel %vm13720_vm8, 0, %v1131_v59  ;;  %v1107_v59 = vld [vmem:[#allocation2 + $0x188] sm:$0x66] }
 0x129   : > { %1133 = vst [vmem:[#allocation2 + $0xc0] sm:$0x11] %v1132_v61  ;;  %v1108_v61 = vsel %vm13656_vm4, 0, %v1107_v59 }
 0x12a   : > { %5868 = vmatpush1.bf16.msra.mxu0 %v12412_v56  ;;  %1109 = vst [vmem:[#allocation2 + $0x188] sm:$0x66] %v1108_v61  ;;  %v1345_v61 = vld [vmem:[#allocation2 + $0x18] sm:$0x88] }
 0x12b   : > { %5869 = vmatprep.subr.bf16.mxu0 %v12420_v62  ;;  %v971_v62 = vld [vmem:[#allocation2 + $0xe8] sm:$0x33] }
 0x12d   : > { %641 = vmatmul.mubr.bf16.gmra.mrb[28].mxu0 %v421_v11  ;;  %v12429_v11 = vld [vmem:[#allocation9 + $0x3c0] ss:$8 sps:$4 sm:$0xff]  }
 0x12e   : > { %650 = vmatprep.mubr.bf16.mxu0 %v13267_v0  ;;  %5870 = vmatpush1.bf16.msra.mxu0 %v12418_v6  ;;  %v1038_v6 = vsel %vm17321_vm14, 0, %v1037_v4 }
 0x12f   : > { %5871 = vmatprep.subr.bf16.mxu0 %v12426_v8  ;;  %6565 = vmatpush1.bf16.msra.mxu1 %v12429_v11  ;;  %1039 = vst [vmem:[#allocation2 + $0xf8] sm:$0xcc] %v1038_v6  ;;  %v1070_v8 = vsel %vm13699_vm12, 0, %v1069_v7  ;;  %v1104_v11 = vld [vmem:[#allocation2 + $0x118] sm:$0x66] }
 0x130   : > { %1071 = vst [vmem:[#allocation2 + $0x100] sm:$0x88] %v1070_v8 }
 0x135   : > { %651 = vmatmul.mubr.bf16.gmra.mrb[32].mxu0 %v422_v14  ;;  %v12430_v14 = vld [vmem:[#allocation9 + $0x3d4] ss:$8 sps:$4 sm:$0xff]  }
 0x136   : > { %660 = vmatprep.mubr.bf16.mxu0 %v13267_v0  ;;  %6566 = vmatprep.subr.bf16.mxu1 %v12430_v14  ;;  %v1105_v14 = vsel %vm13656_vm4, 0, %v1104_v11 }
 0x137   : > { %6567 = vmatpush1.bf16.msra.mxu1 %v12432_v19  ;;  %1106 = vst [vmem:[#allocation2 + $0x118] sm:$0x66] %v1105_v14  ;;  %v1135_v19 = vsel %vm13699_vm12, 0, %v1134_v18  ;;  %v1197_v14 = vld [vmem:[#allocation2 + $0x8] sm:$0xee] }
 0x138   : > { %6568 = vmatprep.subr.bf16.mxu1 %v12433_v23  ;;  %1136 = vst [vmem:[#allocation2 + $0x128] sm:$0x88] %v1135_v19  ;;  %v996_v23 = vsel %vm13694_vm1, 0, %v995_v21 }
 0x139   : > { %997 = vst [vmem:[#allocation2 + $0x138] sm:$0xff] %v996_v23 }
 0x13b   : > { %6569 = vmatpush1.bf16.msra.mxu1 %v12436_v31  ;;  %v446_v31 = vld [vmem:[#allocation8] sm:$0x3] }
 0x13c   : > { %6570 = vmatprep.subr.bf16.mxu1 %v12438_v34 }
 0x13d   : > { %661 = vmatmul.mubr.bf16.gmra.mrb[36].mxu0 %v423_v17  ;;  %v12424_v17 = vld [vmem:[#allocation9 + $0xf0] ss:$8 sps:$4 sm:$0xff]  }
 0x13e   : > { %670 = vmatprep.mubr.bf16.mxu0 %v13267_v0  ;;  %5872 = vmatpush1.bf16.msra.mxu0 %v12424_v17  ;;  %v1117_v17 = vsel %vm17321_vm14, 0, %v1116_v16  ;;  %v1414_v16 = vld [vmem:[#allocation2 + $0x28] sm:$0xff] }
 0x13f   : > { %6571 = vmatpush1.bf16.msra.mxu1 %v12440_v35  ;;  %1118 = vst [vmem:[#allocation2 + $0x120] sm:$0xcc] %v1117_v17  ;;  %v1022_v35 = vsel %vm13656_vm4, 0, %v1021_v29 }
 0x140   : > { %6773 = vmatprep.subr.bf16.mxu1 %v12444_v43  ;;  %1023 = vst [vmem:[#allocation2 + $0x160] sm:$0x66] %v1022_v35 }
 0x145   : > { %671 = vmatmul.mubr.bf16.gmra.mrb[40].mxu0 %v424_v20 }
 0x146   : > { %680 = vmatprep.mubr.bf16.mxu0 %v13267_v0 }
 0x14d   : > { %681 = vmatmul.mubr.bf16.gmra.mrb[44].mxu0 %v425_v26  ;;  %v985_v26 = vld [vmem:[#allocation2 + $0x58] sm:$0xff] }
 0x14e   : > { %690 = vmatprep.mubr.bf16.mxu0 %v13267_v0  ;;  %v986_v28 = vsel %vm13694_vm1, 0, %v985_v26  ;;  %v13786_v26 = vshrl.u32 %v448_v25, 7 }
 0x14f   : > { %987 = vst [vmem:[#allocation2 + $0x58] sm:$0xff] %v986_v28  ;;  %v975_v28 = vld [vmem:[#allocation2 + $0x158] sm:$0x33] }
 0x150   : > { %17322 = vst [vmem:[#allocation21_spill] sm:$0xff] %v13786_v26  ;;  %v17061_v27 = vsub.s32 0, %v13786_v26  ;;  %v17060_v32 = vsub.s32 1, %v13786_v26  ;;  %v976_v34 = vsel %vm13649_vm9, 0, %v975_v28 }
 0x151   : > { %977 = vst [vmem:[#allocation2 + $0x158] sm:$0x33] %v976_v34 }
 0x152   : > { %v13796_v36 = vrot.slane %v446_v31, %v17061_v27  ;;  %v13800_v38 = vrot.slane %v446_v31, %v17060_v32  ;;  %v1270_v31 = vld [vmem:[#allocation2 + $0x10] sm:$0xcc] }
 0x155   : > { %691 = vmatmul.mubr.bf16.gmra.mrb[48].mxu0 %v426_v42  ;;  %v1035_v42 = vsel %vm17321_vm14, 0, %v1034_v41 }
 0x156   : > { %700 = vmatprep.mubr.bf16.mxu0 %v13267_v0  ;;  %1036 = vst [vmem:[#allocation2 + $0x88] sm:$0xcc] %v1035_v42  ;;  %v1128_v0 = vld [vmem:[#allocation2 + $0xb8] sm:$0x88]  ;;  %v1075_v42 = vld [vmem:[#allocation2 + $0x170] sm:$0x88] }
 0x157   : > { %v1129_v56 = vsel %vm13699_vm12, 0, %v1128_v0  ;;  %v1076_v45 = vsel %vm13699_vm12, 0, %v1075_v42 }
 0x158   : > { %1130 = vst [vmem:[#allocation2 + $0xb8] sm:$0x88] %v1129_v56  ;;  %1077 = vst [vmem:[#allocation2 + $0x170] sm:$0x88] %v1076_v45 }
 0x15d   : > { %701 = vmatmul.mubr.bf16.gmra.mrb[52].mxu0 %v427_v52  ;;  %v1102_v52 = vsel %vm13656_vm4, 0, %v1101_v51  ;;  %vm13826_vm4 = vmor %vm1195_vm7, %vm13818_vm11 }
 0x15e   : > { %710 = vmatprep.mubr.bf16.mxu0 %v13686_v57  ;;  %1103 = vst [vmem:[#allocation2 + $0xa8] sm:$0x66] %v1102_v52 }
 0x165   : > { %711 = vmatmul.mubr.bf16.gmra.mrb[56].mxu0 %v428_v1  ;;  %v972_v1 = vsel %vm13649_vm9, 0, %v971_v62 }
 0x166   : > { %720 = vmatprep.mubr.bf16.mxu0 %v13686_v57  ;;  %973 = vst [vmem:[#allocation2 + $0xe8] sm:$0x33] %v972_v1 }
 0x16d   : > { %721 = vmatmul.mubr.bf16.gmra.mrb[60].mxu0 %v429_v24  ;;  %v1138_v24 = vsel %vm13720_vm8, 0, %v1137_v22  ;;  %v12492_v22 = vld [vmem:[#allocation9 + $0x104] ss:$8 sps:$4 sm:$0xff]  }
 0x16e   : > { %1139 = vst [vmem:[#allocation2 + $0x130] sm:$0x11] %v1138_v24  ;;  %v1200_v24 = vld [vmem:[#allocation2 + $0x10] sm:$0x33]  ;;  %6074 = vmatprep.subr.bf16.mxu0 %v12492_v22 }
 0x1c8   : > { %v572_v41 = vpop.f32.mrb[0].mxu0 }
 0x1c9   : > { %v573_v43 = vadd.f32 %v572_v41, %v13796_v36  ;;  %v574_v44 = vpop.f32.mrb[1].mxu0 }
 0x1ca   : > { %v575_v48 = vadd.f32 %v574_v44, %v13800_v38  ;;  %v576_v49 = vpop.f32.mrb[2].mxu0  ;;  %v1140_v44 = vld [vmem:[#allocation2 + $0x198] sm:$0x88] }
 0x1cb   : > { %v731_v51 = vmax.f32 %v573_v43, 0.0  ;;  %v577_v52 = vadd.f32 %v576_v49, %v13796_v36  ;;  %v578_v54 = vpop.f32.mrb[3].mxu0  ;;  %v1120_v49 = vsel %vm17321_vm14, 0, %v1119_v37  ;;  %v1141_v50 = vsel %vm13699_vm12, 0, %v1140_v44  ;;  %v12496_v44 = vld [vmem:[#allocation9 + $0x114] ss:$8 sps:$4 sm:$0xff]  }
 0x1cc   : > { %v732_v0 = vmax.f32 %v575_v48, 0.0  ;;  %v579_v56 = vadd.f32 %v578_v54, %v13800_v38  ;;  %1121 = vst [vmem:[#allocation2 + $0x190] sm:$0xcc] %v1120_v49  ;;  %1142 = vst [vmem:[#allocation2 + $0x198] sm:$0x88] %v1141_v50  ;;  %vm17332_vm14 = vnez %v17313_v15 }
 0x1cd   : > { %v733_v60 = vmax.f32 %v577_v52, 0.0 }
 0x1ce   : > { %v11306_v62 = vpack.c.bf16 %v732_v0, %v731_v51  ;;  %v734_v1 = vmax.f32 %v579_v56, 0.0 }
 0x1d0   : > { %v1147_v30 = vshrl.u32 %v11306_v62, 16  ;;  %v1150_v3 = vshll.u32 %v11306_v62, 16  ;;  %v11307_v4 = vpack.c.bf16 %v734_v1, %v733_v60  ;;  %v582_v6 = vpop.f32.mrb[4].mxu0 }
 0x1d1   : > { %v583_v39 = vadd.f32 %v582_v6, %v13796_v36  ;;  %v584_v7 = vpop.f32.mrb[5].mxu0 }
 0x1d2   : > { %v1149_v8 = vrot.slane %v1147_v30, 6  ;;  %v1152_v9 = vrot.slane %v1150_v3, 7  ;;  %v1222_v11 = vshrl.u32 %v11307_v4, 16  ;;  %v1225_v12 = vshll.u32 %v11307_v4, 16  ;;  %v586_v13 = vpop.f32.mrb[6].mxu0  ;;  %v1000_v30 = vld [vmem:[#allocation2 + $0x1a8] sm:$0xff] }
 0x1d3   : > { %v735_v17 = vmax.f32 %v583_v39, 0.0  ;;  %v585_v18 = vadd.f32 %v584_v7, %v13800_v38  ;;  %v587_v19 = vadd.f32 %v586_v13, %v13796_v36  ;;  %v588_v21 = vpop.f32.mrb[7].mxu0  ;;  %v1639_v33 = vld [vmem:[#allocation2 + $0x198] sm:$0xff] }
 0x1d4   : > { %v1153_v23 = vor.u32 %v1152_v9, %v1149_v8  ;;  %v1224_v25 = vrot.slane %v1222_v11, 5  ;;  %v1227_v28 = vrot.slane %v1225_v12, 6  ;;  %v589_v29 = vadd.f32 %v588_v21, %v13800_v38  ;;  %v1353_v21 = vld [vmem:[#allocation2 + $0x20] sm:$0xff] }
 0x1d5   : > { %v736_v34 = vmax.f32 %v585_v18, 0.0  ;;  %v737_v35 = vmax.f32 %v587_v19, 0.0  ;;  %v1001_v19 = vsel %vm13694_vm1, 0, %v1000_v30 }
 0x1d6   : > { %v1154_v40 = vrot.slane %v1153_v23, 4  ;;  %v1198_v41 = vsel %vm13826_vm4, %v1153_v23, %v1197_v14  ;;  %v1228_v42 = vor.u32 %v1227_v28, %v1224_v25  ;;  %v738_v43 = vmax.f32 %v589_v29, 0.0  ;;  %1002 = vst [vmem:[#allocation2 + $0x1a8] sm:$0xff] %v1001_v19 }
 0x1d7   : > { %1199 = vst [vmem:[#allocation2 + $0x8] sm:$0xee] %v1198_v41  ;;  %v11308_v48 = vpack.c.bf16 %v736_v34, %v735_v17  ;;  %v1417_v17 = vld [vmem:[#allocation2 + $0x30] sm:$0x11] }
 0x1d8   : > { %v1201_v51 = vsel %vm13649_vm9, %v1154_v40, %v1200_v24  ;;  %v1229_v52 = vrot.slane %v1228_v42, 4  ;;  %v1271_v54 = vsel %vm17331_vm6, %v1228_v42, %v1270_v31  ;;  %v11309_v55 = vpack.c.bf16 %v738_v43, %v737_v35  ;;  %v592_v0 = vpop.f32.mrb[8].mxu0  ;;  %v12490_v35 = vld [vmem:[#allocation9 + $0x100] ss:$8 sps:$4 sm:$0xff]  }
 0x1d9   : > { %1202 = vst [vmem:[#allocation2 + $0x10] sm:$0x33] %v1201_v51  ;;  %1272 = vst [vmem:[#allocation2 + $0x10] sm:$0xcc] %v1271_v54  ;;  %v1302_v56 = vshll.u32 %v11308_v48, 16  ;;  %v1305_v58 = vshrl.u32 %v11308_v48, 16  ;;  %v593_v47 = vadd.f32 %v592_v0, %v13796_v36 }
 0x1da   : > { %v594_v59 = vpop.f32.mrb[9].mxu0  ;;  %v1281_v60 = vsel %vm13844_vm10, %v1229_v52, %v1280_v46  ;;  %v1375_v62 = vshrl.u32 %v11309_v55, 16  ;;  %v1378_v9 = vshll.u32 %v11309_v55, 16  ;;  %v1482_v52 = vld [vmem:[#allocation2 + $0x30] sm:$0xee] }
 0x1db   : > { %v595_v63 = vadd.f32 %v594_v59, %v13800_v38  ;;  %v596_v1 = vpop.f32.mrb[10].mxu0  ;;  %1282 = vst [vmem:[#allocation2 + $0x18] sm:$0x77] %v1281_v60  ;;  %v1304_v3 = vrot.slane %v1302_v56, 5  ;;  %v1307_v4 = vrot.slane %v1305_v58, 4  ;;  %v739_v6 = vmax.f32 %v593_v47, 0.0 }
 0x1dc   : > { %v597_v39 = vadd.f32 %v596_v1, %v13796_v36  ;;  %v598_v7 = vpop.f32.mrb[11].mxu0  ;;  %v1377_v8 = vrot.slane %v1375_v62, 7  ;;  %v12494_v59 = vld [vmem:[#allocation9 + $0x110] ss:$8 sps:$4 sm:$0xff]  }
 0x1dd   : > { %v740_v11 = vmax.f32 %v595_v63, 0.0  ;;  %v599_v12 = vadd.f32 %v598_v7, %v13800_v38  ;;  %v1308_v13 = vor.u32 %v1307_v4, %v1304_v3  ;;  %v1346_v14 = vsel %vm13699_vm12, %v1304_v3, %v1345_v61  ;;  %v12504_v63 = vld [vmem:[#allocation9 + $0x124] ss:$8 sps:$4 sm:$0xff]   ;;  %v1485_v1 = vld [vmem:[#allocation2 + $0x38] sm:$0x33] }
 0x1de   : > { %v741_v18 = vmax.f32 %v597_v39, 0.0  ;;  %1347 = vst [vmem:[#allocation2 + $0x18] sm:$0x88] %v1346_v14  ;;  %v1380_v22 = vor.u32 %v1378_v9, %v1377_v8  ;;  %v1381_v23 = vrot.slane %v1377_v8, 4  ;;  %v1707_v28 = vld [vmem:[#allocation2 + $0x8] sm:$0xff] }
 0x1df   : > { %v11310_v24 = vpack.c.bf16 %v740_v11, %v739_v6  ;;  %v742_v25 = vmax.f32 %v599_v12, 0.0  ;;  %v1309_v29 = vrot.slane %v1308_v13, 4  ;;  %v13867_v31 = vcombine.low %v13686_v57, %v1707_v28  ;;  %v1550_v11 = vld [vmem:[#allocation2 + $0x38] sm:$0xcc]  ;;  %v1553_v12 = vld [vmem:[#allocation2 + $0x40] sm:$0x77] }
 0x1e0   : > { %v13870_v34 = vcombine.high %v13686_v57, %v1707_v28  ;;  %v13874_v37 = vsel %vm13694_vm1, %v1380_v22, %v1414_v16  ;;  %v1418_v40 = vsel %vm13720_vm8, %v1381_v23, %v1417_v17  ;;  %v602_v43 = vpop.f32.mrb[12].mxu0  ;;  %v13890_v6 = vld [vmem:[#allocation2 + $0x10] sm:$0xff]  ;;  %v12502_v22 = vld [vmem:[#allocation9 + $0x120] ss:$8 sps:$4 sm:$0xff]  }
 0x1e1   : > { %v1439_v41 = vshrl.u32 %v11310_v24, 16  ;;  %v1442_v42 = vshll.u32 %v11310_v24, 16  ;;  %v13880_v46 = vsel %vm17332_vm14, %v1309_v29, %v1353_v21  ;;  %1416 = vst [vmem:[#allocation2 + $0x28] sm:$0xff] %v13874_v37  ;;  %1419 = vst [vmem:[#allocation2 + $0x30] sm:$0x11] %v1418_v40  ;;  %v11311_v57 = vpack.c.bf16 %v742_v25, %v741_v18  ;;  %v604_v49 = vpop.f32.mrb[13].mxu0 }
 0x1e2   : > { %v603_v48 = vadd.f32 %v602_v43, %v13796_v36  ;;  %5873 = vmatprep.mubr.bf16.mxu0 %v13870_v34  ;;  %1355 = vst [vmem:[#allocation2 + $0x20] sm:$0xff] %v13880_v46  ;;  %v605_v54 = vadd.f32 %v604_v49, %v13800_v38  ;;  %v606_v55 = vpop.f32.mrb[14].mxu0  ;;  %v13896_v7 = vcombine.high %v13880_v46, %v13874_v37  ;;  %v1754_v21 = vld [vmem:[#allocation2 + $0x8] sm:$0xee] }
 0x1e3   : > { %v1441_v50 = vrot.slane %v1439_v41, 6  ;;  %v1444_v51 = vrot.slane %v1442_v42, 7  ;;  %5874 = vmatmul.mubr.bf16.vlgmr.msra.gmra.mrb[64].mxu0 %v13867_v31  ;;  %v1507_v0 = vshrl.u32 %v11311_v57, 16  ;;  %v1510_v56 = vshll.u32 %v11311_v57, 16  ;;  %v608_v47 = vpop.f32.mrb[15].mxu0 }
 0x1e4   : > { %v743_v58 = vmax.f32 %v603_v48, 0.0  ;;  %6075 = vmatpush1.bf16.msra.mxu0 %v12490_v35  ;;  %v744_v61 = vmax.f32 %v605_v54, 0.0  ;;  %v607_v62 = vadd.f32 %v606_v55, %v13796_v36  ;;  %v609_v4 = vadd.f32 %v608_v47, %v13800_v38  ;;  %17333 = vst [vmem:[#allocation22_spill] sm:$0xff] %v13896_v7  ;;  %v12507_v35 = vld [vmem:[#allocation9 + $0x134] ss:$8 sps:$4 sm:$0xff]  }
 0x1e5   : > { %v1445_v60 = vor.u32 %v1444_v51, %v1441_v50  ;;  %6076 = vmatprep.subr.bf16.mxu0 %v12496_v44  ;;  %v1509_v30 = vrot.slane %v1507_v0, 5  ;;  %v1512_v3 = vrot.slane %v1510_v56, 6  ;;  %v13892_v39 = vld [vmem:[#allocation2 + $0x18] sm:$0xff]  ;;  %v13911_v29 = vcombine.high %v1754_v21, %v13890_v6  ;;  %v1618_v42 = vld [vmem:[#allocation2 + $0x40] sm:$0x88] }
 0x1e6   : > { %v11312_v13 = vpack.c.bf16 %v744_v61, %v743_v58  ;;  %v745_v14 = vmax.f32 %v607_v62, 0.0  ;;  %v746_v17 = vmax.f32 %v609_v4, 0.0  ;;  %v13902_v18 = vcombine.high %v13890_v6, %v13892_v39  ;;  %v12505_v47 = vld [vmem:[#allocation9 + $0x130] ss:$8 sps:$4 sm:$0xff]  }
 0x1e7   : > { %v1446_v8 = vrot.slane %v1445_v60, 4  ;;  %v1483_v9 = vsel %vm13826_vm4, %v1445_v60, %v1482_v52  ;;  %v1513_v16 = vor.u32 %v1512_v3, %v1509_v30  ;;  %v13906_v19 = vcombine.low %v13890_v6, %v13892_v39 }
 0x1e8   : > { %1484 = vst [vmem:[#allocation2 + $0x30] sm:$0xee] %v1483_v9  ;;  %17334 = vst [vmem:[#allocation23_spill] sm:$0xff] %v13902_v18  ;;  %6077 = vmatpush1.bf16.msra.mxu0 %v12494_v59  ;;  %v1575_v24 = vshll.u32 %v11312_v13, 16  ;;  %v1578_v25 = vshrl.u32 %v11312_v13, 16  ;;  %v612_v28 = vpop.f32.mrb[16].mxu0  ;;  %v11313_v43 = vpack.c.bf16 %v746_v17, %v745_v14  ;;  %5883 = vmatprep.mubr.bf16.mxu0 %v13902_v18 }
 0x1e9   : > { %v1486_v23 = vsel %vm13649_vm9, %v1446_v8, %v1485_v1  ;;  %6078 = vmatprep.subr.bf16.mxu0 %v12504_v63  ;;  %v1514_v40 = vrot.slane %v1513_v16, 4  ;;  %v1551_v41 = vsel %vm17331_vm6, %v1513_v16, %v1550_v11  ;;  %v613_v44 = vadd.f32 %v612_v28, %v13796_v36  ;;  %v614_v57 = vpop.f32.mrb[17].mxu0  ;;  %v12511_v63 = vld [vmem:[#allocation9 + $0x144] ss:$8 sps:$4 sm:$0xff]  }
 0x1ea   : > { %1487 = vst [vmem:[#allocation2 + $0x38] sm:$0x33] %v1486_v23  ;;  %1552 = vst [vmem:[#allocation2 + $0x38] sm:$0xcc] %v1551_v41  ;;  %v1577_v48 = vrot.slane %v1575_v24, 5  ;;  %v1580_v49 = vrot.slane %v1578_v25, 4  ;;  %v615_v50 = vadd.f32 %v614_v57, %v13800_v38  ;;  %v13921_v52 = vcombine.high %v13892_v39, %v13880_v46 }
 0x1eb   : > { %5884 = vmatmul.mubr.bf16.gmra.mrb[68].mxu0 %v13906_v19  ;;  %v616_v51 = vpop.f32.mrb[18].mxu0  ;;  %v1554_v54 = vsel %vm13844_vm10, %v1514_v40, %v1553_v12  ;;  %v1643_v55 = vshrl.u32 %v11313_v43, 16  ;;  %v1646_v0 = vshll.u32 %v11313_v43, 16  ;;  %v747_v56 = vmax.f32 %v613_v44, 0.0  ;;  %v1621_v1 = vld [vmem:[#allocation2 + $0x48] sm:$0xff]  ;;  %v1682_v11 = vld [vmem:[#allocation2 + $0x50] sm:$0xff] }
 0x1ec   : > { %17335 = vst [vmem:[#allocation24_spill] sm:$0xff] %v13921_v52  ;;  %5893 = vmatprep.mubr.bf16.mxu0 %v13896_v7  ;;  %v618_v58 = vpop.f32.mrb[19].mxu0  ;;  %6079 = vmatpush1.bf16.msra.mxu0 %v12502_v22  ;;  %1555 = vst [vmem:[#allocation2 + $0x40] sm:$0x77] %v1554_v54  ;;  %v1581_v59 = vor.u32 %v1580_v49, %v1577_v48  ;;  %v1619_v60 = vsel %vm13699_vm12, %v1577_v48, %v1618_v42  ;;  %v748_v61 = vmax.f32 %v615_v50, 0.0 }
 0x1ed   : > { %v617_v62 = vadd.f32 %v616_v51, %v13796_v36  ;;  %6080 = vmatprep.subr.bf16.mxu0 %v12507_v35  ;;  %1620 = vst [vmem:[#allocation2 + $0x40] sm:$0x88] %v1619_v60  ;;  %v1645_v30 = vrot.slane %v1643_v55, 7  ;;  %v619_v3 = vadd.f32 %v618_v58, %v13800_v38  ;;  %v2642_v4 = vrot.slane %v13911_v29, 1  ;;  %v1685_v12 = vld [vmem:[#allocation2 + $0x58] sm:$0x11] }
 0x1ee   : > { %v2643_v8 = vrot.slane %v13921_v52, 1  ;;  %v1582_v9 = vrot.slane %v1581_v59, 4  ;;  %v11314_v13 = vpack.c.bf16 %v748_v61, %v747_v56  ;;  %v13933_v16 = vcombine.low %v1754_v21, %v13890_v6  ;;  %v12509_v25 = vld [vmem:[#allocation9 + $0x140] ss:$8 sps:$4 sm:$0xff]   ;;  %v12517_v41 = vld [vmem:[#allocation9 + $0x154] ss:$8 sps:$4 sm:$0xff]  }
 0x1ef   : > { %v749_v14 = vmax.f32 %v617_v62, 0.0  ;;  %v1648_v17 = vor.u32 %v1646_v0, %v1645_v30  ;;  %v1649_v22 = vrot.slane %v1645_v30, 4  ;;  %v750_v23 = vmax.f32 %v619_v3, 0.0  ;;  %v1203_v44 = vld [vmem:[#allocation2 + $0x78] sm:$0xee] }
 0x1f0   : > { %v2644_v24 = vsel %vm2426_vm15, %v2642_v4, %v2643_v8  ;;  %6081 = vmatpush1.bf16.msra.mxu0 %v12505_v47  ;;  %v13940_v28 = vsel %vm17332_vm14, %v1582_v9, %v1621_v1  ;;  %v1156_v35 = vshrl.u32 %v11314_v13, 16  ;;  %v1159_v40 = vshll.u32 %v11314_v13, 16  ;;  %v622_v21 = vpop.f32.mrb[20].mxu0  ;;  %v12442_v51 = vld [vmem:[#allocation9 + $0x400] ss:$8 sps:$4 sm:$0xff]   ;;  %v1712_v9 = vld [vmem:[#allocation2 + $0x30] sm:$0xff] }
 0x1f1   : > { %6572 = vmatprep.mubr.bf16.mxu1 %v2644_v24  ;;  %v13944_v6 = vcombine.low %v13892_v39, %v13880_v46  ;;  %6082 = vmatprep.subr.bf16.mxu0 %v12511_v63  ;;  %1623 = vst [vmem:[#allocation2 + $0x48] sm:$0xff] %v13940_v28  ;;  %v13949_v42 = vsel %vm13694_vm1, %v1648_v17, %v1682_v11  ;;  %v2639_v48 = vrot.slane %v13933_v16, 1  ;;  %v624_v49 = vpop.f32.mrb[21].mxu0  ;;  %v1206_v56 = vld [vmem:[#allocation2 + $0x80] sm:$0x33]  ;;  %v13959_v62 = vld [vmem:[#allocation2 + $0x38] sm:$0xff] }
 0x1f2   : > { %v1686_v43 = vsel %vm13720_vm8, %v1649_v22, %v1685_v12  ;;  %v11315_v57 = vpack.c.bf16 %v750_v23, %v749_v14  ;;  %1684 = vst [vmem:[#allocation2 + $0x50] sm:$0xff] %v13949_v42  ;;  %v1158_v39 = vrot.slane %v1156_v35, 6  ;;  %v1161_v50 = vrot.slane %v1159_v40, 7  ;;  %v626_v0 = vpop.f32.mrb[22].mxu0  ;;  %v12449_v63 = vld [vmem:[#allocation9 + $0x414] ss:$8 sps:$4 sm:$0xff]  }
 0x1f3   : > { %17336 = vst [vmem:[#allocation25_spill] sm:$0xff] %v13944_v6  ;;  %1687 = vst [vmem:[#allocation2 + $0x58] sm:$0x11] %v1686_v43  ;;  %v2640_v54 = vrot.slane %v13944_v6, 1  ;;  %v623_v55 = vadd.f32 %v622_v21, %v13796_v36  ;;  %v625_v59 = vadd.f32 %v624_v49, %v13800_v38  ;;  %v627_v60 = vadd.f32 %v626_v0, %v13796_v36  ;;  %v628_v61 = vpop.f32.mrb[23].mxu0 }
 0x1f4   : > { %v1231_v58 = vshrl.u32 %v11315_v57, 16  ;;  %v1234_v47 = vshll.u32 %v11315_v57, 16  ;;  %6083 = vmatpush1.bf16.msra.mxu0 %v12509_v25  ;;  %v1162_v1 = vor.u32 %v1161_v50, %v1158_v39  ;;  %v13966_v4 = vcombine.low %v13880_v46, %v13874_v37  ;;  %v12515_v11 = vld [vmem:[#allocation9 + $0x150] ss:$8 sps:$4 sm:$0xff]   ;;  %v12521_v12 = vld [vmem:[#allocation9 + $0x164] ss:$8 sps:$4 sm:$0xff]  }
 0x1f5   : > { %v2641_v30 = vsel %vm2426_vm15, %v2639_v48, %v2640_v54  ;;  %v751_v3 = vmax.f32 %v623_v55, 0.0  ;;  %6084 = vmatprep.subr.bf16.mxu0 %v12517_v41  ;;  %v752_v17 = vmax.f32 %v625_v59, 0.0  ;;  %v753_v22 = vmax.f32 %v627_v60, 0.0  ;;  %v13968_v23 = vld [vmem:[#allocation2 + $0x40] sm:$0xff]  ;;  %v12447_v21 = vld [vmem:[#allocation9 + $0x410] ss:$8 sps:$4 sm:$0xff]  }
 0x1f6   : > { %17337 = vst [vmem:[#allocation26_spill] sm:$0xff] %v13966_v4  ;;  %v1233_v13 = vrot.slane %v1231_v58, 5  ;;  %v1236_v14 = vrot.slane %v1234_v47, 6  ;;  %6573 = vmatmul.mubr.bf16.vlgmr.msra.gmra.mrb[0].mxu1 %v2641_v30  ;;  %v1163_v24 = vrot.slane %v1162_v1, 4  ;;  %v1204_v25 = vsel %vm13826_vm4, %v1162_v1, %v1203_v44  ;;  %v1283_v35 = vld [vmem:[#allocation2 + $0x80] sm:$0xcc]  ;;  %5894 = vmatmul.mubr.bf16.gmra.mrb[72].mxu0 %v13966_v4 }
 0x1f7   : > { %6774 = vmatpush1.bf16.msra.mxu1 %v12442_v51  ;;  %v629_v46 = vadd.f32 %v628_v61, %v13800_v38  ;;  %v13975_v40 = vcombine.high %v1712_v9, %v13959_v62  ;;  %1205 = vst [vmem:[#allocation2 + $0x78] sm:$0xee] %v1204_v25  ;;  %v11316_v43 = vpack.c.bf16 %v752_v17, %v751_v3  ;;  %v12455_v44 = vld [vmem:[#allocation9 + $0x424] ss:$8 sps:$4 sm:$0xff]   ;;  %v12528_v61 = vld [vmem:[#allocation9 + $0x174] ss:$8 sps:$4 sm:$0xff]  }
 0x1f8   : > { %v1237_v41 = vor.u32 %v1236_v14, %v1233_v13  ;;  %v13978_v57 = vcombine.high %v13874_v37, %v1712_v9  ;;  %v13981_v48 = vcombine.low %v13874_v37, %v1712_v9  ;;  %6775 = vmatprep.subr.bf16.mxu1 %v12449_v63  ;;  %v1207_v49 = vsel %vm13649_vm9, %v1163_v24, %v1206_v56  ;;  %v1286_v39 = vld [vmem:[#allocation2 + $0x88] sm:$0x77]  ;;  %v632_v51 = vpop.f32.mrb[24].mxu0  ;;  %v1356_v63 = vld [vmem:[#allocation2 + $0x88] sm:$0x88] }
 0x1f9   : > { %17338 = vst [vmem:[#allocation27_spill] sm:$0xff] %v13975_v40  ;;  %v754_v50 = vmax.f32 %v629_v46, 0.0  ;;  %5903 = vmatprep.mubr.bf16.mxu0 %v13975_v40  ;;  %v13987_v55 = vcombine.low %v1712_v9, %v13959_v62  ;;  %v13991_v0 = vcombine.high %v13959_v62, %v13968_v23  ;;  %6085 = vmatpush1.bf16.msra.mxu0 %v12515_v11  ;;  %v12519_v37 = vld [vmem:[#allocation9 + $0x160] ss:$8 sps:$4 sm:$0xff]   ;;  %1208 = vst [vmem:[#allocation2 + $0x80] sm:$0x33] %v1207_v49 }
 0x1fa   : > { %17339 = vst [vmem:[#allocation28_spill] sm:$0xff] %v13978_v57  ;;  %17340 = vst [vmem:[#allocation29_spill] sm:$0xff] %v13981_v48  ;;  %v1238_v58 = vrot.slane %v1237_v41, 4  ;;  %v1284_v47 = vsel %vm17331_vm6, %v1237_v41, %v1283_v35  ;;  %v1311_v56 = vshll.u32 %v11316_v43, 16  ;;  %v1314_v59 = vshrl.u32 %v11316_v43, 16  ;;  %v634_v60 = vpop.f32.mrb[25].mxu0  ;;  %6086 = vmatprep.subr.bf16.mxu0 %v12521_v12 }
 0x1fb   : > { %17341 = vst [vmem:[#allocation30_spill] sm:$0xff] %v13987_v55  ;;  %17342 = vst [vmem:[#allocation31_spill] sm:$0xff] %v13991_v0  ;;  %v11317_v1 = vpack.c.bf16 %v754_v50, %v753_v22  ;;  %v2647_v30 = vrot.slane %v13978_v57, 1  ;;  %v2645_v3 = vrot.slane %v13981_v48, 1  ;;  %v633_v9 = vadd.f32 %v632_v51, %v13796_v36  ;;  %6776 = vmatpush1.bf16.msra.mxu1 %v12447_v21  ;;  %v636_v11 = vpop.f32.mrb[26].mxu0 }
 0x1fc   : > { %1285 = vst [vmem:[#allocation2 + $0x80] sm:$0xcc] %v1284_v47  ;;  %v1287_v13 = vsel %vm13844_vm10, %v1238_v58, %v1286_v39  ;;  %v1313_v14 = vrot.slane %v1311_v56, 5  ;;  %v1316_v17 = vrot.slane %v1314_v59, 4  ;;  %v635_v24 = vadd.f32 %v634_v60, %v13800_v38  ;;  %v638_v12 = vpop.f32.mrb[27].mxu0  ;;  %6777 = vmatprep.subr.bf16.mxu1 %v12455_v44  ;;  %v1359_v39 = vld [vmem:[#allocation2 + $0x90] sm:$0xff] }
 0x1fd   : > { %v12453_v25 = vld [vmem:[#allocation9 + $0x420] ss:$8 sps:$4 sm:$0xff]   ;;  %1288 = vst [vmem:[#allocation2 + $0x88] sm:$0x77] %v1287_v13  ;;  %v1383_v22 = vshrl.u32 %v11317_v1, 16  ;;  %v1386_v35 = vshll.u32 %v11317_v1, 16  ;;  %v2648_v46 = vsel %vm2426_vm15, %v2643_v8, %v2647_v30  ;;  %v2646_v21 = vsel %vm2426_vm15, %v2640_v54, %v2645_v3  ;;  %6087 = vmatpush1.bf16.msra.mxu0 %v12519_v37 }
 0x1fe   : > { %v12460_v41 = vld [vmem:[#allocation9 + $0x434] ss:$8 sps:$4 sm:$0xff]   ;;  %v12526_v43 = vld [vmem:[#allocation9 + $0x170] ss:$8 sps:$4 sm:$0xff]   ;;  %v1317_v49 = vor.u32 %v1316_v17, %v1313_v14  ;;  %v1357_v44 = vsel %vm13699_vm12, %v1313_v14, %v1356_v63  ;;  %6582 = vmatprep.mubr.bf16.mxu1 %v2648_v46  ;;  %v755_v50 = vmax.f32 %v633_v9, 0.0  ;;  %v756_v51 = vmax.f32 %v635_v24, 0.0  ;;  %6088 = vmatprep.subr.bf16.mxu0 %v12528_v61 }
 0x1ff   : > { %1358 = vst [vmem:[#allocation2 + $0x88] sm:$0x88] %v1357_v44  ;;  %v1385_v8 = vrot.slane %v1383_v22, 7  ;;  %v1423_v58 = vld [vmem:[#allocation2 + $0xa0] sm:$0x11]  ;;  %6583 = vmatmul.mubr.bf16.gmra.mrb[4].mxu1 %v2646_v21  ;;  %v637_v47 = vadd.f32 %v636_v11, %v13796_v36  ;;  %5904 = vmatmul.mubr.bf16.gmra.mrb[76].mxu0 %v13987_v55  ;;  %v2651_v54 = vrot.slane %v13991_v0, 1  ;;  %v639_v37 = vadd.f32 %v638_v12, %v13800_v38 }
 0x200   : > { %v12534_v56 = vld [vmem:[#allocation9 + $0x184] ss:$8 sps:$4 sm:$0xff]   ;;  %v1318_v59 = vrot.slane %v1317_v49, 4  ;;  %v1420_v60 = vld [vmem:[#allocation2 + $0x98] sm:$0xff]  ;;  %v11318_v63 = vpack.c.bf16 %v756_v51, %v755_v50  ;;  %v14017_v1 = vcombine.high %v13968_v23, %v13940_v28  ;;  %v14021_v61 = vcombine.low %v13959_v62, %v13968_v23  ;;  %6778 = vmatpush1.bf16.msra.mxu1 %v12453_v25  ;;  %v642_v12 = vpop.f32.mrb[28].mxu0 }
 0x201   : > { %v12458_v9 = vld [vmem:[#allocation9 + $0x430] ss:$8 sps:$4 sm:$0xff]   ;;  %v12466_v11 = vld [vmem:[#allocation9 + $0x444] ss:$8 sps:$4 sm:$0xff]   ;;  %v1388_v13 = vor.u32 %v1386_v35, %v1385_v8  ;;  %v1389_v14 = vrot.slane %v1385_v8, 4  ;;  %v757_v17 = vmax.f32 %v637_v47, 0.0  ;;  %v2652_v24 = vsel %vm2426_vm15, %v2647_v30, %v2651_v54  ;;  %6779 = vmatprep.subr.bf16.mxu1 %v12460_v41  ;;  %6089 = vmatpush1.bf16.msra.mxu0 %v12526_v43 }
 0x202   : > { %17343 = vst [vmem:[#allocation32_spill] sm:$0xff] %v14017_v1  ;;  %17344 = vst [vmem:[#allocation33_spill] sm:$0xff] %v14021_v61  ;;  %v12532_v22 = vld [vmem:[#allocation9 + $0x180] ss:$8 sps:$4 sm:$0xff]   ;;  %v14028_v46 = vsel %vm17332_vm14, %v1318_v59, %v1359_v39  ;;  %v1448_v62 = vshrl.u32 %v11318_v63, 16  ;;  %v1451_v21 = vshll.u32 %v11318_v63, 16  ;;  %6592 = vmatprep.mubr.bf16.mxu1 %v2652_v24  ;;  %5913 = vmatprep.mubr.bf16.mxu0 %v14017_v1 }
 0x203   : > { %v758_v25 = vmax.f32 %v639_v37, 0.0  ;;  %v644_v35 = vpop.f32.mrb[29].mxu0  ;;  %v12537_v49 = vld [vmem:[#allocation9 + $0x194] ss:$8 sps:$4 sm:$0xff]   ;;  %1361 = vst [vmem:[#allocation2 + $0x90] sm:$0xff] %v14028_v46  ;;  %v14034_v30 = vsel %vm13694_vm1, %v1388_v13, %v1420_v60  ;;  %v1424_v41 = vsel %vm13720_vm8, %v1389_v14, %v1423_v58  ;;  %v17063_v44 = vrot.slane %v14021_v61, 1  ;;  %6090 = vmatprep.subr.bf16.mxu0 %v12534_v56 }
 0x204   : > { %v1488_v43 = vld [vmem:[#allocation2 + $0xa0] sm:$0xee]  ;;  %v643_v39 = vadd.f32 %v642_v12, %v13796_v36  ;;  %v646_v50 = vpop.f32.mrb[30].mxu0  ;;  %1422 = vst [vmem:[#allocation2 + $0x98] sm:$0xff] %v14034_v30  ;;  %1425 = vst [vmem:[#allocation2 + $0xa0] sm:$0x11] %v1424_v41  ;;  %v14043_v37 = vcombine.high %v13940_v28, %v13949_v42  ;;  %6780 = vmatpush1.bf16.msra.mxu1 %v12458_v9  ;;  %v645_v13 = vadd.f32 %v644_v35, %v13800_v38 }
 0x205   : > { %v1450_v51 = vrot.slane %v1448_v62, 6  ;;  %v1453_v8 = vrot.slane %v1451_v21, 7  ;;  %v11319_v47 = vpack.c.bf16 %v758_v25, %v757_v17  ;;  %v648_v59 = vpop.f32.mrb[31].mxu0  ;;  %v12464_v58 = vld [vmem:[#allocation9 + $0x440] ss:$8 sps:$4 sm:$0xff]   ;;  %v2650_v56 = vsel %vm2426_vm15, %v2645_v3, %v17063_v44  ;;  %6781 = vmatprep.subr.bf16.mxu1 %v12466_v11  ;;  %6091 = vmatpush1.bf16.msra.mxu0 %v12532_v22  ;;  %v1717_v11 = vld [vmem:[#allocation2 + $0x78] sm:$0xff] }
 0x206   : > { %17345 = vst [vmem:[#allocation34_spill] sm:$0xff] %v14043_v37  ;;  %v1491_v60 = vld [vmem:[#allocation2 + $0xa8] sm:$0x33]  ;;  %v759_v63 = vmax.f32 %v643_v39, 0.0  ;;  %v647_v14 = vadd.f32 %v646_v50, %v13796_v36  ;;  %v12472_v17 = vld [vmem:[#allocation9 + $0x454] ss:$8 sps:$4 sm:$0xff]   ;;  %6092 = vmatprep.subr.bf16.mxu0 %v12537_v49  ;;  %v14055_v3 = vcombine.low %v13968_v23, %v13940_v28  ;;  %v649_v35 = vadd.f32 %v648_v59, %v13800_v38 }
 0x207   : > { %v1454_v24 = vor.u32 %v1453_v8, %v1450_v51  ;;  %v1516_v12 = vshrl.u32 %v11319_v47, 16  ;;  %v1519_v62 = vshll.u32 %v11319_v47, 16  ;;  %v17062_v9 = vrot.slane %v14043_v37, 1  ;;  %v12535_v21 = vld [vmem:[#allocation9 + $0x190] ss:$8 sps:$4 sm:$0xff]   ;;  %6593 = vmatmul.mubr.bf16.gmra.mrb[8].mxu1 %v2650_v56  ;;  %v14091_v44 = vld [vmem:[#allocation2 + $0x80] sm:$0xff] }
 0x208   : > { %v1556_v25 = vld [vmem:[#allocation2 + $0xa8] sm:$0xcc]  ;;  %v760_v41 = vmax.f32 %v645_v13, 0.0  ;;  %v761_v32 = vmax.f32 %v647_v14, 0.0  ;;  %17346 = vst [vmem:[#allocation35_spill] sm:$0xff] %v14055_v3  ;;  %6782 = vmatpush1.bf16.msra.mxu1 %v12464_v58  ;;  %5914 = vmatmul.mubr.bf16.gmra.mrb[80].mxu0 %v14055_v3  ;;  %v762_v56 = vmax.f32 %v649_v35, 0.0  ;;  %v14070_v13 = vcombine.low %v13940_v28, %v13949_v42 }
 0x209   : > { %v14058_v39 = vld [vmem:[#allocation2 + $0x58] sm:$0x11]  ;;  %v1455_v22 = vrot.slane %v1454_v24, 4  ;;  %v1489_v50 = vsel %vm13826_vm4, %v1454_v24, %v1488_v43  ;;  %v1518_v51 = vrot.slane %v1516_v12, 5  ;;  %v1521_v8 = vrot.slane %v1519_v62, 6  ;;  %v14072_v43 = vpop.f32.mrb[32].mxu0  ;;  %6783 = vmatprep.subr.bf16.mxu1 %v12472_v17  ;;  %6093 = vmatpush1.bf16.msra.mxu0 %v12535_v21 }
 0x20a   : > { %v12470_v49 = vld [vmem:[#allocation9 + $0x450] ss:$8 sps:$4 sm:$0xff]   ;;  %1490 = vst [vmem:[#allocation2 + $0xa0] sm:$0xee] %v1489_v50  ;;  %v2656_v23 = vsel %vm2426_vm15, %v2651_v54, %v17062_v9  ;;  %v11320_v59 = vpack.c.bf16 %v760_v41, %v759_v63  ;;  %17347 = vst [vmem:[#allocation36_spill] sm:$0xff] %v14070_v13  ;;  %v14076_v54 = vld [vmem:[#allocation2] sm:$0xff]  ;;  %v10844_v28 = vcombine.high %v14058_v39, %v14058_v39 }
 0x20b   : > { %v1559_v47 = vld [vmem:[#allocation2 + $0xb0] sm:$0x77]  ;;  %v1492_v24 = vsel %vm13649_vm9, %v1455_v22, %v1491_v60  ;;  %v1522_v12 = vor.u32 %v1521_v8, %v1518_v51  ;;  %6602 = vmatprep.mubr.bf16.mxu1 %v2656_v23  ;;  %v1624_v62 = vld [vmem:[#allocation2 + $0xb0] sm:$0x88]  ;;  %v14079_v63 = vcombine.high %v14076_v54, %v1717_v11  ;;  %v14083_v42 = vpop.f32.mrb[33].mxu0  ;;  %v11321_v50 = vpack.c.bf16 %v762_v56, %v761_v32 }
 0x20c   : > { %v12477_v58 = vld [vmem:[#allocation9 + $0x464] ss:$8 sps:$4 sm:$0xff]   ;;  %v12475_v41 = vld [vmem:[#allocation9 + $0x460] ss:$8 sps:$4 sm:$0xff]   ;;  %1493 = vst [vmem:[#allocation2 + $0xa8] sm:$0x33] %v1492_v24  ;;  %6784 = vmatpush1.bf16.msra.mxu1 %v12470_v49 }
 0x20d   : > { %v12544_v14 = vld [vmem:[#allocation9 + $0x1a4] ss:$8 sps:$4 sm:$0xff]   ;;  %17348 = vst [vmem:[#allocation37_spill] sm:$0xff] %v14079_v63  ;;  %v1584_v17 = vshll.u32 %v11320_v59, 16  ;;  %v1587_v35 = vshrl.u32 %v11320_v59, 16  ;;  %v14085_v27 = vpop.f32.mrb[34].mxu0  ;;  %v1557_v8 = vsel %vm17331_vm6, %v1522_v12, %v1556_v25  ;;  %5923 = vmatprep.mubr.bf16.mxu0 %v14079_v63  ;;  %6785 = vmatprep.subr.bf16.mxu1 %v12477_v58 }
 0x20e   : > { %v12482_v60 = vld [vmem:[#allocation9 + $0x474] ss:$8 sps:$4 sm:$0xff]   ;;  %v12542_v22 = vld [vmem:[#allocation9 + $0x1a0] ss:$8 sps:$4 sm:$0xff]   ;;  %v1523_v51 = vrot.slane %v1522_v12, 4  ;;  %v17068_v23 = vrot.slane %v14070_v13, 1  ;;  %6094 = vmatprep.subr.bf16.mxu0 %v12544_v14 }
 0x20f   : > { %v2659_v9 = vrot.slane %v10844_v28, 1  ;;  %v14093_v24 = vld [vmem:[#allocation2 + $0x88] sm:$0xff]  ;;  %v14095_v59 = vpop.f32.mrb[35].mxu0  ;;  %1558 = vst [vmem:[#allocation2 + $0xa8] sm:$0xcc] %v1557_v8  ;;  %v1586_v32 = vrot.slane %v1584_v17, 5  ;;  %6095 = vmatpush1.bf16.msra.mxu0 %v12542_v22 }
 0x210   : > { %v1589_v21 = vrot.slane %v1587_v35, 4  ;;  %v1651_v56 = vshrl.u32 %v11321_v50, 16  ;;  %v1654_v26 = vshll.u32 %v11321_v50, 16  ;;  %v14097_v3 = vld [vmem:[#allocation2 + $0x78] sm:$0xee]  ;;  %v1560_v25 = vsel %vm13844_vm10, %v1523_v51, %v1559_v47  ;;  %v1688_v8 = vld [vmem:[#allocation2 + $0xc0] sm:$0xff]  ;;  %6786 = vmatpush1.bf16.msra.mxu1 %v12475_v41 }
 0x211   : > { %v17349_v12 = vrot.slane %v14021_v61, 1  ;;  %v17350_v49 = vrot.slane %v14043_v37, 1  ;;  %v14110_v35 = vcombine.low %v14076_v54, %v1717_v11  ;;  %v12548_v50 = vld [vmem:[#allocation9 + $0x1b4] ss:$8 sps:$4 sm:$0xff]   ;;  %1561 = vst [vmem:[#allocation2 + $0xb0] sm:$0x77] %v1560_v25  ;;  %v1625_v14 = vsel %vm13699_vm12, %v1586_v32, %v1624_v62  ;;  %6787 = vmatprep.subr.bf16.mxu1 %v12482_v60 }
 0x212   : > { %v1590_v58 = vor.u32 %v1589_v21, %v1586_v32  ;;  %v1627_v47 = vld [vmem:[#allocation2 + $0xb8] sm:$0xff]  ;;  %v1653_v51 = vrot.slane %v1651_v56, 7  ;;  %1626 = vst [vmem:[#allocation2 + $0xb0] sm:$0x88] %v1625_v14  ;;  %v10843_v11 = vcombine.low %v14058_v39, %v14058_v39  ;;  %v14122_v21 = vcombine.high %v14097_v3, %v14091_v44  ;;  %v12556_v56 = vld [vmem:[#allocation9 + $0x1c4] ss:$8 sps:$4 sm:$0xff]   ;;  %6096 = vmatprep.subr.bf16.mxu0 %v12548_v50 }
 0x213   : > { %v2654_v28 = vsel %vm2426_vm15, %v17349_v12, %v17068_v23  ;;  %v2660_v17 = vsel %vm2426_vm15, %v17350_v49, %v2659_v9  ;;  %17351 = vst [vmem:[#allocation38_spill] sm:$0xff] %v14110_v35  ;;  %v14116_v12 = vcombine.high %v14091_v44, %v14093_v24  ;;  %v12546_v23 = vld [vmem:[#allocation9 + $0x1b0] ss:$8 sps:$4 sm:$0xff]   ;;  %v1691_v9 = vld [vmem:[#allocation2 + $0xc8] sm:$0x11]  ;;  %v14126_v62 = vcombine.high %v14093_v24, %v14028_v46  ;;  %v662_v39 = vpop.f32.mrb[36].mxu0 }
 0x214   : > { %6603 = vmatmul.mubr.bf16.gmra.mrb[12].mxu1 %v2654_v28  ;;  %17353 = vst [vmem:[#allocation40_spill] sm:$0xff] %v14122_v21  ;;  %v12480_v32 = vld [vmem:[#allocation9 + $0x470] ss:$8 sps:$4 sm:$0xff]   ;;  %v1591_v25 = vrot.slane %v1590_v58, 4  ;;  %v1656_v22 = vor.u32 %v1654_v26, %v1653_v51  ;;  %v1657_v28 = vrot.slane %v1653_v51, 4  ;;  %5924 = vmatmul.mubr.bf16.gmra.mrb[84].mxu0 %v14110_v35  ;;  %v653_v49 = vadd.f32 %v14072_v43, %v13796_v36  ;;  %v664_v26 = vpop.f32.mrb[37].mxu0 }
 0x215   : > { %17352 = vst [vmem:[#allocation39_spill] sm:$0xff] %v14116_v12  ;;  %6612 = vmatprep.mubr.bf16.mxu1 %v2660_v17  ;;  %17354 = vst [vmem:[#allocation41_spill] sm:$0xff] %v14126_v62  ;;  %v12488_v17 = vld [vmem:[#allocation9 + $0x484] ss:$8 sps:$4 sm:$0xff]   ;;  %5933 = vmatprep.mubr.bf16.mxu0 %v14116_v12  ;;  %v2657_v14 = vrot.slane %v10843_v11, 1  ;;  %v2664_v63 = vrot.slane %v14122_v21, 1  ;;  %v655_v58 = vadd.f32 %v14083_v42, %v13800_v38 }
 0x216   : > { %v14138_v51 = vsel %vm17332_vm14, %v1591_v25, %v1627_v47  ;;  %v14142_v43 = vsel %vm13694_vm1, %v1656_v22, %v1688_v8  ;;  %v1692_v60 = vsel %vm13720_vm8, %v1657_v28, %v1691_v9  ;;  %v763_v11 = vmax.f32 %v653_v49, 0.0  ;;  %v666_v21 = vpop.f32.mrb[38].mxu0  ;;  %6097 = vmatpush1.bf16.msra.mxu0 %v12546_v23  ;;  %v12554_v41 = vld [vmem:[#allocation9 + $0x1c0] ss:$8 sps:$4 sm:$0xff]   ;;  %6788 = vmatpush1.bf16.msra.mxu1 %v12480_v32 }
 0x217   : > { %1629 = vst [vmem:[#allocation2 + $0xb8] sm:$0xff] %v14138_v51  ;;  %1690 = vst [vmem:[#allocation2 + $0xc0] sm:$0xff] %v14142_v43  ;;  %v17355_v42 = vrot.slane %v14070_v13, 1  ;;  %v17356_v47 = vrot.slane %v14126_v62, 1  ;;  %v764_v25 = vmax.f32 %v655_v58, 0.0  ;;  %v14156_v9 = vcombine.low %v14091_v44, %v14093_v24  ;;  %v668_v23 = vpop.f32.mrb[39].mxu0  ;;  %6098 = vmatprep.subr.bf16.mxu0 %v12556_v56  ;;  %6789 = vmatprep.subr.bf16.mxu1 %v12488_v17 }
 0x218   : > { %1693 = vst [vmem:[#allocation2 + $0xc8] sm:$0x11] %v1692_v60  ;;  %v12486_v22 = vld [vmem:[#allocation9 + $0x480] ss:$8 sps:$4 sm:$0xff]   ;;  %v657_v28 = vadd.f32 %v14085_v27, %v13796_v36  ;;  %v14162_v49 = vcombine.high %v14028_v46, %v14034_v30  ;;  %v12500_v58 = vld [vmem:[#allocation9 + $0x494] ss:$8 sps:$4 sm:$0xff]   ;;  %v667_v32 = vadd.f32 %v666_v21, %v13796_v36  ;;  %v14171_v56 = vcombine.low %v14097_v3, %v14091_v44 }
 0x219   : > { %v2658_v50 = vsel %vm2426_vm15, %v17355_v42, %v2657_v14  ;;  %v2666_v8 = vsel %vm2426_vm15, %v2664_v63, %v17356_v47  ;;  %17357 = vst [vmem:[#allocation42_spill] sm:$0xff] %v14156_v9  ;;  %v659_v14 = vadd.f32 %v14095_v59, %v13800_v38  ;;  %v663_v63 = vadd.f32 %v662_v39, %v13796_v36  ;;  %v12498_v27 = vld [vmem:[#allocation9 + $0x490] ss:$8 sps:$4 sm:$0xff]   ;;  %v12559_v47 = vld [vmem:[#allocation9 + $0x1d4] ss:$8 sps:$4 sm:$0xff]  }
 0x21a   : > { %17358 = vst [vmem:[#allocation43_spill] sm:$0xff] %v14162_v49  ;;  %v11322_v60 = vpack.c.bf16 %v764_v25, %v763_v11  ;;  %v665_v42 = vadd.f32 %v664_v26, %v13800_v38  ;;  %17359 = vst [vmem:[#allocation44_spill] sm:$0xff] %v14171_v56  ;;  %v765_v35 = vmax.f32 %v657_v28, 0.0  ;;  %v14175_v59 = vcombine.low %v14093_v24, %v14028_v46  ;;  %v14177_v39 = vld [vmem:[#allocation2 + $0xa0] sm:$0xff]  ;;  %v12557_v17 = vld [vmem:[#allocation9 + $0x1d0] ss:$8 sps:$4 sm:$0xff]  }
 0x21b   : > { %v766_v13 = vmax.f32 %v659_v14, 0.0  ;;  %v767_v12 = vmax.f32 %v663_v63, 0.0  ;;  %6099 = vmatpush1.bf16.msra.mxu0 %v12554_v41  ;;  %v769_v44 = vmax.f32 %v667_v32, 0.0  ;;  %6790 = vmatpush1.bf16.msra.mxu1 %v12486_v22  ;;  %v12563_v3 = vld [vmem:[#allocation9 + $0x1e4] ss:$8 sps:$4 sm:$0xff]   ;;  %v2661_v25 = vrot.slane %v14171_v56, 1 }
 0x21c   : > { %6613 = vmatmul.mubr.bf16.gmra.mrb[16].mxu1 %v2658_v50  ;;  %17360 = vst [vmem:[#allocation45_spill] sm:$0xff] %v14175_v59  ;;  %v1165_v21 = vshrl.u32 %v11322_v60, 16  ;;  %v1168_v26 = vshll.u32 %v11322_v60, 16  ;;  %v768_v11 = vmax.f32 %v665_v42, 0.0  ;;  %5934 = vmatmul.mubr.bf16.gmra.mrb[88].mxu0 %v14156_v9  ;;  %v669_v24 = vadd.f32 %v668_v23, %v13800_v38  ;;  %v672_v14 = vpop.f32.mrb[40].mxu0 }
 0x21d   : > { %6622 = vmatprep.mubr.bf16.mxu1 %v2666_v8  ;;  %v11323_v50 = vpack.c.bf16 %v766_v13, %v765_v35  ;;  %6791 = vmatprep.subr.bf16.mxu1 %v12500_v58  ;;  %v12514_v41 = vld [vmem:[#allocation9 + $0x4a4] ss:$8 sps:$4 sm:$0xff]   ;;  %v14186_v22 = vcombine.high %v14034_v30, %v14177_v39  ;;  %v674_v13 = vpop.f32.mrb[41].mxu0  ;;  %v1362_v28 = vld [vmem:[#allocation2 + $0xf8] sm:$0x88]  ;;  %v17362_v23 = vrot.slane %v14175_v59, 1  ;;  %v14195_v1 = vadd.f32 %v672_v14, %v13796_v36 }
 0x21e   : > { %v1167_v63 = vrot.slane %v1165_v21, 6  ;;  %v1170_v8 = vrot.slane %v1168_v26, 7  ;;  %v1209_v37 = vld [vmem:[#allocation2 + $0xe8] sm:$0xee]  ;;  %5943 = vmatprep.mubr.bf16.mxu0 %v14162_v49  ;;  %v11324_v60 = vpack.c.bf16 %v768_v11, %v767_v12  ;;  %6100 = vmatprep.subr.bf16.mxu0 %v12559_v47  ;;  %v1212_v35 = vld [vmem:[#allocation2 + $0xf0] sm:$0x33] }
 0x21f   : > { %17361 = vst [vmem:[#allocation46_spill] sm:$0xff] %v14186_v22  ;;  %v1240_v42 = vshrl.u32 %v11323_v50, 16  ;;  %v1243_v32 = vshll.u32 %v11323_v50, 16  ;;  %v2663_v58 = vsel %vm2426_vm15, %v2661_v25, %v17362_v23  ;;  %v770_v21 = vmax.f32 %v669_v24, 0.0  ;;  %v676_v26 = vpop.f32.mrb[42].mxu0  ;;  %6101 = vmatpush1.bf16.msra.mxu0 %v12557_v17  ;;  %6792 = vmatpush1.bf16.msra.mxu1 %v12498_v27 }
 0x220   : > { %v12561_v56 = vld [vmem:[#allocation9 + $0x1e0] ss:$8 sps:$4 sm:$0xff]   ;;  %v1171_v49 = vor.u32 %v1170_v8, %v1167_v63  ;;  %v1320_v12 = vshll.u32 %v11324_v60, 16  ;;  %v1323_v11 = vshrl.u32 %v11324_v60, 16  ;;  %v2669_v9 = vrot.slane %v14186_v22, 1  ;;  %v14192_v61 = vpop.f32.mrb[43].mxu0  ;;  %6102 = vmatprep.subr.bf16.mxu0 %v12563_v3  ;;  %6793 = vmatprep.subr.bf16.mxu1 %v12514_v41 }
 0x221   : > { %v12512_v47 = vld [vmem:[#allocation9 + $0x4a0] ss:$8 sps:$4 sm:$0xff]   ;;  %v1242_v50 = vrot.slane %v1240_v42, 5  ;;  %v1245_v0 = vrot.slane %v1243_v32, 6  ;;  %v11325_v48 = vpack.c.bf16 %v770_v21, %v769_v44  ;;  %v12525_v25 = vld [vmem:[#allocation9 + $0x4b4] ss:$8 sps:$4 sm:$0xff]  }
 0x222   : > { %v12569_v17 = vld [vmem:[#allocation9 + $0x1f4] ss:$8 sps:$4 sm:$0xff]   ;;  %v1172_v24 = vrot.slane %v1171_v49, 4  ;;  %v1210_v63 = vsel %vm13826_vm4, %v1171_v49, %v1209_v37  ;;  %v1322_v60 = vrot.slane %v1320_v12, 5  ;;  %v1325_v23 = vrot.slane %v1323_v11, 4  ;;  %v14204_v41 = vld [vmem:[#allocation2 + $0xa8] sm:$0xff] }
 0x223   : > { %v1289_v8 = vld [vmem:[#allocation2 + $0xf0] sm:$0xcc]  ;;  %1211 = vst [vmem:[#allocation2 + $0xe8] sm:$0xee] %v1210_v63  ;;  %v1246_v27 = vor.u32 %v1245_v0, %v1242_v50  ;;  %v1391_v3 = vshrl.u32 %v11325_v48, 16  ;;  %v1394_v42 = vshll.u32 %v11325_v48, 16  ;;  %6103 = vmatpush1.bf16.msra.mxu0 %v12561_v56  ;;  %6794 = vmatpush1.bf16.msra.mxu1 %v12512_v47  ;;  %v14220_v47 = vcombine.high %v14177_v39, %v14204_v41 }
 0x224   : > { %6623 = vmatmul.mubr.bf16.gmra.mrb[20].mxu1 %v2663_v58  ;;  %v17363_v44 = vrot.slane %v14126_v62, 1  ;;  %v12567_v32 = vld [vmem:[#allocation9 + $0x1f0] ss:$8 sps:$4 sm:$0xff]   ;;  %v1213_v37 = vsel %vm13649_vm9, %v1172_v24, %v1212_v35  ;;  %v1326_v21 = vor.u32 %v1325_v23, %v1322_v60  ;;  %v1363_v0 = vsel %vm13699_vm12, %v1322_v60, %v1362_v28  ;;  %v1365_v56 = vld [vmem:[#allocation2 + $0x100] sm:$0xff]  ;;  %v1426_v63 = vld [vmem:[#allocation2 + $0x108] sm:$0xff]  ;;  %v682_v24 = vpop.f32.mrb[44].mxu0  ;;  %6795 = vmatprep.subr.bf16.mxu1 %v12525_v25 }
 0x225   : > { %v1292_v49 = vld [vmem:[#allocation2 + $0xf8] sm:$0x77]  ;;  %v771_v48 = vmax.f32 %v14195_v1, 0.0  ;;  %1214 = vst [vmem:[#allocation2 + $0xf0] sm:$0x33] %v1213_v37  ;;  %v1247_v12 = vrot.slane %v1246_v27, 4  ;;  %v1290_v11 = vsel %vm17331_vm6, %v1246_v27, %v1289_v8  ;;  %v675_v35 = vadd.f32 %v674_v13, %v13800_v38  ;;  %6104 = vmatprep.subr.bf16.mxu0 %v12569_v17 }
 0x226   : > { %v2670_v14 = vsel %vm2426_vm15, %v17363_v44, %v2669_v9  ;;  %v12523_v58 = vld [vmem:[#allocation9 + $0x4b0] ss:$8 sps:$4 sm:$0xff]   ;;  %1364 = vst [vmem:[#allocation2 + $0xf8] sm:$0x88] %v1363_v0  ;;  %v1393_v50 = vrot.slane %v1391_v3, 7  ;;  %v1327_v28 = vrot.slane %v1326_v21, 4  ;;  %v14216_v1 = vcombine.low %v14028_v46, %v14034_v30 }
 0x227   : > { %6632 = vmatprep.mubr.bf16.mxu1 %v2670_v14  ;;  %1291 = vst [vmem:[#allocation2 + $0xf0] sm:$0xcc] %v1290_v11  ;;  %v1429_v60 = vld [vmem:[#allocation2 + $0x110] sm:$0x11]  ;;  %17365 = vst [vmem:[#allocation48_spill] sm:$0xff] %v14220_v47  ;;  %v677_v8 = vadd.f32 %v676_v26, %v13796_v36  ;;  %v684_v23 = vpop.f32.mrb[45].mxu0  ;;  %v1293_v13 = vsel %vm13844_vm10, %v1247_v12, %v1292_v49  ;;  %6105 = vmatpush1.bf16.msra.mxu0 %v12567_v32 }
 0x228   : > { %17364 = vst [vmem:[#allocation47_spill] sm:$0xff] %v14216_v1  ;;  %v12540_v27 = vld [vmem:[#allocation9 + $0x4c4] ss:$8 sps:$4 sm:$0xff]   ;;  %v1396_v25 = vor.u32 %v1394_v42, %v1393_v50  ;;  %v1397_v17 = vrot.slane %v1393_v50, 4  ;;  %v772_v3 = vmax.f32 %v675_v35, 0.0  ;;  %v686_v14 = vpop.f32.mrb[46].mxu0  ;;  %v14229_v46 = vsel %vm17332_vm14, %v1327_v28, %v1365_v56  ;;  %5944 = vmatmul.mubr.bf16.gmra.mrb[92].mxu0 %v14216_v1  ;;  %6796 = vmatpush1.bf16.msra.mxu1 %v12523_v58 }
 0x229   : > { %v14225_v44 = vld [vmem:[#allocation2 + $0xb0] sm:$0xff]  ;;  %1294 = vst [vmem:[#allocation2 + $0xf8] sm:$0x77] %v1293_v13  ;;  %v773_v26 = vmax.f32 %v677_v8, 0.0  ;;  %v679_v37 = vadd.f32 %v14192_v61, %v13800_v38  ;;  %v14236_v42 = vcombine.low %v14034_v30, %v14177_v39  ;;  %v14238_v49 = vpop.f32.mrb[47].mxu0  ;;  %1367 = vst [vmem:[#allocation2 + $0x100] sm:$0xff] %v14229_v46  ;;  %5953 = vmatprep.mubr.bf16.mxu0 %v14220_v47  ;;  %6797 = vmatprep.subr.bf16.mxu1 %v12540_v27 }
 0x22a   : > { %v12538_v21 = vld [vmem:[#allocation9 + $0x4c0] ss:$8 sps:$4 sm:$0xff]   ;;  %v14243_v32 = vsel %vm13694_vm1, %v1396_v25, %v1426_v63  ;;  %v1430_v0 = vsel %vm13720_vm8, %v1397_v17, %v1429_v60  ;;  %v11326_v12 = vpack.c.bf16 %v772_v3, %v771_v48  ;;  %v683_v61 = vadd.f32 %v682_v24, %v13796_v36  ;;  %v12552_v30 = vld [vmem:[#allocation9 + $0x4d4] ss:$8 sps:$4 sm:$0xff]   ;;  %v12550_v3 = vld [vmem:[#allocation9 + $0x4d0] ss:$8 sps:$4 sm:$0xff]  }
 0x22b   : > { %17366 = vst [vmem:[#allocation49_spill] sm:$0xff] %v14236_v42  ;;  %1428 = vst [vmem:[#allocation2 + $0x108] sm:$0xff] %v14243_v32  ;;  %v774_v58 = vmax.f32 %v679_v37, 0.0  ;;  %v2667_v11 = vrot.slane %v14236_v42, 1  ;;  %v14253_v56 = vcombine.high %v14204_v41, %v14225_v44  ;;  %v685_v50 = vadd.f32 %v684_v23, %v13800_v38  ;;  %v1494_v28 = vld [vmem:[#allocation2 + $0x110] sm:$0xee] }
 0x22c   : > { %1431 = vst [vmem:[#allocation2 + $0x110] sm:$0x11] %v1430_v0  ;;  %v1457_v63 = vshrl.u32 %v11326_v12, 16  ;;  %v1460_v48 = vshll.u32 %v11326_v12, 16  ;;  %v775_v35 = vmax.f32 %v683_v61, 0.0  ;;  %v14258_v24 = vcombine.low %v14177_v39, %v14204_v41  ;;  %6798 = vmatpush1.bf16.msra.mxu1 %v12538_v21 }
 0x22d   : > { %17367 = vst [vmem:[#allocation50_spill] sm:$0xff] %v14253_v56  ;;  %v11327_v60 = vpack.c.bf16 %v774_v58, %v773_v26  ;;  %v17369_v8 = vrot.slane %v14175_v59, 1  ;;  %v2673_v25 = vrot.slane %v14253_v56, 1  ;;  %v776_v17 = vmax.f32 %v685_v50, 0.0  ;;  %v14272_v26 = vpop.f32.mrb[48].mxu0  ;;  %6799 = vmatprep.subr.bf16.mxu1 %v12552_v30 }
 0x22e   : > { %17368 = vst [vmem:[#allocation51_spill] sm:$0xff] %v14258_v24  ;;  %v1459_v23 = vrot.slane %v1457_v63, 6  ;;  %v1462_v27 = vrot.slane %v1460_v48, 7  ;;  %v14266_v37 = vcombine.high %v14225_v44, %v14138_v51  ;;  %v14270_v39 = vcombine.low %v14204_v41, %v14225_v44  ;;  %v12566_v0 = vld [vmem:[#allocation9 + $0x4e4] ss:$8 sps:$4 sm:$0xff]   ;;  %v14277_v63 = vpop.f32.mrb[49].mxu0 }
 0x22f   : > { %v2668_v13 = vsel %vm2426_vm15, %v17369_v8, %v2667_v11  ;;  %v1497_v12 = vld [vmem:[#allocation2 + $0x118] sm:$0x33]  ;;  %v1525_v61 = vshrl.u32 %v11327_v60, 16  ;;  %v1528_v58 = vshll.u32 %v11327_v60, 16  ;;  %v2674_v21 = vsel %vm2426_vm15, %v2669_v9, %v2673_v25  ;;  %v1562_v8 = vld [vmem:[#allocation2 + $0x118] sm:$0xcc] }
 0x230   : > { %6633 = vmatmul.mubr.bf16.gmra.mrb[24].mxu1 %v2668_v13  ;;  %17370 = vst [vmem:[#allocation52_spill] sm:$0xff] %v14266_v37  ;;  %17371 = vst [vmem:[#allocation53_spill] sm:$0xff] %v14270_v39  ;;  %v11328_v50 = vpack.c.bf16 %v776_v17, %v775_v35  ;;  %v1463_v48 = vor.u32 %v1462_v27, %v1459_v23  ;;  %v14282_v13 = vcombine.high %v14138_v51, %v14142_v43  ;;  %v14285_v56 = vpop.f32.mrb[50].mxu0  ;;  %v12564_v60 = vld [vmem:[#allocation9 + $0x4e0] ss:$8 sps:$4 sm:$0xff]  }
 0x231   : > { %6642 = vmatprep.mubr.bf16.mxu1 %v2674_v21  ;;  %v687_v30 = vadd.f32 %v686_v14, %v13796_v36  ;;  %v1527_v42 = vrot.slane %v1525_v61, 5  ;;  %v1530_v22 = vrot.slane %v1528_v58, 6  ;;  %5954 = vmatmul.mubr.bf16.gmra.mrb[96].mxu0 %v14258_v24  ;;  %v14288_v17 = vpop.f32.mrb[51].mxu0  ;;  %v1630_v21 = vld [vmem:[#allocation2 + $0x120] sm:$0x88]  ;;  %v17373_v24 = vrot.slane %v14270_v39, 1 }
 0x232   : > { %17372 = vst [vmem:[#allocation54_spill] sm:$0xff] %v14282_v13  ;;  %v1593_v9 = vshll.u32 %v11328_v50, 16  ;;  %v1596_v35 = vshrl.u32 %v11328_v50, 16  ;;  %6800 = vmatpush1.bf16.msra.mxu1 %v12550_v3  ;;  %v1464_v23 = vrot.slane %v1463_v48, 4  ;;  %v1495_v27 = vsel %vm13826_vm4, %v1463_v48, %v1494_v28  ;;  %5963 = vmatprep.mubr.bf16.mxu0 %v14266_v37  ;;  %v12573_v41 = vld [vmem:[#allocation9 + $0x4f4] ss:$8 sps:$4 sm:$0xff]  }
 0x233   : > { %v2677_v14 = vrot.slane %v14282_v13, 1  ;;  %6801 = vmatprep.subr.bf16.mxu1 %v12566_v0  ;;  %1496 = vst [vmem:[#allocation2 + $0x110] sm:$0xee] %v1495_v27  ;;  %v1531_v61 = vor.u32 %v1530_v22, %v1527_v42  ;;  %v2672_v59 = vsel %vm2426_vm15, %v2667_v11, %v17373_v24  ;;  %v1759_v3 = vld [vmem:[#allocation2 + $0xc8] sm:$0x11]  ;;  %v777_v1 = vmax.f32 %v687_v30, 0.0 }
 0x234   : > { %v1595_v58 = vrot.slane %v1593_v9, 5  ;;  %v1598_v50 = vrot.slane %v1596_v35, 4  ;;  %v1498_v47 = vsel %vm13649_vm9, %v1464_v23, %v1497_v12  ;;  %v1565_v28 = vld [vmem:[#allocation2 + $0x120] sm:$0x77]  ;;  %v1633_v48 = vld [vmem:[#allocation2 + $0x128] sm:$0xff]  ;;  %v689_v0 = vadd.f32 %v14238_v49, %v13800_v38  ;;  %v14306_v24 = vld [vmem:[#allocation2 + $0xf0] sm:$0xff] }
 0x235   : > { %v2678_v37 = vsel %vm2426_vm15, %v2673_v25, %v2677_v14  ;;  %v1727_v27 = vld [vmem:[#allocation2 + $0xe8] sm:$0xff]  ;;  %1499 = vst [vmem:[#allocation2 + $0x118] sm:$0x33] %v1498_v47  ;;  %v1532_v22 = vrot.slane %v1531_v61, 4  ;;  %v1563_v42 = vsel %vm17331_vm6, %v1531_v61, %v1562_v8  ;;  %v14308_v12 = vld [vmem:[#allocation2 + $0xf8] sm:$0xff]  ;;  %v14312_v47 = vcombine.low %v14225_v44, %v14138_v51  ;;  %v702_v23 = vpop.f32.mrb[52].mxu0 }
 0x236   : > { %v1599_v9 = vor.u32 %v1598_v50, %v1595_v58  ;;  %v1631_v11 = vsel %vm13699_vm12, %v1595_v58, %v1630_v21  ;;  %6802 = vmatpush1.bf16.msra.mxu1 %v12564_v60  ;;  %v12571_v25 = vld [vmem:[#allocation9 + $0x4f0] ss:$8 sps:$4 sm:$0xff]   ;;  %1564 = vst [vmem:[#allocation2 + $0x118] sm:$0xcc] %v1563_v42  ;;  %v778_v49 = vmax.f32 %v689_v0, 0.0  ;;  %v14316_v8 = vcombine.low %v14138_v51, %v14142_v43  ;;  %v704_v58 = vpop.f32.mrb[53].mxu0 }
 0x237   : > { %1632 = vst [vmem:[#allocation2 + $0x120] sm:$0x88] %v1631_v11  ;;  %17374 = vst [vmem:[#allocation55_spill] sm:$0xff] %v14312_v47  ;;  %v10856_v30 = vcombine.high %v1759_v3, %v1759_v3  ;;  %v14318_v35 = vld [vmem:[#allocation2 + $0xe8] sm:$0xee]  ;;  %6803 = vmatprep.subr.bf16.mxu1 %v12573_v41  ;;  %v1566_v60 = vsel %vm13844_vm10, %v1532_v22, %v1565_v28  ;;  %v14326_v44 = vcombine.low %v14076_v54, %v1727_v27  ;;  %v706_v0 = vpop.f32.mrb[54].mxu0 }
 0x238   : > { %6643 = vmatmul.mubr.bf16.gmra.mrb[28].mxu1 %v2672_v59  ;;  %17375 = vst [vmem:[#allocation56_spill] sm:$0xff] %v14316_v8  ;;  %v12577_v21 = vld [vmem:[#allocation9 + $0x504] ss:$8 sps:$4 sm:$0xff]   ;;  %v1600_v61 = vrot.slane %v1599_v9, 4  ;;  %v14323_v59 = vcombine.high %v14076_v54, %v1727_v27  ;;  %1567 = vst [vmem:[#allocation2 + $0x120] sm:$0x77] %v1566_v60  ;;  %v11329_v51 = vpack.c.bf16 %v778_v49, %v777_v1 }
 0x239   : > { %6652 = vmatprep.mubr.bf16.mxu1 %v2678_v37  ;;  %17377 = vst [vmem:[#allocation58_spill] sm:$0xff] %v14326_v44  ;;  %v2675_v43 = vrot.slane %v14316_v8, 1  ;;  %v2681_v50 = vrot.slane %v10856_v30, 1  ;;  %v14331_v41 = vcombine.high %v14306_v24, %v14308_v12  ;;  %5964 = vmatmul.mubr.bf16.gmra.mrb[100].mxu0 %v14312_v47  ;;  %v10855_v28 = vcombine.low %v1759_v3, %v1759_v3  ;;  %v708_v1 = vpop.f32.mrb[55].mxu0 }
 0x23a   : > { %17376 = vst [vmem:[#allocation57_spill] sm:$0xff] %v14323_v59  ;;  %v14335_v37 = vsel %vm17332_vm14, %v1600_v61, %v1633_v48  ;;  %v14340_v54 = vcombine.high %v14318_v35, %v14306_v24  ;;  %6804 = vmatpush1.bf16.msra.mxu1 %v12571_v25  ;;  %v1659_v27 = vshrl.u32 %v11329_v51, 16  ;;  %v1662_v22 = vshll.u32 %v11329_v51, 16  ;;  %5973 = vmatprep.mubr.bf16.mxu0 %v14323_v59  ;;  %v1697_v51 = vld [vmem:[#allocation2 + $0x138] sm:$0x11]  ;;  %v14369_v59 = vpop.f32.mrb[56].mxu0 }
 0x23b   : > { %17378 = vst [vmem:[#allocation59_spill] sm:$0xff] %v14331_v41  ;;  %1635 = vst [vmem:[#allocation2 + $0x128] sm:$0xff] %v14335_v37  ;;  %v17380_v42 = vrot.slane %v14270_v39, 1  ;;  %v2682_v48 = vsel %vm2426_vm15, %v2677_v14, %v2681_v50  ;;  %7006 = vmatprep.subr.bf16.mxu1 %v12577_v21  ;;  %v2679_v3 = vrot.slane %v10855_v28, 1  ;;  %v14350_v11 = vcombine.high %v14308_v12, %v14229_v46  ;;  %v1694_v21 = vld [vmem:[#allocation2 + $0x130] sm:$0xff]  ;;  %v14378_v13 = vpop.f32.mrb[57].mxu0 }
 0x23c   : > { %17379 = vst [vmem:[#allocation60_spill] sm:$0xff] %v14340_v54  ;;  %v2686_v25 = vrot.slane %v14340_v54, 1  ;;  %v693_v49 = vadd.f32 %v14272_v26, %v13796_v36  ;;  %v1661_v30 = vrot.slane %v1659_v27, 7  ;;  %v695_v60 = vadd.f32 %v14277_v63, %v13800_v38 }
 0x23d   : > { %v2676_v9 = vsel %vm2426_vm15, %v17380_v42, %v2675_v43  ;;  %v14359_v61 = vcombine.low %v14306_v24, %v14308_v12  ;;  %v697_v14 = vadd.f32 %v14285_v56, %v13796_v36  ;;  %v2680_v50 = vsel %vm2426_vm15, %v2675_v43, %v2679_v3 }
 0x23e   : > { %v17119_v28 = vrot.slane %v14350_v11, 1  ;;  %v779_v42 = vmax.f32 %v693_v49, 0.0  ;;  %v14367_v26 = vcombine.high %v14229_v46, %v14243_v32  ;;  %v1664_v27 = vor.u32 %v1662_v22, %v1661_v30 }
 0x23f   : > { %v1665_v63 = vrot.slane %v1661_v30, 4  ;;  %v780_v54 = vmax.f32 %v695_v60, 0.0  ;;  %v781_v8 = vmax.f32 %v697_v14, 0.0  ;;  %v699_v43 = vadd.f32 %v14288_v17, %v13800_v38  ;;  %v14395_v14 = vld [vmem:[#allocation2 + $0x110] sm:$0xff] }
 0x240   : > { %6653 = vmatmul.mubr.bf16.gmra.mrb[32].mxu1 %v2676_v9  ;;  %v2688_v56 = vsel %vm2426_vm15, %v2686_v25, %v17119_v28  ;;  %v703_v3 = vadd.f32 %v702_v23, %v13796_v36  ;;  %v705_v49 = vadd.f32 %v704_v58, %v13800_v38  ;;  %v14382_v22 = vsel %vm13694_vm1, %v1664_v27, %v1694_v21  ;;  %v14387_v25 = vpop.f32.mrb[58].mxu0 }
 0x241   : > { %6662 = vmatprep.mubr.bf16.mxu1 %v2682_v48  ;;  %v1698_v9 = vsel %vm13720_vm8, %v1665_v63, %v1697_v51  ;;  %v11330_v48 = vpack.c.bf16 %v780_v54, %v779_v42  ;;  %v707_v30 = vadd.f32 %v706_v0, %v13796_v36  ;;  %1696 = vst [vmem:[#allocation2 + $0x130] sm:$0xff] %v14382_v22  ;;  %v782_v17 = vmax.f32 %v699_v43, 0.0  ;;  %v14397_v21 = vpop.f32.mrb[59].mxu0 }
 0x242   : > { %1699 = vst [vmem:[#allocation2 + $0x138] sm:$0x11] %v1698_v9  ;;  %5974 = vmatmul.mubr.bf16.gmra.mrb[104].mxu0 %v14326_v44  ;;  %v783_v23 = vmax.f32 %v703_v3, 0.0  ;;  %v784_v58 = vmax.f32 %v705_v49, 0.0  ;;  %v14393_v60 = vcombine.low %v14318_v35, %v14306_v24  ;;  %v14402_v42 = vcombine.low %v14308_v12, %v14229_v46  ;;  %v1215_v49 = vld [vmem:[#allocation2 + $0x158] sm:$0xee] }
 0x243   : > { %5983 = vmatprep.mubr.bf16.mxu0 %v14331_v41  ;;  %v1174_v0 = vshrl.u32 %v11330_v48, 16  ;;  %v1177_v54 = vshll.u32 %v11330_v48, 16  ;;  %v785_v51 = vmax.f32 %v707_v30, 0.0  ;;  %v11331_v27 = vpack.c.bf16 %v782_v17, %v781_v8  ;;  %v1218_v48 = vld [vmem:[#allocation2 + $0x160] sm:$0x33] }
 0x244   : > { %17381 = vst [vmem:[#allocation61_spill] sm:$0xff] %v14393_v60  ;;  %v11332_v63 = vpack.c.bf16 %v784_v58, %v783_v23  ;;  %v2683_v43 = vrot.slane %v14393_v60, 1  ;;  %v709_v24 = vadd.f32 %v708_v1, %v13800_v38  ;;  %v2684_v9 = vrot.slane %v14402_v42, 1  ;;  %v1368_v17 = vld [vmem:[#allocation2 + $0x168] sm:$0x88] }
 0x245   : > { %v1176_v35 = vrot.slane %v1174_v0, 6  ;;  %v1179_v3 = vrot.slane %v1177_v54, 7  ;;  %v14409_v28 = vcombine.high %v14243_v32, %v14395_v14  ;;  %v1249_v30 = vshrl.u32 %v11331_v27, 16  ;;  %v722_v0 = vpop.f32.mrb[60].mxu0 }
 0x246   : > { %v1252_v44 = vshll.u32 %v11331_v27, 16  ;;  %v1329_v12 = vshll.u32 %v11332_v63, 16  ;;  %v1332_v41 = vshrl.u32 %v11332_v63, 16  ;;  %v2685_v1 = vsel %vm2426_vm15, %v2683_v43, %v2684_v9  ;;  %v724_v62 = vpop.f32.mrb[61].mxu0  ;;  %v1295_v63 = vld [vmem:[#allocation2 + $0x160] sm:$0xcc] }
 0x247   : > { %v1180_v8 = vor.u32 %v1179_v3, %v1176_v35  ;;  %v786_v23 = vmax.f32 %v709_v24, 0.0  ;;  %v2691_v58 = vrot.slane %v14409_v28, 1  ;;  %v1251_v54 = vrot.slane %v1249_v30, 5  ;;  %v14422_v3 = vpop.f32.mrb[62].mxu0 }
 0x248   : > { %6663 = vmatmul.mubr.bf16.gmra.mrb[36].mxu1 %v2680_v50  ;;  %v1254_v60 = vrot.slane %v1252_v44, 6  ;;  %v1331_v39 = vrot.slane %v1329_v12, 5  ;;  %v1334_v47 = vrot.slane %v1332_v41, 4  ;;  %v17382_v43 = vrot.slane %v14350_v11, 1  ;;  %v1298_v12 = vld [vmem:[#allocation2 + $0x168] sm:$0x77] }
 0x249   : > { %6672 = vmatprep.mubr.bf16.mxu1 %v2688_v56  ;;  %v1181_v27 = vrot.slane %v1180_v8, 4  ;;  %v1216_v50 = vsel %vm13826_vm4, %v1180_v8, %v1215_v49  ;;  %v11333_v35 = vpack.c.bf16 %v786_v23, %v785_v51  ;;  %v713_v49 = vadd.f32 %v14369_v59, %v13796_v36  ;;  %v14429_v51 = vpop.f32.mrb[63].mxu0  ;;  %v1371_v8 = vld [vmem:[#allocation2 + $0x170] sm:$0xff]  ;;  %v1762_v5 = vld [vmem:[#allocation2 + $0x138] sm:$0x11] }
 0x24a   : > { %v2692_v24 = vsel %vm2426_vm15, %v17382_v43, %v2691_v58  ;;  %1217 = vst [vmem:[#allocation2 + $0x158] sm:$0xee] %v1216_v50  ;;  %5984 = vmatmul.mubr.bf16.gmra.mrb[108].mxu0 %v14359_v61  ;;  %v1255_v44 = vor.u32 %v1254_v60, %v1251_v54  ;;  %v1335_v41 = vor.u32 %v1334_v47, %v1331_v39  ;;  %v1733_v60 = vld [vmem:[#allocation2 + $0x118] sm:$0xff] }
 0x24b   : > { %v1369_v56 = vsel %vm13699_vm12, %v1331_v39, %v1368_v17  ;;  %v1219_v30 = vsel %vm13649_vm9, %v1181_v27, %v1218_v48  ;;  %5993 = vmatprep.mubr.bf16.mxu0 %v14367_v26  ;;  %v1399_v23 = vshrl.u32 %v11333_v35, 16  ;;  %v1402_v50 = vshll.u32 %v11333_v35, 16 }
 0x24c   : > { %1370 = vst [vmem:[#allocation2 + $0x168] sm:$0x88] %v1369_v56  ;;  %v715_v47 = vadd.f32 %v14378_v13, %v13800_v38  ;;  %1220 = vst [vmem:[#allocation2 + $0x160] sm:$0x33] %v1219_v30  ;;  %v1256_v39 = vrot.slane %v1255_v44, 4  ;;  %v1296_v59 = vsel %vm17331_vm6, %v1255_v44, %v1295_v63  ;;  %v1336_v17 = vrot.slane %v1335_v41, 4 }
 0x24d   : > { %v787_v54 = vmax.f32 %v713_v49, 0.0  ;;  %1297 = vst [vmem:[#allocation2 + $0x160] sm:$0xcc] %v1296_v59  ;;  %v1401_v48 = vrot.slane %v1399_v23, 7  ;;  %v14440_v43 = vcombine.low %v14229_v46, %v14243_v32  ;;  %v717_v35 = vadd.f32 %v14387_v25, %v13796_v36  ;;  %v1432_v63 = vld [vmem:[#allocation2 + $0x178] sm:$0xff]  ;;  %v14462_v59 = vld [vmem:[#allocation2 + $0x120] sm:$0xff] }
 0x24e   : > { %v788_v27 = vmax.f32 %v715_v47, 0.0  ;;  %v1299_v13 = vsel %vm13844_vm10, %v1256_v39, %v1298_v12  ;;  %v14448_v56 = vsel %vm17332_vm14, %v1336_v17, %v1371_v8  ;;  %v1435_v44 = vld [vmem:[#allocation2 + $0x180] sm:$0x11]  ;;  %v14451_v41 = vcombine.high %v14395_v14, %v1733_v60 }
 0x24f   : > { %v719_v49 = vadd.f32 %v14397_v21, %v13800_v38  ;;  %1300 = vst [vmem:[#allocation2 + $0x168] sm:$0x77] %v1299_v13  ;;  %1373 = vst [vmem:[#allocation2 + $0x170] sm:$0xff] %v14448_v56  ;;  %v1404_v46 = vor.u32 %v1402_v50, %v1401_v48  ;;  %v1405_v25 = vrot.slane %v1401_v48, 4  ;;  %v789_v12 = vmax.f32 %v717_v35, 0.0 }
 0x250   : > { %6673 = vmatmul.mubr.bf16.gmra.mrb[40].mxu1 %v2685_v1  ;;  %v11334_v30 = vpack.c.bf16 %v788_v27, %v787_v54  ;;  %v723_v8 = vadd.f32 %v722_v0, %v13796_v36  ;;  %v725_v47 = vadd.f32 %v724_v62, %v13800_v38  ;;  %v14460_v39 = vcombine.low %v14243_v32, %v14395_v14  ;;  %v1500_v35 = vld [vmem:[#allocation2 + $0x180] sm:$0xee] }
 0x251   : > { %6682 = vmatprep.mubr.bf16.mxu1 %v2692_v24  ;;  %v790_v23 = vmax.f32 %v719_v49, 0.0  ;;  %v14466_v21 = vsel %vm13694_vm1, %v1404_v46, %v1432_v63  ;;  %v1436_v1 = vsel %vm13720_vm8, %v1405_v25, %v1435_v44  ;;  %v14475_v27 = vcombine.high %v1733_v60, %v14462_v59 }
 0x252   : > { %v1466_v50 = vshrl.u32 %v11334_v30, 16  ;;  %v1469_v24 = vshll.u32 %v11334_v30, 16  ;;  %1434 = vst [vmem:[#allocation2 + $0x178] sm:$0xff] %v14466_v21  ;;  %1437 = vst [vmem:[#allocation2 + $0x180] sm:$0x11] %v1436_v1  ;;  %5994 = vmatmul.mubr.bf16.gmra.mrb[112].mxu0 %v14440_v43  ;;  %v791_v0 = vmax.f32 %v723_v8, 0.0  ;;  %v14478_v49 = vcombine.low %v14395_v14, %v1733_v60 }
 0x253   : > { %v11335_v62 = vpack.c.bf16 %v790_v23, %v789_v12  ;;  %v792_v32 = vmax.f32 %v725_v47, 0.0  ;;  %v2689_v17 = vrot.slane %v14460_v39, 1  ;;  %6003 = vmatprep.mubr.bf16.mxu0 %v14451_v41  ;;  %v2695_v30 = vrot.slane %v14475_v27, 1  ;;  %v1503_v23 = vld [vmem:[#allocation2 + $0x188] sm:$0x33] }
 0x254   : > { %v1468_v54 = vrot.slane %v1466_v50, 6  ;;  %v1471_v48 = vrot.slane %v1469_v24, 7  ;;  %v14485_v12 = vcombine.low %v1733_v60, %v14462_v59  ;;  %v14494_v60 = vcombine.high %v14462_v59, %v14335_v37 }
 0x255   : > { %v1534_v13 = vshrl.u32 %v11335_v62, 16  ;;  %v1537_v63 = vshll.u32 %v11335_v62, 16  ;;  %v11336_v44 = vpack.c.bf16 %v792_v32, %v791_v0  ;;  %v2690_v25 = vsel %vm2426_vm15, %v2684_v9, %v2689_v17  ;;  %v1568_v62 = vld [vmem:[#allocation2 + $0x188] sm:$0xcc]  ;;  %v1636_v0 = vld [vmem:[#allocation2 + $0x190] sm:$0x88] }
 0x256   : > { %v1472_v46 = vor.u32 %v1471_v48, %v1468_v54  ;;  %v2696_v9 = vsel %vm2426_vm15, %v2691_v58, %v2695_v30  ;;  %v14498_v10 = vcombine.high %v14335_v37, %v14382_v22  ;;  %v2693_v58 = vrot.slane %v14485_v12, 1 }
 0x257   : > { %v1536_v8 = vrot.slane %v1534_v13, 5  ;;  %v1539_v47 = vrot.slane %v1537_v63, 6  ;;  %v1602_v1 = vshll.u32 %v11336_v44, 16  ;;  %v1605_v50 = vshrl.u32 %v11336_v44, 16  ;;  %v1571_v63 = vld [vmem:[#allocation2 + $0x190] sm:$0x77] }
 0x258   : > { %v1473_v24 = vrot.slane %v1472_v46, 4  ;;  %v1501_v14 = vsel %vm13826_vm4, %v1472_v46, %v1500_v35  ;;  %6683 = vmatmul.mubr.bf16.gmra.mrb[44].mxu1 %v2690_v25  ;;  %v1143_v35 = vld [vmem:[#allocation2 + $0x1a0] sm:$0x11]  ;;  %v727_v44 = vadd.f32 %v14422_v3, %v13796_v36  ;;  %v729_v46 = vadd.f32 %v14429_v51, %v13800_v38 }
 0x259   : > { %1502 = vst [vmem:[#allocation2 + $0x180] sm:$0xee] %v1501_v14  ;;  %v1540_v32 = vor.u32 %v1539_v47, %v1536_v8  ;;  %v1604_v54 = vrot.slane %v1602_v1, 5  ;;  %v1607_v48 = vrot.slane %v1605_v50, 4  ;;  %6692 = vmatprep.mubr.bf16.mxu1 %v2696_v9  ;;  %v2699_v36 = vrot.slane %v14498_v10, 1 }
 0x25a   : > { %v1504_v13 = vsel %vm13649_vm9, %v1473_v24, %v1503_v23  ;;  %6004 = vmatmul.mubr.bf16.gmra.mrb[116].mxu0 %v14478_v49  ;;  %v793_v3 = vmax.f32 %v727_v44, 0.0  ;;  %v794_v38 = vmax.f32 %v729_v46, 0.0  ;;  %v1144_v51 = vsel %vm13720_vm8, 0, %v1143_v35 }
 0x25b   : > { %1505 = vst [vmem:[#allocation2 + $0x188] sm:$0x33] %v1504_v13  ;;  %v1541_v25 = vrot.slane %v1540_v32, 4  ;;  %v1569_v8 = vsel %vm17331_vm6, %v1540_v32, %v1568_v62  ;;  %v1608_v47 = vor.u32 %v1607_v48, %v1604_v54  ;;  %v1637_v1 = vsel %vm13699_vm12, %v1604_v54, %v1636_v0  ;;  %6013 = vmatprep.mubr.bf16.mxu0 %v14494_v60  ;;  %v1737_v0 = vld [vmem:[#allocation2 + $0x158] sm:$0xff] }
 0x25c   : > { %1570 = vst [vmem:[#allocation2 + $0x188] sm:$0xcc] %v1569_v8  ;;  %1638 = vst [vmem:[#allocation2 + $0x190] sm:$0x88] %v1637_v1  ;;  %v11337_v50 = vpack.c.bf16 %v794_v38, %v793_v3  ;;  %v2694_v14 = vsel %vm2426_vm15, %v2689_v17, %v2693_v58  ;;  %v14525_v62 = vcombine.low %v14335_v37, %v14382_v22  ;;  %v12897_v17 = vld [vmem:[#allocation2] sm:$0xff]  ;;  %v1739_v3 = vld [vmem:[#allocation2 + $0x168] sm:$0xff] }
 0x25d   : > { %v1572_v53 = vsel %vm13844_vm10, %v1541_v25, %v1571_v63  ;;  %v1609_v23 = vrot.slane %v1608_v47, 4  ;;  %1145 = vst [vmem:[#allocation2 + $0x1a0] sm:$0x11] %v1144_v51  ;;  %v2700_v45 = vsel %vm2426_vm15, %v2695_v30, %v2699_v36  ;;  %v10868_v54 = vcombine.high %v1762_v5, %v1762_v5  ;;  %v1703_v22 = vld [vmem:[#allocation2 + $0x1a8] sm:$0x11] }
 0x25e   : > { %1573 = vst [vmem:[#allocation2 + $0x190] sm:$0x77] %v1572_v53  ;;  %v1667_v9 = vshrl.u32 %v11337_v50, 16  ;;  %v1670_v32 = vshll.u32 %v11337_v50, 16  ;;  %v14531_v15 = vcombine.low %v14462_v59, %v14335_v37  ;;  %v14533_v35 = vcombine.high %v12897_v17, %v1737_v0  ;;  %v1763_v59 = vld [vmem:[#allocation2 + $0x158] sm:$0xee] }
 0x25f   : > { %v14520_v24 = vsel %vm17332_vm14, %v1609_v23, %v1639_v33  ;;  %v2697_v13 = vrot.slane %v14525_v62, 1  ;;  %v14539_v30 = vcombine.high %v14448_v56, %v14466_v21  ;;  %v2703_v37 = vrot.slane %v10868_v54, 1  ;;  %v1738_v33 = vld [vmem:[#allocation2 + $0x160] sm:$0xff] }
 0x260   : > { %1641 = vst [vmem:[#allocation2 + $0x198] sm:$0xff] %v14520_v24  ;;  %6693 = vmatmul.mubr.bf16.gmra.mrb[48].mxu1 %v2694_v14  ;;  %v1669_v48 = vrot.slane %v1667_v9, 7  ;;  %v14544_v25 = vcombine.low %v14448_v56, %v14466_v21  ;;  %v10867_v38 = vcombine.low %v1762_v5, %v1762_v5  ;;  %v14555_v53 = vcombine.high %v1763_v59, %v1738_v33  ;;  %v1742_v5 = vld [vmem:[#allocation2 + $0x180] sm:$0xff] }
 0x261   : > { %6702 = vmatprep.mubr.bf16.mxu1 %v2700_v45  ;;  %v2698_v1 = vsel %vm2426_vm15, %v2693_v58, %v2697_v13  ;;  %v2704_v51 = vsel %vm2426_vm15, %v2699_v36, %v2703_v37  ;;  %v14557_v2 = vcombine.low %v12897_v17, %v1737_v0  ;;  %v14559_v23 = vcombine.high %v1738_v33, %v1739_v3  ;;  %v12612_v17 = vld [vmem:[#allocation9 + $0x204] ss:$8 sps:$4 sm:$0xff]  }
 0x262   : > { %6014 = vmatmul.mubr.bf16.gmra.mrb[120].mxu0 %v14531_v15  ;;  %v1672_v63 = vor.u32 %v1670_v32, %v1669_v48  ;;  %v1673_v44 = vrot.slane %v1669_v48, 4  ;;  %v14562_v20 = vcombine.high %v1739_v3, %v14448_v56  ;;  %v2701_v50 = vrot.slane %v10867_v38, 1  ;;  %6307 = vmatprep.subr.bf16.mxu0 %v12612_v17 }
 0x263   : > { %6023 = vmatprep.mubr.bf16.mxu0 %v14533_v35  ;;  %v2708_v58 = vrot.slane %v14555_v53, 1  ;;  %v14569_v45 = vcombine.low %v1763_v59, %v1738_v33  ;;  %v14573_v9 = vcombine.high %v14466_v21, %v1742_v5  ;;  %v14575_v32 = vcombine.low %v1738_v33, %v1739_v3 }
 0x264   : > { %v1700_v46 = vld [vmem:[#allocation2 + $0x1a0] sm:$0xff]  ;;  %v1704_v47 = vsel %vm13720_vm8, %v1673_v44, %v1703_v22  ;;  %v2709_v36 = vrot.slane %v14562_v20, 1  ;;  %v2702_v14 = vsel %vm2426_vm15, %v2697_v13, %v2701_v50  ;;  %v14578_v54 = vcombine.low %v1739_v3, %v14448_v56 }
 0x265   : > { %v14548_v8 = vsel %vm13694_vm1, %v1672_v63, %v1700_v46  ;;  %1705 = vst [vmem:[#allocation2 + $0x1a8] sm:$0x11] %v1704_v47  ;;  %v2705_v48 = vrot.slane %v14569_v45, 1  ;;  %v2713_v22 = vrot.slane %v14573_v9, 1  ;;  %v1743_v63 = vld [vmem:[#allocation2 + $0x188] sm:$0xff]  ;;  %v1744_v44 = vld [vmem:[#allocation2 + $0x190] sm:$0xff]  ;;  %v14587_v37 = vcombine.low %v14466_v21, %v1742_v5 }
 0x266   : > { %1702 = vst [vmem:[#allocation2 + $0x1a0] sm:$0xff] %v14548_v8  ;;  %v2710_v0 = vsel %vm2426_vm15, %v2708_v58, %v2709_v36  ;;  %17383 = vst [vmem:[#allocation62_spill] sm:$0xff] %v14578_v54  ;;  %v2706_v13 = vrot.slane %v14578_v54, 1  ;;  %v14590_v59 = vcombine.high %v1743_v63, %v1744_v44  ;;  %v14592_v47 = vcombine.high %v1742_v5, %v1743_v63 }
 0x267   : > { %17384 = vst [vmem:[#allocation63_spill] sm:$0xff] %v14587_v37  ;;  %v2714_v56 = vsel %vm2426_vm15, %v2709_v36, %v2713_v22  ;;  %v14599_v21 = vcombine.low %v1743_v63, %v1744_v44  ;;  %v2029_v50 = vshll.u32 %v13870_v34, 16  ;;  %v14607_v58 = vcombine.low %v1742_v5, %v1743_v63 }
 0x268   : > { %6703 = vmatmul.mubr.bf16.gmra.mrb[52].mxu1 %v2698_v1  ;;  %v2707_v46 = vsel %vm2426_vm15, %v2705_v48, %v2706_v13  ;;  %17385 = vst [vmem:[#allocation64_spill] sm:$0xff] %v14590_v59  ;;  %v2711_v1 = vrot.slane %v14587_v37, 1  ;;  %v2717_v33 = vrot.slane %v14590_v59, 1  ;;  %v14610_v36 = vcombine.high %v1744_v44, %v14520_v24  ;;  %v12610_v37 = vld [vmem:[#allocation9 + $0x200] ss:$8 sps:$4 sm:$0xff]  }
 0x269   : > { %6712 = vmatprep.mubr.bf16.mxu1 %v2704_v51  ;;  %17386 = vst [vmem:[#allocation65_spill] sm:$0xff] %v14599_v21  ;;  %v14604_v51 = vcombine.high %v14520_v24, %v14548_v8  ;;  %17388 = vst [vmem:[#allocation67_spill] sm:$0xff] %v14607_v58  ;;  %v2031_v17 = vrot.slane %v2029_v50, 1  ;;  %v2027_v63 = vshrl.u32 %v13870_v34, 16  ;;  %vm17392_vm9 = vsmask.f32 7424 }
 0x26a   : > { %6024 = vmatmul.mubr.bf16.gmra.mrb[124].mxu0 %v14557_v2  ;;  %v2712_v3 = vsel %vm2426_vm15, %v2706_v13, %v2711_v1  ;;  %v2718_v38 = vsel %vm2426_vm15, %v2713_v22, %v2717_v33  ;;  %17389 = vst [vmem:[#allocation68_spill] sm:$0xff] %v14610_v36  ;;  %v2017_v13 = vshll.u32 %v13867_v31, 16  ;;  %vm17393_vm1 = vmmov %vm17392_vm9 }
 0x26b   : > { %6033 = vmatprep.mubr.bf16.mxu0 %v14559_v23  ;;  %17387 = vst [vmem:[#allocation66_spill] sm:$0xff] %v14604_v51  ;;  %v2721_v48 = vrot.slane %v14604_v51, 1  ;;  %v14626_v51 = vcombine.low %v1744_v44, %v14520_v24  ;;  %v2032_v50 = vor.u32 %v2031_v17, %v2027_v63  ;;  %v2015_v44 = vshrl.u32 %v13867_v31, 16  ;;  %vm17394_vm12 = vmmov %vm17393_vm1 }
 0x26c   : > { %v1765_v22 = vld [vmem:[#allocation2 + $0x1a8] sm:$0x11]  ;;  %v2019_v59 = vrot.slane %v2017_v13, 1  ;;  %v2805_v17 = vshrl.u32 %v13911_v29, 16  ;;  %vm17395_vm8 = vmmov %vm17393_vm1 }
 0x26d   : > { %17391 = vst [vmem:[#allocation70_spill] sm:$0xff] %v14626_v51  ;;  %vm17396_vm11 = vmmov %vm17393_vm1 }
 0x26e   : > { %v2807_v31 = vrot.slane %v2805_v17, 1  ;;  %v2788_v17 = vshrl.u32 %v13933_v16, 16  ;;  %vm17404_vm7 = vmmov %vm17393_vm1 }
 0x26f   : > { %vm17405_vm5 = vmmov %vm17393_vm1 }
 0x270   : > { %6713 = vmatmul.mubr.bf16.gmra.mrb[56].mxu1 %v2702_v14  ;;  %v2715_v14 = vrot.slane %v14599_v21, 1  ;;  %v2022_v21 = vshll.u32 %v13906_v19, 16  ;;  %vm17412_vm3 = vmmov %vm17393_vm1 }
 0x271   : > { %6722 = vmatprep.mubr.bf16.mxu1 %v2710_v0  ;;  %v2034_v0 = vshll.u32 %v13902_v18, 16  ;;  %vm17413_vm4 = vmmov %vm17393_vm1 }
 0x272   : > { %6034 = vmatmul.mubr.bf16.gmra.mrb[128].mxu0 %v14575_v32  ;;  %v2716_v5 = vsel %vm2426_vm15, %v2711_v1, %v2715_v14  ;;  %v2024_v13 = vrot.slane %v2022_v21, 1  ;;  %vm17419_vm13 = vmmov %vm17393_vm1 }
 0x273   : > { %6043 = vmatprep.mubr.bf16.mxu0 %v14539_v30  ;;  %vm17420_vm2 = vmmov %vm17393_vm1 }
 0x274   : > { %vm17425_vm10 = vmmov %vm17393_vm1 }
 0x275   : > { %vm17426_vm6 = vmmov %vm17393_vm1 }
 0x276   : > { %vm17433_vm14 = vmmov %vm17393_vm1 }
 0x278   : > { %6723 = vmatmul.mubr.bf16.gmra.mrb[60].mxu1 %v2707_v46  ;;  %v2036_v46 = vrot.slane %v2034_v0, 1 }
 0x279   : > { %6732 = vmatprep.mubr.bf16.mxu1 %v2714_v56  ;;  %v14622_v56 = vcombine.low %v14520_v24, %v14548_v8  ;;  %v2046_v8 = vshrl.u32 %v13902_v18, 16  ;;  %v2816_v24 = vshll.u32 %v13921_v52, 16  ;;  %v10879_v18 = vcombine.low %v1765_v22, %v1765_v22 }
 0x27a   : > { %6044 = vmatmul.mubr.bf16.gmra.mrb[132].mxu0 %v14544_v25  ;;  %v2037_v34 = vsel %vm17392_vm9, %v2032_v50, %v2036_v46  ;;  %vm17434_vm9 = vmmov %vm17393_vm1 }
 0x27b   : > { %6053 = vmatprep.mubr.bf16.mxu0 %v14592_v47  ;;  %17390 = vst [vmem:[#allocation69_spill] sm:$0xff] %v14622_v56  ;;  %v2719_v1 = vrot.slane %v14622_v56, 1  ;;  %v2048_v63 = vor.u32 %v2046_v8, %v2036_v46  ;;  %v2020_v56 = vor.u32 %v2019_v59, %v2015_v44  ;;  %v17149_v59 = vshll.u32 %v13975_v40, 16  ;;  %v12613_v44 = vld [vmem:[#allocation9 + $0x210] ss:$8 sps:$4 sm:$0xff]  }
 0x27c   : > { %v2799_v8 = vshll.u32 %v13944_v6, 16 }
 0x27d   : > { %v2720_v50 = vsel %vm2426_vm15, %v2715_v14, %v2719_v1  ;;  %v2025_v21 = vsel %vm17393_vm1, %v2020_v56, %v2024_v13  ;;  %v2723_v14 = vrot.slane %v10879_v18, 1  ;;  %v2834_v56 = vshll.u32 %v13978_v57, 16 }
 0x27e   : > { %v2791_v18 = vshll.u32 %v13933_v16, 16 }
 0x280   : > { %6733 = vmatmul.mubr.bf16.gmra.mrb[64].mxu1 %v2712_v3  ;;  %v2722_v3 = vsel %vm2426_vm15, %v2717_v33, %v2721_v48  ;;  %v17148_v33 = vshll.u32 %v13896_v7, 16 }
 0x281   : > { %6742 = vmatprep.mubr.bf16.mxu1 %v2718_v38  ;;  %v10880_v38 = vcombine.high %v1765_v22, %v1765_v22  ;;  %v2796_v22 = vshrl.u32 %v13944_v6, 16  ;;  %v12578_v6 = vld [vmem:[#allocation9 + $0x510] ss:$8 sps:$4 sm:$0xff]  }
 0x282   : > { %6054 = vmatmul.mubr.bf16.gmra.mrb[136].mxu0 %v14607_v58 }
 0x283   : > { %6063 = vmatprep.mubr.bf16.mxu0 %v14610_v36  ;;  %v2725_v0 = vrot.slane %v10880_v38, 1  ;;  %v12615_v36 = vld [vmem:[#allocation9 + $0x214] ss:$8 sps:$4 sm:$0xff]  }
 0x285   : > { %v2726_v38 = vsel %vm2426_vm15, %v2721_v48, %v2725_v0  ;;  %v17151_v48 = vshll.u32 %v13966_v4, 16 }
 0x288   : > { %6743 = vmatmul.mubr.bf16.gmra.mrb[68].mxu1 %v2716_v5  ;;  %v2813_v5 = vshrl.u32 %v13921_v52, 16  ;;  %v2818_v52 = vrot.slane %v2816_v24, 2  ;;  %v2831_v24 = vshrl.u32 %v13978_v57, 16 }
 0x289   : > { %6752 = vmatprep.mubr.bf16.mxu1 %v2722_v3  ;;  %v2808_v3 = vshll.u32 %v13911_v29, 16 }
 0x28a   : > { %6064 = vmatmul.mubr.bf16.gmra.mrb[140].mxu0 %v14626_v51  ;;  %v2815_v51 = vrot.slane %v2813_v5, 1  ;;  %v2038_v5 = vshrl.u32 %v13906_v19, 16 }
 0x28b   : > { %6106 = vmatprep.mubr.bf16.mxu0 %v2037_v34  ;;  %v2052_v34 = vrot.slane %v17148_v33, 1  ;;  %v2810_v46 = vrot.slane %v2808_v3, 2 }
 0x28c   : > { %v2819_v0 = vor.u32 %v2818_v52, %v2815_v51  ;;  %v2068_v52 = vrot.slane %v17149_v59, 1  ;;  %v2724_v51 = vsel %vm2426_vm15, %v2719_v1, %v2723_v14  ;;  %v12625_v1 = vld [vmem:[#allocation9 + $0x234] ss:$8 sps:$4 sm:$0xff]   ;;  %v12575_v59 = vld [vmem:[#allocation9 + $0x500] ss:$8 sps:$4 sm:$0xff]  }
 0x28d   : > { %v2053_v29 = vsel %vm17394_vm12, %v2048_v63, %v2052_v34  ;;  %v12621_v63 = vld [vmem:[#allocation9 + $0x224] ss:$8 sps:$4 sm:$0xff]   ;;  %v2811_v3 = vor.u32 %v2810_v46, %v2807_v31  ;;  %v12619_v31 = vld [vmem:[#allocation9 + $0x220] ss:$8 sps:$4 sm:$0xff]   ;;  %v2790_v46 = vrot.slane %v2788_v17, 1  ;;  %vm17445_vm12 = vmmov %vm17393_vm1 }
 0x28f   : > { %v2820_v33 = vsel %vm1277_vm0, %v2811_v3, %v2819_v0 }
 0x290   : > { %6753 = vmatmul.mubr.bf16.gmra.mrb[72].mxu1 %v2720_v50  ;;  %v2040_v50 = vor.u32 %v2038_v5, %v2024_v13  ;;  %v2836_v13 = vrot.slane %v2834_v56, 2  ;;  %v2793_v5 = vrot.slane %v2791_v18, 2  ;;  %v17399_v18 = vld [vmem:[#allocation31_spill] sm:$0xff] }
 0x291   : > { %6762 = vmatprep.mubr.bf16.mxu1 %v2726_v38  ;;  %v17150_v38 = vshrl.u32 %v13896_v7, 16  ;;  %v12635_v7 = vld [vmem:[#allocation9 + $0x254] ss:$8 sps:$4 sm:$0xff]  }
 0x292   : > { %6107 = vmatmul.mubr.bf16.vlgmr.msra.gmra.mrb[64].mxu0 %v2025_v21  ;;  %v2044_v21 = vrot.slane %v17151_v48, 1 }
 0x293   : > { %6116 = vmatprep.mubr.bf16.mxu0 %v2053_v29  ;;  %6308 = vmatpush1.bf16.msra.mxu0 %v12610_v37  ;;  %v2798_v37 = vrot.slane %v2796_v22, 1  ;;  %v2801_v29 = vrot.slane %v2799_v8, 2  ;;  %v2064_v16 = vor.u32 %v17150_v38, %v2052_v34  ;;  %v17153_v8 = vshll.u32 %v13987_v55, 16 }
 0x294   : > { %6309 = vmatprep.subr.bf16.mxu0 %v12615_v36  ;;  %v2833_v36 = vrot.slane %v2831_v24, 1  ;;  %v2045_v14 = vsel %vm17395_vm8, %v2040_v50, %v2044_v21  ;;  %v17398_v24 = vld [vmem:[#allocation29_spill] sm:$0xff]  ;;  %v2852_v50 = vshll.u32 %v17399_v18, 16  ;;  %vm17451_vm8 = vmmov %vm17393_vm1 }
 0x295   : > { %v2069_v22 = vsel %vm17396_vm11, %v2064_v16, %v2068_v52  ;;  %v14666_v3 = vor.u32 %v2801_v29, %v2798_v37  ;;  %v2822_v56 = vshrl.u32 %v17398_v24, 16  ;;  %v12623_v16 = vld [vmem:[#allocation9 + $0x230] ss:$8 sps:$4 sm:$0xff]   ;;  %v12580_v37 = vld [vmem:[#allocation9 + $0x514] ss:$8 sps:$4 sm:$0xff]   ;;  %v17160_v29 = vshrl.u32 %v13966_v4, 16  ;;  %vm17452_vm11 = vmmov %vm17393_vm1 }
 0x296   : > { %v14671_v17 = vor.u32 %v2836_v13, %v2833_v36  ;;  %v2060_v38 = vrot.slane %v17153_v8, 1  ;;  %v12629_v36 = vld [vmem:[#allocation9 + $0x244] ss:$8 sps:$4 sm:$0xff]   ;;  %v2854_v48 = vrot.slane %v2852_v50, 2 }
 0x297   : > { %6310 = vmatpush1.bf16.msra.mxu0 %v12613_v44  ;;  %v2825_v44 = vshll.u32 %v17398_v24, 16  ;;  %v12627_v24 = vld [vmem:[#allocation9 + $0x240] ss:$8 sps:$4 sm:$0xff]   ;;  %v12585_v50 = vld [vmem:[#allocation9 + $0x524] ss:$8 sps:$4 sm:$0xff]  }
 0x298   : > { %6763 = vmatmul.mubr.bf16.gmra.mrb[76].mxu1 %v2724_v51  ;;  %6311 = vmatprep.subr.bf16.mxu0 %v12621_v63  ;;  %v17397_v51 = vld [vmem:[#allocation32_spill] sm:$0xff]  ;;  %v2849_v63 = vshrl.u32 %v17399_v18, 16  ;;  %v2824_v18 = vrot.slane %v2822_v56, 1 }
 0x299   : > { %6805 = vmatprep.mubr.bf16.mxu1 %v2820_v33  ;;  %v17157_v34 = vshll.u32 %v17397_v51, 16  ;;  %v1746_v33 = vld [vmem:[#allocation2 + $0x50] sm:$0x11] }
 0x29a   : > { %6117 = vmatmul.mubr.bf16.gmra.mrb[68].mxu0 %v2045_v14  ;;  %v2794_v14 = vor.u32 %v2793_v5, %v2790_v46  ;;  %v2827_v46 = vrot.slane %v2825_v44, 2  ;;  %v2838_v5 = vsel %vm1277_vm0, %v2819_v0, %v14671_v17  ;;  %v2851_v8 = vrot.slane %v2849_v63, 1  ;;  %v17403_v44 = vld [vmem:[#allocation33_spill] sm:$0xff] }
 0x29b   : > { %6126 = vmatprep.mubr.bf16.mxu0 %v2069_v22  ;;  %6312 = vmatpush1.bf16.msra.mxu0 %v12619_v31  ;;  %v14679_v22 = vcombine.high %v1746_v33, %v1746_v33  ;;  %v2084_v31 = vrot.slane %v17157_v34, 1  ;;  %v17402_v34 = vld [vmem:[#allocation35_spill] sm:$0xff]  ;;  %v2843_v63 = vshll.u32 %v17403_v44, 16 }
 0x29c   : > { %6313 = vmatprep.subr.bf16.mxu0 %v12625_v1  ;;  %v2803_v13 = vsel %vm1277_vm0, %v2794_v14, %v14666_v3  ;;  %v2056_v1 = vor.u32 %v17160_v29, %v2044_v21  ;;  %v17401_v14 = vshrl.u32 %v13975_v40, 16  ;;  %v17162_v56 = vshll.u32 %v17402_v34, 16  ;;  %v12583_v29 = vld [vmem:[#allocation9 + $0x520] ss:$8 sps:$4 sm:$0xff]  }
 0x29d   : > { %17400 = vst [vmem:[#allocation71_spill] sm:$0xff] %v14679_v22  ;;  %v2098_v21 = vshll.u32 %v14679_v22, 16 }
 0x29e   : > { %v2080_v57 = vor.u32 %v17401_v14, %v2068_v52  ;;  %v2061_v0 = vsel %vm17404_vm7, %v2056_v1, %v2060_v38  ;;  %v1766_v52 = vld [vmem:[#allocation2 + $0x58] sm:$0x33]  ;;  %v2076_v1 = vrot.slane %v17162_v56, 1  ;;  %v17408_v14 = vld [vmem:[#allocation37_spill] sm:$0xff]  ;;  %vm17456_vm7 = vmmov %vm17393_vm1 }
 0x29f   : > { %6314 = vmatpush1.bf16.msra.mxu0 %v12623_v16  ;;  %v14697_v16 = vor.u32 %v2827_v46, %v2824_v18  ;;  %v12589_v18 = vld [vmem:[#allocation9 + $0x534] ss:$8 sps:$4 sm:$0xff]   ;;  %v2100_v46 = vrot.slane %v2098_v21, 1  ;;  %v17410_v21 = vshrl.u32 %v17397_v51, 16  ;;  %v17175_v51 = vshrl.u32 %v17402_v34, 16 }
 0x2a0   : > { %6806 = vmatmul.mubr.bf16.vlgmr.msra.gmra.mrb[0].mxu1 %v2803_v13  ;;  %v2840_v13 = vshrl.u32 %v17403_v44, 16  ;;  %6315 = vmatprep.subr.bf16.mxu0 %v12629_v36  ;;  %v17406_v44 = vld [vmem:[#allocation34_spill] sm:$0xff] }
 0x2a1   : > { %7007 = vmatpush1.bf16.msra.mxu1 %v12575_v59  ;;  %6815 = vmatprep.mubr.bf16.mxu1 %v2838_v5  ;;  %v2085_v59 = vsel %vm17405_vm5, %v2080_v57, %v2084_v31  ;;  %v14699_v5 = vor.u32 %v2854_v48, %v2851_v8  ;;  %v2867_v57 = vshrl.u32 %v17406_v44, 16  ;;  %v2870_v48 = vshll.u32 %v17406_v44, 16  ;;  %vm17457_vm5 = vmmov %vm17393_vm1 }
 0x2a2   : > { %7008 = vmatprep.subr.bf16.mxu1 %v12580_v37  ;;  %6127 = vmatmul.mubr.bf16.gmra.mrb[72].mxu0 %v2061_v0  ;;  %v12633_v37 = vld [vmem:[#allocation9 + $0x250] ss:$8 sps:$4 sm:$0xff]   ;;  %v2842_v0 = vrot.slane %v2840_v13, 1  ;;  %v14707_v8 = vcombine.low %v1746_v33, %v1746_v33  ;;  %v2829_v56 = vsel %vm1277_vm0, %v14666_v3, %v14697_v16  ;;  %v17409_v13 = vshrl.u32 %v13987_v55, 16  ;;  %v12645_v55 = vld [vmem:[#allocation9 + $0x274] ss:$8 sps:$4 sm:$0xff]  }
 0x2a3   : > { %6136 = vmatprep.mubr.bf16.mxu0 %v2085_v59  ;;  %6316 = vmatpush1.bf16.msra.mxu0 %v12627_v24  ;;  %v2845_v59 = vrot.slane %v2843_v63, 2  ;;  %v12639_v24 = vld [vmem:[#allocation9 + $0x264] ss:$8 sps:$4 sm:$0xff]   ;;  %v2096_v33 = vor.u32 %v17410_v21, %v2084_v31  ;;  %v14720_v63 = vcombine.high %v1766_v52, %v1766_v52  ;;  %v2869_v22 = vrot.slane %v2867_v57, 1  ;;  %v12587_v3 = vld [vmem:[#allocation9 + $0x530] ss:$8 sps:$4 sm:$0xff]  }
 0x2a4   : > { %6317 = vmatprep.subr.bf16.mxu0 %v12635_v7  ;;  %17407 = vst [vmem:[#allocation72_spill] sm:$0xff] %v14707_v8  ;;  %v2072_v36 = vor.u32 %v17409_v13, %v2060_v38  ;;  %v2856_v7 = vsel %vm1277_vm0, %v14671_v17, %v14699_v5  ;;  %v2872_v13 = vrot.slane %v2870_v48, 2  ;;  %v2090_v17 = vshll.u32 %v14707_v8, 16  ;;  %v12593_v31 = vld [vmem:[#allocation9 + $0x544] ss:$8 sps:$4 sm:$0xff]   ;;  %v17414_v21 = vld [vmem:[#allocation39_spill] sm:$0xff] }
 0x2a5   : > { %7009 = vmatpush1.bf16.msra.mxu1 %v12578_v6  ;;  %v2117_v6 = vshll.u32 %v17408_v14, 16  ;;  %17411 = vst [vmem:[#allocation37_spill] sm:$0xff] %v14720_v63  ;;  %v2101_v38 = vsel %vm17413_vm4, %v2096_v33, %v2100_v46  ;;  %v17415_v57 = vld [vmem:[#allocation36_spill] sm:$0xff]  ;;  %v2885_v46 = vshrl.u32 %v14720_v63, 16  ;;  %v17416_v48 = vld [vmem:[#allocation38_spill] sm:$0xff]  ;;  %vm17460_vm4 = vmmov %vm17393_vm1 }
 0x2a6   : > { %7010 = vmatprep.subr.bf16.mxu1 %v12585_v50  ;;  %v12637_v50 = vld [vmem:[#allocation9 + $0x260] ss:$8 sps:$4 sm:$0xff]   ;;  %v2077_v44 = vsel %vm17412_vm3, %v2072_v36, %v2076_v1  ;;  %v2122_v36 = vshll.u32 %v17414_v21, 16  ;;  %v2092_v33 = vrot.slane %v2090_v17, 1  ;;  %v12649_v8 = vld [vmem:[#allocation9 + $0x284] ss:$8 sps:$4 sm:$0xff]   ;;  %vm17459_vm3 = vmmov %vm17393_vm1 }
 0x2a7   : > { %6318 = vmatpush1.bf16.msra.mxu0 %v12633_v37  ;;  %v2115_v37 = vshrl.u32 %v17408_v14, 16  ;;  %v12591_v14 = vld [vmem:[#allocation9 + $0x540] ss:$8 sps:$4 sm:$0xff]   ;;  %v2103_v17 = vshrl.u32 %v17416_v48, 16 }
 0x2a8   : > { %6816 = vmatmul.mubr.bf16.gmra.mrb[4].mxu1 %v2829_v56  ;;  %v14724_v56 = vor.u32 %v2845_v59, %v2842_v0  ;;  %6319 = vmatprep.subr.bf16.mxu0 %v12639_v24  ;;  %v2861_v0 = vshll.u32 %v17415_v57, 16  ;;  %v2888_v59 = vshll.u32 %v14720_v63, 16  ;;  %v2873_v24 = vor.u32 %v2872_v13, %v2869_v22 }
 0x2a9   : > { %6825 = vmatprep.mubr.bf16.mxu1 %v2856_v7  ;;  %7011 = vmatpush1.bf16.msra.mxu1 %v12583_v29  ;;  %v2119_v7 = vrot.slane %v2117_v6, 1  ;;  %v2858_v29 = vshrl.u32 %v17415_v57, 16  ;;  %v2088_v6 = vor.u32 %v17175_v51, %v2076_v1  ;;  %v12596_v57 = vld [vmem:[#allocation9 + $0x554] ss:$8 sps:$4 sm:$0xff]   ;;  %v2124_v4 = vrot.slane %v2122_v36, 1  ;;  %v17418_v51 = vld [vmem:[#allocation42_spill] sm:$0xff] }
 0x2aa   : > { %7012 = vmatprep.subr.bf16.mxu1 %v12589_v18  ;;  %6137 = vmatmul.mubr.bf16.gmra.mrb[76].mxu0 %v2077_v44  ;;  %v12643_v18 = vld [vmem:[#allocation9 + $0x270] ss:$8 sps:$4 sm:$0xff]   ;;  %v2105_v44 = vshll.u32 %v17416_v48, 16  ;;  %v2863_v22 = vrot.slane %v2861_v0, 2  ;;  %v2887_v1 = vrot.slane %v2885_v46, 1  ;;  %v2890_v13 = vrot.slane %v2888_v59, 2 }
 0x2ab   : > { %6146 = vmatprep.mubr.bf16.mxu0 %v2101_v38  ;;  %6320 = vmatpush1.bf16.msra.mxu0 %v12637_v50  ;;  %v14737_v38 = vcombine.low %v1766_v52, %v1766_v52  ;;  %v2847_v50 = vsel %vm1277_vm0, %v14697_v16, %v14724_v56  ;;  %v2120_v63 = vor.u32 %v2119_v7, %v2115_v37  ;;  %v2860_v40 = vrot.slane %v2858_v29, 1  ;;  %v12647_v52 = vld [vmem:[#allocation9 + $0x280] ss:$8 sps:$4 sm:$0xff]   ;;  %v12652_v37 = vld [vmem:[#allocation9 + $0x294] ss:$8 sps:$4 sm:$0xff]  }
 0x2ac   : > { %6321 = vmatprep.subr.bf16.mxu0 %v12645_v55  ;;  %v2874_v55 = vsel %vm1277_vm0, %v14699_v5, %v2873_v24  ;;  %v2110_v34 = vshll.u32 %v17418_v51, 16  ;;  %v2134_v16 = vshrl.u32 %v17414_v21, 16  ;;  %v2093_v7 = vsel %vm17419_vm13, %v2088_v6, %v2092_v33  ;;  %v12601_v29 = vld [vmem:[#allocation9 + $0x564] ss:$8 sps:$4 sm:$0xff]   ;;  %v17421_v46 = vld [vmem:[#allocation43_spill] sm:$0xff]  ;;  %vm17462_vm13 = vmmov %vm17393_vm1 }
 0x2ad   : > { %7013 = vmatpush1.bf16.msra.mxu1 %v12587_v3  ;;  %17417 = vst [vmem:[#allocation38_spill] sm:$0xff] %v14737_v38  ;;  %v12594_v3 = vld [vmem:[#allocation9 + $0x550] ss:$8 sps:$4 sm:$0xff]   ;;  %v2876_v36 = vshrl.u32 %v14737_v38, 16  ;;  %v2879_v5 = vshll.u32 %v14737_v38, 16  ;;  %v2125_v0 = vsel %vm17420_vm2, %v2120_v63, %v2124_v4  ;;  %vm17463_vm2 = vmmov %vm17393_vm1 }
 0x2ae   : > { %7014 = vmatprep.subr.bf16.mxu1 %v12593_v31  ;;  %v2107_v31 = vrot.slane %v2105_v44, 1  ;;  %v2891_v44 = vor.u32 %v2890_v13, %v2887_v1  ;;  %v12599_v63 = vld [vmem:[#allocation9 + $0x560] ss:$8 sps:$4 sm:$0xff]   ;;  %v12658_v1 = vld [vmem:[#allocation9 + $0x2a4] ss:$8 sps:$4 sm:$0xff]  }
 0x2af   : > { %6322 = vmatpush1.bf16.msra.mxu0 %v12643_v18  ;;  %v17422_v18 = vld [vmem:[#allocation40_spill] sm:$0xff]  ;;  %v2878_v59 = vrot.slane %v2876_v36, 1  ;;  %v2881_v21 = vrot.slane %v2879_v5, 2  ;;  %v17427_v5 = vld [vmem:[#allocation47_spill] sm:$0xff] }
 0x2b0   : > { %6826 = vmatmul.mubr.bf16.gmra.mrb[8].mxu1 %v2847_v50  ;;  %6323 = vmatprep.subr.bf16.mxu0 %v12649_v8  ;;  %v2911_v48 = vshrl.u32 %v17422_v18, 16  ;;  %v17423_v50 = vld [vmem:[#allocation41_spill] sm:$0xff]  ;;  %v2108_v38 = vor.u32 %v2107_v31, %v2103_v17  ;;  %v2112_v8 = vrot.slane %v2110_v34, 1 }
 0x2b1   : > { %6835 = vmatprep.mubr.bf16.mxu1 %v2874_v55  ;;  %7015 = vmatpush1.bf16.msra.mxu1 %v12591_v14  ;;  %v2914_v14 = vshll.u32 %v17422_v18, 16  ;;  %v2919_v6 = vshrl.u32 %v17423_v50, 16  ;;  %v2922_v33 = vshll.u32 %v17423_v50, 16  ;;  %v12650_v55 = vld [vmem:[#allocation9 + $0x290] ss:$8 sps:$4 sm:$0xff]   ;;  %v17424_v18 = vshll.u32 %v17421_v46, 16 }
 0x2b2   : > { %7016 = vmatprep.subr.bf16.mxu1 %v12596_v57  ;;  %6147 = vmatmul.mubr.bf16.gmra.mrb[80].mxu0 %v2093_v7  ;;  %v2864_v57 = vor.u32 %v2863_v22, %v2860_v40  ;;  %v2136_v7 = vor.u32 %v2134_v16, %v2124_v4  ;;  %v2892_v40 = vsel %vm1277_vm0, %v2873_v24, %v2891_v44  ;;  %v12656_v22 = vld [vmem:[#allocation9 + $0x2a0] ss:$8 sps:$4 sm:$0xff]   ;;  %v2126_v16 = vshrl.u32 %v17418_v51, 16 }
 0x2b3   : > { %6156 = vmatprep.mubr.bf16.mxu0 %v2125_v0  ;;  %6324 = vmatpush1.bf16.msra.mxu0 %v12647_v52  ;;  %v12605_v0 = vld [vmem:[#allocation9 + $0x574] ss:$8 sps:$4 sm:$0xff]   ;;  %v2140_v50 = vrot.slane %v17424_v18, 1  ;;  %v2913_v52 = vrot.slane %v2911_v48, 1  ;;  %v2916_v34 = vrot.slane %v2914_v14, 2  ;;  %v2921_v4 = vrot.slane %v2919_v6, 1 }
 0x2b4   : > { %6325 = vmatprep.subr.bf16.mxu0 %v12652_v37  ;;  %v2865_v13 = vsel %vm1277_vm0, %v14724_v56, %v2864_v57  ;;  %v2113_v17 = vsel %vm17425_vm10, %v2108_v38, %v2112_v8  ;;  %v12603_v56 = vld [vmem:[#allocation9 + $0x570] ss:$8 sps:$4 sm:$0xff]   ;;  %v12661_v37 = vld [vmem:[#allocation9 + $0x2b4] ss:$8 sps:$4 sm:$0xff]   ;;  %v2882_v36 = vor.u32 %v2881_v21, %v2878_v59  ;;  %v12609_v14 = vld [vmem:[#allocation9 + $0x584] ss:$8 sps:$4 sm:$0xff]  }
 0x2b5   : > { %7017 = vmatpush1.bf16.msra.mxu1 %v12594_v3  ;;  %v2924_v3 = vrot.slane %v2922_v33, 2  ;;  %v2141_v31 = vsel %vm17426_vm6, %v2136_v7, %v2140_v50  ;;  %v17428_v48 = vld [vmem:[#allocation48_spill] sm:$0xff]  ;;  %v2917_v21 = vor.u32 %v2916_v34, %v2913_v52  ;;  %v17444_v51 = vld [vmem:[#allocation53_spill] sm:$0xff]  ;;  %vm17464_vm10 = vmmov %vm17393_vm1 }
 0x2b6   : > { %7018 = vmatprep.subr.bf16.mxu1 %v12601_v29  ;;  %v17182_v29 = vshll.u32 %v17427_v5, 16  ;;  %v17181_v44 = vshll.u32 %v17428_v48, 16  ;;  %v17429_v6 = vld [vmem:[#allocation44_spill] sm:$0xff]  ;;  %vm17465_vm6 = vmmov %vm17393_vm1 }
 0x2b7   : > { %6326 = vmatpush1.bf16.msra.mxu0 %v12650_v55  ;;  %v2894_v38 = vshrl.u32 %v17429_v6, 16  ;;  %v2897_v33 = vshll.u32 %v17429_v6, 16  ;;  %v17430_v55 = vld [vmem:[#allocation45_spill] sm:$0xff]  ;;  %v14771_v59 = vor.u32 %v2924_v3, %v2921_v4  ;;  %v2128_v6 = vor.u32 %v2126_v16, %v2112_v8  ;;  %v12618_v34 = vld [vmem:[#allocation9 + $0x594] ss:$8 sps:$4 sm:$0xff]  }
 0x2b8   : > { %6836 = vmatmul.mubr.bf16.gmra.mrb[12].mxu1 %v2865_v13  ;;  %6327 = vmatprep.subr.bf16.mxu0 %v12658_v1  ;;  %v2902_v7 = vshrl.u32 %v17430_v55, 16  ;;  %v17431_v13 = vld [vmem:[#allocation46_spill] sm:$0xff]  ;;  %v12607_v1 = vld [vmem:[#allocation9 + $0x580] ss:$8 sps:$4 sm:$0xff]   ;;  %v2132_v24 = vrot.slane %v17182_v29, 1  ;;  %v2156_v52 = vrot.slane %v17181_v44, 1 }
 0x2b9   : > { %6845 = vmatprep.mubr.bf16.mxu1 %v2892_v40  ;;  %7019 = vmatpush1.bf16.msra.mxu1 %v12599_v63  ;;  %v2905_v63 = vshll.u32 %v17430_v55, 16  ;;  %v2937_v18 = vshrl.u32 %v17431_v13, 16  ;;  %v2940_v40 = vshll.u32 %v17431_v13, 16  ;;  %v12667_v4 = vld [vmem:[#allocation9 + $0x2c4] ss:$8 sps:$4 sm:$0xff]   ;;  %v2896_v3 = vrot.slane %v2894_v38, 1 }
 0x2ba   : > { %7020 = vmatprep.subr.bf16.mxu1 %v12605_v0  ;;  %6157 = vmatmul.mubr.bf16.gmra.mrb[84].mxu0 %v2113_v17  ;;  %v12659_v0 = vld [vmem:[#allocation9 + $0x2b0] ss:$8 sps:$4 sm:$0xff]   ;;  %v2883_v17 = vsel %vm1277_vm0, %v2864_v57, %v2882_v36  ;;  %v2904_v13 = vrot.slane %v2902_v7, 1  ;;  %v17432_v57 = vshrl.u32 %v17421_v46, 16  ;;  %v12665_v36 = vld [vmem:[#allocation9 + $0x2c0] ss:$8 sps:$4 sm:$0xff]   ;;  %v2133_v38 = vsel %vm17433_vm14, %v2128_v6, %v2132_v24  ;;  %vm17466_vm14 = vmmov %vm17393_vm1 }
 0x2bb   : > { %6166 = vmatprep.mubr.bf16.mxu0 %v2141_v31  ;;  %6328 = vmatpush1.bf16.msra.mxu0 %v12656_v22  ;;  %v2899_v31 = vrot.slane %v2897_v33, 2  ;;  %v2907_v22 = vrot.slane %v2905_v63, 2  ;;  %v2939_v16 = vrot.slane %v2937_v18, 1  ;;  %v12671_v44 = vld [vmem:[#allocation9 + $0x2d4] ss:$8 sps:$4 sm:$0xff]  }
 0x2bc   : > { %6329 = vmatprep.subr.bf16.mxu0 %v12661_v37  ;;  %v2152_v8 = vor.u32 %v17432_v57, %v2140_v50  ;;  %v2942_v37 = vrot.slane %v2940_v40, 2  ;;  %v17435_v7 = vld [vmem:[#allocation51_spill] sm:$0xff]  ;;  %v17437_v40 = vld [vmem:[#allocation49_spill] sm:$0xff] }
 0x2bd   : > { %7021 = vmatpush1.bf16.msra.mxu1 %v12603_v56  ;;  %v2926_v56 = vsel %vm1277_vm0, %v2917_v21, %v14771_v59  ;;  %v12632_v21 = vld [vmem:[#allocation9 + $0x5a4] ss:$8 sps:$4 sm:$0xff]   ;;  %v2900_v50 = vor.u32 %v2899_v31, %v2896_v3  ;;  %v14788_v18 = vor.u32 %v2907_v22, %v2904_v13  ;;  %v12630_v3 = vld [vmem:[#allocation9 + $0x5a0] ss:$8 sps:$4 sm:$0xff]   ;;  %v12642_v13 = vld [vmem:[#allocation9 + $0x5b4] ss:$8 sps:$4 sm:$0xff]  }
 0x2be   : > { %7022 = vmatprep.subr.bf16.mxu1 %v12609_v14  ;;  %v12616_v14 = vld [vmem:[#allocation9 + $0x590] ss:$8 sps:$4 sm:$0xff]   ;;  %v2157_v33 = vsel %vm17434_vm9, %v2152_v8, %v2156_v52  ;;  %v14792_v6 = vor.u32 %v2942_v37, %v2939_v16  ;;  %v17439_v31 = vshll.u32 %v17435_v7, 16  ;;  %v12675_v37 = vld [vmem:[#allocation9 + $0x2e4] ss:$8 sps:$4 sm:$0xff]   ;;  %vm17467_vm9 = vmmov %vm17393_vm1 }
 0x2bf   : > { %6330 = vmatpush1.bf16.msra.mxu0 %v12659_v0  ;;  %v2928_v0 = vshrl.u32 %v17437_v40, 16  ;;  %v17438_v8 = vld [vmem:[#allocation50_spill] sm:$0xff] }
 0x2c0   : > { %6846 = vmatmul.mubr.bf16.gmra.mrb[16].mxu1 %v2883_v17  ;;  %v17436_v17 = vld [vmem:[#allocation52_spill] sm:$0xff]  ;;  %6331 = vmatprep.subr.bf16.mxu0 %v12667_v4  ;;  %v2955_v63 = vshrl.u32 %v17438_v8, 16  ;;  %v12669_v4 = vld [vmem:[#allocation9 + $0x2d0] ss:$8 sps:$4 sm:$0xff]   ;;  %v2148_v22 = vrot.slane %v17439_v31, 1 }
 0x2c1   : > { %6855 = vmatprep.mubr.bf16.mxu1 %v2926_v56  ;;  %7023 = vmatpush1.bf16.msra.mxu1 %v12607_v1  ;;  %v17185_v29 = vshll.u32 %v17436_v17, 16  ;;  %v2931_v1 = vshll.u32 %v17437_v40, 16  ;;  %v1747_v56 = vld [vmem:[#allocation2 + $0xc0] sm:$0x11]  ;;  %v2930_v57 = vrot.slane %v2928_v0, 1  ;;  %v17443_v0 = vld [vmem:[#allocation55_spill] sm:$0xff] }
 0x2c2   : > { %7024 = vmatprep.subr.bf16.mxu1 %v12618_v34  ;;  %6167 = vmatmul.mubr.bf16.gmra.mrb[88].mxu0 %v2133_v38  ;;  %v2958_v34 = vshll.u32 %v17438_v8, 16  ;;  %v14804_v8 = vcombine.high %v1747_v56, %v1747_v56  ;;  %v2957_v38 = vrot.slane %v2955_v63, 1  ;;  %v12640_v55 = vld [vmem:[#allocation9 + $0x5b0] ss:$8 sps:$4 sm:$0xff]  }
 0x2c3   : > { %6176 = vmatprep.mubr.bf16.mxu0 %v2157_v33  ;;  %6332 = vmatpush1.bf16.msra.mxu0 %v12665_v36  ;;  %v2172_v16 = vrot.slane %v17185_v29, 1  ;;  %v2909_v33 = vsel %vm1277_vm0, %v2900_v50, %v14788_v18  ;;  %v2933_v36 = vrot.slane %v2931_v1, 2  ;;  %v17442_v29 = vshrl.u32 %v17428_v48, 16 }
 0x2c4   : > { %6333 = vmatprep.subr.bf16.mxu0 %v12671_v44  ;;  %17440 = vst [vmem:[#allocation40_spill] sm:$0xff] %v14804_v8  ;;  %v2944_v44 = vsel %vm1277_vm0, %v14771_v59, %v14792_v6  ;;  %v2960_v40 = vrot.slane %v2958_v34, 2  ;;  %v2946_v59 = vshrl.u32 %v17444_v51, 16  ;;  %v17194_v1 = vshrl.u32 %v17435_v7, 16 }
 0x2c5   : > { %7025 = vmatpush1.bf16.msra.mxu1 %v12616_v14  ;;  %v17441_v14 = vshrl.u32 %v17427_v5, 16  ;;  %v2168_v50 = vor.u32 %v17442_v29, %v2156_v52  ;;  %v2949_v5 = vshll.u32 %v17444_v51, 16  ;;  %v2934_v34 = vor.u32 %v2933_v36, %v2930_v57  ;;  %v12653_v57 = vld [vmem:[#allocation9 + $0x5c0] ss:$8 sps:$4 sm:$0xff]  }
 0x2c6   : > { %7026 = vmatprep.subr.bf16.mxu1 %v12632_v21  ;;  %v12673_v21 = vld [vmem:[#allocation9 + $0x2e0] ss:$8 sps:$4 sm:$0xff]   ;;  %v2186_v29 = vshll.u32 %v14804_v8, 16  ;;  %v2961_v52 = vor.u32 %v2960_v40, %v2957_v38  ;;  %v2948_v40 = vrot.slane %v2946_v59, 1  ;;  %v2160_v51 = vor.u32 %v17194_v1, %v2148_v22 }
 0x2c7   : > { %v2144_v31 = vor.u32 %v17441_v14, %v2132_v24  ;;  %6334 = vmatpush1.bf16.msra.mxu0 %v12669_v4  ;;  %v12655_v24 = vld [vmem:[#allocation9 + $0x5c4] ss:$8 sps:$4 sm:$0xff]   ;;  %v2173_v63 = vsel %vm17445_vm12, %v2168_v50, %v2172_v16  ;;  %v2951_v38 = vrot.slane %v2949_v5, 2  ;;  %vm17468_vm12 = vmmov %vm17393_vm1 }
 0x2c8   : > { %6856 = vmatmul.mubr.bf16.gmra.mrb[20].mxu1 %v2909_v33  ;;  %v12683_v33 = vld [vmem:[#allocation9 + $0x2f4] ss:$8 sps:$4 sm:$0xff]   ;;  %6335 = vmatprep.subr.bf16.mxu0 %v12675_v37  ;;  %v17446_v4 = vld [vmem:[#allocation54_spill] sm:$0xff]  ;;  %v1767_v14 = vld [vmem:[#allocation2 + $0xc8] sm:$0x33] }
 0x2c9   : > { %6865 = vmatprep.mubr.bf16.mxu1 %v2944_v44  ;;  %7027 = vmatpush1.bf16.msra.mxu1 %v12630_v3  ;;  %v2149_v46 = vsel %vm17393_vm1, %v2144_v31, %v2148_v22  ;;  %v2973_v3 = vshrl.u32 %v17446_v4, 16  ;;  %v2976_v44 = vshll.u32 %v17446_v4, 16  ;;  %v12681_v31 = vld [vmem:[#allocation9 + $0x2f0] ss:$8 sps:$4 sm:$0xff]   ;;  %v17448_v36 = vld [vmem:[#allocation57_spill] sm:$0xff]  ;;  %v2952_v8 = vor.u32 %v2951_v38, %v2948_v40 }
 0x2ca   : > { %7028 = vmatprep.subr.bf16.mxu1 %v12642_v13  ;;  %6177 = vmatmul.mubr.bf16.gmra.mrb[92].mxu0 %v2149_v46  ;;  %v17447_v13 = vshll.u32 %v17443_v0, 16  ;;  %v17193_v46 = vshrl.u32 %v17436_v17, 16  ;;  %v2205_v50 = vshll.u32 %v17448_v36, 16  ;;  %v12664_v4 = vld [vmem:[#allocation9 + $0x5d4] ss:$8 sps:$4 sm:$0xff]   ;;  %v14851_v1 = vcombine.low %v1767_v14, %v1767_v14 }
 0x2cb   : > { %6186 = vmatprep.mubr.bf16.mxu0 %v2173_v63  ;;  %6336 = vmatpush1.bf16.msra.mxu0 %v12673_v21  ;;  %v14826_v63 = vcombine.low %v1747_v56, %v1747_v56  ;;  %v2935_v21 = vsel %vm1277_vm0, %v14788_v18, %v2934_v34  ;;  %v2975_v59 = vrot.slane %v2973_v3, 1  ;;  %v2978_v5 = vrot.slane %v2976_v44, 2  ;;  %v12662_v18 = vld [vmem:[#allocation9 + $0x5d0] ss:$8 sps:$4 sm:$0xff]   ;;  %v17453_v44 = vld [vmem:[#allocation56_spill] sm:$0xff] }
 0x2cc   : > { %v2164_v37 = vrot.slane %v17447_v13, 1  ;;  %6337 = vmatprep.subr.bf16.mxu0 %v12683_v33  ;;  %v2184_v13 = vor.u32 %v17193_v46, %v2172_v16  ;;  %v2962_v33 = vsel %vm1277_vm0, %v14792_v6, %v2961_v52  ;;  %v14836_v56 = vcombine.high %v1767_v14, %v1767_v14  ;;  %v12685_v14 = vld [vmem:[#allocation9 + $0x5f0] ss:$8 sps:$4 sm:$0xff]  }
 0x2cd   : > { %7029 = vmatpush1.bf16.msra.mxu1 %v12640_v55  ;;  %17449 = vst [vmem:[#allocation48_spill] sm:$0xff] %v14826_v63  ;;  %v2188_v55 = vrot.slane %v2186_v29, 1  ;;  %v2178_v22 = vshll.u32 %v14826_v63, 16  ;;  %v2203_v16 = vshrl.u32 %v17448_v36, 16  ;;  %v2207_v29 = vrot.slane %v2205_v50, 1  ;;  %v17455_v50 = vld [vmem:[#allocation58_spill] sm:$0xff] }
 0x2ce   : > { %7030 = vmatprep.subr.bf16.mxu1 %v12655_v24  ;;  %17450 = vst [vmem:[#allocation44_spill] sm:$0xff] %v14836_v56  ;;  %v2165_v24 = vsel %vm17451_vm8, %v2160_v51, %v2164_v37  ;;  %v17211_v3 = vshrl.u32 %v17443_v0, 16  ;;  %v2979_v51 = vor.u32 %v2978_v5, %v2975_v59  ;;  %v2991_v38 = vshrl.u32 %v14836_v56, 16  ;;  %vm17469_vm8 = vmmov %vm17393_vm1 }
 0x2cf   : > { %6338 = vmatpush1.bf16.msra.mxu0 %v12681_v31  ;;  %v2189_v6 = vsel %vm17452_vm11, %v2184_v13, %v2188_v55  ;;  %v2964_v31 = vshrl.u32 %v17453_v44, 16  ;;  %v2994_v36 = vshll.u32 %v14836_v56, 16  ;;  %v2180_v55 = vrot.slane %v2178_v22, 1  ;;  %vm17470_vm11 = vmmov %vm17393_vm1 }
 0x2d0   : > { %6866 = vmatmul.mubr.bf16.gmra.mrb[24].mxu1 %v2935_v21  ;;  %v12678_v21 = vld [vmem:[#allocation9 + $0x5e4] ss:$8 sps:$4 sm:$0xff]   ;;  %v2176_v13 = vor.u32 %v17211_v3, %v2164_v37  ;;  %v2208_v46 = vor.u32 %v2207_v29, %v2203_v16  ;;  %v2953_v59 = vsel %vm1277_vm0, %v2934_v34, %v2952_v8  ;;  %v2980_v56 = vsel %vm1277_vm0, %v2961_v52, %v2979_v51 }
 0x2d1   : > { %6875 = vmatprep.mubr.bf16.mxu1 %v2962_v33  ;;  %7031 = vmatpush1.bf16.msra.mxu1 %v12653_v57  ;;  %v2967_v33 = vshll.u32 %v17453_v44, 16  ;;  %v17454_v57 = vld [vmem:[#allocation59_spill] sm:$0xff]  ;;  %v2966_v5 = vrot.slane %v2964_v31, 1  ;;  %v2993_v17 = vrot.slane %v2991_v38, 1  ;;  %v2191_v0 = vshrl.u32 %v17455_v50, 16 }
 0x2d2   : > { %7032 = vmatprep.subr.bf16.mxu1 %v12664_v4  ;;  %6187 = vmatmul.mubr.bf16.gmra.mrb[96].mxu0 %v2165_v24  ;;  %v2210_v40 = vshll.u32 %v17454_v57, 16  ;;  %v2193_v4 = vshll.u32 %v17455_v50, 16  ;;  %v12676_v24 = vld [vmem:[#allocation9 + $0x5e0] ss:$8 sps:$4 sm:$0xff]   ;;  %v2222_v22 = vshrl.u32 %v17454_v57, 16  ;;  %v2181_v16 = vsel %vm17456_vm7, %v2176_v13, %v2180_v55  ;;  %vm17471_vm7 = vmmov %vm17393_vm1 }
 0x2d3   : > { %6196 = vmatprep.mubr.bf16.mxu0 %v2189_v6  ;;  %v12687_v6 = vld [vmem:[#allocation9 + $0x5f4] ss:$8 sps:$4 sm:$0xff]   ;;  %v2969_v44 = vrot.slane %v2967_v33, 2  ;;  %v2982_v29 = vshrl.u32 %v14851_v1, 16  ;;  %v12693_v52 = vld [vmem:[#allocation9 + $0x604] ss:$8 sps:$4 sm:$0xff]  }
 0x2d4   : > { %v2212_v63 = vrot.slane %v2210_v40, 1  ;;  %v2195_v37 = vrot.slane %v2193_v4, 1  ;;  %v17208_v33 = vshll.u32 %v14367_v26, 16  ;;  %v17458_v40 = vld [vmem:[#allocation60_spill] sm:$0xff]  ;;  %v3028_v4 = vshll.u32 %v14350_v11, 16 }
 0x2d5   : > { %7033 = vmatpush1.bf16.msra.mxu1 %v12662_v18  ;;  %v2996_v18 = vrot.slane %v2994_v36, 2  ;;  %v2970_v31 = vor.u32 %v2969_v44, %v2966_v5  ;;  %v3017_v38 = vshrl.u32 %v17458_v40, 16  ;;  %v3020_v50 = vshll.u32 %v17458_v40, 16 }
 0x2d6   : > { %7034 = vmatprep.subr.bf16.mxu1 %v12678_v21  ;;  %v2213_v34 = vsel %vm17457_vm5, %v2208_v46, %v2212_v63  ;;  %v2985_v21 = vshll.u32 %v14851_v1, 16  ;;  %v3025_v46 = vshrl.u32 %v14350_v11, 16  ;;  %v2224_v13 = vor.u32 %v2222_v22, %v2212_v63  ;;  %vm17473_vm5 = vmmov %vm17393_vm1 }
 0x2d7   : > { %v2997_v36 = vor.u32 %v2996_v18, %v2993_v17  ;;  %v2984_v55 = vrot.slane %v2982_v29, 1  ;;  %v2971_v44 = vsel %vm1277_vm0, %v2952_v8, %v2970_v31  ;;  %v2228_v5 = vrot.slane %v17208_v33, 1  ;;  %v17461_v29 = vld [vmem:[#allocation61_spill] sm:$0xff] }
 0x2d8   : > { %6876 = vmatmul.mubr.bf16.gmra.mrb[28].mxu1 %v2953_v59  ;;  %v3022_v18 = vrot.slane %v3020_v50, 2  ;;  %v3030_v40 = vrot.slane %v3028_v4, 2  ;;  %v2214_v22 = vshrl.u32 %v14359_v61, 16  ;;  %v17206_v8 = vshll.u32 %v14440_v43, 16 }
 0x2d9   : > { %6885 = vmatprep.mubr.bf16.mxu1 %v2980_v56  ;;  %7035 = vmatpush1.bf16.msra.mxu1 %v12676_v24  ;;  %v2198_v56 = vshll.u32 %v14359_v61, 16  ;;  %v2196_v24 = vor.u32 %v2195_v37, %v2191_v0  ;;  %v2998_v17 = vsel %vm1277_vm0, %v2979_v51, %v2997_v36  ;;  %v2229_v63 = vsel %vm17460_vm4, %v2224_v13, %v2228_v5  ;;  %vm17480_vm4 = vmmov %vm17393_vm1 }
 0x2da   : > { %7036 = vmatprep.subr.bf16.mxu1 %v12687_v6  ;;  %6197 = vmatmul.mubr.bf16.gmra.mrb[100].mxu0 %v2181_v16  ;;  %v2987_v6 = vrot.slane %v2985_v21, 2  ;;  %v3019_v16 = vrot.slane %v3017_v38, 1  ;;  %v3000_v21 = vshrl.u32 %v17461_v29, 16  ;;  %v3003_v51 = vshll.u32 %v17461_v29, 16 }
 0x2db   : > { %6206 = vmatprep.mubr.bf16.mxu0 %v2213_v34  ;;  %v2200_v59 = vrot.slane %v2198_v56, 1  ;;  %v3027_v34 = vrot.slane %v3025_v46, 1  ;;  %v3011_v56 = vshll.u32 %v14402_v42, 16  ;;  %v3043_v50 = vshrl.u32 %v14409_v28, 16 }
 0x2dc   : > { %v2988_v37 = vor.u32 %v2987_v6, %v2984_v55  ;;  %v3023_v38 = vor.u32 %v3022_v18, %v3019_v16  ;;  %v3046_v46 = vshll.u32 %v14409_v28, 16  ;;  %v17210_v4 = vshrl.u32 %v14367_v26, 16 }
 0x2dd   : > { %7037 = vmatpush1.bf16.msra.mxu1 %v12685_v14  ;;  %v2201_v0 = vsel %vm17459_vm3, %v2196_v24, %v2200_v59  ;;  %v17202_v14 = vshll.u32 %v14451_v41, 16  ;;  %v3031_v36 = vor.u32 %v3030_v40, %v3027_v34  ;;  %v2216_v13 = vor.u32 %v2214_v22, %v2200_v59  ;;  %vm17477_vm3 = vmmov %vm17393_vm1 }
 0x2de   : > { %7239 = vmatprep.subr.bf16.mxu1 %v12693_v52  ;;  %v3008_v52 = vshrl.u32 %v14402_v42, 16  ;;  %v2989_v24 = vsel %vm1277_vm0, %v2970_v31, %v2988_v37  ;;  %v3002_v6 = vrot.slane %v3000_v21, 1  ;;  %v2220_v18 = vrot.slane %v17206_v8, 1 }
 0x2df   : > { %v2244_v55 = vrot.slane %v17202_v14, 1  ;;  %v3032_v16 = vsel %vm1277_vm0, %v3023_v38, %v3031_v36  ;;  %v3045_v34 = vrot.slane %v3043_v50, 1  ;;  %v3048_v40 = vrot.slane %v3046_v46, 2 }
 0x2e0   : > { %6886 = vmatmul.mubr.bf16.gmra.mrb[32].mxu1 %v2971_v44  ;;  %v3005_v44 = vrot.slane %v3003_v51, 2  ;;  %v2240_v31 = vor.u32 %v17210_v4, %v2228_v5  ;;  %v17200_v59 = vshll.u32 %v14478_v49, 16  ;;  %v17201_v37 = vshll.u32 %v14494_v60, 16 }
 0x2e1   : > { %6895 = vmatprep.mubr.bf16.mxu1 %v2998_v17  ;;  %v3010_v17 = vrot.slane %v3008_v52, 1  ;;  %v3034_v22 = vshrl.u32 %v14460_v39, 16  ;;  %v3037_v29 = vshll.u32 %v14460_v39, 16  ;;  %v3049_v38 = vor.u32 %v3048_v40, %v3045_v34 }
 0x2e2   : > { %6207 = vmatmul.mubr.bf16.gmra.mrb[104].mxu0 %v2201_v0  ;;  %v3013_v0 = vrot.slane %v3011_v56, 2  ;;  %v2245_v21 = vsel %vm17463_vm2, %v2240_v31, %v2244_v55  ;;  %v3006_v51 = vor.u32 %v3005_v44, %v3002_v6  ;;  %v17207_v56 = vshrl.u32 %v14440_v43, 16  ;;  %vm17485_vm2 = vmmov %vm17393_vm1 }
 0x2e3   : > { %6216 = vmatprep.mubr.bf16.mxu0 %v2229_v63  ;;  %v2221_v63 = vsel %vm17462_vm13, %v2216_v13, %v2220_v18  ;;  %v17203_v5 = vshrl.u32 %v14451_v41, 16  ;;  %v3061_v50 = vshrl.u32 %v14475_v27, 16  ;;  %v3064_v46 = vshll.u32 %v14475_v27, 16  ;;  %vm17484_vm13 = vmmov %vm17393_vm1 }
 0x2e4   : > { %v3014_v52 = vor.u32 %v3013_v0, %v3010_v17  ;;  %v2236_v13 = vrot.slane %v17200_v59, 1  ;;  %v2260_v6 = vrot.slane %v17201_v37, 1  ;;  %v3036_v44 = vrot.slane %v3034_v22, 1 }
 0x2e5   : > { %v3039_v17 = vrot.slane %v3037_v29, 2  ;;  %v3050_v40 = vsel %vm1277_vm0, %v3031_v36, %v3049_v38  ;;  %v2232_v31 = vor.u32 %v17207_v56, %v2220_v18  ;;  %v3052_v36 = vshrl.u32 %v14485_v12, 16 }
 0x2e6   : > { %v3015_v0 = vsel %vm1277_vm0, %v3006_v51, %v3014_v52  ;;  %v17204_v51 = vshrl.u32 %v14478_v49, 16  ;;  %v3055_v37 = vshll.u32 %v14485_v12, 16  ;;  %v2279_v4 = vshrl.u32 %v14557_v2, 16 }
 0x2e7   : > { %v2237_v59 = vsel %vm17464_vm10, %v2232_v31, %v2236_v13  ;;  %v3040_v29 = vor.u32 %v3039_v17, %v3036_v44  ;;  %v1768_v44 = vld [vmem:[#allocation2 + $0x138] sm:$0x33]  ;;  %v2293_v17 = vshll.u32 %v14533_v35, 16  ;;  %vm17489_vm10 = vmmov %vm17393_vm1 }
 0x2e8   : > { %6896 = vmatmul.mubr.bf16.gmra.mrb[36].mxu1 %v2989_v24  ;;  %v1748_v24 = vld [vmem:[#allocation2 + $0x130] sm:$0x11]  ;;  %v14934_v8 = vcombine.high %v1768_v44, %v1768_v44 }
 0x2e9   : > { %6905 = vmatprep.mubr.bf16.mxu1 %v3032_v16  ;;  %v2256_v16 = vor.u32 %v17203_v5, %v2244_v55  ;;  %v14908_v34 = vcombine.high %v1748_v24, %v1748_v24  ;;  %v17205_v55 = vshll.u32 %v14531_v15, 16  ;;  %v3041_v31 = vsel %vm1277_vm0, %v3014_v52, %v3040_v29 }
 0x2ea   : > { %6217 = vmatmul.mubr.bf16.gmra.mrb[108].mxu0 %v2221_v63  ;;  %v3063_v63 = vrot.slane %v3061_v50, 1  ;;  %v3079_v50 = vshrl.u32 %v14498_v10, 16  ;;  %v14929_v14 = vcombine.low %v1748_v24, %v1748_v24  ;;  %v3057_v5 = vrot.slane %v3055_v37, 2 }
 0x2eb   : > { %6226 = vmatprep.mubr.bf16.mxu0 %v2245_v21  ;;  %v3066_v21 = vrot.slane %v3064_v46, 2  ;;  %v2261_v22 = vsel %vm17465_vm6, %v2256_v16, %v2260_v6  ;;  %v3082_v46 = vshll.u32 %v14498_v10, 16  ;;  %v17209_v16 = vshrl.u32 %v14494_v60, 16 }
 0x2ec   : > { %v2291_v52 = vshrl.u32 %v14533_v35, 16  ;;  %v2266_v24 = vshll.u32 %v14929_v14, 16  ;;  %v2295_v33 = vrot.slane %v2293_v17, 1  ;;  %v3100_v35 = vshll.u32 %v14934_v8, 16 }
 0x2ed   : > { %v3067_v18 = vor.u32 %v3066_v21, %v3063_v63  ;;  %v2272_v63 = vor.u32 %v17209_v16, %v2260_v6  ;;  %v3070_v6 = vshrl.u32 %v14525_v62, 16  ;;  %v2281_v17 = vshll.u32 %v14557_v2, 16 }
 0x2ee   : > { %v3123_v2 = vshrl.u32 %v14555_v53, 16  ;;  %vm3271_vm6 = vcmask 1045504  }
 0x2ef   : > { %v3072_v16 = vrot.slane %v3070_v6, 1  ;;  %v2283_v3 = vrot.slane %v2281_v17, 1 }
 0x2f0   : > { %6906 = vmatmul.mubr.bf16.gmra.mrb[40].mxu1 %v3015_v0  ;;  %v2274_v0 = vshll.u32 %v14908_v34, 16 }
 0x2f1   : > { %6915 = vmatprep.mubr.bf16.mxu1 %v3050_v40  ;;  %v2248_v40 = vor.u32 %v17204_v51, %v2236_v13  ;;  %v3068_v13 = vsel %vm1277_vm0, %v3049_v38, %v3067_v18  ;;  %v3081_v51 = vrot.slane %v3079_v50, 1 }
 0x2f2   : > { %6227 = vmatmul.mubr.bf16.gmra.mrb[112].mxu0 %v2237_v59  ;;  %v2252_v59 = vrot.slane %v17205_v55, 1  ;;  %v2276_v21 = vrot.slane %v2274_v0, 1  ;;  %v3084_v55 = vrot.slane %v3082_v46, 2  ;;  %v3073_v0 = vshll.u32 %v14525_v62, 16 }
 0x2f3   : > { %6236 = vmatprep.mubr.bf16.mxu0 %v2261_v22  ;;  %v3054_v22 = vrot.slane %v3052_v36, 1  ;;  %v17220_v36 = vshrl.u32 %v14531_v15, 16  ;;  %v2298_v46 = vshll.u32 %v14559_v23, 16 }
 0x2f4   : > { %v2253_v56 = vsel %vm17466_vm14, %v2248_v40, %v2252_v59  ;;  %v2277_v37 = vsel %vm17467_vm9, %v2272_v63, %v2276_v21  ;;  %v3085_v50 = vor.u32 %v3084_v55, %v3081_v51  ;;  %v3097_v40 = vshrl.u32 %v14934_v8, 16 }
 0x2f5   : > { %v3058_v38 = vor.u32 %v3057_v5, %v3054_v22  ;;  %v3075_v63 = vrot.slane %v3073_v0, 2  ;;  %v14950_v21 = vcombine.low %v1768_v44, %v1768_v44  ;;  %v2300_v51 = vrot.slane %v2298_v46, 1 }
 0x2f6   : > { %v3086_v55 = vsel %vm1277_vm0, %v3067_v18, %v3085_v50  ;;  %v3099_v22 = vrot.slane %v3097_v40, 1  ;;  %v17214_v44 = vshll.u32 %v14539_v30, 16  ;;  %v3126_v46 = vshll.u32 %v14555_v53, 16 }
 0x2f7   : > { %v3059_v5 = vsel %vm1277_vm0, %v3040_v29, %v3058_v38  ;;  %v2286_v29 = vshll.u32 %v14575_v32, 16  ;;  %v3088_v18 = vshrl.u32 %v14950_v21, 16  ;;  %v3091_v6 = vshll.u32 %v14950_v21, 16 }
 0x2f8   : > { %6916 = vmatmul.mubr.bf16.gmra.mrb[44].mxu1 %v3041_v31  ;;  %v2264_v31 = vor.u32 %v17220_v36, %v2252_v59  ;;  %v2310_v59 = vshrl.u32 %v14559_v23, 16  ;;  %v2284_v40 = vor.u32 %v2283_v3, %v2279_v4  ;;  %v1769_v36 = vld [vmem:[#allocation2 + $0x1a8] sm:$0x33] }
 0x2f9   : > { %6925 = vmatprep.mubr.bf16.mxu1 %v3068_v13  ;;  %v2268_v13 = vrot.slane %v2266_v24, 1  ;;  %v3076_v24 = vor.u32 %v3075_v63, %v3072_v16  ;;  %v3131_v16 = vshrl.u32 %v14562_v20, 16  ;;  %v3090_v63 = vrot.slane %v3088_v18, 1 }
 0x2fa   : > { %6237 = vmatmul.mubr.bf16.gmra.mrb[116].mxu0 %v2253_v56  ;;  %v2296_v56 = vor.u32 %v2295_v33, %v2291_v52 }
 0x2fb   : > { %6246 = vmatprep.mubr.bf16.mxu0 %v2277_v37  ;;  %v3102_v37 = vrot.slane %v3100_v35, 2  ;;  %v2269_v33 = vsel %vm17393_vm1, %v2264_v31, %v2268_v13  ;;  %v2312_v35 = vor.u32 %v2310_v59, %v2300_v51  ;;  %v3077_v17 = vsel %vm1277_vm0, %v3058_v38, %v3076_v24 }
 0x2fc   : > { %v2301_v52 = vsel %vm17468_vm12, %v2296_v56, %v2300_v51  ;;  %v3134_v31 = vshll.u32 %v14562_v20, 16  ;;  %v2288_v13 = vrot.slane %v2286_v29, 1  ;;  %v2316_v56 = vrot.slane %v17214_v44, 1 }
 0x2fd   : > { %v3103_v0 = vor.u32 %v3102_v37, %v3099_v22  ;;  %v3125_v22 = vrot.slane %v3123_v2, 1  ;;  %v3128_v37 = vrot.slane %v3126_v46, 2  ;;  %v3133_v4 = vrot.slane %v3131_v16, 1 }
 0x2fe   : > { %v2289_v53 = vsel %vm17469_vm8, %v2284_v40, %v2288_v13  ;;  %v2317_v3 = vsel %vm17470_vm11, %v2312_v35, %v2316_v56  ;;  %v3136_v38 = vrot.slane %v3134_v31, 2  ;;  %v2302_v51 = vshrl.u32 %v14575_v32, 16 }
 0x2ff   : > { %v17219_v59 = vshrl.u32 %v14539_v30, 16  ;;  %v3106_v29 = vshrl.u32 %v14569_v45, 16  ;;  %v3129_v18 = vor.u32 %v3128_v37, %v3125_v22  ;;  %v3152_v2 = vshll.u32 %v14573_v9, 16 }
 0x300   : > { %6926 = vmatmul.mubr.bf16.gmra.mrb[48].mxu1 %v3059_v5  ;;  %v3093_v5 = vrot.slane %v3091_v6, 2  ;;  %v17213_v6 = vshll.u32 %v14544_v25, 16  ;;  %v3114_v46 = vshrl.u32 %v14578_v54, 16  ;;  %v3117_v40 = vshll.u32 %v14578_v54, 16 }
 0x301   : > { %6935 = vmatprep.mubr.bf16.mxu1 %v3086_v55  ;;  %v3104_v55 = vsel %vm1277_vm0, %v3085_v50, %v3103_v0  ;;  %v3109_v50 = vshll.u32 %v14569_v45, 16  ;;  %v3149_v0 = vshrl.u32 %v14573_v9, 16  ;;  %v3137_v35 = vor.u32 %v3136_v38, %v3133_v4  ;;  %v17472_v38 = vld [vmem:[#allocation68_spill] sm:$0xff] }
 0x302   : > { %6247 = vmatmul.mubr.bf16.gmra.mrb[120].mxu0 %v2269_v33  ;;  %v3094_v33 = vor.u32 %v3093_v5, %v3090_v63  ;;  %v2328_v16 = vor.u32 %v17219_v59, %v2316_v56  ;;  %v3108_v63 = vrot.slane %v3106_v29, 1  ;;  %v2308_v22 = vrot.slane %v17213_v6, 1 }
 0x303   : > { %6256 = vmatprep.mubr.bf16.mxu0 %v2301_v52  ;;  %v17212_v52 = vshll.u32 %v14592_v47, 16  ;;  %v3111_v5 = vrot.slane %v3109_v50, 2  ;;  %v3151_v37 = vrot.slane %v3149_v0, 1  ;;  %v17215_v4 = vshll.u32 %v14607_v58, 16  ;;  %v17474_v50 = vld [vmem:[#allocation63_spill] sm:$0xff] }
 0x304   : > { %v3095_v31 = vsel %vm1277_vm0, %v3076_v24, %v3094_v33  ;;  %v17216_v24 = vshrl.u32 %v14544_v25, 16  ;;  %v3143_v0 = vshll.u32 %v17474_v50, 16  ;;  %v17226_v59 = vshrl.u32 %v17472_v38, 16 }
 0x305   : > { %v2332_v45 = vrot.slane %v17212_v52, 1  ;;  %v3112_v29 = vor.u32 %v3111_v5, %v3108_v63  ;;  %v1749_v52 = vld [vmem:[#allocation2 + $0x1a0] sm:$0x11]  ;;  %v2324_v63 = vrot.slane %v17215_v4, 1  ;;  %v17478_v4 = vld [vmem:[#allocation70_spill] sm:$0xff] }
 0x306   : > { %v15008_v44 = vcombine.high %v1749_v52, %v1749_v52 }
 0x307   : > { %v2333_v33 = vsel %vm17473_vm5, %v2328_v16, %v2332_v45  ;;  %v2320_v16 = vor.u32 %v17216_v24, %v2308_v22  ;;  %v17224_v24 = vshll.u32 %v17478_v4, 16 }
 0x308   : > { %6936 = vmatmul.mubr.bf16.gmra.mrb[52].mxu1 %v3077_v17  ;;  %v2304_v17 = vor.u32 %v2302_v51, %v2288_v13  ;;  %v3116_v13 = vrot.slane %v3114_v46, 1  ;;  %v17218_v51 = vshll.u32 %v17472_v38, 16  ;;  %17476 = vst [vmem:[#allocation51_spill] sm:$0xff] %v15008_v44  ;;  %v15137_v38 = vld [vmem:[#allocation2 + $0x80] sm:$0xff] }
 0x309   : > { %6945 = vmatprep.mubr.bf16.mxu1 %v3104_v55  ;;  %v3138_v55 = vsel %vm1277_vm0, %v3129_v18, %v3137_v35  ;;  %v3140_v18 = vshrl.u32 %v17474_v50, 16 }
 0x30a   : > { %6257 = vmatmul.mubr.bf16.gmra.mrb[124].mxu0 %v2289_v53  ;;  %v3154_v53 = vrot.slane %v3152_v2, 2  ;;  %v2309_v56 = vsel %vm17471_vm7, %v2304_v17, %v2308_v22  ;;  %v12728_v2 = vld [vmem:[#allocation9 + $0x804] ss:$8 sps:$4 sm:$0xff]   ;;  %v17475_v17 = vld [vmem:[#allocation64_spill] sm:$0xff]  ;;  %vm3972_vm7 = vcmask 1044480  }
 0x30b   : > { %6266 = vmatprep.mubr.bf16.mxu0 %v2317_v3  ;;  %v3119_v3 = vrot.slane %v3117_v40, 2  ;;  %v17217_v40 = vshrl.u32 %v14592_v47, 16  ;;  %7705 = vmatprep.subr.bf16.mxu0 %v12728_v2  ;;  %v2325_v2 = vsel %vm17477_vm3, %v2320_v16, %v2324_v63 }
 0x30c   : > { %v3155_v46 = vor.u32 %v3154_v53, %v3151_v37  ;;  %v2348_v37 = vrot.slane %v17218_v51, 1 }
 0x30d   : > { %v3120_v6 = vor.u32 %v3119_v3, %v3116_v13  ;;  %v2344_v5 = vor.u32 %v17217_v40, %v2332_v45  ;;  %v17479_v45 = vld [vmem:[#allocation65_spill] sm:$0xff] }
 0x30e   : > { %v3156_v13 = vsel %vm1277_vm0, %v3137_v35, %v3155_v46  ;;  %v3158_v40 = vshrl.u32 %v17479_v45, 16  ;;  %v3161_v51 = vshll.u32 %v17479_v45, 16  ;;  %v15031_v45 = vcombine.high %v1769_v36, %v1769_v36 }
 0x30f   : > { %v3121_v53 = vsel %vm1277_vm0, %v3112_v29, %v3120_v6  ;;  %v2349_v29 = vsel %vm17480_vm4, %v2344_v5, %v2348_v37  ;;  %v2340_v5 = vrot.slane %v17224_v24, 1 }
 0x310   : > { %6946 = vmatmul.mubr.bf16.gmra.mrb[56].mxu1 %v3095_v31  ;;  %v3167_v31 = vshrl.u32 %v17475_v17, 16  ;;  %17483 = vst [vmem:[#allocation59_spill] sm:$0xff] %v15031_v45 }
 0x311   : > { %6955 = vmatprep.mubr.bf16.mxu1 %v3138_v55  ;;  %v3170_v55 = vshll.u32 %v17475_v17, 16 }
 0x312   : > { %6267 = vmatmul.mubr.bf16.gmra.mrb[128].mxu0 %v2309_v56  ;;  %v3142_v56 = vrot.slane %v3140_v18, 1  ;;  %v3169_v3 = vrot.slane %v3167_v31, 1  ;;  %v17481_v31 = vld [vmem:[#allocation66_spill] sm:$0xff] }
 0x313   : > { %6276 = vmatprep.mubr.bf16.mxu0 %v2333_v33  ;;  %v3145_v33 = vrot.slane %v3143_v0, 2  ;;  %v3172_v22 = vrot.slane %v3170_v55, 2  ;;  %v17222_v0 = vshrl.u32 %v14607_v58, 16  ;;  %v3185_v55 = vshrl.u32 %v17481_v31, 16 }
 0x314   : > { %v3188_v16 = vshll.u32 %v17481_v31, 16 }
 0x315   : > { %v3146_v18 = vor.u32 %v3145_v33, %v3142_v56  ;;  %v3173_v35 = vor.u32 %v3172_v22, %v3169_v3  ;;  %v3160_v56 = vrot.slane %v3158_v40, 1  ;;  %v3163_v33 = vrot.slane %v3161_v51, 2  ;;  %v1750_v51 = vld [vmem:[#allocation2] sm:$0xee] }
 0x316   : > { %v2360_v3 = vor.u32 %v17226_v59, %v2348_v37 }
 0x317   : > { %v3174_v31 = vsel %vm1277_vm0, %v3155_v46, %v3173_v35  ;;  %v3164_v40 = vor.u32 %v3163_v33, %v3160_v56 }
 0x318   : > { %6956 = vmatmul.mubr.bf16.gmra.mrb[60].mxu1 %v3121_v53  ;;  %v2362_v53 = vshll.u32 %v15008_v44, 16  ;;  %v17486_v44 = vld [vmem:[#allocation69_spill] sm:$0xff] }
 0x319   : > { %6965 = vmatprep.mubr.bf16.mxu1 %v3156_v13  ;;  %v2336_v13 = vor.u32 %v17222_v0, %v2324_v63  ;;  %v3187_v63 = vrot.slane %v3185_v55, 1  ;;  %v3190_v0 = vrot.slane %v3188_v16, 2  ;;  %v3176_v37 = vshrl.u32 %v17486_v44, 16 }
 0x31a   : > { %6277 = vmatmul.mubr.bf16.gmra.mrb[132].mxu0 %v2325_v2  ;;  %v15025_v2 = vcombine.low %v1749_v52, %v1749_v52  ;;  %v2364_v22 = vrot.slane %v2362_v53, 1  ;;  %v3179_v53 = vshll.u32 %v17486_v44, 16  ;;  %v17231_v55 = vshrl.u32 %v17478_v4, 16 }
 0x31b   : > { %6286 = vmatprep.mubr.bf16.mxu0 %v2349_v29  ;;  %v3147_v29 = vsel %vm1277_vm0, %v3120_v6, %v3146_v18  ;;  %v2341_v24 = vsel %vm17484_vm13, %v2336_v13, %v2340_v5  ;;  %v3191_v46 = vor.u32 %v3190_v0, %v3187_v63  ;;  %v3203_v16 = vshrl.u32 %v15031_v45, 16  ;;  %v12898_v13 = vld [vmem:[#allocation2 + $0x8] sm:$0xff] }
 0x31c   : > { %17482 = vst [vmem:[#allocation57_spill] sm:$0xff] %v15025_v2  ;;  %v2354_v52 = vshll.u32 %v15025_v2, 16  ;;  %v2365_v6 = vsel %vm17485_vm2, %v2360_v3, %v2364_v22  ;;  %v10826_v56 = vcombine.high %v1750_v51, %v12898_v13  ;;  %v3165_v33 = vsel %vm1277_vm0, %v3146_v18, %v3164_v40  ;;  %v17487_v3 = vld [vmem:[#allocation23_spill] sm:$0xff] }
 0x31d   : > { %v2431_v22 = vrot.slane %v17487_v3, 1  ;;  %v3178_v59 = vrot.slane %v3176_v37, 1  ;;  %v3181_v44 = vrot.slane %v3179_v53, 2  ;;  %v3192_v0 = vsel %vm1277_vm0, %v3173_v35, %v3191_v46  ;;  %v17491_v3 = vld [vmem:[#allocation24_spill] sm:$0xff] }
 0x31e   : > { %v3205_v63 = vrot.slane %v3203_v16, 1  ;;  %v10825_v53 = vcombine.low %v1750_v51, %v12898_v13  ;;  %v12899_v13 = vld [vmem:[#allocation2 + $0x10] sm:$0xff] }
 0x320   : > { %6966 = vmatmul.mubr.bf16.gmra.mrb[64].mxu1 %v3147_v29  ;;  %v2356_v29 = vrot.slane %v2354_v52, 1 }
 0x321   : > { %6975 = vmatprep.mubr.bf16.mxu1 %v3174_v31  ;;  %v3206_v31 = vshll.u32 %v15031_v45, 16  ;;  %v2430_v45 = vrot.slane %v10826_v56, 1  ;;  %v2427_v56 = vrot.slane %v10825_v53, 1 }
 0x322   : > { %6287 = vmatmul.mubr.bf16.gmra.mrb[136].mxu0 %v2341_v24  ;;  %v2352_v24 = vor.u32 %v17231_v55, %v2340_v5  ;;  %v3182_v5 = vor.u32 %v3181_v44, %v3178_v59  ;;  %v17490_v44 = vld [vmem:[#allocation22_spill] sm:$0xff] }
 0x323   : > { %6296 = vmatprep.mubr.bf16.mxu0 %v2365_v6  ;;  %v15045_v6 = vcombine.low %v1769_v36, %v1769_v36  ;;  %v3208_v2 = vrot.slane %v3206_v31, 2  ;;  %v2432_v18 = vsel %vm2426_vm15, %v2430_v45, %v2431_v22  ;;  %v2435_v59 = vrot.slane %v17490_v44, 1  ;;  %v1770_v45 = vld [vmem:[#allocation2 + $0x8] sm:$0xcc]  ;;  %v17511_v44 = vld [vmem:[#allocation39_spill] sm:$0xff] }
 0x324   : > { %v2357_v17 = vsel %vm17489_vm10, %v2352_v24, %v2356_v29  ;;  %v3183_v35 = vsel %vm1277_vm0, %v3164_v40, %v3182_v5  ;;  %v12726_v24 = vld [vmem:[#allocation9 + $0x800] ss:$8 sps:$4 sm:$0xff]   ;;  %v12731_v29 = vld [vmem:[#allocation9 + $0x814] ss:$8 sps:$4 sm:$0xff]   ;;  %v17514_v4 = vrot.slane %v17511_v44, 1  ;;  %v17526_v58 = vrot.slane %v17511_v44, 1 }
 0x325   : > { %17488 = vst [vmem:[#allocation58_spill] sm:$0xff] %v15045_v6  ;;  %v3194_v52 = vshrl.u32 %v15045_v6, 16  ;;  %v3197_v37 = vshll.u32 %v15045_v6, 16  ;;  %v3209_v36 = vor.u32 %v3208_v2, %v3205_v63  ;;  %v10890_v2 = vcombine.high %v1770_v45, %v12899_v13  ;;  %v12729_v63 = vld [vmem:[#allocation9 + $0x810] ss:$8 sps:$4 sm:$0xff]  }
 0x326   : > { %v12712_v6 = vld [vmem:[#allocation9 + $0x654] ss:$8 sps:$4 sm:$0xff]  }
 0x327   : > { %v3196_v16 = vrot.slane %v3194_v52, 1  ;;  %v3199_v31 = vrot.slane %v3197_v37, 2  ;;  %v17492_v37 = vld [vmem:[#allocation27_spill] sm:$0xff] }
 0x328   : > { %6976 = vmatmul.mubr.bf16.gmra.mrb[68].mxu1 %v3165_v33  ;;  %v2428_v33 = vrot.slane %v13906_v19, 1  ;;  %v2436_v19 = vsel %vm2426_vm15, %v2431_v22, %v2435_v59  ;;  %v2439_v53 = vrot.slane %v17492_v37, 1  ;;  %v12735_v22 = vld [vmem:[#allocation9 + $0x820] ss:$8 sps:$4 sm:$0xff]   ;;  %v17530_v44 = vld [vmem:[#allocation47_spill] sm:$0xff] }
 0x329   : > { %6985 = vmatprep.mubr.bf16.mxu1 %v3192_v0  ;;  %v3200_v40 = vor.u32 %v3199_v31, %v3196_v16  ;;  %v3276_v0 = vrot.slane %v17491_v3, 2  ;;  %v10889_v16 = vcombine.low %v1770_v45, %v12899_v13  ;;  %v12740_v31 = vld [vmem:[#allocation9 + $0x834] ss:$8 sps:$4 sm:$0xff]   ;;  %v12691_v3 = vld [vmem:[#allocation9 + $0x600] ss:$8 sps:$4 sm:$0xff]   ;;  %v17253_v54 = vrot.slane %v17530_v44, 1 }
 0x32a   : > { %6297 = vmatmul.mubr.bf16.gmra.mrb[140].mxu0 %v2357_v17  ;;  %v3210_v17 = vsel %vm1277_vm0, %v3191_v46, %v3209_v36  ;;  %v2429_v51 = vsel %vm2426_vm15, %v2427_v56, %v2428_v33  ;;  %v12737_v46 = vld [vmem:[#allocation9 + $0x824] ss:$8 sps:$4 sm:$0xff]   ;;  %v12696_v13 = vld [vmem:[#allocation9 + $0x614] ss:$8 sps:$4 sm:$0xff]  }
 0x32b   : > { %6339 = vmatprep.mubr.bf16.mxu0 %v2432_v18  ;;  %v3275_v18 = vrot.slane %v10890_v2, 2  ;;  %v3201_v52 = vsel %vm1277_vm0, %v3182_v5, %v3200_v40  ;;  %v3272_v40 = vrot.slane %v10889_v16, 2  ;;  %vm17521_vm0 = vsmask.f32 5376 }
 0x32c   : > { %vm17531_vm14 = vmmov %vm17521_vm0 }
 0x32d   : > { %v3277_v36 = vsel %vm3271_vm6, %v3275_v18, %v3276_v0  ;;  %vm17534_vm9 = vmmov %vm17521_vm0 }
 0x32e   : > { %vm17554_vm1 = vmmov %vm17521_vm0 }
 0x32f   : > { %vm17557_vm12 = vmmov %vm17521_vm0 }
 0x330   : > { %6986 = vmatmul.mubr.bf16.gmra.mrb[72].mxu1 %v3183_v35  ;;  %v17493_v35 = vld [vmem:[#allocation26_spill] sm:$0xff]  ;;  %vm17570_vm8 = vmmov %vm17521_vm0 }
 0x331   : > { %6995 = vmatprep.mubr.bf16.mxu1 %v3210_v17  ;;  %v2433_v56 = vrot.slane %v17493_v35, 1  ;;  %vm17572_vm11 = vmmov %vm17521_vm0 }
 0x332   : > { %6340 = vmatmul.mubr.bf16.vlgmr.msra.gmra.mrb[64].mxu0 %v2429_v51  ;;  %v17495_v51 = vld [vmem:[#allocation28_spill] sm:$0xff]  ;;  %vm17661_vm5 = vmmov %vm17521_vm0 }
 0x333   : > { %6349 = vmatprep.mubr.bf16.mxu0 %v2436_v19  ;;  %7706 = vmatpush1.bf16.msra.mxu0 %v12726_v24  ;;  %v2434_v17 = vsel %vm2426_vm15, %v2428_v33, %v2433_v56  ;;  %v2440_v24 = vsel %vm2426_vm15, %v2435_v59, %v2439_v53  ;;  %v3280_v2 = vrot.slane %v17495_v51, 2  ;;  %v12738_v19 = vld [vmem:[#allocation9 + $0x830] ss:$8 sps:$4 sm:$0xff]   ;;  %v17497_v33 = vld [vmem:[#allocation32_spill] sm:$0xff]  ;;  %vm17668_vm3 = vmmov %vm17521_vm0 }
 0x334   : > { %7707 = vmatprep.subr.bf16.mxu0 %v12731_v29  ;;  %v17494_v29 = vld [vmem:[#allocation25_spill] sm:$0xff]  ;;  %vm17672_vm4 = vmmov %vm17521_vm0 }
 0x335   : > { %v3273_v5 = vrot.slane %v17494_v29, 2  ;;  %v3281_v59 = vsel %vm3271_vm6, %v3276_v0, %v3280_v2  ;;  %v17498_v29 = vld [vmem:[#allocation29_spill] sm:$0xff]  ;;  %v12748_v0 = vld [vmem:[#allocation9 + $0x850] ss:$8 sps:$4 sm:$0xff]   ;;  %vm17676_vm13 = vmmov %vm17521_vm0 }
 0x336   : > { %v3278_v51 = vrot.slane %v17498_v29, 2  ;;  %vm17679_vm2 = vmmov %vm17521_vm0 }
 0x337   : > { %7708 = vmatpush1.bf16.msra.mxu0 %v12729_v63  ;;  %v17496_v63 = vld [vmem:[#allocation30_spill] sm:$0xff]  ;;  %v3274_v18 = vsel %vm3271_vm6, %v3272_v40, %v3273_v5  ;;  %v17499_v40 = vld [vmem:[#allocation31_spill] sm:$0xff]  ;;  %vm17684_vm10 = vmmov %vm17521_vm0 }
 0x338   : > { %6996 = vmatmul.mubr.bf16.gmra.mrb[76].mxu1 %v3201_v52  ;;  %7709 = vmatprep.subr.bf16.mxu0 %v12737_v46  ;;  %v2437_v45 = vrot.slane %v17496_v63, 1  ;;  %v12746_v46 = vld [vmem:[#allocation9 + $0x844] ss:$8 sps:$4 sm:$0xff]   ;;  %v2443_v52 = vrot.slane %v17497_v33, 1  ;;  %v12900_v33 = vld [vmem:[#allocation2 + $0x78] sm:$0xff] }
 0x339   : > { %7038 = vmatprep.mubr.bf16.mxu1 %v3277_v36  ;;  %v12744_v36 = vld [vmem:[#allocation9 + $0x840] ss:$8 sps:$4 sm:$0xff]   ;;  %v15091_v63 = vld [vmem:[#allocation2 + $0x18] sm:$0xff] }
 0x33a   : > { %6350 = vmatmul.mubr.bf16.gmra.mrb[68].mxu0 %v2434_v17  ;;  %v12750_v17 = vld [vmem:[#allocation9 + $0x854] ss:$8 sps:$4 sm:$0xff]   ;;  %v2438_v16 = vsel %vm2426_vm15, %v2433_v56, %v2437_v45  ;;  %17506 = vst [vmem:[#allocation61_spill] sm:$0xff] %v15091_v63 }
 0x33b   : > { %6359 = vmatprep.mubr.bf16.mxu0 %v2440_v24  ;;  %7710 = vmatpush1.bf16.msra.mxu0 %v12735_v22  ;;  %v12694_v22 = vld [vmem:[#allocation9 + $0x610] ss:$8 sps:$4 sm:$0xff]   ;;  %v2444_v24 = vsel %vm2426_vm15, %v2439_v53, %v2443_v52  ;;  %v12704_v56 = vld [vmem:[#allocation9 + $0x634] ss:$8 sps:$4 sm:$0xff]   ;;  %v17502_v53 = vshll.u32 %v17493_v35, 16 }
 0x33c   : > { %7711 = vmatprep.subr.bf16.mxu0 %v12740_v31  ;;  %v12699_v31 = vld [vmem:[#allocation9 + $0x624] ss:$8 sps:$4 sm:$0xff]  }
 0x33d   : > { %v3617_v29 = vrot.slane %v17502_v53, 3  ;;  %v15086_v53 = vld [vmem:[#allocation2 + $0x10] sm:$0xcc] }
 0x33e   : > { %17504 = vst [vmem:[#allocation60_spill] sm:$0xff] %v15086_v53 }
 0x33f   : > { %7712 = vmatpush1.bf16.msra.mxu0 %v12738_v19  ;;  %v12697_v19 = vld [vmem:[#allocation9 + $0x620] ss:$8 sps:$4 sm:$0xff]  }
 0x340   : > { %7039 = vmatmul.mubr.bf16.vlgmr.msra.gmra.mrb[0].mxu1 %v3274_v18  ;;  %7713 = vmatprep.subr.bf16.mxu0 %v12746_v46  ;;  %v3284_v18 = vrot.slane %v17499_v40, 2  ;;  %v3279_v46 = vsel %vm3271_vm6, %v3273_v5, %v3278_v51 }
 0x341   : > { %7240 = vmatpush1.bf16.msra.mxu1 %v12691_v3  ;;  %7048 = vmatprep.mubr.bf16.mxu1 %v3281_v59  ;;  %v17500_v3 = vld [vmem:[#allocation35_spill] sm:$0xff] }
 0x342   : > { %7241 = vmatprep.subr.bf16.mxu1 %v12696_v13  ;;  %6360 = vmatmul.mubr.bf16.gmra.mrb[72].mxu0 %v2438_v16  ;;  %v2441_v59 = vrot.slane %v17500_v3, 1  ;;  %v12754_v13 = vld [vmem:[#allocation9 + $0x864] ss:$8 sps:$4 sm:$0xff]   ;;  %v17501_v16 = vld [vmem:[#allocation71_spill] sm:$0xff] }
 0x343   : > { %6369 = vmatprep.mubr.bf16.mxu0 %v2444_v24  ;;  %7714 = vmatpush1.bf16.msra.mxu0 %v12744_v36  ;;  %v2447_v55 = vrot.slane %v17501_v16, 1  ;;  %v17503_v24 = vshrl.u32 %v17493_v35, 16  ;;  %v3285_v36 = vsel %vm3271_vm6, %v3280_v2, %v3284_v18  ;;  %v12760_v3 = vld [vmem:[#allocation9 + $0x874] ss:$8 sps:$4 sm:$0xff]   ;;  %v12708_v16 = vld [vmem:[#allocation9 + $0x644] ss:$8 sps:$4 sm:$0xff]  }
 0x344   : > { %7715 = vmatprep.subr.bf16.mxu0 %v12750_v17  ;;  %v12752_v17 = vld [vmem:[#allocation9 + $0x860] ss:$8 sps:$4 sm:$0xff]   ;;  %v2442_v5 = vsel %vm2426_vm15, %v2437_v45, %v2441_v59  ;;  %v12758_v45 = vld [vmem:[#allocation9 + $0x870] ss:$8 sps:$4 sm:$0xff]   ;;  %v12764_v35 = vld [vmem:[#allocation9 + $0x884] ss:$8 sps:$4 sm:$0xff]  }
 0x345   : > { %7242 = vmatpush1.bf16.msra.mxu1 %v12694_v22  ;;  %v3616_v40 = vrot.slane %v17503_v24, 2  ;;  %v15083_v22 = vld [vmem:[#allocation2 + $0x70] sm:$0xee]  ;;  %v17505_v24 = vld [vmem:[#allocation33_spill] sm:$0xff] }
 0x346   : > { %7243 = vmatprep.subr.bf16.mxu1 %v12699_v31  ;;  %v12702_v31 = vld [vmem:[#allocation9 + $0x630] ss:$8 sps:$4 sm:$0xff]   ;;  %v3282_v2 = vrot.slane %v17505_v24, 2 }
 0x347   : > { %7716 = vmatpush1.bf16.msra.mxu0 %v12748_v0  ;;  %v10828_v0 = vcombine.high %v15083_v22, %v12900_v33 }
 0x348   : > { %7049 = vmatmul.mubr.bf16.gmra.mrb[4].mxu1 %v3279_v46  ;;  %7717 = vmatprep.subr.bf16.mxu0 %v12754_v13  ;;  %v2448_v46 = vsel %vm2426_vm15, %v2443_v52, %v2447_v55  ;;  %v12706_v13 = vld [vmem:[#allocation9 + $0x640] ss:$8 sps:$4 sm:$0xff]   ;;  %v1775_v55 = vld [vmem:[#allocation2 + $0x58] sm:$0xff]  ;;  %v17509_v52 = vld [vmem:[#allocation34_spill] sm:$0xff]  ;;  %v3283_v37 = vsel %vm3271_vm6, %v3278_v51, %v3282_v2 }
 0x349   : > { %7058 = vmatprep.mubr.bf16.mxu1 %v3285_v36  ;;  %7244 = vmatpush1.bf16.msra.mxu1 %v12697_v19  ;;  %v15095_v19 = vcombine.low %v15086_v53, %v15091_v63  ;;  %v3288_v36 = vrot.slane %v17509_v52, 2  ;;  %v2452_v53 = vrot.slane %v10828_v0, 1  ;;  %v1786_v52 = vld [vmem:[#allocation2 + $0x60] sm:$0x77]  ;;  %v12710_v51 = vld [vmem:[#allocation9 + $0x650] ss:$8 sps:$4 sm:$0xff]  }
 0x34a   : > { %7245 = vmatprep.subr.bf16.mxu1 %v12704_v56  ;;  %6370 = vmatmul.mubr.bf16.gmra.mrb[76].mxu0 %v2442_v5  ;;  %v15097_v56 = vor.u32 %v3617_v29, %v3616_v40  ;;  %v17510_v5 = vld [vmem:[#allocation72_spill] sm:$0xff]  ;;  %v12902_v40 = vld [vmem:[#allocation2 + $0x50] sm:$0xff] }
 0x34b   : > { %17507 = vst [vmem:[#allocation23_spill] sm:$0xff] %v15095_v19  ;;  %6379 = vmatprep.mubr.bf16.mxu0 %v2448_v46  ;;  %7718 = vmatpush1.bf16.msra.mxu0 %v12752_v17  ;;  %v2445_v24 = vrot.slane %v17510_v5, 1  ;;  %v3609_v17 = vshrl.u32 %v15095_v19, 16  ;;  %v3289_v29 = vsel %vm3271_vm6, %v3284_v18, %v3288_v36  ;;  %v10827_v5 = vcombine.low %v15083_v22, %v12900_v33  ;;  %v12770_v0 = vld [vmem:[#allocation9 + $0x894] ss:$8 sps:$4 sm:$0xff]   ;;  %v17516_v33 = vld [vmem:[#allocation37_spill] sm:$0xff] }
 0x34c   : > { %17508 = vst [vmem:[#allocation24_spill] sm:$0xff] %v15097_v56  ;;  %7719 = vmatprep.subr.bf16.mxu0 %v12760_v3  ;;  %v12762_v3 = vld [vmem:[#allocation9 + $0x880] ss:$8 sps:$4 sm:$0xff]   ;;  %v15109_v46 = vcombine.low %v12902_v40, %v1775_v55  ;;  %v12715_v18 = vld [vmem:[#allocation9 + $0x664] ss:$8 sps:$4 sm:$0xff]   ;;  %v3292_v22 = vrot.slane %v17516_v33, 2 }
 0x34d   : > { %7246 = vmatpush1.bf16.msra.mxu1 %v12702_v31  ;;  %v15105_v31 = vcombine.high %v12902_v40, %v1775_v55  ;;  %v3611_v63 = vrot.slane %v3609_v17, 2  ;;  %v12768_v55 = vld [vmem:[#allocation9 + $0x890] ss:$8 sps:$4 sm:$0xff]   ;;  %v15119_v17 = vcombine.high %v1786_v52, %v1786_v52 }
 0x34e   : > { %7247 = vmatprep.subr.bf16.mxu1 %v12708_v16  ;;  %v3612_v16 = vshll.u32 %v15095_v19, 16  ;;  %17513 = vst [vmem:[#allocation28_spill] sm:$0xff] %v15109_v46  ;;  %v2454_v19 = vsel %vm2426_vm15, %v2452_v53, %v17514_v4  ;;  %v17519_v40 = vld [vmem:[#allocation42_spill] sm:$0xff]  ;;  %v12713_v4 = vld [vmem:[#allocation9 + $0x660] ss:$8 sps:$4 sm:$0xff]  }
 0x34f   : > { %7720 = vmatpush1.bf16.msra.mxu0 %v12758_v45  ;;  %17512 = vst [vmem:[#allocation25_spill] sm:$0xff] %v15105_v31  ;;  %17517 = vst [vmem:[#allocation29_spill] sm:$0xff] %v15119_v17  ;;  %v3661_v53 = vshll.u32 %v15105_v31, 16 }
 0x350   : > { %7059 = vmatmul.mubr.bf16.gmra.mrb[8].mxu1 %v3283_v37  ;;  %v2446_v37 = vsel %vm2426_vm15, %v2441_v59, %v2445_v24  ;;  %7721 = vmatprep.subr.bf16.mxu0 %v12764_v35  ;;  %v3614_v45 = vrot.slane %v3612_v16, 3  ;;  %v3658_v59 = vshrl.u32 %v15105_v31, 16  ;;  %v2449_v24 = vrot.slane %v10827_v5, 1 }
 0x351   : > { %7068 = vmatprep.mubr.bf16.mxu1 %v3289_v29  ;;  %7248 = vmatpush1.bf16.msra.mxu1 %v12706_v13  ;;  %v17515_v29 = vld [vmem:[#allocation36_spill] sm:$0xff]  ;;  %v3663_v33 = vrot.slane %v3661_v53, 3  ;;  %v3652_v31 = vshll.u32 %v15109_v46, 16  ;;  %v12718_v53 = vld [vmem:[#allocation9 + $0x670] ss:$8 sps:$4 sm:$0xff]  }
 0x352   : > { %7249 = vmatprep.subr.bf16.mxu1 %v12712_v6  ;;  %6380 = vmatmul.mubr.bf16.gmra.mrb[80].mxu0 %v2446_v37  ;;  %v17243_v50 = vrot.slane %v17515_v29, 2  ;;  %v15117_v13 = vld [vmem:[#allocation2 + $0x78] sm:$0xcc]  ;;  %v15121_v6 = vcombine.low %v1786_v52, %v1786_v52  ;;  %v3615_v35 = vor.u32 %v3614_v45, %v3611_v63  ;;  %v12774_v45 = vld [vmem:[#allocation9 + $0x8a4] ss:$8 sps:$4 sm:$0xff]  }
 0x353   : > { %6389 = vmatprep.mubr.bf16.mxu0 %v2454_v19  ;;  %7722 = vmatpush1.bf16.msra.mxu0 %v12762_v3  ;;  %v3649_v19 = vshrl.u32 %v15109_v46, 16  ;;  %v17520_v37 = vld [vmem:[#allocation43_spill] sm:$0xff] }
 0x354   : > { %17518 = vst [vmem:[#allocation31_spill] sm:$0xff] %v15121_v6  ;;  %7723 = vmatprep.subr.bf16.mxu0 %v12770_v0  ;;  %v3287_v3 = vsel %vm3271_vm6, %v3282_v2, %v17243_v50  ;;  %v12720_v63 = vld [vmem:[#allocation9 + $0x674] ss:$8 sps:$4 sm:$0xff]   ;;  %v15133_v5 = vsel %vm17521_vm0, %v3615_v35, %v15097_v56  ;;  %v3293_v0 = vsel %vm3271_vm6, %v3288_v36, %v3292_v22  ;;  %v3676_v50 = vshrl.u32 %v15119_v17, 16 }
 0x355   : > { %7250 = vmatpush1.bf16.msra.mxu1 %v12710_v51  ;;  %17522 = vst [vmem:[#allocation71_spill] sm:$0xff] %v15133_v5  ;;  %v3660_v51 = vrot.slane %v3658_v59, 2  ;;  %v3651_v16 = vrot.slane %v3649_v19, 2  ;;  %v10892_v2 = vcombine.high %v15117_v13, %v15137_v38  ;;  %v3679_v35 = vshll.u32 %v15119_v17, 16  ;;  %v12777_v19 = vld [vmem:[#allocation9 + $0x8b4] ss:$8 sps:$4 sm:$0xff]  }
 0x356   : > { %7251 = vmatprep.subr.bf16.mxu1 %v12715_v18  ;;  %v12772_v18 = vld [vmem:[#allocation9 + $0x8a0] ss:$8 sps:$4 sm:$0xff]   ;;  %v3667_v59 = vshrl.u32 %v15121_v6, 16  ;;  %v17523_v36 = vrot.slane %v17519_v40, 1  ;;  %v3670_v52 = vshll.u32 %v15121_v6, 16  ;;  %v3678_v5 = vrot.slane %v3676_v50, 2 }
 0x357   : > { %7724 = vmatpush1.bf16.msra.mxu0 %v12768_v55  ;;  %v12724_v55 = vld [vmem:[#allocation9 + $0x684] ss:$8 sps:$4 sm:$0xff]   ;;  %v15148_v56 = vor.u32 %v3663_v33, %v3660_v51  ;;  %v3681_v17 = vrot.slane %v3679_v35, 3  ;;  %v12775_v50 = vld [vmem:[#allocation9 + $0x8b0] ss:$8 sps:$4 sm:$0xff]  }
 0x358   : > { %7069 = vmatmul.mubr.bf16.gmra.mrb[12].mxu1 %v3287_v3  ;;  %v2451_v22 = vsel %vm2426_vm15, %v2449_v24, %v17523_v36  ;;  %v3654_v3 = vrot.slane %v3652_v31, 3  ;;  %7725 = vmatprep.subr.bf16.mxu0 %v12774_v45  ;;  %v3669_v46 = vrot.slane %v3667_v59, 2  ;;  %v3672_v6 = vrot.slane %v3670_v52, 3  ;;  %v17529_v45 = vld [vmem:[#allocation41_spill] sm:$0xff] }
 0x359   : > { %7078 = vmatprep.mubr.bf16.mxu1 %v3293_v0  ;;  %7252 = vmatpush1.bf16.msra.mxu1 %v12713_v4  ;;  %17524 = vst [vmem:[#allocation33_spill] sm:$0xff] %v15148_v56  ;;  %v17525_v0 = vrot.slane %v17520_v37, 1  ;;  %v17527_v4 = vld [vmem:[#allocation38_spill] sm:$0xff]  ;;  %v17254_v51 = vrot.slane %v17529_v45, 2  ;;  %v3682_v35 = vor.u32 %v3681_v17, %v3678_v5  ;;  %v12722_v59 = vld [vmem:[#allocation9 + $0x680] ss:$8 sps:$4 sm:$0xff]   ;;  %v10891_v17 = vcombine.low %v15117_v13, %v15137_v38 }
 0x35a   : > { %7253 = vmatprep.subr.bf16.mxu1 %v12720_v63  ;;  %6390 = vmatmul.mubr.bf16.gmra.mrb[84].mxu0 %v2451_v22  ;;  %v3290_v36 = vrot.slane %v17527_v4, 2  ;;  %v15156_v31 = vor.u32 %v3654_v3, %v3651_v16  ;;  %v3297_v63 = vrot.slane %v10892_v2, 2  ;;  %v1778_v33 = vld [vmem:[#allocation2 + $0xc8] sm:$0xff]  ;;  %v3673_v22 = vor.u32 %v3672_v6, %v3669_v46  ;;  %v12734_v16 = vld [vmem:[#allocation9 + $0x694] ss:$8 sps:$4 sm:$0xff]  }
 0x35b   : > { %v2458_v24 = vsel %vm2426_vm15, %v17526_v58, %v17525_v0  ;;  %7726 = vmatpush1.bf16.msra.mxu0 %v12772_v18  ;;  %v17252_v58 = vrot.slane %v17428_v48, 1  ;;  %v12783_v3 = vld [vmem:[#allocation9 + $0x8c4] ss:$8 sps:$4 sm:$0xff]   ;;  %v15163_v52 = vsel %vm17531_vm14, %v15148_v56, %v3682_v35  ;;  %v17533_v2 = vrot.slane %v17515_v29, 2  ;;  %v12781_v29 = vld [vmem:[#allocation9 + $0x8c0] ss:$8 sps:$4 sm:$0xff]   ;;  %vm17702_vm14 = vmmov %vm17521_vm0 }
 0x35c   : > { %17528 = vst [vmem:[#allocation34_spill] sm:$0xff] %v15156_v31  ;;  %6399 = vmatprep.mubr.bf16.mxu0 %v2458_v24  ;;  %7727 = vmatprep.subr.bf16.mxu0 %v12777_v19  ;;  %17532 = vst [vmem:[#allocation72_spill] sm:$0xff] %v15163_v52  ;;  %v12904_v5 = vld [vmem:[#allocation2 + $0xc0] sm:$0xff]  ;;  %v1787_v6 = vld [vmem:[#allocation2 + $0xd0] sm:$0x77]  ;;  %v3299_v19 = vsel %vm3271_vm6, %v3297_v63, %v17254_v51  ;;  %v17537_v0 = vrot.slane %v17519_v40, 1 }
 0x35d   : > { %7254 = vmatpush1.bf16.msra.mxu1 %v12718_v53  ;;  %v3291_v18 = vsel %vm3271_vm6, %v17533_v2, %v3290_v36  ;;  %v15170_v46 = vcombine.high %v12904_v5, %v1778_v33  ;;  %v15174_v53 = vsel %vm17534_vm9, %v15156_v31, %v3673_v22  ;;  %v12732_v38 = vld [vmem:[#allocation9 + $0x690] ss:$8 sps:$4 sm:$0xff]   ;;  %v12786_v13 = vld [vmem:[#allocation9 + $0x8d4] ss:$8 sps:$4 sm:$0xff]   ;;  %v17538_v4 = vrot.slane %v17520_v37, 1  ;;  %v17539_v63 = vld [vmem:[#allocation45_spill] sm:$0xff] }
 0x35e   : > { %7255 = vmatprep.subr.bf16.mxu1 %v12724_v55  ;;  %17535 = vst [vmem:[#allocation39_spill] sm:$0xff] %v15174_v53  ;;  %v15179_v55 = vcombine.low %v12904_v5, %v1778_v33  ;;  %v2456_v24 = vsel %vm2426_vm15, %v17537_v0, %v17253_v54  ;;  %v12743_v33 = vld [vmem:[#allocation9 + $0x6a4] ss:$8 sps:$4 sm:$0xff]   ;;  %v15192_v35 = vcombine.high %v1787_v6, %v1787_v6  ;;  %v17543_v51 = vld [vmem:[#allocation52_spill] sm:$0xff]  ;;  %vm17705_vm9 = vmmov %vm17521_vm0 }
 0x35f   : > { %7728 = vmatpush1.bf16.msra.mxu0 %v12775_v50  ;;  %v2462_v36 = vsel %vm2426_vm15, %v17538_v4, %v17252_v58  ;;  %v17256_v50 = vrot.slane %v17539_v63, 2  ;;  %v15194_v22 = vcombine.low %v1787_v6, %v1787_v6  ;;  %v3734_v40 = vshrl.u32 %v15170_v46, 16  ;;  %v12792_v6 = vld [vmem:[#allocation9 + $0x8e4] ss:$8 sps:$4 sm:$0xff]  }
 0x360   : > { %7079 = vmatmul.mubr.bf16.gmra.mrb[16].mxu1 %v3291_v18  ;;  %17536 = vst [vmem:[#allocation36_spill] sm:$0xff] %v15179_v55  ;;  %7729 = vmatprep.subr.bf16.mxu0 %v12783_v3  ;;  %17540 = vst [vmem:[#allocation37_spill] sm:$0xff] %v15192_v35  ;;  %v3737_v2 = vshll.u32 %v15170_v46, 16  ;;  %v17542_v18 = vld [vmem:[#allocation46_spill] sm:$0xff]  ;;  %v3725_v0 = vshrl.u32 %v15179_v55, 16  ;;  %v3728_v54 = vshll.u32 %v15179_v55, 16 }
 0x361   : > { %7088 = vmatprep.mubr.bf16.mxu1 %v3299_v19  ;;  %7256 = vmatpush1.bf16.msra.mxu1 %v12722_v59  ;;  %v3294_v59 = vrot.slane %v10891_v17, 2  ;;  %17541 = vst [vmem:[#allocation42_spill] sm:$0xff] %v15194_v22  ;;  %v12784_v19 = vld [vmem:[#allocation9 + $0x8d0] ss:$8 sps:$4 sm:$0xff]   ;;  %v12757_v3 = vld [vmem:[#allocation9 + $0x6b4] ss:$8 sps:$4 sm:$0xff]  }
 0x362   : > { %7257 = vmatprep.subr.bf16.mxu1 %v12734_v16  ;;  %6400 = vmatmul.mubr.bf16.gmra.mrb[88].mxu0 %v2456_v24  ;;  %v12741_v16 = vld [vmem:[#allocation9 + $0x6a0] ss:$8 sps:$4 sm:$0xff]   ;;  %v3736_v4 = vrot.slane %v3734_v40, 2  ;;  %v3739_v24 = vrot.slane %v3737_v2, 3  ;;  %v2459_v17 = vrot.slane %v17435_v7, 1  ;;  %v3727_v58 = vrot.slane %v3725_v0, 2 }
 0x363   : > { %6409 = vmatprep.mubr.bf16.mxu0 %v2462_v36  ;;  %7730 = vmatpush1.bf16.msra.mxu0 %v12781_v29  ;;  %v3752_v36 = vshrl.u32 %v15192_v35, 16  ;;  %v3296_v29 = vsel %vm3271_vm6, %v3294_v59, %v17256_v50  ;;  %v3755_v5 = vshll.u32 %v15192_v35, 16  ;;  %v17544_v40 = vrot.slane %v17542_v18, 2  ;;  %v12790_v0 = vld [vmem:[#allocation9 + $0x8e0] ss:$8 sps:$4 sm:$0xff]  }
 0x364   : > { %7731 = vmatprep.subr.bf16.mxu0 %v12786_v13  ;;  %v3743_v13 = vshrl.u32 %v15194_v22, 16  ;;  %v3730_v53 = vrot.slane %v3728_v54, 3  ;;  %v3746_v31 = vshll.u32 %v15194_v22, 16  ;;  %v12755_v59 = vld [vmem:[#allocation9 + $0x6b0] ss:$8 sps:$4 sm:$0xff]   ;;  %v17547_v35 = vrot.slane %v17530_v44, 1 }
 0x365   : > { %7258 = vmatpush1.bf16.msra.mxu1 %v12732_v38  ;;  %v3754_v52 = vrot.slane %v3752_v36, 2  ;;  %v12797_v50 = vld [vmem:[#allocation9 + $0x8f4] ss:$8 sps:$4 sm:$0xff]   ;;  %v15215_v38 = vor.u32 %v3739_v24, %v3736_v4  ;;  %v3757_v56 = vrot.slane %v3755_v5, 3  ;;  %v17549_v36 = vrot.slane %v17543_v51, 1  ;;  %v17551_v24 = vld [vmem:[#allocation49_spill] sm:$0xff] }
 0x366   : > { %7259 = vmatprep.subr.bf16.mxu1 %v12743_v33  ;;  %v17545_v33 = vrot.slane %v17529_v45, 2  ;;  %v2460_v45 = vsel %vm2426_vm15, %v17547_v35, %v2459_v17  ;;  %v3748_v54 = vrot.slane %v3746_v31, 3  ;;  %v3300_v5 = vrot.slane %v17551_v24, 2  ;;  %v12765_v31 = vld [vmem:[#allocation9 + $0x6c0] ss:$8 sps:$4 sm:$0xff]  }
 0x367   : > { %7732 = vmatpush1.bf16.msra.mxu0 %v12784_v19  ;;  %17546 = vst [vmem:[#allocation43_spill] sm:$0xff] %v15215_v38  ;;  %v15220_v19 = vor.u32 %v3730_v53, %v3727_v58  ;;  %v17553_v58 = vld [vmem:[#allocation55_spill] sm:$0xff] }
 0x368   : > { %7089 = vmatmul.mubr.bf16.gmra.mrb[20].mxu1 %v3296_v29  ;;  %v3303_v2 = vsel %vm3271_vm6, %v17545_v33, %v17544_v40  ;;  %v3745_v29 = vrot.slane %v3743_v13, 2  ;;  %v12767_v40 = vld [vmem:[#allocation9 + $0x6c4] ss:$8 sps:$4 sm:$0xff]   ;;  %7733 = vmatprep.subr.bf16.mxu0 %v12792_v6  ;;  %v1781_v13 = vld [vmem:[#allocation2 + $0x138] sm:$0xff]  ;;  %v3758_v33 = vor.u32 %v3757_v56, %v3754_v52  ;;  %v17259_v53 = vrot.slane %v17553_v58, 1 }
 0x369   : > { %7098 = vmatprep.mubr.bf16.mxu1 %v3303_v2  ;;  %7260 = vmatpush1.bf16.msra.mxu1 %v12741_v16  ;;  %17548 = vst [vmem:[#allocation38_spill] sm:$0xff] %v15220_v19  ;;  %v17550_v16 = vrot.slane %v17428_v48, 1  ;;  %v17552_v2 = vld [vmem:[#allocation50_spill] sm:$0xff]  ;;  %v1788_v56 = vld [vmem:[#allocation2 + $0x140] sm:$0x77] }
 0x36a   : > { %7261 = vmatprep.subr.bf16.mxu1 %v12757_v3  ;;  %6410 = vmatmul.mubr.bf16.gmra.mrb[92].mxu0 %v2460_v45  ;;  %v3306_v35 = vrot.slane %v17552_v2, 2  ;;  %v12795_v3 = vld [vmem:[#allocation9 + $0x8f0] ss:$8 sps:$4 sm:$0xff]   ;;  %v3749_v6 = vor.u32 %v3748_v54, %v3745_v29  ;;  %v15232_v45 = vsel %vm17554_vm1, %v15215_v38, %v3758_v33  ;;  %v17560_v29 = vld [vmem:[#allocation40_spill] sm:$0xff]  ;;  %v2464_v2 = vsel %vm2426_vm15, %v2459_v17, %v17259_v53  ;;  %vm17708_vm1 = vmmov %vm17521_vm0 }
 0x36b   : > { %v2466_v4 = vsel %vm2426_vm15, %v17550_v16, %v17549_v36  ;;  %7734 = vmatpush1.bf16.msra.mxu0 %v12790_v0  ;;  %17555 = vst [vmem:[#allocation41_spill] sm:$0xff] %v15232_v45  ;;  %v12780_v36 = vld [vmem:[#allocation9 + $0x6d4] ss:$8 sps:$4 sm:$0xff]   ;;  %v17559_v0 = vrot.slane %v17539_v63, 2  ;;  %v17563_v63 = vld [vmem:[#allocation53_spill] sm:$0xff]  ;;  %v17565_v17 = vrot.slane %v17543_v51, 1 }
 0x36c   : > { %6419 = vmatprep.mubr.bf16.mxu0 %v2466_v4  ;;  %7735 = vmatprep.subr.bf16.mxu0 %v12797_v50  ;;  %v12905_v16 = vld [vmem:[#allocation2 + $0x130] sm:$0xff]  ;;  %v15238_v52 = vsel %vm17557_vm12, %v15220_v19, %v3749_v6  ;;  %v2469_v50 = vrot.slane %v17560_v29, 1  ;;  %v15244_v54 = vld [vmem:[#allocation2 + $0xe0] sm:$0xee]  ;;  %v3304_v6 = vrot.slane %v17563_v63, 2  ;;  %v15255_v29 = vcombine.high %v1788_v56, %v1788_v56  ;;  %vm17709_vm12 = vmmov %vm17521_vm0 }
 0x36d   : > { %7262 = vmatpush1.bf16.msra.mxu1 %v12755_v59  ;;  %v15234_v24 = vcombine.high %v12905_v16, %v1781_v13  ;;  %17558 = vst [vmem:[#allocation45_spill] sm:$0xff] %v15238_v52  ;;  %v3301_v59 = vsel %vm3271_vm6, %v17559_v0, %v3300_v5  ;;  %v15246_v4 = vcombine.low %v12905_v16, %v1781_v13  ;;  %v12778_v0 = vld [vmem:[#allocation9 + $0x6d0] ss:$8 sps:$4 sm:$0xff]   ;;  %v12906_v52 = vld [vmem:[#allocation2 + $0xe8] sm:$0xff] }
 0x36e   : > { %7263 = vmatprep.subr.bf16.mxu1 %v12767_v40  ;;  %v17562_v40 = vrot.slane %v17542_v18, 2  ;;  %17564 = vst [vmem:[#allocation52_spill] sm:$0xff] %v15255_v29  ;;  %v10830_v13 = vcombine.high %v15244_v54, %v12906_v52  ;;  %v12789_v16 = vld [vmem:[#allocation9 + $0x6e4] ss:$8 sps:$4 sm:$0xff]   ;;  %v15258_v18 = vcombine.low %v1788_v56, %v1788_v56  ;;  %v17567_v56 = vld [vmem:[#allocation48_spill] sm:$0xff] }
 0x36f   : > { %17556 = vst [vmem:[#allocation47_spill] sm:$0xff] %v15234_v24  ;;  %17561 = vst [vmem:[#allocation46_spill] sm:$0xff] %v15246_v4  ;;  %7736 = vmatpush1.bf16.msra.mxu0 %v12795_v3  ;;  %v3810_v3 = vshrl.u32 %v15234_v24, 16  ;;  %v2467_v19 = vrot.slane %v17567_v56, 1  ;;  %v12787_v38 = vld [vmem:[#allocation9 + $0x6e0] ss:$8 sps:$4 sm:$0xff]  }
 0x370   : > { %7099 = vmatmul.mubr.bf16.gmra.mrb[24].mxu1 %v3301_v59  ;;  %v3307_v33 = vsel %vm3271_vm6, %v17562_v40, %v3306_v35  ;;  %v3813_v59 = vshll.u32 %v15234_v24, 16  ;;  %v2470_v40 = vsel %vm2426_vm15, %v17565_v17, %v2469_v50  ;;  %v3831_v24 = vshll.u32 %v15255_v29, 16 }
 0x371   : > { %7108 = vmatprep.mubr.bf16.mxu1 %v3307_v33  ;;  %7264 = vmatpush1.bf16.msra.mxu1 %v12765_v31  ;;  %v3801_v31 = vshrl.u32 %v15246_v4, 16  ;;  %v17566_v33 = vld [vmem:[#allocation54_spill] sm:$0xff]  ;;  %v3812_v53 = vrot.slane %v3810_v3, 2  ;;  %v3305_v50 = vsel %vm3271_vm6, %v3300_v5, %v3304_v6  ;;  %v2474_v17 = vrot.slane %v10830_v13, 1 }
 0x372   : > { %7265 = vmatprep.subr.bf16.mxu1 %v12780_v36  ;;  %6420 = vmatmul.mubr.bf16.gmra.mrb[96].mxu0 %v2464_v2  ;;  %v3310_v63 = vrot.slane %v17566_v33, 2  ;;  %v3815_v45 = vrot.slane %v3813_v59, 3  ;;  %v3804_v36 = vshll.u32 %v15246_v4, 16  ;;  %v3828_v2 = vshrl.u32 %v15255_v29, 16  ;;  %v12798_v5 = vld [vmem:[#allocation9 + $0x6f0] ss:$8 sps:$4 sm:$0xff]  }
 0x373   : > { %6429 = vmatprep.mubr.bf16.mxu0 %v2470_v40  ;;  %v3803_v22 = vrot.slane %v3801_v31, 2  ;;  %v12800_v40 = vld [vmem:[#allocation9 + $0x6f4] ss:$8 sps:$4 sm:$0xff]   ;;  %v3819_v3 = vshrl.u32 %v15258_v18, 16  ;;  %v3833_v4 = vrot.slane %v3831_v24, 3  ;;  %v2475_v29 = vrot.slane %v17454_v57, 1 }
 0x374   : > { %v3806_v55 = vrot.slane %v3804_v36, 3  ;;  %v15273_v59 = vor.u32 %v3815_v45, %v3812_v53  ;;  %v3830_v33 = vrot.slane %v3828_v2, 2  ;;  %v3311_v31 = vsel %vm3271_vm6, %v3306_v35, %v3310_v63  ;;  %v12805_v2 = vld [vmem:[#allocation9 + $0x704] ss:$8 sps:$4 sm:$0xff]  }
 0x375   : > { %7266 = vmatpush1.bf16.msra.mxu1 %v12778_v0  ;;  %v3822_v0 = vshll.u32 %v15258_v18, 16  ;;  %v3821_v56 = vrot.slane %v3819_v3, 2  ;;  %v17568_v53 = vrot.slane %v17553_v58, 1  ;;  %v10829_v24 = vcombine.low %v15244_v54, %v12906_v52 }
 0x376   : > { %7267 = vmatprep.subr.bf16.mxu1 %v12789_v16  ;;  %v15278_v13 = vor.u32 %v3806_v55, %v3803_v22  ;;  %v3834_v16 = vor.u32 %v3833_v4, %v3830_v33  ;;  %v2476_v35 = vsel %vm2426_vm15, %v2474_v17, %v2475_v29  ;;  %v17571_v22 = vld [vmem:[#allocation44_spill] sm:$0xff]  ;;  %v1772_v4 = vld [vmem:[#allocation2 + $0xe8] sm:$0xcc]  ;;  %v2479_v17 = vrot.slane %v14367_v26, 1 }
 0x377   : > { %v3824_v36 = vrot.slane %v3822_v0, 3  ;;  %v2468_v45 = vsel %vm2426_vm15, %v17568_v53, %v2467_v19  ;;  %v2471_v52 = vrot.slane %v10829_v24, 1  ;;  %v2472_v33 = vrot.slane %v14359_v61, 1  ;;  %v12907_v0 = vld [vmem:[#allocation2 + $0xf0] sm:$0xff] }
 0x378   : > { %7109 = vmatmul.mubr.bf16.gmra.mrb[28].mxu1 %v3305_v50  ;;  %v17569_v50 = vld [vmem:[#allocation56_spill] sm:$0xff]  ;;  %v15288_v57 = vsel %vm17570_vm8, %v15273_v59, %v3834_v16  ;;  %v3312_v16 = vrot.slane %v14851_v1, 2  ;;  %v2477_v53 = vrot.slane %v14440_v43, 1  ;;  %v2483_v61 = vrot.slane %v14451_v41, 1  ;;  %vm17711_vm8 = vmmov %vm17521_vm0 }
 0x379   : > { %7118 = vmatprep.mubr.bf16.mxu1 %v3311_v31  ;;  %7268 = vmatpush1.bf16.msra.mxu1 %v12787_v38  ;;  %v3308_v3 = vrot.slane %v17569_v50, 2  ;;  %v3825_v55 = vor.u32 %v3824_v36, %v3821_v56  ;;  %v3314_v38 = vrot.slane %v17571_v22, 2  ;;  %v10894_v31 = vcombine.high %v1772_v4, %v12907_v0 }
 0x37a   : > { %7269 = vmatprep.subr.bf16.mxu1 %v12800_v40  ;;  %6430 = vmatmul.mubr.bf16.gmra.mrb[100].mxu0 %v2468_v45  ;;  %v2473_v56 = vsel %vm2426_vm15, %v2471_v52, %v2472_v33  ;;  %v10893_v45 = vcombine.low %v1772_v4, %v12907_v0  ;;  %v2484_v1 = vsel %vm2426_vm15, %v2479_v17, %v2483_v61  ;;  %v2481_v50 = vrot.slane %v14478_v49, 1 }
 0x37b   : > { %6439 = vmatprep.mubr.bf16.mxu0 %v2476_v35  ;;  %v15293_v19 = vsel %vm17572_vm11, %v15278_v13, %v3825_v55  ;;  %v3309_v54 = vsel %vm3271_vm6, %v3304_v6, %v3308_v3  ;;  %v3315_v40 = vsel %vm3271_vm6, %v3310_v63, %v3314_v38  ;;  %v3319_v36 = vrot.slane %v10894_v31, 2  ;;  %vm17716_vm11 = vmmov %vm17521_vm0 }
 0x37c   : > { %v3320_v6 = vrot.slane %v14350_v11, 2  ;;  %v3313_v63 = vsel %vm3271_vm6, %v3308_v3, %v3312_v16  ;;  %v3317_v35 = vrot.slane %v14402_v42, 2  ;;  %v3324_v11 = vrot.slane %v14409_v28, 2 }
 0x37d   : > { %7270 = vmatpush1.bf16.msra.mxu1 %v12798_v5  ;;  %v2480_v5 = vsel %vm2426_vm15, %v2475_v29, %v2479_v17  ;;  %v3316_v29 = vrot.slane %v10893_v45, 2  ;;  %v2487_v55 = vrot.slane %v14494_v60, 1  ;;  %v2482_v38 = vsel %vm2426_vm15, %v2477_v53, %v2481_v50 }
 0x37e   : > { %7472 = vmatprep.subr.bf16.mxu1 %v12805_v2  ;;  %v3321_v24 = vsel %vm3271_vm6, %v3319_v36, %v3320_v6  ;;  %v2478_v2 = vsel %vm2426_vm15, %v2472_v33, %v2477_v53  ;;  %v3325_v22 = vsel %vm3271_vm6, %v3320_v6, %v3324_v11  ;;  %v3322_v42 = vrot.slane %v14460_v39, 2  ;;  %v1753_v33 = vld [vmem:[#allocation2 + $0x150] sm:$0xee] }
 0x37f   : > { %v3318_v3 = vsel %vm3271_vm6, %v3316_v29, %v3317_v35  ;;  %v2488_v4 = vsel %vm2426_vm15, %v2483_v61, %v2487_v55  ;;  %v3328_v28 = vrot.slane %v14475_v27, 2  ;;  %v2485_v52 = vrot.slane %v14531_v15, 1 }
 0x380   : > { %7119 = vmatmul.mubr.bf16.gmra.mrb[32].mxu1 %v3309_v54  ;;  %v3323_v54 = vsel %vm3271_vm6, %v3317_v35, %v3322_v42  ;;  %v2491_v17 = vrot.slane %v14908_v34, 1  ;;  %v3326_v39 = vrot.slane %v14485_v12, 2  ;;  %v2489_v16 = vrot.slane %v14929_v14, 1  ;;  %v1773_v14 = vld [vmem:[#allocation2 + $0x158] sm:$0xcc]  ;;  %v12909_v35 = vld [vmem:[#allocation2 + $0x160] sm:$0xff] }
 0x381   : > { %7128 = vmatprep.mubr.bf16.mxu1 %v3315_v40  ;;  %v3329_v40 = vsel %vm3271_vm6, %v3324_v11, %v3328_v28  ;;  %v2486_v0 = vsel %vm2426_vm15, %v2481_v50, %v2485_v52  ;;  %v2497_v53 = vrot.slane %v14559_v23, 1  ;;  %v3330_v45 = vrot.slane %v14525_v62, 2 }
 0x382   : > { %6440 = vmatmul.mubr.bf16.gmra.mrb[104].mxu0 %v2473_v56  ;;  %v2492_v31 = vsel %vm2426_vm15, %v2487_v55, %v2491_v17  ;;  %v12908_v56 = vld [vmem:[#allocation2 + $0x158] sm:$0xff]  ;;  %v3327_v34 = vsel %vm3271_vm6, %v3322_v42, %v3326_v39  ;;  %v2494_v29 = vrot.slane %v14575_v32, 1  ;;  %v10896_v11 = vcombine.high %v1773_v14, %v12909_v35 }
 0x383   : > { %6449 = vmatprep.mubr.bf16.mxu0 %v2480_v5  ;;  %v10832_v27 = vcombine.high %v1753_v33, %v12908_v56  ;;  %v3332_v5 = vrot.slane %v14498_v10, 2  ;;  %v10831_v61 = vcombine.low %v1753_v33, %v12908_v56  ;;  %v3336_v10 = vrot.slane %v14934_v8, 2 }
 0x384   : > { %v3334_v8 = vrot.slane %v14950_v21, 2  ;;  %v3342_v55 = vrot.slane %v14562_v20, 2  ;;  %v2505_v32 = vrot.slane %v14592_v47, 1  ;;  %v3346_v20 = vrot.slane %v14573_v9, 2  ;;  %v17577_v9 = vld [vmem:[#allocation64_spill] sm:$0xff] }
 0x385   : > { %v2496_v36 = vrot.slane %v10832_v27, 1  ;;  %v3333_v6 = vsel %vm3271_vm6, %v3328_v28, %v3332_v5  ;;  %v3337_v23 = vsel %vm3271_vm6, %v3332_v5, %v3336_v10 }
 0x386   : > { %v3347_v56 = vsel %vm3271_vm6, %v3342_v55, %v3346_v20 }
 0x387   : > { %v2498_v12 = vsel %vm2426_vm15, %v2496_v36, %v2497_v53  ;;  %v3350_v36 = vrot.slane %v17577_v9, 2 }
 0x388   : > { %7129 = vmatmul.mubr.bf16.gmra.mrb[36].mxu1 %v3313_v63  ;;  %v2490_v63 = vsel %vm2426_vm15, %v2485_v52, %v2489_v16  ;;  %v17576_v16 = vld [vmem:[#allocation63_spill] sm:$0xff] }
 0x389   : > { %7138 = vmatprep.mubr.bf16.mxu1 %v3321_v24  ;;  %v2493_v24 = vrot.slane %v10831_v61, 1  ;;  %v17579_v61 = vld [vmem:[#allocation51_spill] sm:$0xff] }
 0x38a   : > { %6450 = vmatmul.mubr.bf16.gmra.mrb[108].mxu0 %v2478_v2  ;;  %v3331_v2 = vsel %vm3271_vm6, %v3326_v39, %v3330_v45 }
 0x38b   : > { %6459 = vmatprep.mubr.bf16.mxu0 %v2484_v1  ;;  %v2501_v1 = vrot.slane %v14539_v30, 1  ;;  %v2495_v50 = vsel %vm2426_vm15, %v2493_v24, %v2494_v29 }
 0x38d   : > { %v2502_v62 = vsel %vm2426_vm15, %v2497_v53, %v2501_v1  ;;  %v2506_v21 = vsel %vm2426_vm15, %v2501_v1, %v2505_v32 }
 0x390   : > { %7139 = vmatmul.mubr.bf16.gmra.mrb[40].mxu1 %v3318_v3  ;;  %v3341_v3 = vrot.slane %v10896_v11, 2 }
 0x391   : > { %7148 = vmatprep.mubr.bf16.mxu1 %v3325_v22  ;;  %v2499_v22 = vrot.slane %v14544_v25, 1 }
 0x392   : > { %6460 = vmatmul.mubr.bf16.gmra.mrb[112].mxu0 %v2482_v38  ;;  %v3335_v38 = vsel %vm3271_vm6, %v3330_v45, %v3334_v8  ;;  %v3343_v42 = vsel %vm3271_vm6, %v3341_v3, %v3342_v55  ;;  %v3351_v45 = vsel %vm3271_vm6, %v3346_v20, %v3350_v36 }
 0x393   : > { %6469 = vmatprep.mubr.bf16.mxu0 %v2488_v4  ;;  %v10895_v4 = vcombine.low %v1773_v14, %v12909_v35  ;;  %v2500_v28 = vsel %vm2426_vm15, %v2494_v29, %v2499_v22  ;;  %v1790_v14 = vld [vmem:[#allocation2 + $0x10] sm:$0x88] }
 0x394   : > { %v17582_v35 = vld [vmem:[#allocation66_spill] sm:$0xff] }
 0x395   : > { %v3338_v52 = vrot.slane %v10895_v4, 2  ;;  %v3354_v11 = vrot.slane %v17582_v35, 2 }
 0x397   : > { %v3355_v55 = vsel %vm3271_vm6, %v3350_v36, %v3354_v11  ;;  %v17590_v36 = vld [vmem:[#allocation58_spill] sm:$0xff] }
 0x398   : > { %7149 = vmatmul.mubr.bf16.gmra.mrb[44].mxu1 %v3323_v54  ;;  %v17573_v54 = vld [vmem:[#allocation62_spill] sm:$0xff] }
 0x399   : > { %7158 = vmatprep.mubr.bf16.mxu1 %v3329_v40  ;;  %v3339_v17 = vrot.slane %v17573_v54, 2  ;;  %v17574_v40 = vld [vmem:[#allocation67_spill] sm:$0xff] }
 0x39a   : > { %6470 = vmatmul.mubr.bf16.gmra.mrb[116].mxu0 %v2486_v0  ;;  %v2503_v33 = vrot.slane %v17574_v40, 1 }
 0x39b   : > { %6479 = vmatprep.mubr.bf16.mxu0 %v2492_v31  ;;  %v3340_v0 = vsel %vm3271_vm6, %v3338_v52, %v3339_v17  ;;  %v17575_v31 = vld [vmem:[#allocation68_spill] sm:$0xff]  ;;  %v17586_v52 = vld [vmem:[#allocation59_spill] sm:$0xff] }
 0x39c   : > { %v2509_v39 = vrot.slane %v17575_v31, 1  ;;  %v2504_v27 = vsel %vm2426_vm15, %v2499_v22, %v2503_v33  ;;  %v17584_v22 = vld [vmem:[#allocation22_spill] sm:$0xff]  ;;  %v3358_v20 = vrot.slane %v17586_v52, 2 }
 0x39d   : > { %v12812_v52 = vld [vmem:[#allocation9 + $0x724] ss:$8 sps:$4 sm:$0xff]  }
 0x39e   : > { %v2510_v5 = vsel %vm2426_vm15, %v2505_v32, %v2509_v39 }
 0x3a0   : > { %7159 = vmatmul.mubr.bf16.gmra.mrb[48].mxu1 %v3327_v34  ;;  %v3344_v34 = vrot.slane %v17576_v16, 2 }
 0x3a1   : > { %7168 = vmatprep.mubr.bf16.mxu1 %v3333_v6  ;;  %v17578_v6 = vld [vmem:[#allocation70_spill] sm:$0xff] }
 0x3a2   : > { %6480 = vmatmul.mubr.bf16.gmra.mrb[120].mxu0 %v2490_v63  ;;  %v2507_v53 = vrot.slane %v17578_v6, 1  ;;  %v3345_v63 = vsel %vm3271_vm6, %v3339_v17, %v3344_v34 }
 0x3a3   : > { %6489 = vmatprep.mubr.bf16.mxu0 %v2498_v12  ;;  %v2513_v12 = vrot.slane %v17579_v61, 1  ;;  %v3464_v61 = vrot.slane %v17584_v22, 2 }
 0x3a4   : > { %v2508_v10 = vsel %vm2426_vm15, %v2503_v33, %v2507_v53  ;;  %v17587_v33 = vld [vmem:[#allocation27_spill] sm:$0xff] }
 0x3a5   : > { %v2514_v24 = vsel %vm2426_vm15, %v2509_v39, %v2513_v12  ;;  %v3359_v39 = vsel %vm3271_vm6, %v3354_v11, %v3358_v20  ;;  %v17591_v12 = vld [vmem:[#allocation30_spill] sm:$0xff]  ;;  %v3468_v11 = vrot.slane %v17587_v33, 2 }
 0x3a8   : > { %7169 = vmatmul.mubr.bf16.gmra.mrb[52].mxu1 %v3331_v2  ;;  %v17580_v2 = vld [vmem:[#allocation65_spill] sm:$0xff] }
 0x3a9   : > { %7178 = vmatprep.mubr.bf16.mxu1 %v3337_v23  ;;  %v3348_v1 = vrot.slane %v17580_v2, 2  ;;  %v17581_v23 = vld [vmem:[#allocation61_spill] sm:$0xff] }
 0x3aa   : > { %6490 = vmatmul.mubr.bf16.gmra.mrb[124].mxu0 %v2495_v50  ;;  %v10930_v29 = vcombine.high %v1790_v14, %v17581_v23  ;;  %v17583_v50 = vld [vmem:[#allocation57_spill] sm:$0xff]  ;;  %v10929_v4 = vcombine.low %v1790_v14, %v17581_v23  ;;  %v17592_v14 = vld [vmem:[#allocation32_spill] sm:$0xff] }
 0x3ab   : > { %6499 = vmatprep.mubr.bf16.mxu0 %v2502_v62  ;;  %v2511_v62 = vrot.slane %v17583_v50, 1  ;;  %v3349_v8 = vsel %vm3271_vm6, %v3344_v34, %v3348_v1  ;;  %v12803_v50 = vld [vmem:[#allocation9 + $0x700] ss:$8 sps:$4 sm:$0xff]  }
 0x3ac   : > { %v3976_v3 = vrot.slane %v10930_v29, 3  ;;  %v3973_v54 = vrot.slane %v10929_v4, 3  ;;  %v17593_v29 = vld [vmem:[#allocation23_spill] sm:$0xff] }
 0x3ad   : > { %v2512_v32 = vsel %vm2426_vm15, %v2507_v53, %v2511_v62  ;;  %v3356_v53 = vrot.slane %v17590_v36, 2  ;;  %v3460_v35 = vrot.slane %v17593_v29, 2  ;;  %v1776_v29 = vld [vmem:[#allocation2 + $0x60] sm:$0x33]  ;;  %vm17653_vm15 = vmmov %vm17521_vm0 }
 0x3b0   : > { %7179 = vmatmul.mubr.bf16.gmra.mrb[56].mxu1 %v3335_v38  ;;  %v3977_v38 = vrot.slane %v17584_v22, 3 }
 0x3b1   : > { %7188 = vmatprep.mubr.bf16.mxu1 %v3343_v42 }
 0x3b2   : > { %6500 = vmatmul.mubr.bf16.gmra.mrb[128].mxu0 %v2500_v28  ;;  %v3978_v42 = vsel %vm3972_vm7, %v3976_v3, %v3977_v38  ;;  %v17585_v28 = vld [vmem:[#allocation69_spill] sm:$0xff] }
 0x3b3   : > { %6509 = vmatprep.mubr.bf16.mxu0 %v2506_v21  ;;  %v3352_v21 = vrot.slane %v17585_v28, 2  ;;  %v12806_v28 = vld [vmem:[#allocation9 + $0x710] ss:$8 sps:$4 sm:$0xff]  }
 0x3b5   : > { %v3353_v17 = vsel %vm3271_vm6, %v3348_v1, %v3352_v21 }
 0x3b8   : > { %7189 = vmatmul.mubr.bf16.gmra.mrb[60].mxu1 %v3340_v0  ;;  %v3981_v0 = vrot.slane %v17587_v33, 3 }
 0x3b9   : > { %7198 = vmatprep.mubr.bf16.mxu1 %v3347_v56  ;;  %v17588_v56 = vld [vmem:[#allocation26_spill] sm:$0xff] }
 0x3ba   : > { %6510 = vmatmul.mubr.bf16.gmra.mrb[132].mxu0 %v2504_v27  ;;  %v3974_v27 = vrot.slane %v17588_v56, 3  ;;  %v3982_v9 = vsel %vm3972_vm7, %v3977_v38, %v3981_v0  ;;  %v3461_v62 = vrot.slane %v17588_v56, 2 }
 0x3bb   : > { %6519 = vmatprep.mubr.bf16.mxu0 %v2510_v5  ;;  %v17589_v5 = vld [vmem:[#allocation60_spill] sm:$0xff] }
 0x3bc   : > { %v15383_v16 = vcombine.high %v17589_v5, %v17581_v23  ;;  %v3975_v34 = vsel %vm3972_vm7, %v3973_v54, %v3974_v27  ;;  %v3462_v38 = vsel %vm3271_vm6, %v3460_v35, %v3461_v62  ;;  %v3466_v54 = vrot.slane %v17591_v12, 2  ;;  %v12822_v35 = vld [vmem:[#allocation9 + $0x740] ss:$8 sps:$4 sm:$0xff]  }
 0x3be   : > { %v3467_v5 = vsel %vm3271_vm6, %v3461_v62, %v3466_v54  ;;  %v12828_v62 = vld [vmem:[#allocation9 + $0x754] ss:$8 sps:$4 sm:$0xff]  }
 0x3c0   : > { %7199 = vmatmul.mubr.bf16.gmra.mrb[64].mxu1 %v3345_v63  ;;  %v3463_v63 = vrot.slane %v15383_v16, 2 }
 0x3c1   : > { %7208 = vmatprep.mubr.bf16.mxu1 %v3351_v45  ;;  %v3979_v45 = vrot.slane %v17591_v12, 3 }
 0x3c2   : > { %6520 = vmatmul.mubr.bf16.gmra.mrb[136].mxu0 %v2508_v10  ;;  %v3357_v10 = vsel %vm3271_vm6, %v3352_v21, %v3356_v53  ;;  %v3465_v2 = vsel %vm3271_vm6, %v3463_v63, %v3464_v61  ;;  %v1791_v53 = vld [vmem:[#allocation2 + $0x80] sm:$0x88]  ;;  %v12817_v63 = vld [vmem:[#allocation9 + $0x730] ss:$8 sps:$4 sm:$0xff]  }
 0x3c3   : > { %6529 = vmatprep.mubr.bf16.mxu0 %v2514_v24  ;;  %v3985_v24 = vrot.slane %v17592_v14, 3  ;;  %v3980_v1 = vsel %vm3972_vm7, %v3974_v27, %v3979_v45  ;;  %v12819_v27 = vld [vmem:[#allocation9 + $0x734] ss:$8 sps:$4 sm:$0xff]  }
 0x3c5   : > { %v3986_v23 = vsel %vm3972_vm7, %v3981_v0, %v3985_v24  ;;  %v12810_v0 = vld [vmem:[#allocation9 + $0x720] ss:$8 sps:$4 sm:$0xff]  }
 0x3c8   : > { %7209 = vmatmul.mubr.bf16.gmra.mrb[68].mxu1 %v3349_v8  ;;  %v17594_v8 = vld [vmem:[#allocation35_spill] sm:$0xff] }
 0x3c9   : > { %7218 = vmatprep.mubr.bf16.mxu1 %v3355_v55  ;;  %v3983_v3 = vrot.slane %v17594_v8, 3  ;;  %v12808_v55 = vld [vmem:[#allocation9 + $0x714] ss:$8 sps:$4 sm:$0xff]  }
 0x3ca   : > { %6530 = vmatmul.mubr.bf16.gmra.mrb[140].mxu0 %v2512_v32  ;;  %v17595_v32 = vld [vmem:[#allocation25_spill] sm:$0xff] }
 0x3cb   : > { %7737 = vmatprep.mubr.bf16.mxu0 %v3978_v42  ;;  %v3989_v4 = vrot.slane %v17595_v32, 3  ;;  %v3469_v42 = vsel %vm3271_vm6, %v3464_v61, %v3468_v11  ;;  %v3984_v21 = vsel %vm3972_vm7, %v3979_v45, %v3983_v3  ;;  %v12824_v45 = vld [vmem:[#allocation9 + $0x744] ss:$8 sps:$4 sm:$0xff]  }
 0x3cd   : > { %v3990_v20 = vsel %vm3972_vm7, %v3985_v24, %v3989_v4  ;;  %v3470_v24 = vrot.slane %v17594_v8, 2 }
 0x3d0   : > { %7219 = vmatmul.mubr.bf16.gmra.mrb[72].mxu1 %v3353_v17  ;;  %v3472_v17 = vrot.slane %v17592_v14, 2 }
 0x3d1   : > { %7228 = vmatprep.mubr.bf16.mxu1 %v3359_v39  ;;  %v17596_v39 = vld [vmem:[#allocation28_spill] sm:$0xff] }
 0x3d2   : > { %7738 = vmatmul.mubr.bf16.vlgmr.msra.gmra.mrb[144].mxu0 %v3975_v34  ;;  %v3987_v56 = vrot.slane %v17596_v39, 3  ;;  %v17597_v34 = vld [vmem:[#allocation29_spill] sm:$0xff]  ;;  %v3473_v36 = vsel %vm3271_vm6, %v3468_v11, %v3472_v17  ;;  %v17598_v11 = vld [vmem:[#allocation31_spill] sm:$0xff] }
 0x3d3   : > { %7747 = vmatprep.mubr.bf16.mxu0 %v3982_v9  ;;  %v3993_v9 = vrot.slane %v17597_v34, 3  ;;  %v3996_v34 = vrot.slane %v17530_v44, 3 }
 0x3d4   : > { %v3988_v61 = vsel %vm3972_vm7, %v3983_v3, %v3987_v56  ;;  %v3471_v3 = vsel %vm3271_vm6, %v3466_v54, %v3470_v24  ;;  %v3474_v54 = vrot.slane %v17596_v39, 2  ;;  %v12837_v39 = vld [vmem:[#allocation9 + $0x770] ss:$8 sps:$4 sm:$0xff]  }
 0x3d8   : > { %7229 = vmatmul.mubr.bf16.gmra.mrb[76].mxu1 %v3357_v10  ;;  %v3994_v10 = vsel %vm3972_vm7, %v3989_v4, %v3993_v9  ;;  %v12839_v9 = vld [vmem:[#allocation9 + $0x774] ss:$8 sps:$4 sm:$0xff]  }
 0x3d9   : > { %7271 = vmatprep.mubr.bf16.mxu1 %v3465_v2  ;;  %v12910_v2 = vld [vmem:[#allocation2 + $0x88] sm:$0xff] }
 0x3da   : > { %7748 = vmatmul.mubr.bf16.gmra.mrb[148].mxu0 %v3980_v1  ;;  %v10932_v1 = vcombine.high %v1791_v53, %v12910_v2 }
 0x3db   : > { %7757 = vmatprep.mubr.bf16.mxu0 %v3986_v23  ;;  %v3476_v23 = vrot.slane %v17595_v32, 2 }
 0x3dd   : > { %v3477_v4 = vsel %vm3271_vm6, %v3472_v17, %v3476_v23 }
 0x3e0   : > { %7272 = vmatmul.mubr.bf16.vlgmr.msra.gmra.mrb[0].mxu1 %v3462_v38  ;;  %v3999_v38 = vrot.slane %v17520_v37, 3 }
 0x3e1   : > { %7473 = vmatpush1.bf16.msra.mxu1 %v12803_v50  ;;  %7281 = vmatprep.mubr.bf16.mxu1 %v3469_v42  ;;  %v3991_v50 = vrot.slane %v17598_v11, 3  ;;  %v10902_v42 = vcombine.high %v1776_v29, %v1776_v29  ;;  %v4001_v11 = vrot.slane %v17435_v7, 3 }
 0x3e2   : > { %7474 = vmatprep.subr.bf16.mxu1 %v12808_v55  ;;  %7758 = vmatmul.mubr.bf16.gmra.mrb[152].mxu0 %v3984_v21  ;;  %v3998_v55 = vrot.slane %v10932_v1, 3  ;;  %v10931_v21 = vcombine.low %v1791_v53, %v12910_v2  ;;  %v10901_v53 = vcombine.low %v1776_v29, %v1776_v29  ;;  %v3486_v29 = vrot.slane %v17520_v37, 2 }
 0x3e3   : > { %7767 = vmatprep.mubr.bf16.mxu0 %v3990_v20  ;;  %v3992_v32 = vsel %vm3972_vm7, %v3987_v56, %v3991_v50  ;;  %v3475_v56 = vsel %vm3271_vm6, %v3470_v24, %v3474_v54  ;;  %v12848_v50 = vld [vmem:[#allocation9 + $0x794] ss:$8 sps:$4 sm:$0xff]  }
 0x3e4   : > { %v4000_v20 = vsel %vm3972_vm7, %v3998_v55, %v3999_v38  ;;  %v3995_v17 = vrot.slane %v10931_v21, 3 }
 0x3e5   : > { %7475 = vmatpush1.bf16.msra.mxu1 %v12806_v28  ;;  %v12826_v28 = vld [vmem:[#allocation9 + $0x750] ss:$8 sps:$4 sm:$0xff]  }
 0x3e6   : > { %7476 = vmatprep.subr.bf16.mxu1 %v12812_v52  ;;  %v12832_v52 = vld [vmem:[#allocation9 + $0x764] ss:$8 sps:$4 sm:$0xff]  }
 0x3e8   : > { %7282 = vmatmul.mubr.bf16.gmra.mrb[4].mxu1 %v3467_v5  ;;  %v12830_v5 = vld [vmem:[#allocation9 + $0x760] ss:$8 sps:$4 sm:$0xff]  }
 0x3e9   : > { %7291 = vmatprep.mubr.bf16.mxu1 %v3473_v36  ;;  %7477 = vmatpush1.bf16.msra.mxu1 %v12810_v0  ;;  %v3480_v0 = vrot.slane %v10902_v42, 2  ;;  %v4003_v36 = vrot.slane %v17428_v48, 3  ;;  %v4002_v42 = vsel %vm3972_vm7, %v3996_v34, %v4001_v11 }
 0x3ea   : > { %7478 = vmatprep.subr.bf16.mxu1 %v12819_v27  ;;  %7768 = vmatmul.mubr.bf16.gmra.mrb[156].mxu0 %v3988_v61  ;;  %v1777_v27 = vld [vmem:[#allocation2 + $0x80] sm:$0xcc] }
 0x3eb   : > { %7777 = vmatprep.mubr.bf16.mxu0 %v3994_v10  ;;  %v15426_v61 = vcombine.high %v1777_v27, %v12910_v2  ;;  %v12844_v10 = vld [vmem:[#allocation9 + $0x784] ss:$8 sps:$4 sm:$0xff]   ;;  %v4004_v1 = vsel %vm3972_vm7, %v3999_v38, %v4003_v36  ;;  %v15435_v55 = vcombine.low %v1777_v27, %v12910_v2  ;;  %v3490_v2 = vrot.slane %v17428_v48, 2  ;;  %v12859_v27 = vld [vmem:[#allocation9 + $0x7b4] ss:$8 sps:$4 sm:$0xff]  }
 0x3ed   : > { %7479 = vmatpush1.bf16.msra.mxu1 %v12817_v63  ;;  %v3481_v63 = vsel %vm3271_vm6, %v3476_v23, %v3480_v0  ;;  %v3485_v24 = vrot.slane %v15426_v61, 2  ;;  %v12842_v23 = vld [vmem:[#allocation9 + $0x780] ss:$8 sps:$4 sm:$0xff]   ;;  %v3482_v21 = vrot.slane %v15435_v55, 2  ;;  %v4005_v0 = vrot.slane %v17553_v58, 3 }
 0x3ee   : > { %7480 = vmatprep.subr.bf16.mxu1 %v12824_v45  ;;  %v3997_v45 = vsel %vm3972_vm7, %v3995_v17, %v3996_v34  ;;  %v4011_v34 = vrot.slane %v15170_v46, 3 }
 0x3ef   : > { %v3487_v38 = vsel %vm3271_vm6, %v3485_v24, %v3486_v29 }
 0x3f0   : > { %7292 = vmatmul.mubr.bf16.gmra.mrb[8].mxu1 %v3471_v3  ;;  %v4007_v3 = vrot.slane %v17543_v51, 3 }
 0x3f1   : > { %7301 = vmatprep.mubr.bf16.mxu1 %v3477_v4  ;;  %7481 = vmatpush1.bf16.msra.mxu1 %v12822_v35  ;;  %v3478_v35 = vrot.slane %v10901_v53, 2  ;;  %v12846_v4 = vld [vmem:[#allocation9 + $0x790] ss:$8 sps:$4 sm:$0xff]  }
 0x3f2   : > { %7482 = vmatprep.subr.bf16.mxu1 %v12828_v62  ;;  %7778 = vmatmul.mubr.bf16.gmra.mrb[160].mxu0 %v3992_v32  ;;  %v4008_v32 = vsel %vm3972_vm7, %v4003_v36, %v4007_v3  ;;  %v12857_v53 = vld [vmem:[#allocation9 + $0x7b0] ss:$8 sps:$4 sm:$0xff]  }
 0x3f3   : > { %7787 = vmatprep.mubr.bf16.mxu0 %v4000_v20  ;;  %v3479_v62 = vsel %vm3271_vm6, %v3474_v54, %v3478_v35  ;;  %v12850_v20 = vld [vmem:[#allocation9 + $0x7a0] ss:$8 sps:$4 sm:$0xff]  }
 0x3f4   : > { %v12862_v35 = vld [vmem:[#allocation9 + $0x7c0] ss:$8 sps:$4 sm:$0xff]  }
 0x3f5   : > { %7483 = vmatpush1.bf16.msra.mxu1 %v12826_v28  ;;  %v12852_v28 = vld [vmem:[#allocation9 + $0x7a4] ss:$8 sps:$4 sm:$0xff]  }
 0x3f6   : > { %7484 = vmatprep.subr.bf16.mxu1 %v12832_v52  ;;  %v3483_v52 = vrot.slane %v17530_v44, 2 }
 0x3f8   : > { %7302 = vmatmul.mubr.bf16.gmra.mrb[12].mxu1 %v3475_v56  ;;  %v3484_v17 = vsel %vm3271_vm6, %v3482_v21, %v3483_v52  ;;  %v3491_v56 = vsel %vm3271_vm6, %v3486_v29, %v3490_v2  ;;  %v17599_v29 = vld [vmem:[#allocation36_spill] sm:$0xff]  ;;  %v12866_v21 = vld [vmem:[#allocation9 + $0x7d0] ss:$8 sps:$4 sm:$0xff]  }
 0x3f9   : > { %7311 = vmatprep.mubr.bf16.mxu1 %v3481_v63  ;;  %7485 = vmatpush1.bf16.msra.mxu1 %v12830_v5  ;;  %v4006_v63 = vsel %vm3972_vm7, %v4001_v11, %v4005_v0 }
 0x3fa   : > { %7486 = vmatprep.subr.bf16.mxu1 %v12839_v9  ;;  %7788 = vmatmul.mubr.bf16.gmra.mrb[164].mxu0 %v3997_v45  ;;  %v4012_v45 = vsel %vm3972_vm7, %v4007_v3, %v4011_v34 }
 0x3fb   : > { %7797 = vmatprep.mubr.bf16.mxu0 %v4004_v1  ;;  %v3494_v1 = vrot.slane %v17543_v51, 2 }
 0x3fd   : > { %7487 = vmatpush1.bf16.msra.mxu1 %v12837_v39  ;;  %v12864_v39 = vld [vmem:[#allocation9 + $0x7c4] ss:$8 sps:$4 sm:$0xff]  }
 0x3fe   : > { %7488 = vmatprep.subr.bf16.mxu1 %v12844_v10  ;;  %v3488_v10 = vrot.slane %v17435_v7, 2 }
 0x400   : > { %7312 = vmatmul.mubr.bf16.gmra.mrb[16].mxu1 %v3479_v62  ;;  %v3489_v11 = vsel %vm3271_vm6, %v3483_v52, %v3488_v10 }
 0x401   : > { %7321 = vmatprep.mubr.bf16.mxu1 %v3487_v38  ;;  %7489 = vmatpush1.bf16.msra.mxu1 %v12842_v23  ;;  %v4009_v23 = vrot.slane %v17599_v29, 3  ;;  %v17600_v38 = vld [vmem:[#allocation37_spill] sm:$0xff] }
 0x402   : > { %7490 = vmatprep.subr.bf16.mxu1 %v12848_v50  ;;  %7798 = vmatmul.mubr.bf16.gmra.mrb[168].mxu0 %v4002_v42  ;;  %v12868_v50 = vld [vmem:[#allocation9 + $0x7d4] ss:$8 sps:$4 sm:$0xff]   ;;  %v3495_v42 = vsel %vm3271_vm6, %v3490_v2, %v3494_v1  ;;  %v3498_v2 = vrot.slane %v15170_v46, 2 }
 0x403   : > { %7807 = vmatprep.mubr.bf16.mxu0 %v4008_v32 }
 0x404   : > { %v3499_v46 = vsel %vm3271_vm6, %v3494_v1, %v3498_v2 }
 0x405   : > { %7491 = vmatpush1.bf16.msra.mxu1 %v12846_v4  ;;  %v15443_v54 = vpop.f32.mrb[64].mxu0  ;;  %v4015_v4 = vrot.slane %v17600_v38, 3 }
 0x406   : > { %7492 = vmatprep.subr.bf16.mxu1 %v12852_v28  ;;  %v15446_v5 = vpop.f32.mrb[65].mxu0  ;;  %v1792_v28 = vld [vmem:[#allocation2 + $0xf0] sm:$0x88] }
 0x407   : > { %v15450_v9 = vpop.f32.mrb[66].mxu0  ;;  %v4016_v52 = vsel %vm3972_vm7, %v4011_v34, %v4015_v4  ;;  %v4021_v4 = vrot.slane %v14367_v26, 3 }
 0x408   : > { %7322 = vmatmul.mubr.bf16.gmra.mrb[20].mxu1 %v3484_v17  ;;  %v15453_v36 = vpop.f32.mrb[67].mxu0  ;;  %v3492_v17 = vrot.slane %v17553_v58, 2 }
 0x409   : > { %7331 = vmatprep.mubr.bf16.mxu1 %v3491_v56  ;;  %7493 = vmatpush1.bf16.msra.mxu1 %v12850_v20  ;;  %v4010_v20 = vsel %vm3972_vm7, %v4005_v0, %v4009_v23  ;;  %v12911_v56 = vld [vmem:[#allocation2 + $0xf8] sm:$0xff] }
 0x40a   : > { %7494 = vmatprep.subr.bf16.mxu1 %v12859_v27  ;;  %7808 = vmatmul.mubr.bf16.gmra.mrb[172].mxu0 %v4006_v63  ;;  %v12871_v27 = vld [vmem:[#allocation9 + $0x7e4] ss:$8 sps:$4 sm:$0xff]   ;;  %v12875_v0 = vld [vmem:[#allocation9 + $0x7f4] ss:$8 sps:$4 sm:$0xff]   ;;  %v3493_v34 = vsel %vm3271_vm6, %v3488_v10, %v3492_v17 }
 0x40b   : > { %7817 = vmatprep.mubr.bf16.mxu0 %v4012_v45  ;;  %v1779_v63 = vld [vmem:[#allocation2 + $0xd0] sm:$0x33] }
 0x40d   : > { %7495 = vmatpush1.bf16.msra.mxu1 %v12857_v53  ;;  %v15459_v24 = vpop.f32.mrb[68].mxu0  ;;  %v10934_v53 = vcombine.high %v1792_v28, %v12911_v56 }
 0x40e   : > { %7496 = vmatprep.subr.bf16.mxu1 %v12864_v39  ;;  %v15462_v62 = vpop.f32.mrb[69].mxu0  ;;  %v12869_v39 = vld [vmem:[#allocation9 + $0x7e0] ss:$8 sps:$4 sm:$0xff]  }
 0x40f   : > { %v15466_v3 = vpop.f32.mrb[70].mxu0  ;;  %v4020_v38 = vrot.slane %v10934_v53, 3  ;;  %v3496_v53 = vrot.slane %v17599_v29, 2 }
 0x410   : > { %7332 = vmatmul.mubr.bf16.gmra.mrb[24].mxu1 %v3489_v11  ;;  %v15469_v32 = vpop.f32.mrb[71].mxu0 }
 0x411   : > { %7341 = vmatprep.mubr.bf16.mxu1 %v3495_v42  ;;  %7497 = vmatpush1.bf16.msra.mxu1 %v12862_v35  ;;  %v17601_v35 = vld [vmem:[#allocation42_spill] sm:$0xff]  ;;  %v4022_v10 = vsel %vm3972_vm7, %v4020_v38, %v4021_v4 }
 0x412   : > { %7498 = vmatprep.subr.bf16.mxu1 %v12868_v50  ;;  %7818 = vmatmul.mubr.bf16.gmra.mrb[176].mxu0 %v4010_v20  ;;  %v4013_v11 = vrot.slane %v17601_v35, 3  ;;  %v10933_v35 = vcombine.low %v1792_v28, %v12911_v56  ;;  %v4025_v28 = vrot.slane %v14451_v41, 3 }
 0x413   : > { %7827 = vmatprep.mubr.bf16.mxu0 %v4016_v52  ;;  %v12873_v52 = vld [vmem:[#allocation9 + $0x7f0] ss:$8 sps:$4 sm:$0xff]  }
 0x415   : > { %7499 = vmatpush1.bf16.msra.mxu1 %v12866_v21  ;;  %v15475_v45 = vpop.f32.mrb[72].mxu0  ;;  %v10908_v21 = vcombine.high %v1779_v63, %v1779_v63 }
 0x416   : > { %7500 = vmatprep.subr.bf16.mxu1 %v12871_v27  ;;  %v15478_v50 = vpop.f32.mrb[73].mxu0  ;;  %v4014_v27 = vsel %vm3972_vm7, %v4009_v23, %v4013_v11  ;;  %v3497_v23 = vsel %vm3271_vm6, %v3492_v17, %v3496_v53  ;;  %v10907_v11 = vcombine.low %v1779_v63, %v1779_v63  ;;  %v3508_v63 = vrot.slane %v14367_v26, 2 }
 0x417   : > { %17602 = vst [vmem:[#allocation49_spill] sm:$0xff] %v15478_v50  ;;  %v15482_v42 = vpop.f32.mrb[74].mxu0  ;;  %v4017_v50 = vrot.slane %v10933_v35, 3 }
 0x418   : > { %17603 = vst [vmem:[#allocation50_spill] sm:$0xff] %v15482_v42  ;;  %7342 = vmatmul.mubr.bf16.gmra.mrb[28].mxu1 %v3493_v34  ;;  %v15485_v20 = vpop.f32.mrb[75].mxu0  ;;  %v3502_v42 = vrot.slane %v10908_v21, 2  ;;  %v1780_v34 = vld [vmem:[#allocation2 + $0xf0] sm:$0xcc]  ;;  %v3500_v35 = vrot.slane %v10907_v11, 2 }
 0x419   : > { %17604 = vst [vmem:[#allocation55_spill] sm:$0xff] %v15485_v20  ;;  %7351 = vmatprep.mubr.bf16.mxu1 %v3499_v46  ;;  %7501 = vmatpush1.bf16.msra.mxu1 %v12869_v39  ;;  %v4018_v46 = vrot.slane %v14440_v43, 3  ;;  %v12912_v39 = vld [vmem:[#allocation9 + $0x804] ss:$8 sps:$4 sm:$0xff]   ;;  %v15500_v38 = vcombine.high %v1780_v34, %v12911_v56 }
 0x41a   : > { %7502 = vmatprep.subr.bf16.mxu1 %v12875_v0  ;;  %7828 = vmatmul.mubr.bf16.gmra.mrb[180].mxu0 %v4014_v27  ;;  %v3503_v29 = vsel %vm3271_vm6, %v3498_v2, %v3502_v42  ;;  %v4026_v27 = vsel %vm3972_vm7, %v4021_v4, %v4025_v28  ;;  %v4023_v2 = vrot.slane %v14478_v49, 3 }
 0x41b   : > { %7837 = vmatprep.mubr.bf16.mxu0 %v4022_v10  ;;  %v3507_v17 = vrot.slane %v15500_v38, 2 }
 0x41d   : > { %7503 = vmatpush1.bf16.msra.mxu1 %v12873_v52  ;;  %v15490_v1 = vpop.f32.mrb[76].mxu0  ;;  %v4019_v52 = vsel %vm3972_vm7, %v4017_v50, %v4018_v46  ;;  %v15515_v50 = vcombine.low %v1780_v34, %v12911_v56  ;;  %v3509_v4 = vsel %vm3271_vm6, %v3507_v17, %v3508_v63  ;;  %v3512_v56 = vrot.slane %v14451_v41, 2 }
 0x41e   : > { %17605 = vst [vmem:[#allocation40_spill] sm:$0xff] %v15490_v1  ;;  %11452 = vmatprep.subr.bf16.mxu1 %v12912_v39  ;;  %v15493_v20 = vpop.f32.mrb[77].mxu0  ;;  %v3501_v39 = vsel %vm3271_vm6, %v3496_v53, %v3500_v35  ;;  %v3505_v53 = vrot.slane %v14440_v43, 2  ;;  %v4027_v35 = vrot.slane %v14531_v15, 3 }
 0x41f   : > { %17606 = vst [vmem:[#allocation53_spill] sm:$0xff] %v15493_v20  ;;  %v15497_v0 = vpop.f32.mrb[78].mxu0 }
 0x420   : > { %17607 = vst [vmem:[#allocation54_spill] sm:$0xff] %v15497_v0  ;;  %7352 = vmatmul.mubr.bf16.gmra.mrb[32].mxu1 %v3497_v23  ;;  %v15502_v21 = vpop.f32.mrb[79].mxu0  ;;  %v4029_v23 = vrot.slane %v14494_v60, 3  ;;  %v12913_v0 = vld [vmem:[#allocation2 + $0x168] sm:$0xff] }
 0x421   : > { %17608 = vst [vmem:[#allocation48_spill] sm:$0xff] %v15502_v21  ;;  %7361 = vmatprep.mubr.bf16.mxu1 %v3503_v29 }
 0x422   : > { %7838 = vmatmul.mubr.bf16.gmra.mrb[184].mxu0 %v4019_v52  ;;  %v4024_v52 = vsel %vm3972_vm7, %v4018_v46, %v4023_v2 }
 0x423   : > { %7847 = vmatprep.mubr.bf16.mxu0 %v4026_v27  ;;  %v4030_v27 = vsel %vm3972_vm7, %v4025_v28, %v4029_v23  ;;  %v3513_v28 = vsel %vm3271_vm6, %v3508_v63, %v3512_v56 }
 0x425   : > { %v15508_v10 = vpop.f32.mrb[80].mxu0 }
 0x426   : > { %17609 = vst [vmem:[#allocation56_spill] sm:$0xff] %v15508_v10  ;;  %v15511_v42 = vpop.f32.mrb[81].mxu0  ;;  %v17619_v10 = vld [vmem:[#allocation46_spill] sm:$0xff] }
 0x427   : > { %17610 = vst [vmem:[#allocation44_spill] sm:$0xff] %v15511_v42  ;;  %v15517_v29 = vpop.f32.mrb[82].mxu0  ;;  %v3504_v42 = vrot.slane %v15515_v50, 2 }
 0x428   : > { %17611 = vst [vmem:[#allocation62_spill] sm:$0xff] %v15517_v29  ;;  %7362 = vmatmul.mubr.bf16.gmra.mrb[36].mxu1 %v3501_v39  ;;  %v15520_v11 = vpop.f32.mrb[83].mxu0  ;;  %v3510_v29 = vrot.slane %v14478_v49, 2 }
 0x429   : > { %17612 = vst [vmem:[#allocation67_spill] sm:$0xff] %v15520_v11  ;;  %7371 = vmatprep.mubr.bf16.mxu1 %v3509_v4  ;;  %v3506_v39 = vsel %vm3271_vm6, %v3504_v42, %v3505_v53  ;;  %v17615_v4 = vld [vmem:[#allocation47_spill] sm:$0xff]  ;;  %v3516_v42 = vrot.slane %v14494_v60, 2 }
 0x42a   : > { %7848 = vmatmul.mubr.bf16.gmra.mrb[188].mxu0 %v4024_v52  ;;  %v4033_v46 = vrot.slane %v17615_v4, 3  ;;  %v3511_v63 = vsel %vm3271_vm6, %v3505_v53, %v3510_v29 }
 0x42b   : > { %7857 = vmatprep.mubr.bf16.mxu0 %v4030_v27  ;;  %v4028_v27 = vsel %vm3972_vm7, %v4023_v2, %v4027_v35  ;;  %v3517_v2 = vsel %vm3271_vm6, %v3512_v56, %v3516_v42  ;;  %v4035_v56 = vrot.slane %v15258_v18, 3 }
 0x42d   : > { %v15527_v34 = vpop.f32.mrb[84].mxu0 }
 0x42e   : > { %17613 = vst [vmem:[#allocation68_spill] sm:$0xff] %v15527_v34  ;;  %v15530_v17 = vpop.f32.mrb[85].mxu0  ;;  %v4034_v34 = vsel %vm3972_vm7, %v4029_v23, %v4033_v46  ;;  %v1793_v23 = vld [vmem:[#allocation2 + $0x160] sm:$0x88] }
 0x42f   : > { %17614 = vst [vmem:[#allocation63_spill] sm:$0xff] %v15530_v17  ;;  %v15534_v52 = vpop.f32.mrb[86].mxu0  ;;  %v10936_v53 = vcombine.high %v1793_v23, %v12913_v0 }
 0x430   : > { %17616 = vst [vmem:[#allocation64_spill] sm:$0xff] %v15534_v52  ;;  %7372 = vmatmul.mubr.bf16.gmra.mrb[40].mxu1 %v3506_v39  ;;  %v15537_v11 = vpop.f32.mrb[87].mxu0  ;;  %v4031_v52 = vrot.slane %v17619_v10, 3 }
 0x431   : > { %17617 = vst [vmem:[#allocation70_spill] sm:$0xff] %v15537_v11  ;;  %7381 = vmatprep.mubr.bf16.mxu1 %v3513_v28  ;;  %v17621_v11 = vld [vmem:[#allocation52_spill] sm:$0xff] }
 0x432   : > { %7858 = vmatmul.mubr.bf16.gmra.mrb[192].mxu0 %v4028_v27  ;;  %v4037_v28 = vrot.slane %v17621_v11, 3  ;;  %v3520_v11 = vrot.slane %v17615_v4, 2  ;;  %v4036_v4 = vsel %vm3972_vm7, %v4031_v52, %v4035_v56 }
 0x433   : > { %7867 = vmatprep.mubr.bf16.mxu0 %v4034_v34  ;;  %v4032_v34 = vsel %vm3972_vm7, %v4027_v35, %v4031_v52  ;;  %v4042_v35 = vrot.slane %v10936_v53, 3 }
 0x435   : > { %v15543_v17 = vpop.f32.mrb[88].mxu0 }
 0x436   : > { %17618 = vst [vmem:[#allocation51_spill] sm:$0xff] %v15543_v17  ;;  %v15546_v39 = vpop.f32.mrb[89].mxu0  ;;  %v4038_v17 = vsel %vm3972_vm7, %v4033_v46, %v4037_v28  ;;  %v3521_v28 = vsel %vm3271_vm6, %v3516_v42, %v3520_v11 }
 0x437   : > { %17620 = vst [vmem:[#allocation65_spill] sm:$0xff] %v15546_v39  ;;  %v15550_v21 = vpop.f32.mrb[90].mxu0  ;;  %v3514_v39 = vrot.slane %v14531_v15, 2 }
 0x438   : > { %17622 = vst [vmem:[#allocation61_spill] sm:$0xff] %v15550_v21  ;;  %7382 = vmatmul.mubr.bf16.gmra.mrb[44].mxu1 %v3511_v63  ;;  %v15553_v27 = vpop.f32.mrb[91].mxu0  ;;  %v1782_v21 = vld [vmem:[#allocation2 + $0x140] sm:$0x33] }
 0x439   : > { %17623 = vst [vmem:[#allocation66_spill] sm:$0xff] %v15553_v27  ;;  %7391 = vmatprep.mubr.bf16.mxu1 %v3517_v2  ;;  %v3515_v2 = vsel %vm3271_vm6, %v3510_v29, %v3514_v39  ;;  %v3518_v29 = vrot.slane %v17619_v10, 2 }
 0x43a   : > { %7868 = vmatmul.mubr.bf16.gmra.mrb[196].mxu0 %v4032_v34  ;;  %v17271_v34 = vrot.slane %v14539_v30, 3 }
 0x43b   : > { %7877 = vmatprep.mubr.bf16.mxu0 %v4038_v17  ;;  %v10914_v17 = vcombine.high %v1782_v21, %v1782_v21  ;;  %v3519_v52 = vsel %vm3271_vm6, %v3514_v39, %v3518_v29 }
 0x43c   : > { %v4044_v18 = vsel %vm3972_vm7, %v4042_v35, %v17271_v34 }
 0x43d   : > { %v15559_v63 = vpop.f32.mrb[92].mxu0  ;;  %v3524_v53 = vrot.slane %v10914_v17, 2 }
 0x43e   : > { %17624 = vst [vmem:[#allocation57_spill] sm:$0xff] %v15559_v63  ;;  %v15562_v20 = vpop.f32.mrb[93].mxu0  ;;  %v10935_v63 = vcombine.low %v1793_v23, %v12913_v0  ;;  %v10913_v23 = vcombine.low %v1782_v21, %v1782_v21  ;;  %v3530_v21 = vrot.slane %v14539_v30, 2 }
 0x43f   : > { %17625 = vst [vmem:[#allocation22_spill] sm:$0xff] %v15562_v20  ;;  %v15566_v46 = vpop.f32.mrb[94].mxu0  ;;  %v17270_v20 = vrot.slane %v14544_v25, 3  ;;  %v3525_v35 = vsel %vm3271_vm6, %v3520_v11, %v3524_v53 }
 0x440   : > { %17626 = vst [vmem:[#allocation69_spill] sm:$0xff] %v15566_v46  ;;  %7392 = vmatmul.mubr.bf16.gmra.mrb[48].mxu1 %v3515_v2  ;;  %v15569_v27 = vpop.f32.mrb[95].mxu0  ;;  %v1783_v46 = vld [vmem:[#allocation2 + $0x160] sm:$0xcc]  ;;  %v4039_v42 = vrot.slane %v10935_v63, 3  ;;  %v3522_v17 = vrot.slane %v10913_v23, 2 }
 0x441   : > { %17627 = vst [vmem:[#allocation59_spill] sm:$0xff] %v15569_v27  ;;  %7401 = vmatprep.mubr.bf16.mxu1 %v3521_v28  ;;  %v15585_v28 = vcombine.high %v1783_v46, %v12913_v0  ;;  %v15599_v53 = vcombine.low %v1783_v46, %v12913_v0 }
 0x442   : > { %7878 = vmatmul.mubr.bf16.gmra.mrb[200].mxu0 %v4036_v4  ;;  %v4041_v63 = vsel %vm3972_vm7, %v4039_v42, %v17270_v20  ;;  %v3523_v11 = vsel %vm3271_vm6, %v3518_v29, %v3522_v17  ;;  %v3534_v20 = vrot.slane %v14592_v47, 2 }
 0x443   : > { %7887 = vmatprep.mubr.bf16.mxu0 %v4044_v18  ;;  %v3529_v4 = vrot.slane %v15585_v28, 2  ;;  %v3526_v23 = vrot.slane %v15599_v53, 2 }
 0x444   : > { %v3535_v29 = vsel %vm3271_vm6, %v3530_v21, %v3534_v20 }
 0x445   : > { %v15576_v2 = vpop.f32.mrb[96].mxu0 }
 0x446   : > { %17628 = vst [vmem:[#allocation27_spill] sm:$0xff] %v15576_v2  ;;  %v15579_v27 = vpop.f32.mrb[97].mxu0 }
 0x447   : > { %17629 = vst [vmem:[#allocation26_spill] sm:$0xff] %v15579_v27  ;;  %v15582_v56 = vpop.f32.mrb[98].mxu0 }
 0x448   : > { %17630 = vst [vmem:[#allocation60_spill] sm:$0xff] %v15582_v56  ;;  %7402 = vmatmul.mubr.bf16.gmra.mrb[52].mxu1 %v3519_v52  ;;  %v15587_v10 = vpop.f32.mrb[99].mxu0 }
 0x449   : > { %17631 = vst [vmem:[#allocation58_spill] sm:$0xff] %v15587_v10  ;;  %7411 = vmatprep.mubr.bf16.mxu1 %v3525_v35  ;;  %v3531_v35 = vsel %vm3271_vm6, %v3529_v4, %v3530_v21  ;;  %v3532_v4 = vrot.slane %v17574_v40, 2  ;;  %v12914_v21 = vld [vmem:[#allocation2 + $0x1a0] sm:$0xff] }
 0x44a   : > { %7888 = vmatmul.mubr.bf16.gmra.mrb[204].mxu0 %v4041_v63  ;;  %v3527_v63 = vrot.slane %v14544_v25, 2 }
 0x44c   : > { %v3528_v0 = vsel %vm3271_vm6, %v3526_v23, %v3527_v63 }
 0x44d   : > { %v15594_v39 = vpop.f32.mrb[100].mxu0 }
 0x44e   : > { %17632 = vst [vmem:[#allocation30_spill] sm:$0xff] %v15594_v39  ;;  %v15596_v18 = vpop.f32.mrb[101].mxu0 }
 0x44f   : > { %17633 = vst [vmem:[#allocation32_spill] sm:$0xff] %v15596_v18  ;;  %v15601_v52 = vpop.f32.mrb[102].mxu0 }
 0x450   : > { %17634 = vst [vmem:[#allocation23_spill] sm:$0xff] %v15601_v52  ;;  %7412 = vmatmul.mubr.bf16.gmra.mrb[56].mxu1 %v3523_v11  ;;  %v15604_v42 = vpop.f32.mrb[103].mxu0  ;;  %v3538_v11 = vrot.slane %v17575_v31, 2 }
 0x451   : > { %17635 = vst [vmem:[#allocation35_spill] sm:$0xff] %v15604_v42  ;;  %7421 = vmatprep.mubr.bf16.mxu1 %v3531_v35  ;;  %v1784_v35 = vld [vmem:[#allocation2 + $0x1a8] sm:$0xff] }
 0x455   : > { %v15609_v34 = vpop.f32.mrb[104].mxu0 }
 0x456   : > { %17636 = vst [vmem:[#allocation25_spill] sm:$0xff] %v15609_v34  ;;  %v15611_v18 = vpop.f32.mrb[105].mxu0 }
 0x457   : > { %17637 = vst [vmem:[#allocation28_spill] sm:$0xff] %v15611_v18  ;;  %v15614_v46 = vpop.f32.mrb[106].mxu0  ;;  %v3533_v18 = vsel %vm3271_vm6, %v3527_v63, %v3532_v4 }
 0x458   : > { %17638 = vst [vmem:[#allocation29_spill] sm:$0xff] %v15614_v46  ;;  %7422 = vmatmul.mubr.bf16.gmra.mrb[60].mxu1 %v3528_v0  ;;  %v15617_v17 = vpop.f32.mrb[107].mxu0  ;;  %v3539_v0 = vsel %vm3271_vm6, %v3534_v20, %v3538_v11  ;;  %v15629_v46 = vcombine.high %v12914_v21, %v1784_v35 }
 0x459   : > { %17639 = vst [vmem:[#allocation31_spill] sm:$0xff] %v15617_v17  ;;  %7431 = vmatprep.mubr.bf16.mxu1 %v3535_v29  ;;  %v3536_v17 = vrot.slane %v17578_v6, 2 }
 0x45a   : > { %v3542_v52 = vrot.slane %v15629_v46, 2 }
 0x45b   : > { %v3537_v63 = vsel %vm3271_vm6, %v3532_v4, %v3536_v17 }
 0x45d   : > { %v15621_v42 = vpop.f32.mrb[108].mxu0 }
 0x45e   : > { %17640 = vst [vmem:[#allocation36_spill] sm:$0xff] %v15621_v42  ;;  %v15623_v34 = vpop.f32.mrb[109].mxu0  ;;  %v1785_v42 = vld [vmem:[#allocation2 + $0x1b0] sm:$0x33] }
 0x45f   : > { %17641 = vst [vmem:[#allocation37_spill] sm:$0xff] %v15623_v34  ;;  %v15626_v23 = vpop.f32.mrb[110].mxu0 }
 0x460   : > { %17642 = vst [vmem:[#allocation42_spill] sm:$0xff] %v15626_v23  ;;  %7432 = vmatmul.mubr.bf16.gmra.mrb[64].mxu1 %v3533_v18  ;;  %v15631_v29 = vpop.f32.mrb[111].mxu0  ;;  %v15640_v18 = vcombine.low %v12914_v21, %v1784_v35  ;;  %v3543_v23 = vsel %vm3271_vm6, %v3538_v11, %v3542_v52  ;;  %v10919_v21 = vcombine.low %v1785_v42, %v1785_v42 }
 0x461   : > { %17643 = vst [vmem:[#allocation47_spill] sm:$0xff] %v15631_v29  ;;  %7441 = vmatprep.mubr.bf16.mxu1 %v3539_v0  ;;  %v10920_v29 = vcombine.high %v1785_v42, %v1785_v42 }
 0x462   : > { %v3540_v10 = vrot.slane %v15640_v18, 2 }
 0x463   : > { %v3546_v56 = vrot.slane %v10920_v29, 2  ;;  %v17651_v29 = vshrl.u32 %v17584_v22, 16 }
 0x464   : > { %v3541_v35 = vsel %vm3271_vm6, %v3536_v17, %v3540_v10 }
 0x465   : > { %v15635_v39 = vpop.f32.mrb[112].mxu0  ;;  %v3547_v11 = vsel %vm3271_vm6, %v3542_v52, %v3546_v56  ;;  %v17654_v52 = vshrl.u32 %v17587_v33, 16 }
 0x466   : > { %17644 = vst [vmem:[#allocation46_spill] sm:$0xff] %v15635_v39  ;;  %v15637_v34 = vpop.f32.mrb[113].mxu0  ;;  %v3621_v39 = vshrl.u32 %v15383_v16, 16 }
 0x467   : > { %17645 = vst [vmem:[#allocation52_spill] sm:$0xff] %v15637_v34  ;;  %v15642_v20 = vpop.f32.mrb[114].mxu0  ;;  %v3624_v34 = vshll.u32 %v15383_v16, 16  ;;  %v3628_v16 = vrot.slane %v17651_v29, 2 }
 0x468   : > { %17646 = vst [vmem:[#allocation73_spill] sm:$0xff] %v15642_v20  ;;  %7442 = vmatmul.mubr.bf16.gmra.mrb[68].mxu1 %v3537_v63  ;;  %v15645_v0 = vpop.f32.mrb[115].mxu0 }
 0x469   : > { %17647 = vst [vmem:[#allocation74_spill] sm:$0xff] %v15645_v0  ;;  %7451 = vmatprep.mubr.bf16.mxu1 %v3543_v23  ;;  %v3623_v23 = vrot.slane %v3621_v39, 2  ;;  %v3626_v0 = vrot.slane %v3624_v34, 3 }
 0x46b   : > { %v3627_v1 = vor.u32 %v3626_v0, %v3623_v23  ;;  %v17658_v23 = vshll.u32 %v17591_v12, 16 }
 0x46d   : > { %v15650_v27 = vpop.f32.mrb[116].mxu0 }
 0x46e   : > { %17648 = vst [vmem:[#allocation75_spill] sm:$0xff] %v15650_v27  ;;  %v15652_v4 = vpop.f32.mrb[117].mxu0  ;;  %v17652_v27 = vshll.u32 %v17584_v22, 16  ;;  %v17655_v22 = vshll.u32 %v17587_v33, 16 }
 0x46f   : > { %17649 = vst [vmem:[#allocation76_spill] sm:$0xff] %v15652_v4  ;;  %v15655_v63 = vpop.f32.mrb[118].mxu0  ;;  %v3544_v4 = vrot.slane %v10919_v21, 2 }
 0x470   : > { %17650 = vst [vmem:[#allocation77_spill] sm:$0xff] %v15655_v63  ;;  %7452 = vmatmul.mubr.bf16.gmra.mrb[72].mxu1 %v3541_v35  ;;  %v15658_v20 = vpop.f32.mrb[119].mxu0  ;;  %v3629_v2 = vrot.slane %v17652_v27, 3  ;;  %v3636_v35 = vrot.slane %v17654_v52, 2  ;;  %v3637_v27 = vrot.slane %v17655_v22, 3  ;;  %v17663_v52 = vshll.u32 %v17592_v14, 16 }
 0x471   : > { %7461 = vmatprep.mubr.bf16.mxu1 %v3547_v11  ;;  %v3545_v56 = vsel %vm3271_vm6, %v3540_v10, %v3544_v4  ;;  %v17657_v10 = vshrl.u32 %v17591_v12, 16  ;;  %v12915_v22 = vld [vmem:[#allocation9 + $0x800] ss:$8 sps:$4 sm:$0xff]   ;;  %vm17696_vm6 = vmmov %vm17521_vm0 }
 0x472   : > { %v3630_v42 = vor.u32 %v3629_v2, %v3628_v16  ;;  %v3638_v0 = vor.u32 %v3637_v27, %v3636_v35  ;;  %v17660_v16 = vld [vmem:[#allocation71_spill] sm:$0xff]  ;;  %v3645_v35 = vrot.slane %v17663_v52, 3  ;;  %v17669_v52 = vshrl.u32 %v17594_v8, 16 }
 0x473   : > { %v3632_v4 = vrot.slane %v17657_v10, 2  ;;  %v12916_v10 = vld [vmem:[#allocation9 + $0x814] ss:$8 sps:$4 sm:$0xff]  }
 0x474   : > { %v3631_v34 = vsel %vm17653_vm15, %v3627_v1, %v3630_v42  ;;  %v3633_v1 = vrot.slane %v17658_v23, 3  ;;  %v3639_v33 = vsel %vm17661_vm5, %v3630_v42, %v3638_v0  ;;  %v12918_v42 = vld [vmem:[#allocation9 + $0x824] ss:$8 sps:$4 sm:$0xff]   ;;  %vm17728_vm15 = vmmov %vm17521_vm0 }
 0x475   : > { %v15664_v17 = vpop.f32.mrb[120].mxu0  ;;  %vm17731_vm5 = vmmov %vm17521_vm0 }
 0x476   : > { %v15666_v63 = vpop.f32.mrb[121].mxu0  ;;  %v3634_v12 = vor.u32 %v3633_v1, %v3632_v4 }
 0x477   : > { %v15669_v39 = vpop.f32.mrb[122].mxu0 }
 0x478   : > { %7462 = vmatmul.mubr.bf16.gmra.mrb[76].mxu1 %v3545_v56  ;;  %v15676_v21 = vpop.f32.mrb[123].mxu0  ;;  %v17662_v56 = vshrl.u32 %v17592_v14, 16 }
 0x479   : > { %7504 = vmatprep.mubr.bf16.mxu1 %v3631_v34 }
 0x47a   : > { %v3644_v34 = vrot.slane %v17662_v56, 2  ;;  %v17667_v56 = vld [vmem:[#allocation24_spill] sm:$0xff] }
 0x47b   : > { %v3635_v14 = vsel %vm17668_vm3, %v17667_v56, %v3634_v12  ;;  %vm17734_vm3 = vmmov %vm17521_vm0 }
 0x47c   : > { %v3646_v23 = vor.u32 %v3645_v35, %v3644_v34  ;;  %v12920_v34 = vld [vmem:[#allocation9 + $0x834] ss:$8 sps:$4 sm:$0xff]  }
 0x47d   : > { %v15678_v2 = vpop.f32.mrb[124].mxu0 }
 0x47e   : > { %v15680_v11 = vpop.f32.mrb[125].mxu0  ;;  %v3647_v4 = vsel %vm17672_vm4, %v3638_v0, %v3646_v23  ;;  %v17678_v0 = vld [vmem:[#allocation33_spill] sm:$0xff]  ;;  %vm17739_vm4 = vmmov %vm17521_vm0 }
 0x47f   : > { %17656 = vst [vmem:[#allocation78_spill] sm:$0xff] %v15680_v11  ;;  %v15686_v29 = vpop.f32.mrb[126].mxu0 }
 0x480   : > { %17659 = vst [vmem:[#allocation79_spill] sm:$0xff] %v15686_v29  ;;  %7505 = vmatmul.mubr.bf16.vlgmr.msra.gmra.mrb[0].mxu1 %v17660_v16  ;;  %v15694_v27 = vpop.f32.mrb[127].mxu0  ;;  %v12917_v29 = vld [vmem:[#allocation9 + $0x810] ss:$8 sps:$4 sm:$0xff]  }
 0x481   : > { %11468 = vmatpush1.bf16.msra.mxu1 %v12915_v22  ;;  %17664 = vst [vmem:[#allocation71_spill] sm:$0xff] %v15694_v27  ;;  %7514 = vmatprep.mubr.bf16.mxu1 %v3639_v33  ;;  %v3640_v22 = vrot.slane %v17669_v52, 2  ;;  %v17670_v33 = vshll.u32 %v17594_v8, 16  ;;  %v12922_v52 = vld [vmem:[#allocation9 + $0x844] ss:$8 sps:$4 sm:$0xff]  }
 0x482   : > { %11453 = vmatprep.subr.bf16.mxu1 %v12916_v10 }
 0x483   : > { %v3641_v27 = vrot.slane %v17670_v33, 3 }
 0x485   : > { %11469 = vmatpush1.bf16.msra.mxu1 %v12917_v29  ;;  %v15696_v16 = vpop.f32.mrb[128].mxu0  ;;  %v12919_v29 = vld [vmem:[#allocation9 + $0x820] ss:$8 sps:$4 sm:$0xff]   ;;  %v3642_v35 = vor.u32 %v3641_v27, %v3640_v22  ;;  %v12924_v22 = vld [vmem:[#allocation9 + $0x854] ss:$8 sps:$4 sm:$0xff]  }
 0x486   : > { %17665 = vst [vmem:[#allocation80_spill] sm:$0xff] %v15696_v16  ;;  %11454 = vmatprep.subr.bf16.mxu1 %v12918_v42  ;;  %v15698_v11 = vpop.f32.mrb[129].mxu0  ;;  %v12921_v42 = vld [vmem:[#allocation9 + $0x830] ss:$8 sps:$4 sm:$0xff]   ;;  %v12923_v27 = vld [vmem:[#allocation9 + $0x840] ss:$8 sps:$4 sm:$0xff]  }
 0x487   : > { %17666 = vst [vmem:[#allocation81_spill] sm:$0xff] %v15698_v11  ;;  %v15706_v10 = vpop.f32.mrb[130].mxu0 }
 0x488   : > { %17671 = vst [vmem:[#allocation24_spill] sm:$0xff] %v15706_v10  ;;  %7515 = vmatmul.mubr.bf16.gmra.mrb[4].mxu1 %v3635_v14  ;;  %v15709_v1 = vpop.f32.mrb[131].mxu0  ;;  %v3643_v14 = vsel %vm17676_vm13, %v3634_v12, %v3642_v35  ;;  %vm17743_vm13 = vmmov %vm17521_vm0 }
 0x489   : > { %17673 = vst [vmem:[#allocation82_spill] sm:$0xff] %v15709_v1  ;;  %7524 = vmatprep.mubr.bf16.mxu1 %v3647_v4  ;;  %11470 = vmatpush1.bf16.msra.mxu1 %v12919_v29  ;;  %v3665_v4 = vsel %vm17679_vm2, %v3646_v23, %v17678_v0  ;;  %v17683_v23 = vld [vmem:[#allocation34_spill] sm:$0xff]  ;;  %vm17747_vm2 = vmmov %vm17521_vm0 }
 0x48a   : > { %11455 = vmatprep.subr.bf16.mxu1 %v12920_v34  ;;  %v3697_v34 = vshrl.u32 %v15426_v61, 16  ;;  %v3656_v0 = vsel %vm17684_vm10, %v3642_v35, %v17683_v23  ;;  %v3685_v35 = vshrl.u32 %v15435_v55, 16  ;;  %v3688_v23 = vshll.u32 %v15435_v55, 16  ;;  %v17695_v55 = vld [vmem:[#allocation39_spill] sm:$0xff]  ;;  %vm17749_vm10 = vmmov %vm17521_vm0 }
 0x48d   : > { %11471 = vmatpush1.bf16.msra.mxu1 %v12921_v42  ;;  %v15711_v56 = vpop.f32.mrb[132].mxu0  ;;  %v3700_v42 = vshll.u32 %v15426_v61, 16  ;;  %v17687_v61 = vshll.u32 %v17520_v37, 16 }
 0x48e   : > { %17674 = vst [vmem:[#allocation83_spill] sm:$0xff] %v15711_v56  ;;  %11456 = vmatprep.subr.bf16.mxu1 %v12922_v52  ;;  %v15713_v8 = vpop.f32.mrb[133].mxu0  ;;  %v12925_v52 = vld [vmem:[#allocation9 + $0x850] ss:$8 sps:$4 sm:$0xff]  }
 0x48f   : > { %17675 = vst [vmem:[#allocation84_spill] sm:$0xff] %v15713_v8  ;;  %v15716_v33 = vpop.f32.mrb[134].mxu0 }
 0x490   : > { %17677 = vst [vmem:[#allocation85_spill] sm:$0xff] %v15716_v33  ;;  %7525 = vmatmul.mubr.bf16.gmra.mrb[8].mxu1 %v3643_v14  ;;  %v15720_v29 = vpop.f32.mrb[135].mxu0  ;;  %v12926_v33 = vld [vmem:[#allocation9 + $0x864] ss:$8 sps:$4 sm:$0xff]  }
 0x491   : > { %17680 = vst [vmem:[#allocation33_spill] sm:$0xff] %v15720_v29  ;;  %7534 = vmatprep.mubr.bf16.mxu1 %v3665_v4  ;;  %11472 = vmatpush1.bf16.msra.mxu1 %v12923_v27  ;;  %v3699_v27 = vrot.slane %v3697_v34, 2  ;;  %v17686_v29 = vshrl.u32 %v17520_v37, 16  ;;  %v12930_v37 = vld [vmem:[#allocation9 + $0x884] ss:$8 sps:$4 sm:$0xff]  }
 0x492   : > { %11457 = vmatprep.subr.bf16.mxu1 %v12924_v22  ;;  %v3702_v22 = vrot.slane %v3700_v42, 3 }
 0x493   : > { %v3704_v8 = vrot.slane %v17686_v29, 2 }
 0x494   : > { %v3703_v34 = vor.u32 %v3702_v22, %v3699_v27  ;;  %v17697_v27 = vshrl.u32 %v17428_v48, 16 }
 0x495   : > { %11473 = vmatpush1.bf16.msra.mxu1 %v12925_v52  ;;  %v15724_v12 = vpop.f32.mrb[136].mxu0  ;;  %v3705_v52 = vrot.slane %v17687_v61, 3 }
 0x496   : > { %17681 = vst [vmem:[#allocation86_spill] sm:$0xff] %v15724_v12  ;;  %11458 = vmatprep.subr.bf16.mxu1 %v12926_v33  ;;  %v15726_v14 = vpop.f32.mrb[137].mxu0  ;;  %v17689_v12 = vld [vmem:[#allocation72_spill] sm:$0xff]  ;;  %v3712_v22 = vrot.slane %v17697_v27, 2 }
 0x497   : > { %17682 = vst [vmem:[#allocation87_spill] sm:$0xff] %v15726_v14  ;;  %v15730_v4 = vpop.f32.mrb[138].mxu0  ;;  %v12927_v33 = vld [vmem:[#allocation9 + $0x860] ss:$8 sps:$4 sm:$0xff]   ;;  %v12928_v14 = vld [vmem:[#allocation9 + $0x874] ss:$8 sps:$4 sm:$0xff]   ;;  %v3706_v42 = vor.u32 %v3705_v52, %v3704_v8 }
 0x498   : > { %17685 = vst [vmem:[#allocation34_spill] sm:$0xff] %v15730_v4  ;;  %7535 = vmatmul.mubr.bf16.gmra.mrb[12].mxu1 %v3656_v0  ;;  %v15736_v56 = vpop.f32.mrb[139].mxu0  ;;  %v12929_v0 = vld [vmem:[#allocation9 + $0x870] ss:$8 sps:$4 sm:$0xff]   ;;  %v17698_v52 = vshll.u32 %v17428_v48, 16 }
 0x499   : > { %17688 = vst [vmem:[#allocation88_spill] sm:$0xff] %v15736_v56  ;;  %7544 = vmatprep.mubr.bf16.mxu1 %v17689_v12  ;;  %11474 = vmatpush1.bf16.msra.mxu1 %v12927_v33  ;;  %v3687_v56 = vrot.slane %v3685_v35, 2  ;;  %v3690_v12 = vrot.slane %v3688_v23, 3  ;;  %v17692_v33 = vshrl.u32 %v17530_v44, 16  ;;  %v3707_v8 = vsel %vm17696_vm6, %v3703_v34, %v3706_v42  ;;  %v12931_v23 = vld [vmem:[#allocation9 + $0x880] ss:$8 sps:$4 sm:$0xff]   ;;  %vm17753_vm6 = vmmov %vm17521_vm0 }
 0x49a   : > { %11459 = vmatprep.subr.bf16.mxu1 %v12928_v14  ;;  %v17693_v14 = vshll.u32 %v17530_v44, 16  ;;  %v12934_v34 = vld [vmem:[#allocation9 + $0x8a4] ss:$8 sps:$4 sm:$0xff]  }
 0x49b   : > { %v3692_v4 = vrot.slane %v17692_v33, 2  ;;  %v3691_v44 = vor.u32 %v3690_v12, %v3687_v56  ;;  %v17704_v12 = vshll.u32 %v17543_v51, 16 }
 0x49c   : > { %v3693_v1 = vrot.slane %v17693_v14, 3 }
 0x49d   : > { %11475 = vmatpush1.bf16.msra.mxu1 %v12929_v0  ;;  %v15741_v29 = vpop.f32.mrb[140].mxu0  ;;  %v3713_v0 = vrot.slane %v17698_v52, 3  ;;  %v17700_v52 = vshrl.u32 %v17435_v7, 16 }
 0x49e   : > { %17690 = vst [vmem:[#allocation72_spill] sm:$0xff] %v15741_v29  ;;  %11460 = vmatprep.subr.bf16.mxu1 %v12930_v37  ;;  %v15743_v61 = vpop.f32.mrb[141].mxu0  ;;  %v12932_v37 = vld [vmem:[#allocation9 + $0x894] ss:$8 sps:$4 sm:$0xff]   ;;  %v3694_v33 = vor.u32 %v3693_v1, %v3692_v4  ;;  %v12945_v29 = vld [vmem:[#allocation9 + $0x8f0] ss:$8 sps:$4 sm:$0xff]  }
 0x49f   : > { %17691 = vst [vmem:[#allocation89_spill] sm:$0xff] %v15743_v61  ;;  %v15749_v10 = vpop.f32.mrb[142].mxu0  ;;  %v3714_v14 = vor.u32 %v3713_v0, %v3712_v22  ;;  %v3721_v22 = vrot.slane %v17704_v12, 3  ;;  %v17706_v12 = vshrl.u32 %v17553_v58, 16  ;;  %v17707_v61 = vshll.u32 %v17553_v58, 16 }
 0x4a0   : > { %17694 = vst [vmem:[#allocation90_spill] sm:$0xff] %v15749_v10  ;;  %7545 = vmatmul.mubr.bf16.gmra.mrb[16].mxu1 %v17695_v55  ;;  %v15757_v35 = vpop.f32.mrb[143].mxu0  ;;  %v12933_v10 = vld [vmem:[#allocation9 + $0x890] ss:$8 sps:$4 sm:$0xff]   ;;  %v3695_v48 = vsel %vm17521_vm0, %v3691_v44, %v3694_v33  ;;  %v12879_v44 = vld [vmem:[#allocation12 + $0x40] sm:$0xff]  }
 0x4a1   : > { %17699 = vst [vmem:[#allocation39_spill] sm:$0xff] %v15757_v35  ;;  %7554 = vmatprep.mubr.bf16.mxu1 %v3707_v8  ;;  %11476 = vmatpush1.bf16.msra.mxu1 %v12931_v23  ;;  %v3708_v8 = vrot.slane %v17700_v52, 2  ;;  %v17701_v23 = vshll.u32 %v17435_v7, 16  ;;  %v3715_v1 = vsel %vm17702_vm14, %v3706_v42, %v3714_v14  ;;  %v12936_v7 = vld [vmem:[#allocation9 + $0x8b4] ss:$8 sps:$4 sm:$0xff]   ;;  %vm17768_vm14 = vmmov %vm17521_vm0 }
 0x4a2   : > { %11461 = vmatprep.subr.bf16.mxu1 %v12932_v37  ;;  %v12935_v37 = vld [vmem:[#allocation9 + $0x8a0] ss:$8 sps:$4 sm:$0xff]   ;;  %11340 = vmatprep.subr.bf16.mxu0 %v12879_v44  ;;  %v12937_v42 = vld [vmem:[#allocation9 + $0x8b0] ss:$8 sps:$4 sm:$0xff]   ;;  %v12940_v44 = vld [vmem:[#allocation9 + $0x8d4] ss:$8 sps:$4 sm:$0xff]  }
 0x4a3   : > { %v3709_v35 = vrot.slane %v17701_v23, 3 }
 0x4a5   : > { %11477 = vmatpush1.bf16.msra.mxu1 %v12933_v10  ;;  %v15759_v55 = vpop.f32.mrb[144].mxu0  ;;  %v17703_v10 = vshrl.u32 %v17543_v51, 16 }
 0x4a6   : > { %11462 = vmatprep.subr.bf16.mxu1 %v12934_v34  ;;  %v15761_v27 = vpop.f32.mrb[145].mxu0  ;;  %v12880_v34 = vld [vmem:[#allocation12] sm:$0xff]  }
 0x4a7   : > { %v15768_v56 = vpop.f32.mrb[146].mxu0  ;;  %v3720_v4 = vrot.slane %v17703_v10, 2  ;;  %11341 = vmatpush3.bf16.msra.mxu0 %v12880_v34  ;;  %v12938_v10 = vld [vmem:[#allocation9 + $0x8c4] ss:$8 sps:$4 sm:$0xff]  }
 0x4a8   : > { %7555 = vmatmul.mubr.bf16.gmra.mrb[20].mxu1 %v3695_v48  ;;  %v15775_v0 = vpop.f32.mrb[147].mxu0  ;;  %v3710_v48 = vor.u32 %v3709_v35, %v3708_v8 }
 0x4a9   : > { %7564 = vmatprep.mubr.bf16.mxu1 %v3715_v1  ;;  %11478 = vmatpush1.bf16.msra.mxu1 %v12935_v37  ;;  %v3722_v52 = vor.u32 %v3721_v22, %v3720_v4  ;;  %v3716_v37 = vrot.slane %v17706_v12, 2  ;;  %v12939_v22 = vld [vmem:[#allocation9 + $0x8c0] ss:$8 sps:$4 sm:$0xff]  }
 0x4aa   : > { %11463 = vmatprep.subr.bf16.mxu1 %v12936_v7  ;;  %v3711_v1 = vsel %vm17705_vm9, %v3694_v33, %v3710_v48  ;;  %v3717_v7 = vrot.slane %v17707_v61, 3  ;;  %v12941_v33 = vld [vmem:[#allocation9 + $0x8d0] ss:$8 sps:$4 sm:$0xff]   ;;  %vm17772_vm9 = vmmov %vm17521_vm0 }
 0x4ab   : > { %v3723_v8 = vsel %vm17708_vm1, %v3714_v14, %v3722_v52  ;;  %vm17778_vm1 = vmmov %vm17521_vm0 }
 0x4ac   : > { %v3718_v34 = vor.u32 %v3717_v7, %v3716_v37  ;;  %v12943_v7 = vld [vmem:[#allocation9 + $0x8e0] ss:$8 sps:$4 sm:$0xff]  }
 0x4ad   : > { %11479 = vmatpush1.bf16.msra.mxu1 %v12937_v42  ;;  %v15777_v23 = vpop.f32.mrb[148].mxu0 }
 0x4ae   : > { %11464 = vmatprep.subr.bf16.mxu1 %v12938_v10  ;;  %v15779_v51 = vpop.f32.mrb[149].mxu0  ;;  %v12942_v10 = vld [vmem:[#allocation9 + $0x8e4] ss:$8 sps:$4 sm:$0xff]   ;;  %v3719_v61 = vsel %vm17709_vm12, %v3710_v48, %v3718_v34  ;;  %v3773_v48 = vshrl.u32 %v15500_v38, 16  ;;  %vm17782_vm12 = vmmov %vm17521_vm0 }
 0x4af   : > { %v15786_v35 = vpop.f32.mrb[150].mxu0 }
 0x4b0   : > { %7565 = vmatmul.mubr.bf16.gmra.mrb[24].mxu1 %v3711_v1  ;;  %v15789_v4 = vpop.f32.mrb[151].mxu0  ;;  %v17710_v1 = vld [vmem:[#allocation43_spill] sm:$0xff] }
 0x4b1   : > { %7574 = vmatprep.mubr.bf16.mxu1 %v3723_v8  ;;  %11480 = vmatpush1.bf16.msra.mxu1 %v12939_v22  ;;  %v3741_v12 = vsel %vm17711_vm8, %v3722_v52, %v17710_v1  ;;  %v12881_v8 = vld [vmem:[#allocation12 + $0x48] sm:$0xff]   ;;  %vm17786_vm8 = vmmov %vm17521_vm0 }
 0x4b2   : > { %11465 = vmatprep.subr.bf16.mxu1 %v12940_v44  ;;  %v12882_v22 = vld [vmem:[#allocation12 + $0x8] sm:$0xff]   ;;  %v12883_v44 = vld [vmem:[#allocation12 + $0x50] sm:$0xff]   ;;  %11342 = vmatprep.subr.bf16.mxu0 %v12881_v8  ;;  %v3775_v8 = vrot.slane %v3773_v48, 2 }
 0x4b3   : > { %11343 = vmatpush3.bf16.msra.mxu0 %v12882_v22 }
 0x4b4   : > { %11344 = vmatprep.subr.bf16.mxu0 %v12883_v44 }
 0x4b5   : > { %11481 = vmatpush1.bf16.msra.mxu1 %v12941_v33  ;;  %v15791_v42 = vpop.f32.mrb[152].mxu0  ;;  %v12944_v33 = vld [vmem:[#allocation9 + $0x8f4] ss:$8 sps:$4 sm:$0xff]  }
 0x4b6   : > { %11466 = vmatprep.subr.bf16.mxu1 %v12942_v10  ;;  %v15793_v58 = vpop.f32.mrb[153].mxu0  ;;  %v12884_v10 = vld [vmem:[#allocation12 + $0x10] sm:$0xff]  }
 0x4b7   : > { %v15796_v14 = vpop.f32.mrb[154].mxu0  ;;  %11345 = vmatpush3.bf16.msra.mxu0 %v12884_v10 }
 0x4b8   : > { %7575 = vmatmul.mubr.bf16.gmra.mrb[28].mxu1 %v3719_v61  ;;  %v15800_v37 = vpop.f32.mrb[155].mxu0  ;;  %v3776_v61 = vshll.u32 %v15500_v38, 16  ;;  %v17719_v38 = vshll.u32 %v14367_v26, 16 }
 0x4b9   : > { %7584 = vmatprep.mubr.bf16.mxu1 %v3741_v12  ;;  %17712 = vst [vmem:[#allocation43_spill] sm:$0xff] %v15800_v37  ;;  %11482 = vmatpush1.bf16.msra.mxu1 %v12943_v7  ;;  %v17715_v12 = vld [vmem:[#allocation38_spill] sm:$0xff]  ;;  %v17726_v37 = vld [vmem:[#allocation45_spill] sm:$0xff] }
 0x4ba   : > { %11467 = vmatprep.subr.bf16.mxu1 %v12944_v33  ;;  %v3732_v11 = vsel %vm17716_vm11, %v3718_v34, %v17715_v12  ;;  %v3778_v22 = vrot.slane %v3776_v61, 3  ;;  %v17718_v33 = vshrl.u32 %v14367_v26, 16  ;;  %v3781_v44 = vrot.slane %v17719_v38, 3  ;;  %vm17788_vm11 = vmmov %vm17521_vm0 }
 0x4bb   : > { %v3764_v34 = vshll.u32 %v15515_v50, 16  ;;  %v17725_v38 = vshll.u32 %v14440_v43, 16 }
 0x4bc   : > { %v3780_v16 = vrot.slane %v17718_v33, 2  ;;  %v3779_v10 = vor.u32 %v3778_v22, %v3775_v8  ;;  %v17724_v33 = vshrl.u32 %v14440_v43, 16  ;;  %v17730_v22 = vshll.u32 %v14451_v41, 16 }
 0x4bd   : > { %11483 = vmatpush1.bf16.msra.mxu1 %v12945_v29  ;;  %v15804_v52 = vpop.f32.mrb[156].mxu0  ;;  %v17720_v29 = vld [vmem:[#allocation41_spill] sm:$0xff] }
 0x4be   : > { %17713 = vst [vmem:[#allocation91_spill] sm:$0xff] %v15804_v52  ;;  %v15806_v1 = vpop.f32.mrb[157].mxu0  ;;  %v3768_v26 = vrot.slane %v17724_v33, 2 }
 0x4bf   : > { %17714 = vst [vmem:[#allocation92_spill] sm:$0xff] %v15806_v1  ;;  %v15810_v7 = vpop.f32.mrb[158].mxu0  ;;  %v3761_v1 = vshrl.u32 %v15515_v50, 16 }
 0x4c0   : > { %7585 = vmatmul.mubr.bf16.gmra.mrb[32].mxu1 %v3732_v11  ;;  %17717 = vst [vmem:[#allocation38_spill] sm:$0xff] %v15810_v7  ;;  %v15817_v52 = vpop.f32.mrb[159].mxu0  ;;  %v3782_v11 = vor.u32 %v3781_v44, %v3780_v16  ;;  %v3766_v7 = vrot.slane %v3764_v34, 3  ;;  %v17729_v16 = vshrl.u32 %v14451_v41, 16  ;;  %v3789_v44 = vrot.slane %v17730_v22, 3 }
 0x4c1   : > { %7594 = vmatprep.mubr.bf16.mxu1 %v17720_v29  ;;  %17721 = vst [vmem:[#allocation41_spill] sm:$0xff] %v15817_v52  ;;  %v3763_v61 = vrot.slane %v3761_v1, 2  ;;  %v3769_v29 = vrot.slane %v17725_v38, 3 }
 0x4c2   : > { %v3783_v50 = vsel %vm17728_vm15, %v3779_v10, %v3782_v11  ;;  %v3788_v8 = vrot.slane %v17729_v16, 2  ;;  %v17732_v10 = vshrl.u32 %v14478_v49, 16  ;;  %v17733_v16 = vshll.u32 %v14478_v49, 16  ;;  %vm17792_vm15 = vmmov %vm17521_vm0 }
 0x4c3   : > { %v3767_v34 = vor.u32 %v3766_v7, %v3763_v61  ;;  %v3770_v33 = vor.u32 %v3769_v29, %v3768_v26  ;;  %v17735_v7 = vshrl.u32 %v14494_v60, 16  ;;  %v17736_v26 = vshll.u32 %v14494_v60, 16 }
 0x4c5   : > { %v15821_v12 = vpop.f32.mrb[160].mxu0  ;;  %v3796_v61 = vrot.slane %v17735_v7, 2  ;;  %v3797_v29 = vrot.slane %v17736_v26, 3 }
 0x4c6   : > { %17722 = vst [vmem:[#allocation93_spill] sm:$0xff] %v15821_v12  ;;  %v15823_v48 = vpop.f32.mrb[161].mxu0  ;;  %v3785_v12 = vrot.slane %v17733_v16, 3  ;;  %v17741_v16 = vshll.u32 %v14531_v15, 16 }
 0x4c7   : > { %17723 = vst [vmem:[#allocation94_spill] sm:$0xff] %v15823_v48  ;;  %v15830_v52 = vpop.f32.mrb[162].mxu0  ;;  %v3790_v48 = vor.u32 %v3789_v44, %v3788_v8  ;;  %v3798_v44 = vor.u32 %v3797_v29, %v3796_v61 }
 0x4c8   : > { %7595 = vmatmul.mubr.bf16.gmra.mrb[36].mxu1 %v17726_v37  ;;  %17727 = vst [vmem:[#allocation45_spill] sm:$0xff] %v15830_v52  ;;  %v15837_v1 = vpop.f32.mrb[163].mxu0  ;;  %v3771_v37 = vsel %vm17731_vm5, %v3767_v34, %v3770_v33  ;;  %v3784_v52 = vrot.slane %v17732_v10, 2  ;;  %v17740_v10 = vshrl.u32 %v14531_v15, 16  ;;  %v3793_v7 = vrot.slane %v17741_v16, 3  ;;  %vm17794_vm5 = vmmov %vm17521_vm0 }
 0x4c9   : > { %7604 = vmatprep.mubr.bf16.mxu1 %v3783_v50  ;;  %v3791_v50 = vsel %vm17734_vm3, %v3782_v11, %v3790_v48  ;;  %v3817_v15 = vsel %vm17749_vm10, %v3798_v44, %v15273_v59  ;;  %v17755_v59 = vshrl.u32 %v14539_v30, 16  ;;  %vm17798_vm3 = vmmov %vm17521_vm0 }
 0x4ca   : > { %v3786_v22 = vor.u32 %v3785_v12, %v3784_v52  ;;  %v3792_v11 = vrot.slane %v17740_v10, 2  ;;  %v3852_v10 = vshll.u32 %v15585_v28, 16 }
 0x4cc   : > { %v3794_v12 = vor.u32 %v3793_v7, %v3792_v11 }
 0x4cd   : > { %v15839_v43 = vpop.f32.mrb[164].mxu0 }
 0x4ce   : > { %v15841_v38 = vpop.f32.mrb[165].mxu0 }
 0x4cf   : > { %v15848_v41 = vpop.f32.mrb[166].mxu0 }
 0x4d0   : > { %7605 = vmatmul.mubr.bf16.gmra.mrb[40].mxu1 %v3771_v37  ;;  %v15855_v8 = vpop.f32.mrb[167].mxu0  ;;  %v3787_v37 = vsel %vm17739_vm4, %v3770_v33, %v3786_v22  ;;  %v3795_v33 = vsel %vm17747_vm2, %v3786_v22, %v3794_v12  ;;  %v3808_v22 = vsel %vm17753_vm6, %v3794_v12, %v15278_v13 }
 0x4d1   : > { %7614 = vmatprep.mubr.bf16.mxu1 %v3791_v50  ;;  %v3799_v50 = vsel %vm17743_vm13, %v3790_v48, %v3798_v44  ;;  %v3849_v48 = vshrl.u32 %v15585_v28, 16  ;;  %v3856_v44 = vrot.slane %v17755_v59, 2 }
 0x4d5   : > { %v15857_v34 = vpop.f32.mrb[168].mxu0 }
 0x4d6   : > { %17737 = vst [vmem:[#allocation95_spill] sm:$0xff] %v15857_v34  ;;  %v15859_v49 = vpop.f32.mrb[169].mxu0 }
 0x4d7   : > { %17738 = vst [vmem:[#allocation96_spill] sm:$0xff] %v15859_v49  ;;  %v15866_v60 = vpop.f32.mrb[170].mxu0 }
 0x4d8   : > { %7615 = vmatmul.mubr.bf16.gmra.mrb[44].mxu1 %v3787_v37  ;;  %17742 = vst [vmem:[#allocation97_spill] sm:$0xff] %v15866_v60  ;;  %v15869_v52 = vpop.f32.mrb[171].mxu0 }
 0x4d9   : > { %7624 = vmatprep.mubr.bf16.mxu1 %v3799_v50  ;;  %17744 = vst [vmem:[#allocation98_spill] sm:$0xff] %v15869_v52  ;;  %v3851_v50 = vrot.slane %v3849_v48, 2  ;;  %v12886_v48 = vld [vmem:[#allocation12 + $0x18] sm:$0xff]  }
 0x4dd   : > { %v15871_v61 = vpop.f32.mrb[172].mxu0 }
 0x4de   : > { %17745 = vst [vmem:[#allocation99_spill] sm:$0xff] %v15871_v61  ;;  %v15873_v26 = vpop.f32.mrb[173].mxu0 }
 0x4df   : > { %17746 = vst [vmem:[#allocation100_spill] sm:$0xff] %v15873_v26  ;;  %v15876_v29 = vpop.f32.mrb[174].mxu0 }
 0x4e0   : > { %7625 = vmatmul.mubr.bf16.gmra.mrb[48].mxu1 %v3795_v33  ;;  %17748 = vst [vmem:[#allocation101_spill] sm:$0xff] %v15876_v29  ;;  %v15880_v37 = vpop.f32.mrb[175].mxu0  ;;  %v3854_v33 = vrot.slane %v3852_v10, 3 }
 0x4e1   : > { %7634 = vmatprep.mubr.bf16.mxu1 %v3817_v15  ;;  %17750 = vst [vmem:[#allocation102_spill] sm:$0xff] %v15880_v37  ;;  %v17756_v15 = vshll.u32 %v14539_v30, 16 }
 0x4e2   : > { %v3855_v13 = vor.u32 %v3854_v33, %v3851_v50  ;;  %v17763_v50 = vshrl.u32 %v14592_v47, 16 }
 0x4e3   : > { %v3857_v37 = vrot.slane %v17756_v15, 3  ;;  %v17760_v15 = vshrl.u32 %v14544_v25, 16 }
 0x4e4   : > { %v3864_v33 = vrot.slane %v17763_v50, 2 }
 0x4e5   : > { %v15884_v11 = vpop.f32.mrb[176].mxu0  ;;  %v3858_v12 = vor.u32 %v3857_v37, %v3856_v44  ;;  %v17764_v44 = vshll.u32 %v14592_v47, 16 }
 0x4e6   : > { %17751 = vst [vmem:[#allocation103_spill] sm:$0xff] %v15884_v11  ;;  %v15886_v16 = vpop.f32.mrb[177].mxu0  ;;  %v3840_v11 = vshll.u32 %v15599_v53, 16 }
 0x4e7   : > { %17752 = vst [vmem:[#allocation104_spill] sm:$0xff] %v15886_v16  ;;  %v15890_v7 = vpop.f32.mrb[178].mxu0  ;;  %v3837_v16 = vshrl.u32 %v15599_v53, 16  ;;  %v3859_v37 = vsel %vm17521_vm0, %v3855_v13, %v3858_v12 }
 0x4e8   : > { %7635 = vmatmul.mubr.bf16.gmra.mrb[52].mxu1 %v3808_v22  ;;  %17754 = vst [vmem:[#allocation105_spill] sm:$0xff] %v15890_v7  ;;  %v15897_v28 = vpop.f32.mrb[179].mxu0  ;;  %v12885_v22 = vld [vmem:[#allocation12 + $0x58] sm:$0xff]   ;;  %v3842_v29 = vrot.slane %v3840_v11, 3 }
 0x4e9   : > { %7644 = vmatprep.mubr.bf16.mxu1 %v15288_v57  ;;  %17757 = vst [vmem:[#allocation106_spill] sm:$0xff] %v15897_v28  ;;  %11346 = vmatprep.subr.bf16.mxu0 %v12885_v22  ;;  %v3839_v59 = vrot.slane %v3837_v16, 2  ;;  %v3844_v57 = vrot.slane %v17760_v15, 2  ;;  %v17761_v28 = vshll.u32 %v14544_v25, 16  ;;  %v3865_v22 = vrot.slane %v17764_v44, 3  ;;  %v12887_v16 = vld [vmem:[#allocation12 + $0x60] sm:$0xff]  }
 0x4ea   : > { %11347 = vmatpush3.bf16.msra.mxu0 %v12886_v48  ;;  %v12888_v15 = vld [vmem:[#allocation12 + $0x20] sm:$0xff]   ;;  %v17769_v48 = vshrl.u32 %v17574_v40, 16  ;;  %v17770_v44 = vshll.u32 %v17574_v40, 16 }
 0x4eb   : > { %v3845_v26 = vrot.slane %v17761_v28, 3  ;;  %11348 = vmatprep.subr.bf16.mxu0 %v12887_v16 }
 0x4ed   : > { %v15901_v7 = vpop.f32.mrb[180].mxu0  ;;  %v3846_v28 = vor.u32 %v3845_v26, %v3844_v57 }
 0x4ee   : > { %17758 = vst [vmem:[#allocation107_spill] sm:$0xff] %v15901_v7  ;;  %v15903_v10 = vpop.f32.mrb[181].mxu0  ;;  %11349 = vmatpush3.bf16.msra.mxu0 %v12888_v15  ;;  %v12890_v7 = vld [vmem:[#allocation12 + $0x28] sm:$0xff]  }
 0x4ef   : > { %17759 = vst [vmem:[#allocation108_spill] sm:$0xff] %v15903_v10  ;;  %v15910_v53 = vpop.f32.mrb[182].mxu0  ;;  %v3843_v10 = vor.u32 %v3842_v29, %v3839_v59  ;;  %v17773_v59 = vshrl.u32 %v17575_v31, 16 }
 0x4f0   : > { %7645 = vmatmul.mubr.bf16.gmra.mrb[56].mxu1 %v15293_v19  ;;  %17762 = vst [vmem:[#allocation109_spill] sm:$0xff] %v15910_v53  ;;  %v15917_v11 = vpop.f32.mrb[183].mxu0  ;;  %v3866_v19 = vor.u32 %v3865_v22, %v3864_v33  ;;  %v12889_v53 = vld [vmem:[#allocation12 + $0x68] sm:$0xff]   ;;  %v17774_v33 = vshll.u32 %v17575_v31, 16 }
 0x4f1   : > { %7654 = vmatprep.mubr.bf16.mxu1 %v3859_v37  ;;  %17765 = vst [vmem:[#allocation110_spill] sm:$0xff] %v15917_v11  ;;  %v3847_v50 = vsel %vm17768_vm14, %v3843_v10, %v3846_v28  ;;  %v3860_v37 = vrot.slane %v17769_v48, 2  ;;  %v3861_v11 = vrot.slane %v17770_v44, 3  ;;  %11350 = vmatprep.subr.bf16.mxu0 %v12889_v53  ;;  %v3872_v57 = vrot.slane %v17773_v59, 2  ;;  %v12892_v44 = vld [vmem:[#allocation12 + $0x30] sm:$0xff]   ;;  %v12893_v59 = vld [vmem:[#allocation12 + $0x78] sm:$0xff]  }
 0x4f2   : > { %v3867_v29 = vsel %vm17772_vm9, %v3858_v12, %v3866_v19  ;;  %v3873_v22 = vrot.slane %v17774_v33, 3  ;;  %11351 = vmatpush3.bf16.msra.mxu0 %v12890_v7  ;;  %v3886_v48 = vshrl.u32 %v15629_v46, 16  ;;  %v3889_v53 = vshll.u32 %v15629_v46, 16 }
 0x4f3   : > { %v3862_v16 = vor.u32 %v3861_v11, %v3860_v37  ;;  %v17780_v11 = vshll.u32 %v17578_v6, 16 }
 0x4f4   : > { %v3874_v15 = vor.u32 %v3873_v22, %v3872_v57  ;;  %v12894_v57 = vld [vmem:[#allocation12 + $0x38] sm:$0xff]  }
 0x4f5   : > { %v15919_v13 = vpop.f32.mrb[184].mxu0  ;;  %v3863_v7 = vsel %vm17778_vm1, %v3846_v28, %v3862_v16  ;;  %v3869_v37 = vrot.slane %v17780_v11, 3  ;;  %v3880_v11 = vshll.u32 %v15640_v18, 16 }
 0x4f6   : > { %17766 = vst [vmem:[#allocation111_spill] sm:$0xff] %v15919_v13  ;;  %v15921_v61 = vpop.f32.mrb[185].mxu0 }
 0x4f7   : > { %17767 = vst [vmem:[#allocation112_spill] sm:$0xff] %v15921_v61  ;;  %v15928_v26 = vpop.f32.mrb[186].mxu0 }
 0x4f8   : > { %7655 = vmatmul.mubr.bf16.gmra.mrb[60].mxu1 %v3847_v50  ;;  %17771 = vst [vmem:[#allocation113_spill] sm:$0xff] %v15928_v26  ;;  %v15935_v10 = vpop.f32.mrb[187].mxu0  ;;  %v12891_v50 = vld [vmem:[#allocation12 + $0x70] sm:$0xff]  }
 0x4f9   : > { %7664 = vmatprep.mubr.bf16.mxu1 %v3867_v29  ;;  %17775 = vst [vmem:[#allocation114_spill] sm:$0xff] %v15935_v10  ;;  %v1789_v26 = vld [vmem:[#allocation2 + $0x1b0] sm:$0x77]  ;;  %11352 = vmatprep.subr.bf16.mxu0 %v12891_v50  ;;  %v17779_v29 = vshrl.u32 %v17578_v6, 16  ;;  %v3875_v10 = vsel %vm17782_vm12, %v3866_v19, %v3874_v15  ;;  %v3891_v50 = vrot.slane %v3889_v53, 3 }
 0x4fa   : > { %11353 = vmatpush3.bf16.msra.mxu0 %v12892_v44  ;;  %v15951_v13 = vcombine.high %v1789_v26, %v1789_v26 }
 0x4fb   : > { %v3868_v33 = vrot.slane %v17779_v29, 2  ;;  %11354 = vmatprep.subr.bf16.mxu0 %v12893_v59  ;;  %v3877_v29 = vshrl.u32 %v15640_v18, 16  ;;  %v3882_v59 = vrot.slane %v3880_v11, 3 }
 0x4fd   : > { %v15939_v12 = vpop.f32.mrb[188].mxu0 }
 0x4fe   : > { %17776 = vst [vmem:[#allocation115_spill] sm:$0xff] %v15939_v12  ;;  %v15941_v61 = vpop.f32.mrb[189].mxu0  ;;  %v3888_v12 = vrot.slane %v3886_v48, 2  ;;  %11355 = vmatpush3.bf16.msra.mxu0 %v12894_v57 }
 0x4ff   : > { %17777 = vst [vmem:[#allocation116_spill] sm:$0xff] %v15941_v61  ;;  %v15948_v22 = vpop.f32.mrb[190].mxu0  ;;  %v3870_v61 = vor.u32 %v3869_v37, %v3868_v33 }
 0x500   : > { %7665 = vmatmul.mubr.bf16.gmra.mrb[64].mxu1 %v3863_v7  ;;  %17781 = vst [vmem:[#allocation117_spill] sm:$0xff] %v15948_v22  ;;  %v15953_v28 = vpop.f32.mrb[191].mxu0  ;;  %v3892_v44 = vor.u32 %v3891_v50, %v3888_v12  ;;  %v3904_v7 = vshrl.u32 %v15951_v13, 16  ;;  %v3907_v22 = vshll.u32 %v15951_v13, 16 }
 0x501   : > { %7674 = vmatprep.mubr.bf16.mxu1 %v3875_v10  ;;  %17783 = vst [vmem:[#allocation118_spill] sm:$0xff] %v15953_v28  ;;  %v3871_v53 = vsel %vm17786_vm8, %v3862_v16, %v3870_v61  ;;  %v3879_v10 = vrot.slane %v3877_v29, 2  ;;  %v10927_v28 = vcombine.low %v1789_v26, %v1789_v26 }
 0x502   : > { %v3893_v37 = vsel %vm17788_vm11, %v3874_v15, %v3892_v44  ;;  %v3906_v57 = vrot.slane %v3904_v7, 2  ;;  %v3909_v12 = vrot.slane %v3907_v22, 3 }
 0x503   : > { %v3883_v52 = vor.u32 %v3882_v59, %v3879_v10  ;;  %v3895_v60 = vshrl.u32 %v10927_v28, 16  ;;  %v4047_v10 = vrot.slane %v14592_v47, 3  ;;  %v4051_v47 = vrot.slane %v17575_v31, 3 }
 0x504   : > { %v3910_v49 = vor.u32 %v3909_v12, %v3906_v57  ;;  %v4055_v31 = vrot.slane %v15629_v46, 3  ;;  %v13268_v46 = vmov 1966171168  }
 0x505   : > { %v15959_v19 = vpop.f32.mrb[192].mxu0  ;;  %v3884_v26 = vsel %vm17792_vm15, %v3870_v61, %v3883_v52  ;;  %v3897_v29 = vrot.slane %v3895_v60, 2  ;;  %v17800_v61 = vrot.slane %v14539_v30, 3  ;;  %v4052_v30 = vsel %vm3972_vm7, %v4047_v10, %v4051_v47 }
 0x506   : > { %17784 = vst [vmem:[#allocation119_spill] sm:$0xff] %v15959_v19  ;;  %v15961_v48 = vpop.f32.mrb[193].mxu0  ;;  %v3898_v19 = vshll.u32 %v10927_v28, 16  ;;  %v3911_v15 = vsel %vm17794_vm5, %v3892_v44, %v3910_v49  ;;  %v4045_v44 = vrot.slane %v17574_v40, 3  ;;  %v4049_v40 = vrot.slane %v17578_v6, 3 }
 0x507   : > { %17785 = vst [vmem:[#allocation120_spill] sm:$0xff] %v15961_v48  ;;  %v15964_v33 = vpop.f32.mrb[194].mxu0 }
 0x508   : > { %7675 = vmatmul.mubr.bf16.gmra.mrb[68].mxu1 %v3871_v53  ;;  %17787 = vst [vmem:[#allocation121_spill] sm:$0xff] %v15964_v33  ;;  %v15967_v50 = vpop.f32.mrb[195].mxu0  ;;  %v3900_v11 = vrot.slane %v3898_v19, 3  ;;  %v4048_v19 = vsel %vm3972_vm7, %v17800_v61, %v4047_v10  ;;  %v4059_v61 = vrot.slane %v15951_v13, 3 }
 0x509   : > { %7684 = vmatprep.mubr.bf16.mxu1 %v3893_v37  ;;  %17789 = vst [vmem:[#allocation122_spill] sm:$0xff] %v15967_v50 }
 0x50a   : > { %v3901_v7 = vor.u32 %v3900_v11, %v3897_v29  ;;  %v4060_v10 = vsel %vm3972_vm7, %v4055_v31, %v4059_v61 }
 0x50c   : > { %v3902_v57 = vsel %vm17798_vm3, %v3883_v52, %v3901_v7  ;;  %v17804_v52 = vrot.slane %v14544_v25, 3  ;;  %v4050_v7 = vsel %vm3972_vm7, %v4045_v44, %v4049_v40  ;;  %v4053_v25 = vrot.slane %v15640_v18, 3 }
 0x50d   : > { %v15969_v48 = vpop.f32.mrb[196].mxu0 }
 0x50e   : > { %17790 = vst [vmem:[#allocation123_spill] sm:$0xff] %v15969_v48  ;;  %v15971_v16 = vpop.f32.mrb[197].mxu0  ;;  %v4046_v29 = vsel %vm3972_vm7, %v17804_v52, %v4045_v44  ;;  %v4057_v52 = vrot.slane %v10927_v28, 3  ;;  %v8101_v44 = vunpack.c.l.s4 %v13268_v46  ;;  %v17815_v46 = vld [vmem:[#allocation40_spill] sm:$0xff]  ;;  %v17838_v48 = vld [vmem:[#allocation69_spill] sm:$0xff] }
 0x50f   : > { %17791 = vst [vmem:[#allocation124_spill] sm:$0xff] %v15971_v16  ;;  %v15974_v53 = vpop.f32.mrb[198].mxu0  ;;  %v17836_v16 = vld [vmem:[#allocation22_spill] sm:$0xff] }
 0x510   : > { %7685 = vmatmul.mubr.bf16.gmra.mrb[72].mxu1 %v3884_v26  ;;  %17793 = vst [vmem:[#allocation125_spill] sm:$0xff] %v15974_v53  ;;  %v15977_v22 = vpop.f32.mrb[199].mxu0  ;;  %v4058_v6 = vsel %vm3972_vm7, %v4053_v25, %v4057_v52  ;;  %v17813_v52 = vld [vmem:[#allocation50_spill] sm:$0xff]  ;;  %v17834_v53 = vld [vmem:[#allocation57_spill] sm:$0xff] }
 0x511   : > { %7694 = vmatprep.mubr.bf16.mxu1 %v3911_v15  ;;  %17795 = vst [vmem:[#allocation126_spill] sm:$0xff] %v15977_v22  ;;  %v17832_v22 = vld [vmem:[#allocation66_spill] sm:$0xff] }
 0x515   : > { %v15980_v59 = vpop.f32.mrb[200].mxu0 }
 0x516   : > { %17796 = vst [vmem:[#allocation127_spill] sm:$0xff] %v15980_v59  ;;  %v15982_v37 = vpop.f32.mrb[201].mxu0  ;;  %v17830_v59 = vld [vmem:[#allocation61_spill] sm:$0xff] }
 0x517   : > { %17797 = vst [vmem:[#allocation128_spill] sm:$0xff] %v15982_v37  ;;  %v15985_v60 = vpop.f32.mrb[202].mxu0  ;;  %v17828_v37 = vld [vmem:[#allocation65_spill] sm:$0xff] }
 0x518   : > { %7695 = vmatmul.mubr.bf16.gmra.mrb[76].mxu1 %v3902_v57  ;;  %17799 = vst [vmem:[#allocation129_spill] sm:$0xff] %v15985_v60  ;;  %v15990_v49 = vpop.f32.mrb[203].mxu0  ;;  %v4056_v57 = vsel %vm3972_vm7, %v4051_v47, %v4055_v31  ;;  %v17827_v60 = vld [vmem:[#allocation51_spill] sm:$0xff] }
 0x519   : > { %17801 = vst [vmem:[#allocation130_spill] sm:$0xff] %v15990_v49  ;;  %7897 = vmatprep.mubr.bf16.mxu1 %v4048_v19  ;;  %v4054_v19 = vsel %vm3972_vm7, %v4049_v40, %v4053_v25  ;;  %v8102_v40 = vunpack.c.0.s8 %v8101_v44  ;;  %v17816_v44 = vld [vmem:[#allocation53_spill] sm:$0xff]  ;;  %v17826_v49 = vld [vmem:[#allocation70_spill] sm:$0xff] }
 0x51d   : > { %v15994_v12 = vpop.f32.mrb[204].mxu0 }
 0x51e   : > { %17802 = vst [vmem:[#allocation131_spill] sm:$0xff] %v15994_v12  ;;  %v15996_v26 = vpop.f32.mrb[205].mxu0  ;;  %v17825_v12 = vld [vmem:[#allocation64_spill] sm:$0xff] }
 0x51f   : > { %17803 = vst [vmem:[#allocation132_spill] sm:$0xff] %v15996_v26  ;;  %v16001_v11 = vpop.f32.mrb[206].mxu0  ;;  %v17824_v26 = vld [vmem:[#allocation63_spill] sm:$0xff] }
 0x520   : > { %17805 = vst [vmem:[#allocation133_spill] sm:$0xff] %v16001_v11  ;;  %7898 = vmatmul.mubr.bf16.vlgmr.msra.gmra.mrb[64].mxu1 %v4046_v29  ;;  %v16004_v15 = vpop.f32.mrb[207].mxu0  ;;  %v4389_v29 = vld [vmem:[#allocation11] sm:$0x3] }
 0x521   : > { %17806 = vst [vmem:[#allocation134_spill] sm:$0xff] %v16004_v15  ;;  %7907 = vmatprep.mubr.bf16.mxu1 %v4052_v30  ;;  %v17807_v30 = vld [vmem:[#allocation21_spill] sm:$0xff]  ;;  %v17822_v15 = vld [vmem:[#allocation67_spill] sm:$0xff]  ;;  %v17823_v11 = vld [vmem:[#allocation68_spill] sm:$0xff] }
 0x522   : > { %v17808_v47 = vsub.s32 0, %v17807_v30  ;;  %v17810_v18 = vsub.s32 1, %v17807_v30 }
 0x524   : > { %v16021_v13 = vrot.slane %v4389_v29, %v17810_v18 }
 0x526   : > { %17811 = vst [vmem:[#allocation135_spill] sm:$0xff] %v16021_v13  ;;  %v11487_v31 = vadd.f32 %v15446_v5, %v16021_v13  ;;  %v11493_v61 = vadd.f32 %v15453_v36, %v16021_v13  ;;  %v16048_v5 = vadd.f32 %v15469_v32, %v16021_v13  ;;  %v17812_v36 = vld [vmem:[#allocation49_spill] sm:$0xff] }
 0x528   : > { %7908 = vmatmul.mubr.bf16.gmra.mrb[68].mxu1 %v4050_v7  ;;  %v16017_v7 = vrot.slane %v4389_v29, %v17808_v47  ;;  %v17817_v29 = vld [vmem:[#allocation54_spill] sm:$0xff]  ;;  %v17818_v47 = vld [vmem:[#allocation48_spill] sm:$0xff] }
 0x529   : > { %7917 = vmatprep.mubr.bf16.mxu1 %v4056_v57  ;;  %v16024_v57 = vsub.s32 %v8102_v40, %v17807_v30  ;;  %v16080_v18 = vadd.f32 %v17818_v47, %v16021_v13  ;;  %v17819_v40 = vld [vmem:[#allocation56_spill] sm:$0xff] }
 0x52a   : > { %17809 = vst [vmem:[#allocation21_spill] sm:$0xff] %v16017_v7  ;;  %v11484_v28 = vadd.f32 %v15443_v54, %v16017_v7  ;;  %v11490_v25 = vadd.f32 %v15450_v9, %v16017_v7  ;;  %v16044_v54 = vadd.f32 %v15466_v3, %v16017_v7  ;;  %v16052_v9 = vadd.f32 %v15475_v45, %v16017_v7 }
 0x52b   : > { %v16068_v32 = vadd.f32 %v17815_v46, %v16017_v7  ;;  %v16072_v45 = vadd.f32 %v17816_v44, %v16021_v13  ;;  %v16076_v30 = vadd.f32 %v17817_v29, %v16017_v7  ;;  %v17821_v46 = vld [vmem:[#allocation62_spill] sm:$0xff]  ;;  %v16096_v29 = vadd.f32 %v17822_v15, %v16021_v13 }
 0x52c   : > { %v16092_v44 = vadd.f32 %v17821_v46, %v16017_v7  ;;  %v16100_v47 = vadd.f32 %v17823_v11, %v16017_v7  ;;  %v16112_v46 = vadd.f32 %v17826_v49, %v16021_v13  ;;  %v16116_v15 = vadd.f32 %v17827_v60, %v16017_v7 }
 0x52d   : > { %v16120_v11 = vadd.f32 %v17828_v37, %v16021_v13  ;;  %v16132_v49 = vadd.f32 %v17834_v53, %v16017_v7  ;;  %v16136_v60 = vadd.f32 %v17836_v16, %v16021_v13  ;;  %v16140_v37 = vadd.f32 %v17838_v48, %v16017_v7  ;;  %v17844_v53 = vld [vmem:[#allocation26_spill] sm:$0xff] }
 0x52e   : > { %v17848_v48 = vld [vmem:[#allocation58_spill] sm:$0xff] }
 0x52f   : > { %17829 = vst [vmem:[#allocation49_spill] sm:$0xff] %v16120_v11  ;;  %17835 = vst [vmem:[#allocation40_spill] sm:$0xff] %v16132_v49  ;;  %v16152_v49 = vadd.f32 %v17844_v53, %v16021_v13  ;;  %v17852_v11 = vld [vmem:[#allocation32_spill] sm:$0xff] }
 0x530   : > { %7918 = vmatmul.mubr.bf16.gmra.mrb[72].mxu1 %v4054_v19  ;;  %v16036_v19 = vadd.f32 %v15459_v24, %v16017_v7  ;;  %v16056_v24 = vadd.f32 %v17812_v36, %v16021_v13  ;;  %v16084_v36 = vadd.f32 %v17819_v40, %v16017_v7  ;;  %v16104_v40 = vadd.f32 %v17824_v26, %v16021_v13 }
 0x531   : > { %7927 = vmatprep.mubr.bf16.mxu1 %v4060_v10  ;;  %v16040_v10 = vadd.f32 %v15462_v62, %v16021_v13  ;;  %v16060_v62 = vadd.f32 %v17813_v52, %v16017_v7  ;;  %v17820_v52 = vld [vmem:[#allocation44_spill] sm:$0xff]  ;;  %v16124_v26 = vadd.f32 %v17830_v59, %v16017_v7  ;;  %17837 = vst [vmem:[#allocation53_spill] sm:$0xff] %v16136_v60  ;;  %17839 = vst [vmem:[#allocation54_spill] sm:$0xff] %v16140_v37  ;;  %v17840_v59 = vld [vmem:[#allocation59_spill] sm:$0xff] }
 0x532   : > { %v16144_v33 = vadd.f32 %v17840_v59, %v16021_v13  ;;  %17845 = vst [vmem:[#allocation44_spill] sm:$0xff] %v16152_v49  ;;  %v17846_v60 = vld [vmem:[#allocation60_spill] sm:$0xff]  ;;  %v16160_v37 = vadd.f32 %v17848_v48, %v16021_v13  ;;  %v17850_v59 = vld [vmem:[#allocation30_spill] sm:$0xff]  ;;  %v16168_v53 = vadd.f32 %v17852_v11, %v16021_v13  ;;  %v17855_v48 = vld [vmem:[#allocation35_spill] sm:$0xff] }
 0x533   : > { %17831 = vst [vmem:[#allocation50_spill] sm:$0xff] %v16124_v26  ;;  %v16156_v34 = vadd.f32 %v17846_v60, %v16017_v7 }
 0x534   : > { %17841 = vst [vmem:[#allocation48_spill] sm:$0xff] %v16144_v33  ;;  %17849 = vst [vmem:[#allocation67_spill] sm:$0xff] %v16160_v37  ;;  %v16164_v33 = vadd.f32 %v17850_v59, %v16017_v7  ;;  %v16177_v37 = vadd.f32 %v17855_v48, %v16021_v13  ;;  %v17856_v59 = vld [vmem:[#allocation25_spill] sm:$0xff] }
 0x535   : > { %17847 = vst [vmem:[#allocation62_spill] sm:$0xff] %v16156_v34  ;;  %17853 = vst [vmem:[#allocation63_spill] sm:$0xff] %v16168_v53  ;;  %v17858_v53 = vld [vmem:[#allocation28_spill] sm:$0xff] }
 0x536   : > { %17851 = vst [vmem:[#allocation68_spill] sm:$0xff] %v16164_v33  ;;  %v16186_v33 = vadd.f32 %v17858_v53, %v16021_v13  ;;  %v17865_v53 = vld [vmem:[#allocation42_spill] sm:$0xff] }
 0x538   : > { %7928 = vmatmul.mubr.bf16.gmra.mrb[76].mxu1 %v4058_v6  ;;  %v17814_v6 = vld [vmem:[#allocation55_spill] sm:$0xff] }
 0x539   : > { %v16064_v3 = vadd.f32 %v17814_v6, %v16021_v13  ;;  %v16088_v6 = vadd.f32 %v17820_v52, %v16021_v13  ;;  %v16108_v52 = vadd.f32 %v17825_v12, %v16017_v7  ;;  %v16128_v12 = vadd.f32 %v17832_v22, %v16021_v13  ;;  %v17842_v22 = vld [vmem:[#allocation27_spill] sm:$0xff] }
 0x53b   : > { %17833 = vst [vmem:[#allocation55_spill] sm:$0xff] %v16128_v12  ;;  %v16148_v12 = vadd.f32 %v17842_v22, %v16017_v7 }
 0x53d   : > { %17843 = vst [vmem:[#allocation56_spill] sm:$0xff] %v16148_v12 }
 0x553   : > { %v7506_v50 = vpop.f32.mrb[0].mxu1 }
 0x554   : > { %v11485_v26 = vadd.f32 %v11484_v28, %v7506_v50  ;;  %v7508_v16 = vpop.f32.mrb[1].mxu1  ;;  %v17854_v50 = vld [vmem:[#allocation23_spill] sm:$0xff] }
 0x555   : > { %v11488_v22 = vadd.f32 %v11487_v31, %v7508_v16  ;;  %v7510_v12 = vpop.f32.mrb[2].mxu1  ;;  %v16172_v28 = vadd.f32 %v17854_v50, %v16017_v7  ;;  %v16181_v31 = vadd.f32 %v17856_v59, %v16017_v7  ;;  %v17859_v50 = vld [vmem:[#allocation29_spill] sm:$0xff]  ;;  %v17861_v59 = vld [vmem:[#allocation36_spill] sm:$0xff] }
 0x556   : > { %v11486_v60 = vadd.f32 %v11485_v26, %v15759_v55  ;;  %v11491_v34 = vadd.f32 %v11490_v25, %v7510_v12  ;;  %v7512_v49 = vpop.f32.mrb[3].mxu1  ;;  %v16190_v55 = vadd.f32 %v17859_v50, %v16017_v7  ;;  %v17860_v12 = vld [vmem:[#allocation31_spill] sm:$0xff] }
 0x557   : > { %17857 = vst [vmem:[#allocation64_spill] sm:$0xff] %v16181_v31  ;;  %v11489_v16 = vadd.f32 %v11488_v22, %v15761_v27  ;;  %v11494_v11 = vadd.f32 %v11493_v61, %v7512_v49  ;;  %v16195_v48 = vadd.f32 %v17860_v12, %v16021_v13  ;;  %v16199_v31 = vadd.f32 %v17861_v59, %v16017_v7  ;;  %v17863_v49 = vld [vmem:[#allocation37_spill] sm:$0xff]  ;;  %v17869_v12 = vld [vmem:[#allocation46_spill] sm:$0xff] }
 0x558   : > { %v7938_v25 = vmax.f32 %v11486_v60, 0.0  ;;  %v11492_v26 = vadd.f32 %v11491_v34, %v15768_v56  ;;  %v16204_v22 = vadd.f32 %v17863_v49, %v16021_v13  ;;  %v16208_v60 = vadd.f32 %v17865_v53, %v16017_v7  ;;  %v17867_v56 = vld [vmem:[#allocation47_spill] sm:$0xff] }
 0x559   : > { %17862 = vst [vmem:[#allocation70_spill] sm:$0xff] %v16199_v31  ;;  %v7939_v27 = vmax.f32 %v11489_v16, 0.0  ;;  %v11495_v61 = vadd.f32 %v11494_v11, %v15775_v0  ;;  %v16212_v34 = vadd.f32 %v17867_v56, %v16021_v13  ;;  %v16216_v59 = vadd.f32 %v17869_v12, %v16017_v7  ;;  %v17871_v16 = vld [vmem:[#allocation52_spill] sm:$0xff]  ;;  %v17872_v31 = vld [vmem:[#allocation73_spill] sm:$0xff] }
 0x55a   : > { %17864 = vst [vmem:[#allocation51_spill] sm:$0xff] %v16204_v22  ;;  %17866 = vst [vmem:[#allocation65_spill] sm:$0xff] %v16208_v60  ;;  %v7940_v50 = vmax.f32 %v11492_v26, 0.0  ;;  %v16220_v0 = vadd.f32 %v17871_v16, %v16021_v13  ;;  %v16224_v53 = vadd.f32 %v17872_v31, %v16017_v7  ;;  %v17874_v60 = vld [vmem:[#allocation74_spill] sm:$0xff]  ;;  %v17876_v26 = vld [vmem:[#allocation75_spill] sm:$0xff] }
 0x55b   : > { %17868 = vst [vmem:[#allocation61_spill] sm:$0xff] %v16212_v34  ;;  %17870 = vst [vmem:[#allocation66_spill] sm:$0xff] %v16216_v59  ;;  %v11225_v11 = vpack.c.bf16 %v7939_v27, %v7938_v25  ;;  %v7941_v49 = vmax.f32 %v11495_v61, 0.0  ;;  %v7516_v22 = vpop.f32.mrb[4].mxu1  ;;  %v16228_v56 = vadd.f32 %v17874_v60, %v16021_v13  ;;  %v16232_v34 = vadd.f32 %v17876_v26, %v16017_v7  ;;  %v17877_v16 = vld [vmem:[#allocation76_spill] sm:$0xff]  ;;  %v17878_v60 = vld [vmem:[#allocation77_spill] sm:$0xff] }
 0x55c   : > { %17873 = vst [vmem:[#allocation57_spill] sm:$0xff] %v16224_v53  ;;  %v11497_v12 = vadd.f32 %v16036_v19, %v7516_v22  ;;  %v7518_v59 = vpop.f32.mrb[5].mxu1  ;;  %v16237_v25 = vadd.f32 %v17877_v16, %v16021_v13  ;;  %v16247_v26 = vadd.f32 %v15658_v20, %v16021_v13 }
 0x55d   : > { %17875 = vst [vmem:[#allocation22_spill] sm:$0xff] %v16228_v56  ;;  %v8106_v27 = vrot.slane %v11225_v11, %v16024_v57  ;;  %v11226_v61 = vpack.c.bf16 %v7941_v49, %v7940_v50  ;;  %v11500_v31 = vadd.f32 %v16040_v10, %v7518_v59  ;;  %v7520_v53 = vpop.f32.mrb[6].mxu1  ;;  %v16243_v56 = vadd.f32 %v17878_v60, %v16017_v7 }
 0x55e   : > { %17879 = vst [vmem:[#allocation69_spill] sm:$0xff] %v16247_v26  ;;  %v11498_v19 = vadd.f32 %v11497_v12, %v15777_v23  ;;  %v11503_v22 = vadd.f32 %v16044_v54, %v7520_v53  ;;  %v7522_v16 = vpop.f32.mrb[7].mxu1  ;;  %v16253_v11 = vadd.f32 %v15664_v17, %v16017_v7  ;;  %v16264_v17 = vadd.f32 %v15666_v63, %v16021_v13 }
 0x55f   : > { %v8114_v50 = vcombine.high %v8106_v27, %v8106_v27  ;;  %v8113_v10 = vrot.slane %v11226_v61, %v16024_v57  ;;  %v11501_v59 = vadd.f32 %v11500_v31, %v15779_v51  ;;  %v8122_v49 = vrot.slane %v8106_v27, %v16024_v57 }
 0x560   : > { %v7942_v60 = vmax.f32 %v11498_v19, 0.0  ;;  %v11504_v20 = vadd.f32 %v11503_v22, %v15786_v35  ;;  %v11506_v26 = vadd.f32 %v16048_v5, %v7522_v16  ;;  %v16268_v51 = vadd.f32 %v15669_v39, %v16017_v7 }
 0x561   : > { %v8136_v23 = vrot.slane %v8114_v50, %v16024_v57  ;;  %v8115_v54 = vcombine.high %v8113_v10, %v8113_v10  ;;  %v8129_v53 = vrot.slane %v8113_v10, %v16024_v57  ;;  %v7943_v12 = vmax.f32 %v11501_v59, 0.0 }
 0x562   : > { %v7944_v27 = vmax.f32 %v11504_v20, 0.0  ;;  %v11507_v61 = vadd.f32 %v11506_v26, %v15789_v4  ;;  %v16273_v35 = vadd.f32 %v15676_v21, %v16021_v13  ;;  %v16279_v39 = vadd.f32 %v15678_v2, %v16017_v7  ;;  %v17880_v4 = vld [vmem:[#allocation78_spill] sm:$0xff] }
 0x563   : > { %v9121_v5 = vcombine.low %v8122_v49, %v8136_v23  ;;  %v8143_v31 = vrot.slane %v8115_v54, %v16024_v57  ;;  %v8145_v19 = vcombine.high %v8129_v53, %v8129_v53  ;;  %v7526_v22 = vpop.f32.mrb[8].mxu1  ;;  %v11266_v16 = vcombine.high %v8122_v49, %v8136_v23 }
 0x564   : > { %v11227_v50 = vpack.c.bf16 %v7943_v12, %v7942_v60  ;;  %v7945_v63 = vmax.f32 %v11507_v61, 0.0  ;;  %v11509_v10 = vadd.f32 %v16052_v9, %v7526_v22  ;;  %v7528_v59 = vpop.f32.mrb[9].mxu1  ;;  %v16283_v26 = vadd.f32 %v17880_v4, %v16021_v13 }
 0x565   : > { %v9123_v21 = vcombine.low %v8143_v31, %v8145_v19  ;;  %v11512_v20 = vadd.f32 %v16056_v24, %v7528_v59  ;;  %v7530_v54 = vpop.f32.mrb[10].mxu1  ;;  %v8147_v12 = vcombine.high %v8143_v31, %v8143_v31  ;;  %v9131_v22 = vrot.slane %v9121_v5, %v16024_v57 }
 0x566   : > { %v8156_v53 = vrot.slane %v11227_v50, %v16024_v57  ;;  %v11228_v49 = vpack.c.bf16 %v7945_v63, %v7944_v27  ;;  %v11510_v60 = vadd.f32 %v11509_v10, %v15791_v42  ;;  %v11515_v9 = vadd.f32 %v16060_v62, %v7530_v54  ;;  %v7532_v23 = vpop.f32.mrb[11].mxu1  ;;  %v17881_v63 = vld [vmem:[#allocation43_spill] sm:$0xff] }
 0x567   : > { %v11513_v2 = vadd.f32 %v11512_v20, %v15793_v58  ;;  %v11518_v61 = vadd.f32 %v16064_v3, %v7532_v23  ;;  %v9138_v27 = vrot.slane %v11266_v16, %v16024_v57  ;;  %v17882_v58 = vld [vmem:[#allocation79_spill] sm:$0xff] }
 0x568   : > { %v16293_v19 = vrot.slane %v8156_v53, %v16024_v57  ;;  %v8163_v24 = vrot.slane %v11228_v49, %v16024_v57  ;;  %v7946_v59 = vmax.f32 %v11510_v60, 0.0  ;;  %v8164_v50 = vcombine.high %v8156_v53, %v8156_v53  ;;  %v17883_v3 = vld [vmem:[#allocation71_spill] sm:$0xff] }
 0x569   : > { %v7947_v42 = vmax.f32 %v11513_v2, 0.0  ;;  %v11516_v62 = vadd.f32 %v11515_v9, %v15796_v14  ;;  %v11519_v31 = vadd.f32 %v11518_v61, %v17881_v63  ;;  %v16301_v10 = vadd.f32 %v17882_v58, %v16017_v7 }
 0x56a   : > { %v16305_v5 = vadd.f32 %v17883_v3, %v16021_v13  ;;  %v9124_v4 = vcombine.low %v8147_v12, %v16293_v19  ;;  %v8165_v20 = vcombine.high %v8163_v24, %v8163_v24  ;;  %v9145_v60 = vrot.slane %v9123_v21, %v16024_v57 }
 0x56b   : > { %v11229_v54 = vpack.c.bf16 %v7947_v42, %v7946_v59  ;;  %v7948_v49 = vmax.f32 %v11516_v62, 0.0  ;;  %v7949_v16 = vmax.f32 %v11519_v31, 0.0  ;;  %v7536_v53 = vpop.f32.mrb[12].mxu1  ;;  %v9153_v61 = vcombine.low %v9131_v22, %v9138_v27  ;;  %v17885_v31 = vld [vmem:[#allocation91_spill] sm:$0xff] }
 0x56c   : > { %17884 = vst [vmem:[#allocation59_spill] sm:$0xff] %v16305_v5  ;;  %v8193_v14 = vrot.slane %v8165_v20, %v16024_v57  ;;  %v11521_v9 = vadd.f32 %v16068_v32, %v7536_v53  ;;  %v7538_v23 = vpop.f32.mrb[13].mxu1  ;;  %v9152_v2 = vrot.slane %v9124_v4, %v16024_v57  ;;  %v16313_v63 = vrot.slane %v8164_v50, %v16024_v57  ;;  %v17886_v50 = vld [vmem:[#allocation92_spill] sm:$0xff] }
 0x56d   : > { %v8205_v12 = vrot.slane %v11229_v54, %v16024_v57  ;;  %v11230_v58 = vpack.c.bf16 %v7949_v16, %v7948_v49  ;;  %v11524_v59 = vadd.f32 %v16072_v45, %v7538_v23  ;;  %v7540_v42 = vpop.f32.mrb[14].mxu1  ;;  %v9154_v32 = vcombine.high %v9131_v22, %v9138_v27  ;;  %v17887_v54 = vld [vmem:[#allocation38_spill] sm:$0xff] }
 0x56e   : > { %v8196_v62 = vcombine.high %v8193_v14, %v8193_v14  ;;  %v11522_v21 = vadd.f32 %v11521_v9, %v17885_v31  ;;  %v11527_v3 = vadd.f32 %v16076_v30, %v7540_v42  ;;  %v7542_v20 = vpop.f32.mrb[15].mxu1  ;;  %v9155_v16 = vcombine.low %v9145_v60, %v9152_v2  ;;  %v17888_v42 = vld [vmem:[#allocation41_spill] sm:$0xff] }
 0x56f   : > { %v8213_v53 = vcombine.high %v8205_v12, %v8205_v12  ;;  %v8221_v4 = vrot.slane %v8205_v12, %v16024_v57  ;;  %v8212_v13 = vrot.slane %v11230_v58, %v16024_v57  ;;  %v11525_v7 = vadd.f32 %v11524_v59, %v17886_v50 }
 0x570   : > { %v7950_v5 = vmax.f32 %v11522_v21, 0.0  ;;  %v11528_v49 = vadd.f32 %v11527_v3, %v17887_v54  ;;  %v11530_v45 = vadd.f32 %v16080_v18, %v7542_v20  ;;  %v11267_v9 = vcombine.high %v16293_v19, %v16313_v63 }
 0x571   : > { %v8179_v30 = vrot.slane %v8163_v24, %v16024_v57  ;;  %v16327_v23 = vcombine.low %v8196_v62, %v8221_v4  ;;  %v8214_v22 = vcombine.high %v8212_v13, %v8212_v13  ;;  %v7951_v27 = vmax.f32 %v11525_v7, 0.0 }
 0x572   : > { %v7952_v12 = vmax.f32 %v11528_v49, 0.0  ;;  %v11531_v58 = vadd.f32 %v11530_v45, %v17888_v42  ;;  %v9170_v59 = vrot.slane %v9154_v32, %v16024_v57  ;;  %v8235_v21 = vrot.slane %v8213_v53, %v16024_v57  ;;  %v17889_v49 = vld [vmem:[#allocation93_spill] sm:$0xff] }
 0x573   : > { %v9188_v31 = vcombine.low %v8179_v30, %v8193_v14  ;;  %v7546_v3 = vpop.f32.mrb[16].mxu1  ;;  %v9156_v18 = vcombine.high %v9145_v60, %v9152_v2  ;;  %v9177_v20 = vrot.slane %v9155_v16, %v16024_v57  ;;  %v11231_v50 = vpack.c.bf16 %v7951_v27, %v7950_v5  ;;  %v17890_v30 = vld [vmem:[#allocation94_spill] sm:$0xff] }
 0x574   : > { %v7953_v19 = vmax.f32 %v11531_v58, 0.0  ;;  %v11533_v24 = vadd.f32 %v16084_v36, %v7546_v3  ;;  %v7548_v63 = vpop.f32.mrb[17].mxu1  ;;  %v9163_v62 = vrot.slane %v9153_v61, %v16024_v57  ;;  %v8243_v7 = vcombine.high %v8221_v4, %v8221_v4 }
 0x575   : > { %v16336_v54 = vrot.slane %v8214_v22, %v16024_v57  ;;  %v9184_v32 = vrot.slane %v9156_v18, %v16024_v57  ;;  %v11536_v14 = vadd.f32 %v16088_v6, %v7548_v63  ;;  %v7550_v53 = vpop.f32.mrb[18].mxu1  ;;  %v8254_v60 = vrot.slane %v11231_v50, %v16024_v57  ;;  %v17891_v18 = vld [vmem:[#allocation45_spill] sm:$0xff] }
 0x576   : > { %v11232_v2 = vpack.c.bf16 %v7953_v19, %v7952_v12  ;;  %v11534_v5 = vadd.f32 %v11533_v24, %v17889_v49  ;;  %v9185_v45 = vcombine.low %v9163_v62, %v9177_v20  ;;  %v7552_v16 = vpop.f32.mrb[19].mxu1  ;;  %v11539_v61 = vadd.f32 %v16092_v44, %v7550_v53 }
 0x577   : > { %v9186_v36 = vcombine.low %v9170_v59, %v9184_v32  ;;  %v11537_v27 = vadd.f32 %v11536_v14, %v17890_v30  ;;  %v11542_v4 = vadd.f32 %v16096_v29, %v7552_v16  ;;  %v16346_v22 = vrot.slane %v8212_v13, %v16024_v57 }
 0x578   : > { %v8262_v42 = vcombine.high %v8254_v60, %v8254_v60  ;;  %v8261_v6 = vrot.slane %v11232_v2, %v16024_v57  ;;  %v7954_v58 = vmax.f32 %v11534_v5, 0.0  ;;  %v8270_v12 = vrot.slane %v8254_v60, %v16024_v57 }
 0x579   : > { %10337 = vmatprep.mubr.bf16.mxu0 %v9186_v36  ;;  %v7955_v3 = vmax.f32 %v11537_v27, 0.0  ;;  %v11540_v20 = vadd.f32 %v11539_v61, %v17891_v18  ;;  %v11543_v59 = vadd.f32 %v11542_v4, %v15837_v1  ;;  %v9253_v44 = vcombine.low %v16346_v22, %v16336_v54 }
 0x57a   : > { %v8284_v29 = vrot.slane %v8262_v42, %v16024_v57  ;;  %v8263_v50 = vcombine.high %v8261_v6, %v8261_v6  ;;  %10338 = vmatmul.mubr.bf16.vlgmr.msra.gmra.mrb[208].mxu0 %v9185_v45  ;;  %v9190_v13 = vcombine.low %v8235_v21, %v8243_v7  ;;  %v9197_v32 = vrot.slane %v11267_v9, %v16024_v57 }
 0x57b   : > { %v11233_v19 = vpack.c.bf16 %v7955_v3, %v7954_v58  ;;  %v7956_v24 = vmax.f32 %v11540_v20, 0.0  ;;  %v7957_v63 = vmax.f32 %v11543_v59, 0.0  ;;  %v7556_v62 = vpop.f32.mrb[20].mxu1  ;;  %v16357_v14 = vrot.slane %v8261_v6, %v16024_v57 }
 0x57c   : > { %v8294_v53 = vcombine.high %v8284_v29, %v8284_v29  ;;  %v11545_v1 = vadd.f32 %v16100_v47, %v7556_v62  ;;  %v7558_v60 = vpop.f32.mrb[21].mxu1  ;;  %v9204_v2 = vrot.slane %v9188_v31, %v16024_v57  ;;  %v8292_v49 = vcombine.high %v8270_v12, %v8270_v12 }
 0x57d   : > { %v8304_v5 = vrot.slane %v11233_v19, %v16024_v57  ;;  %v11234_v45 = vpack.c.bf16 %v7957_v63, %v7956_v24  ;;  %v11548_v21 = vadd.f32 %v16104_v40, %v7558_v60  ;;  %v7560_v7 = vpop.f32.mrb[22].mxu1  ;;  %v16364_v16 = vrot.slane %v8263_v50, %v16024_v57 }
 0x57e   : > { %v16367_v9 = vcombine.low %v8294_v53, %v16357_v14  ;;  %v11546_v36 = vadd.f32 %v11545_v1, %v15839_v43  ;;  %v11551_v47 = vadd.f32 %v16108_v52, %v7560_v7  ;;  %v7562_v30 = vpop.f32.mrb[23].mxu1  ;;  %v9211_v40 = vrot.slane %v16327_v23, %v16024_v57 }
 0x57f   : > { %v8312_v27 = vcombine.high %v8304_v5, %v8304_v5  ;;  %v8311_v31 = vrot.slane %v11234_v45, %v16024_v57  ;;  %v11549_v61 = vadd.f32 %v11548_v21, %v15841_v38  ;;  %v9218_v6 = vrot.slane %v9190_v13, %v16024_v57 }
 0x580   : > { %v7958_v4 = vmax.f32 %v11546_v36, 0.0  ;;  %v11552_v42 = vadd.f32 %v11551_v47, %v15848_v41  ;;  %v9220_v58 = vcombine.high %v9197_v32, %v9204_v2  ;;  %v11268_v43 = vcombine.high %v16346_v22, %v16336_v54 }
 0x581   : > { %v9255_v12 = vcombine.low %v8284_v29, %v8292_v49  ;;  %v8334_v52 = vrot.slane %v8312_v27, %v16024_v57  ;;  %v7959_v3 = vmax.f32 %v11549_v61, 0.0  ;;  %v11269_v18 = vcombine.high %v16357_v14, %v16364_v16  ;;  %v17892_v49 = vld [vmem:[#allocation49_spill] sm:$0xff] }
 0x582   : > { %v8313_v38 = vcombine.high %v8311_v31, %v8311_v31  ;;  %v9222_v20 = vcombine.high %v9211_v40, %v9218_v6  ;;  %v11554_v23 = vadd.f32 %v16112_v46, %v7562_v30  ;;  %v16384_v59 = vrot.slane %v8311_v31, %v16024_v57  ;;  %v17894_v31 = vld [vmem:[#allocation96_spill] sm:$0xff] }
 0x583   : > { %v8343_v41 = vcombine.high %v8334_v52, %v8334_v52  ;;  %v7960_v50 = vmax.f32 %v11552_v42, 0.0  ;;  %v9236_v13 = vrot.slane %v9220_v58, %v16024_v57  ;;  %v7566_v19 = vpop.f32.mrb[24].mxu1  ;;  %v11235_v24 = vpack.c.bf16 %v7959_v3, %v7958_v4  ;;  %v17895_v4 = vld [vmem:[#allocation50_spill] sm:$0xff]  ;;  %v17896_v58 = vld [vmem:[#allocation55_spill] sm:$0xff] }
 0x584   : > { %v9250_v29 = vrot.slane %v9222_v20, %v16024_v57  ;;  %v11555_v63 = vadd.f32 %v11554_v23, %v15855_v8  ;;  %v9219_v62 = vcombine.low %v9197_v32, %v9204_v2  ;;  %v7568_v53 = vpop.f32.mrb[25].mxu1  ;;  %v9221_v60 = vcombine.low %v9211_v40, %v9218_v6  ;;  %v17893_v32 = vld [vmem:[#allocation95_spill] sm:$0xff] }
 0x585   : > { %v16390_v1 = vcombine.low %v8343_v41, %v16384_v59  ;;  %v11557_v46 = vadd.f32 %v16116_v15, %v7566_v19  ;;  %v11560_v45 = vadd.f32 %v17892_v49, %v7568_v53  ;;  %v7570_v21 = vpop.f32.mrb[26].mxu1  ;;  %v8352_v7 = vrot.slane %v11235_v24, %v16024_v57 }
 0x586   : > { %v9252_v36 = vcombine.low %v9236_v13, %v9250_v29  ;;  %v7961_v47 = vmax.f32 %v11555_v63, 0.0  ;;  %v9229_v30 = vrot.slane %v9219_v62, %v16024_v57  ;;  %v7572_v27 = vpop.f32.mrb[27].mxu1  ;;  %v9243_v8 = vrot.slane %v9221_v60, %v16024_v57  ;;  %v17897_v13 = vld [vmem:[#allocation97_spill] sm:$0xff]  ;;  %v17898_v63 = vld [vmem:[#allocation98_spill] sm:$0xff] }
 0x587   : > { %v11558_v2 = vadd.f32 %v11557_v46, %v17893_v32  ;;  %v11561_v61 = vadd.f32 %v11560_v45, %v17894_v31  ;;  %v11563_v40 = vadd.f32 %v17895_v4, %v7570_v21  ;;  %v8320_v15 = vrot.slane %v8304_v5, %v16024_v57  ;;  %v17899_v32 = vld [vmem:[#allocation40_spill] sm:$0xff] }
 0x588   : > { %v8360_v42 = vcombine.high %v8352_v7, %v8352_v7  ;;  %10345 = vmatprep.mubr.bf16.mxu0 %v9252_v36  ;;  %v11236_v6 = vpack.c.bf16 %v7961_v47, %v7960_v50  ;;  %v11566_v3 = vadd.f32 %v17896_v58, %v7572_v27  ;;  %v9251_v20 = vcombine.low %v9229_v30, %v9243_v8 }
 0x589   : > { %v7962_v23 = vmax.f32 %v11558_v2, 0.0  ;;  %v7963_v41 = vmax.f32 %v11561_v61, 0.0  ;;  %v11564_v19 = vadd.f32 %v11563_v40, %v17897_v13  ;;  %v9320_v24 = vcombine.low %v8320_v15, %v8334_v52 }
 0x58a   : > { %v8359_v29 = vrot.slane %v11236_v6, %v16024_v57  ;;  %v11567_v62 = vadd.f32 %v11566_v3, %v17898_v63  ;;  %v9263_v5 = vrot.slane %v9253_v44, %v16024_v57  ;;  %v8341_v53 = vrot.slane %v8313_v38, %v16024_v57  ;;  %10346 = vmatmul.mubr.bf16.gmra.mrb[212].mxu0 %v9251_v20 }
 0x58b   : > { %v11237_v50 = vpack.c.bf16 %v7963_v41, %v7962_v23  ;;  %v7964_v60 = vmax.f32 %v11564_v19, 0.0  ;;  %v9270_v46 = vrot.slane %v11268_v43, %v16024_v57  ;;  %v7576_v49 = vpop.f32.mrb[28].mxu1  ;;  %v16412_v45 = vrot.slane %v8360_v42, %v16024_v57  ;;  %v17900_v41 = vld [vmem:[#allocation99_spill] sm:$0xff]  ;;  %v17901_v19 = vld [vmem:[#allocation53_spill] sm:$0xff] }
 0x58c   : > { %v8361_v52 = vcombine.high %v8359_v29, %v8359_v29  ;;  %v8375_v21 = vrot.slane %v8359_v29, %v16024_v57  ;;  %v9277_v36 = vrot.slane %v9255_v12, %v16024_v57  ;;  %v7578_v47 = vpop.f32.mrb[29].mxu1  ;;  %v7965_v22 = vmax.f32 %v11567_v62, 0.0 }
 0x58d   : > { %v8402_v54 = vrot.slane %v11237_v50, %v16024_v57  ;;  %v9284_v44 = vrot.slane %v16367_v9, %v16024_v57  ;;  %v9286_v38 = vcombine.high %v9263_v5, %v9270_v46  ;;  %v7580_v30 = vpop.f32.mrb[30].mxu1  ;;  %v16420_v43 = vrot.slane %v8352_v7, %v16024_v57 }
 0x58e   : > { %v8389_v27 = vrot.slane %v8361_v52, %v16024_v57  ;;  %v9285_v8 = vcombine.low %v9263_v5, %v9270_v46  ;;  %v11569_v2 = vadd.f32 %v17899_v32, %v7576_v49  ;;  %v7582_v31 = vpop.f32.mrb[31].mxu1  ;;  %v8342_v12 = vcombine.high %v16384_v59, %v16384_v59  ;;  %v17902_v52 = vld [vmem:[#allocation100_spill] sm:$0xff] }
 0x58f   : > { %v16427_v61 = vrot.slane %v8402_v54, %v16024_v57  ;;  %v11238_v4 = vpack.c.bf16 %v7965_v22, %v7964_v60  ;;  %v9288_v40 = vcombine.high %v9277_v36, %v9284_v44  ;;  %v9385_v9 = vcombine.low %v16420_v43, %v16412_v45 }
 0x590   : > { %v8391_v15 = vcombine.high %v8375_v21, %v8375_v21  ;;  %v8393_v7 = vcombine.high %v8389_v27, %v8389_v27  ;;  %v9287_v42 = vcombine.low %v9277_v36, %v9284_v44  ;;  %v9302_v58 = vrot.slane %v9286_v38, %v16024_v57  ;;  %v17903_v36 = vld [vmem:[#allocation54_spill] sm:$0xff] }
 0x591   : > { %v16432_v6 = vrot.slane %v11238_v4, %v16024_v57  ;;  %v9316_v3 = vrot.slane %v9288_v40, %v16024_v57  ;;  %v9295_v59 = vrot.slane %v9285_v8, %v16024_v57  ;;  %v11570_v13 = vadd.f32 %v11569_v2, %v17900_v41  ;;  %v17904_v8 = vld [vmem:[#allocation48_spill] sm:$0xff]  ;;  %v17905_v40 = vld [vmem:[#allocation101_spill] sm:$0xff] }
 0x592   : > { %v16438_v20 = vcombine.low %v8393_v7, %v16427_v61  ;;  %v9309_v23 = vrot.slane %v9287_v42, %v16024_v57  ;;  %v11572_v29 = vadd.f32 %v17901_v19, %v7578_v47  ;;  %v11270_v63 = vcombine.high %v16420_v43, %v16412_v45  ;;  %v17907_v41 = vld [vmem:[#allocation56_spill] sm:$0xff] }
 0x593   : > { %v8410_v62 = vcombine.high %v8402_v54, %v8402_v54  ;;  %v8411_v5 = vcombine.high %v16432_v6, %v16432_v6  ;;  %v9318_v50 = vcombine.low %v9302_v58, %v9316_v3  ;;  %v7586_v60 = vpop.f32.mrb[32].mxu1  ;;  %v7966_v49 = vmax.f32 %v11570_v13, 0.0 }
 0x594   : > { %v9317_v46 = vcombine.low %v9295_v59, %v9309_v23  ;;  %v11573_v21 = vadd.f32 %v11572_v29, %v17902_v52  ;;  %v11575_v22 = vadd.f32 %v17903_v36, %v7580_v30  ;;  %v7588_v44 = vpop.f32.mrb[33].mxu1  ;;  %v9387_v38 = vcombine.low %v8389_v27, %v8391_v15  ;;  %v17909_v52 = vld [vmem:[#allocation103_spill] sm:$0xff] }
 0x595   : > { %10353 = vmatprep.mubr.bf16.mxu0 %v9318_v50  ;;  %v11578_v47 = vadd.f32 %v17904_v8, %v7582_v31  ;;  %v9322_v32 = vcombine.low %v8341_v53, %v8342_v12  ;;  %v9329_v54 = vrot.slane %v11269_v18, %v16024_v57  ;;  %v7590_v2 = vpop.f32.mrb[34].mxu1  ;;  %v9336_v42 = vrot.slane %v9320_v24, %v16024_v57  ;;  %v17906_v31 = vld [vmem:[#allocation102_spill] sm:$0xff] }
 0x596   : > { %10354 = vmatmul.mubr.bf16.gmra.mrb[216].mxu0 %v9317_v46  ;;  %v7967_v4 = vmax.f32 %v11573_v21, 0.0  ;;  %v11576_v7 = vadd.f32 %v11575_v22, %v17905_v40  ;;  %v9343_v30 = vrot.slane %v16390_v1, %v16024_v57  ;;  %v7592_v27 = vpop.f32.mrb[35].mxu1  ;;  %v16459_v15 = vrot.slane %v8410_v62, %v16024_v57  ;;  %v17908_v62 = vld [vmem:[#allocation44_spill] sm:$0xff] }
 0x597   : > { %v8439_v53 = vrot.slane %v8411_v5, %v16024_v57  ;;  %v11579_v12 = vadd.f32 %v11578_v47, %v17906_v31  ;;  %v9350_v14 = vrot.slane %v9322_v32, %v16024_v57  ;;  %v9352_v58 = vcombine.high %v9329_v54, %v9336_v42  ;;  %v17911_v32 = vld [vmem:[#allocation62_spill] sm:$0xff] }
 0x598   : > { %v11239_v16 = vpack.c.bf16 %v7967_v4, %v7966_v49  ;;  %v7968_v18 = vmax.f32 %v11576_v7, 0.0  ;;  %v9351_v3 = vcombine.low %v9329_v54, %v9336_v42  ;;  %v11581_v13 = vadd.f32 %v17907_v41, %v7586_v60  ;;  %v17910_v60 = vld [vmem:[#allocation104_spill] sm:$0xff] }
 0x599   : > { %v7969_v59 = vmax.f32 %v11579_v12, 0.0  ;;  %v9354_v23 = vcombine.high %v9343_v30, %v9350_v14  ;;  %v9353_v24 = vcombine.low %v9343_v30, %v9350_v14  ;;  %v9368_v19 = vrot.slane %v9352_v58, %v16024_v57 }
 0x59a   : > { %v8451_v1 = vrot.slane %v11239_v16, %v16024_v57  ;;  %v9361_v29 = vrot.slane %v9351_v3, %v16024_v57  ;;  %v11584_v5 = vadd.f32 %v17908_v62, %v7588_v44  ;;  %v11582_v21 = vadd.f32 %v11581_v13, %v17909_v52  ;;  %v17912_v3 = vld [vmem:[#allocation105_spill] sm:$0xff]  ;;  %v17914_v13 = vld [vmem:[#allocation68_spill] sm:$0xff] }
 0x59b   : > { %v11240_v50 = vpack.c.bf16 %v7969_v59, %v7968_v18  ;;  %v9382_v46 = vrot.slane %v9354_v23, %v16024_v57  ;;  %v9375_v49 = vrot.slane %v9353_v24, %v16024_v57  ;;  %v7596_v36 = vpop.f32.mrb[36].mxu1  ;;  %v8442_v22 = vcombine.high %v8439_v53, %v8439_v53  ;;  %v17913_v23 = vld [vmem:[#allocation67_spill] sm:$0xff] }
 0x59c   : > { %v16473_v8 = vrot.slane %v8451_v1, %v16024_v57  ;;  %v11585_v47 = vadd.f32 %v11584_v5, %v17910_v60  ;;  %v11587_v54 = vadd.f32 %v17911_v32, %v7590_v2  ;;  %v7598_v4 = vpop.f32.mrb[37].mxu1  ;;  %v7970_v42 = vmax.f32 %v11582_v21, 0.0  ;;  %v17915_v5 = vld [vmem:[#allocation106_spill] sm:$0xff] }
 0x59d   : > { %v8458_v40 = vrot.slane %v11240_v50, %v16024_v57  ;;  %v9384_v44 = vcombine.low %v9368_v19, %v9382_v46  ;;  %v9383_v7 = vcombine.low %v9361_v29, %v9375_v49  ;;  %v7600_v30 = vpop.f32.mrb[38].mxu1  ;;  %v11271_v31 = vcombine.high %v16427_v61, %v16459_v15  ;;  %v17916_v49 = vld [vmem:[#allocation107_spill] sm:$0xff] }
 0x59e   : > { %v8425_v12 = vrot.slane %v16432_v6, %v16024_v57  ;;  %v16483_v14 = vcombine.low %v8442_v22, %v16473_v8  ;;  %v7971_v16 = vmax.f32 %v11585_v47, 0.0  ;;  %v7602_v18 = vpop.f32.mrb[39].mxu1  ;;  %v8459_v58 = vcombine.high %v8451_v1, %v8451_v1 }
 0x59f   : > { %v8460_v2 = vcombine.high %v8458_v40, %v8458_v40  ;;  %10361 = vmatprep.mubr.bf16.mxu0 %v9384_v44  ;;  %v11588_v59 = vadd.f32 %v11587_v54, %v17912_v3  ;;  %v11590_v24 = vadd.f32 %v17913_v23, %v7592_v27  ;;  %v11593_v19 = vadd.f32 %v17914_v13, %v7596_v36 }
 0x5a0   : > { %10362 = vmatmul.mubr.bf16.gmra.mrb[220].mxu0 %v9383_v7  ;;  %v11241_v41 = vpack.c.bf16 %v7971_v16, %v7970_v42  ;;  %v9395_v6 = vrot.slane %v9385_v9, %v16024_v57  ;;  %v9402_v1 = vrot.slane %v11270_v63, %v16024_v57  ;;  %v16496_v29 = vcombine.low %v8425_v12, %v8439_v53  ;;  %v17917_v63 = vld [vmem:[#allocation63_spill] sm:$0xff]  ;;  %v17918_v7 = vld [vmem:[#allocation108_spill] sm:$0xff] }
 0x5a1   : > { %v7972_v62 = vmax.f32 %v11588_v59, 0.0  ;;  %v11591_v50 = vadd.f32 %v11590_v24, %v17915_v5  ;;  %v9409_v27 = vrot.slane %v9387_v38, %v16024_v57  ;;  %v11594_v52 = vadd.f32 %v11593_v19, %v17916_v49 }
 0x5a2   : > { %v8500_v46 = vrot.slane %v11241_v41, %v16024_v57  ;;  %v9416_v21 = vrot.slane %v16438_v20, %v16024_v57  ;;  %v9418_v9 = vcombine.high %v9395_v6, %v9402_v1  ;;  %v8481_v36 = vrot.slane %v8459_v58, %v16024_v57 }
 0x5a3   : > { %v8489_v45 = vcombine.high %v16473_v8, %v16473_v8  ;;  %v7973_v43 = vmax.f32 %v11591_v50, 0.0  ;;  %v11596_v53 = vadd.f32 %v17917_v63, %v7598_v4  ;;  %v7606_v22 = vpop.f32.mrb[40].mxu1  ;;  %v16509_v60 = vrot.slane %v8458_v40, %v16024_v57  ;;  %v17919_v50 = vld [vmem:[#allocation109_spill] sm:$0xff] }
 0x5a4   : > { %v16512_v38 = vrot.slane %v8460_v2, %v16024_v57  ;;  %v8508_v47 = vcombine.high %v8500_v46, %v8500_v46  ;;  %v9420_v32 = vcombine.high %v9409_v27, %v9416_v21  ;;  %v7608_v54 = vpop.f32.mrb[41].mxu1  ;;  %v7974_v44 = vmax.f32 %v11594_v52, 0.0 }
 0x5a5   : > { %v11242_v20 = vpack.c.bf16 %v7973_v43, %v7972_v62  ;;  %v11597_v42 = vadd.f32 %v11596_v53, %v17918_v7  ;;  %v9417_v12 = vcombine.low %v9395_v6, %v9402_v1  ;;  %v7610_v16 = vpop.f32.mrb[42].mxu1  ;;  %v9434_v4 = vrot.slane %v9418_v9, %v16024_v57  ;;  %v17923_v7 = vld [vmem:[#allocation112_spill] sm:$0xff] }
 0x5a6   : > { %v8530_v8 = vrot.slane %v8508_v47, %v16024_v57  ;;  %v9448_v58 = vrot.slane %v9420_v32, %v16024_v57  ;;  %v9419_v40 = vcombine.low %v9409_v27, %v9416_v21  ;;  %v7612_v3 = vpop.f32.mrb[43].mxu1  ;;  %v8516_v2 = vrot.slane %v8500_v46, %v16024_v57  ;;  %v17921_v47 = vld [vmem:[#allocation110_spill] sm:$0xff] }
 0x5a7   : > { %v8507_v59 = vrot.slane %v11242_v20, %v16024_v57  ;;  %v7975_v23 = vmax.f32 %v11597_v42, 0.0  ;;  %v11599_v24 = vadd.f32 %v16172_v28, %v7600_v30  ;;  %v9427_v19 = vrot.slane %v9417_v12, %v16024_v57  ;;  %v17920_v28 = vld [vmem:[#allocation64_spill] sm:$0xff]  ;;  %v17922_v20 = vld [vmem:[#allocation111_spill] sm:$0xff] }
 0x5a8   : > { %v8540_v41 = vcombine.high %v8530_v8, %v8530_v8  ;;  %v9450_v13 = vcombine.low %v9434_v4, %v9448_v58  ;;  %v9441_v6 = vrot.slane %v9419_v40, %v16024_v57  ;;  %v9517_v1 = vcombine.low %v16509_v60, %v16512_v38 }
 0x5a9   : > { %v16526_v62 = vrot.slane %v8507_v59, %v16024_v57  ;;  %v11243_v5 = vpack.c.bf16 %v7975_v23, %v7974_v44  ;;  %v11600_v27 = vadd.f32 %v11599_v24, %v17919_v50  ;;  %v11602_v49 = vadd.f32 %v16177_v37, %v7602_v18  ;;  %v17924_v23 = vld [vmem:[#allocation113_spill] sm:$0xff] }
 0x5aa   : > { %10369 = vmatprep.mubr.bf16.mxu0 %v9450_v13  ;;  %v9449_v46 = vcombine.low %v9427_v19, %v9441_v6  ;;  %v11605_v30 = vadd.f32 %v17920_v28, %v7606_v22  ;;  %v11608_v52 = vadd.f32 %v16186_v33, %v7608_v54  ;;  %v8538_v21 = vcombine.high %v8516_v2, %v8516_v2 }
 0x5ab   : > { %v16533_v9 = vcombine.low %v8540_v41, %v16526_v62  ;;  %v8550_v43 = vrot.slane %v11243_v5, %v16024_v57  ;;  %v7976_v63 = vmax.f32 %v11600_v27, 0.0  ;;  %v7616_v53 = vpop.f32.mrb[44].mxu1  ;;  %v11603_v32 = vadd.f32 %v11602_v49, %v17921_v47  ;;  %v17925_v49 = vld [vmem:[#allocation114_spill] sm:$0xff] }
 0x5ac   : > { %10370 = vmatmul.mubr.bf16.gmra.mrb[224].mxu0 %v9449_v46  ;;  %v11606_v44 = vadd.f32 %v11605_v30, %v17922_v20  ;;  %v11609_v42 = vadd.f32 %v11608_v52, %v17923_v7  ;;  %v11611_v37 = vadd.f32 %v16190_v55, %v7610_v16  ;;  %v7618_v18 = vpop.f32.mrb[45].mxu1  ;;  %v11272_v33 = vcombine.high %v16509_v60, %v16512_v38 }
 0x5ad   : > { %v8509_v22 = vcombine.high %v8507_v59, %v8507_v59  ;;  %v8558_v54 = vcombine.high %v8550_v43, %v8550_v43  ;;  %v9454_v12 = vcombine.low %v8481_v36, %v8489_v45  ;;  %v7620_v4 = vpop.f32.mrb[46].mxu1  ;;  %v7977_v58 = vmax.f32 %v11603_v32, 0.0 }
 0x5ae   : > { %v7978_v40 = vmax.f32 %v11606_v44, 0.0  ;;  %v7979_v2 = vmax.f32 %v11609_v42, 0.0  ;;  %v11612_v24 = vadd.f32 %v11611_v37, %v17924_v23  ;;  %v7622_v41 = vpop.f32.mrb[47].mxu1  ;;  %v9519_v13 = vcombine.low %v8530_v8, %v8538_v21  ;;  %v17927_v23 = vld [vmem:[#allocation115_spill] sm:$0xff] }
 0x5af   : > { %v8580_v19 = vrot.slane %v8558_v54, %v16024_v57  ;;  %v9461_v55 = vrot.slane %v11271_v31, %v16024_v57  ;;  %v9468_v16 = vrot.slane %v16496_v29, %v16024_v57  ;;  %v11244_v59 = vpack.c.bf16 %v7977_v58, %v7976_v63 }
 0x5b0   : > { %v11245_v36 = vpack.c.bf16 %v7979_v2, %v7978_v40  ;;  %v9475_v45 = vrot.slane %v16483_v14, %v16024_v57  ;;  %v9482_v6 = vrot.slane %v9454_v12, %v16024_v57  ;;  %v16554_v5 = vrot.slane %v8509_v22, %v16024_v57  ;;  %v17926_v14 = vld [vmem:[#allocation70_spill] sm:$0xff] }
 0x5b1   : > { %v8589_v8 = vcombine.high %v8580_v19, %v8580_v19  ;;  %v9484_v50 = vcombine.high %v9461_v55, %v9468_v16  ;;  %v11614_v27 = vadd.f32 %v16195_v48, %v7612_v3  ;;  %v8557_v61 = vrot.slane %v11244_v59, %v16024_v57  ;;  %v17928_v59 = vld [vmem:[#allocation51_spill] sm:$0xff] }
 0x5b2   : > { %v8598_v15 = vrot.slane %v11245_v36, %v16024_v57  ;;  %v9486_v31 = vcombine.high %v9475_v45, %v9482_v6  ;;  %v9483_v29 = vcombine.low %v9461_v55, %v9468_v16  ;;  %v7980_v46 = vmax.f32 %v11612_v24, 0.0 }
 0x5b3   : > { %v11615_v28 = vadd.f32 %v11614_v27, %v17925_v49  ;;  %v9485_v30 = vcombine.low %v9475_v45, %v9482_v6  ;;  %v11617_v52 = vadd.f32 %v17926_v14, %v7616_v53  ;;  %v7626_v21 = vpop.f32.mrb[48].mxu1  ;;  %v8566_v63 = vrot.slane %v8550_v43, %v16024_v57 }
 0x5b4   : > { %v8559_v47 = vcombine.high %v8557_v61, %v8557_v61  ;;  %v16563_v32 = vrot.slane %v8557_v61, %v16024_v57  ;;  %v9500_v48 = vrot.slane %v9484_v50, %v16024_v57  ;;  %v7628_v3 = vpop.f32.mrb[49].mxu1  ;;  %v9514_v20 = vrot.slane %v9486_v31, %v16024_v57  ;;  %v17930_v50 = vld [vmem:[#allocation61_spill] sm:$0xff]  ;;  %v17931_v31 = vld [vmem:[#allocation116_spill] sm:$0xff] }
 0x5b5   : > { %v7981_v44 = vmax.f32 %v11615_v28, 0.0  ;;  %v9493_v7 = vrot.slane %v9483_v29, %v16024_v57  ;;  %v9507_v42 = vrot.slane %v9485_v30, %v16024_v57  ;;  %v7630_v37 = vpop.f32.mrb[50].mxu1  ;;  %v11273_v53 = vcombine.high %v16526_v62, %v16554_v5  ;;  %v17933_v30 = vld [vmem:[#allocation118_spill] sm:$0xff] }
 0x5b6   : > { %v16571_v22 = vcombine.low %v8566_v63, %v8580_v19  ;;  %v16574_v43 = vcombine.low %v8589_v8, %v16563_v32  ;;  %v8606_v54 = vcombine.high %v8598_v15, %v8598_v15  ;;  %v7632_v12 = vpop.f32.mrb[51].mxu1  ;;  %v9516_v58 = vcombine.low %v9500_v48, %v9514_v20  ;;  %v17929_v19 = vld [vmem:[#allocation65_spill] sm:$0xff] }
 0x5b7   : > { %v11246_v40 = vpack.c.bf16 %v7981_v44, %v7980_v46  ;;  %v9515_v2 = vcombine.low %v9493_v7, %v9507_v42  ;;  %v11618_v24 = vadd.f32 %v11617_v52, %v17927_v23  ;;  %v16578_v55 = vrot.slane %v8559_v47, %v16024_v57 }
 0x5b8   : > { %v16581_v16 = vrot.slane %v8598_v15, %v16024_v57  ;;  %v11620_v36 = vadd.f32 %v17928_v59, %v7618_v18  ;;  %v11623_v45 = vadd.f32 %v17929_v19, %v7620_v4  ;;  %10377 = vmatprep.mubr.bf16.mxu0 %v9516_v58  ;;  %v11626_v27 = vadd.f32 %v17930_v50, %v7622_v41  ;;  %v17932_v15 = vld [vmem:[#allocation117_spill] sm:$0xff] }
 0x5b9   : > { %v8605_v6 = vrot.slane %v11246_v40, %v16024_v57  ;;  %v7982_v8 = vmax.f32 %v11618_v24, 0.0  ;;  %v9527_v61 = vrot.slane %v9517_v1, %v16024_v57  ;;  %10378 = vmatmul.mubr.bf16.gmra.mrb[228].mxu0 %v9515_v2  ;;  %v9534_v18 = vrot.slane %v11272_v33, %v16024_v57  ;;  %v17935_v50 = vld [vmem:[#allocation57_spill] sm:$0xff] }
 0x5ba   : > { %v11621_v29 = vadd.f32 %v11620_v36, %v17931_v31  ;;  %v11624_v46 = vadd.f32 %v11623_v45, %v17932_v15  ;;  %v9541_v4 = vrot.slane %v9519_v13, %v16024_v57  ;;  %v11627_v14 = vadd.f32 %v11626_v27, %v17933_v30  ;;  %v17934_v36 = vld [vmem:[#allocation66_spill] sm:$0xff] }
 0x5bb   : > { %v8607_v49 = vcombine.high %v8605_v6, %v8605_v6  ;;  %v8621_v28 = vrot.slane %v8605_v6, %v16024_v57  ;;  %v9548_v41 = vrot.slane %v16533_v9, %v16024_v57  ;;  %v16599_v52 = vpop.f32.mrb[52].mxu1  ;;  %v9550_v1 = vcombine.high %v9527_v61, %v9534_v18 }
 0x5bc   : > { %v7983_v60 = vmax.f32 %v11621_v29, 0.0  ;;  %v7984_v38 = vmax.f32 %v11624_v46, 0.0  ;;  %v9549_v63 = vcombine.low %v9527_v61, %v9534_v18  ;;  %v7638_v47 = vpop.f32.mrb[53].mxu1  ;;  %v8588_v33 = vcombine.high %v16563_v32, %v16563_v32  ;;  %v17936_v61 = vld [vmem:[#allocation22_spill] sm:$0xff]  ;;  %v17937_v18 = vld [vmem:[#allocation119_spill] sm:$0xff] }
 0x5bd   : > { %v16604_v13 = vrot.slane %v8606_v54, %v16024_v57  ;;  %v7985_v48 = vmax.f32 %v11627_v14, 0.0  ;;  %v9552_v20 = vcombine.high %v9541_v4, %v9548_v41  ;;  %v7640_v44 = vpop.f32.mrb[54].mxu1  ;;  %v8635_v7 = vrot.slane %v8607_v49, %v16024_v57 }
 0x5be   : > { %v8637_v42 = vcombine.high %v8621_v28, %v8621_v28  ;;  %v11247_v9 = vpack.c.bf16 %v7983_v60, %v7982_v8  ;;  %v9551_v58 = vcombine.low %v9541_v4, %v9548_v41  ;;  %v16607_v40 = vpop.f32.mrb[55].mxu1  ;;  %v9566_v23 = vrot.slane %v9550_v1, %v16024_v57  ;;  %v17940_v60 = vld [vmem:[#allocation122_spill] sm:$0xff] }
 0x5bf   : > { %v11248_v2 = vpack.c.bf16 %v7985_v48, %v7984_v38  ;;  %v9580_v24 = vrot.slane %v9552_v20, %v16024_v57  ;;  %v9559_v32 = vrot.slane %v9549_v63, %v16024_v57  ;;  %v11629_v19 = vadd.f32 %v17934_v36, %v7626_v21  ;;  %v17938_v21 = vld [vmem:[#allocation120_spill] sm:$0xff] }
 0x5c0   : > { %v8648_v54 = vrot.slane %v11247_v9, %v16024_v57  ;;  %v9573_v59 = vrot.slane %v9551_v58, %v16024_v57  ;;  %v11632_v45 = vadd.f32 %v16220_v0, %v7628_v3  ;;  %v11635_v27 = vadd.f32 %v17935_v50, %v7630_v37  ;;  %v17939_v0 = vld [vmem:[#allocation121_spill] sm:$0xff] }
 0x5c1   : > { %v8655_v6 = vrot.slane %v11248_v2, %v16024_v57  ;;  %v9582_v8 = vcombine.low %v9566_v23, %v9580_v24  ;;  %v11638_v31 = vadd.f32 %v17936_v61, %v7632_v12  ;;  %v8639_v29 = vcombine.high %v8635_v7, %v8635_v7 }
 0x5c2   : > { %v16620_v15 = vrot.slane %v8648_v54, %v16024_v57  ;;  %v9581_v46 = vcombine.low %v9559_v32, %v9573_v59  ;;  %v11630_v4 = vadd.f32 %v11629_v19, %v17937_v18  ;;  %v8656_v49 = vcombine.high %v8648_v54, %v8648_v54 }
 0x5c3   : > { %v8657_v28 = vcombine.high %v8655_v6, %v8655_v6  ;;  %10385 = vmatprep.mubr.bf16.mxu0 %v9582_v8  ;;  %v11633_v30 = vadd.f32 %v11632_v45, %v17938_v21  ;;  %v11636_v3 = vadd.f32 %v11635_v27, %v17939_v0  ;;  %v7646_v14 = vpop.f32.mrb[56].mxu1  ;;  %v9649_v37 = vcombine.low %v16581_v16, %v16604_v13  ;;  %v17942_v0 = vld [vmem:[#allocation124_spill] sm:$0xff] }
 0x5c4   : > { %v16628_v12 = vcombine.low %v8639_v29, %v16620_v15  ;;  %10386 = vmatmul.mubr.bf16.gmra.mrb[232].mxu0 %v9581_v46  ;;  %v7986_v41 = vmax.f32 %v11630_v4, 0.0  ;;  %v11639_v38 = vadd.f32 %v11638_v31, %v17940_v60  ;;  %v16631_v1 = vpop.f32.mrb[57].mxu1  ;;  %v11274_v63 = vcombine.high %v16581_v16, %v16604_v13  ;;  %v17941_v31 = vld [vmem:[#allocation123_spill] sm:$0xff]  ;;  %v17943_v60 = vld [vmem:[#allocation125_spill] sm:$0xff] }
 0x5c5   : > { %v7987_v48 = vmax.f32 %v11633_v30, 0.0  ;;  %v7988_v20 = vmax.f32 %v11636_v3, 0.0  ;;  %v9586_v9 = vcombine.low %v16578_v55, %v8588_v33  ;;  %v16636_v58 = vpop.f32.mrb[58].mxu1  ;;  %v9651_v2 = vcombine.low %v8635_v7, %v8637_v42 }
 0x5c6   : > { %v7989_v23 = vmax.f32 %v11639_v38, 0.0  ;;  %v9593_v24 = vrot.slane %v11273_v53, %v16024_v57  ;;  %v9600_v32 = vrot.slane %v16571_v22, %v16024_v57  ;;  %v16644_v54 = vpop.f32.mrb[59].mxu1  ;;  %v16647_v16 = vrot.slane %v8656_v49, %v16024_v57 }
 0x5c7   : > { %v8685_v13 = vrot.slane %v8657_v28, %v16024_v57  ;;  %v11249_v55 = vpack.c.bf16 %v7987_v48, %v7986_v41  ;;  %v9607_v33 = vrot.slane %v16574_v43, %v16024_v57  ;;  %v9614_v42 = vrot.slane %v9586_v9, %v16024_v57  ;;  %v17944_v48 = vld [vmem:[#allocation69_spill] sm:$0xff] }
 0x5c8   : > { %v11250_v7 = vpack.c.bf16 %v7989_v23, %v7988_v20  ;;  %v9616_v59 = vcombine.high %v9593_v24, %v9600_v32  ;;  %v9615_v62 = vcombine.low %v9593_v24, %v9600_v32  ;;  %v11641_v53 = vadd.f32 %v16232_v34, %v16599_v52 }
 0x5c9   : > { %v8697_v5 = vrot.slane %v11249_v55, %v16024_v57  ;;  %v11644_v22 = vadd.f32 %v16237_v25, %v7638_v47  ;;  %v11647_v36 = vadd.f32 %v16243_v56, %v7640_v44  ;;  %v8671_v19 = vrot.slane %v8655_v6, %v16024_v57 }
 0x5ca   : > { %v8704_v45 = vrot.slane %v11250_v7, %v16024_v57  ;;  %v9618_v8 = vcombine.high %v9607_v33, %v9614_v42  ;;  %v9617_v43 = vcombine.low %v9607_v33, %v9614_v42  ;;  %v8688_v50 = vcombine.high %v8685_v13, %v8685_v13  ;;  %v17945_v7 = vld [vmem:[#allocation126_spill] sm:$0xff] }
 0x5cb   : > { %v16661_v27 = vrot.slane %v8697_v5, %v16024_v57  ;;  %v9632_v61 = vrot.slane %v9616_v59, %v16024_v57  ;;  %v11642_v29 = vadd.f32 %v11641_v53, %v17941_v31  ;;  %v16665_v46 = vpop.f32.mrb[60].mxu1  ;;  %v8705_v34 = vcombine.high %v8697_v5, %v8697_v5  ;;  %v17946_v59 = vld [vmem:[#allocation127_spill] sm:$0xff]  ;;  %v17948_v31 = vld [vmem:[#allocation129_spill] sm:$0xff] }
 0x5cc   : > { %v9646_v25 = vrot.slane %v9618_v8, %v16024_v57  ;;  %v9625_v56 = vrot.slane %v9615_v62, %v16024_v57  ;;  %v9639_v52 = vrot.slane %v9617_v43, %v16024_v57  ;;  %v16670_v47 = vpop.f32.mrb[61].mxu1  ;;  %v11275_v44 = vcombine.high %v16620_v15, %v16647_v16  ;;  %v17947_v8 = vld [vmem:[#allocation128_spill] sm:$0xff]  ;;  %v17953_v15 = vld [vmem:[#allocation59_spill] sm:$0xff] }
 0x5cd   : > { %v16674_v6 = vcombine.low %v8671_v19, %v8685_v13  ;;  %v16677_v18 = vcombine.low %v8688_v50, %v16661_v27  ;;  %v8706_v4 = vcombine.high %v8704_v45, %v8704_v45  ;;  %v7660_v49 = vpop.f32.mrb[62].mxu1  ;;  %v7990_v30 = vmax.f32 %v11642_v29, 0.0 }
 0x5ce   : > { %v9648_v28 = vcombine.low %v9632_v61, %v9646_v25  ;;  %v9647_v21 = vcombine.low %v9625_v56, %v9639_v52  ;;  %v11645_v3 = vadd.f32 %v11644_v22, %v17942_v0  ;;  %v16680_v41 = vpop.f32.mrb[63].mxu1  ;;  %v11648_v38 = vadd.f32 %v11647_v36, %v17943_v60 }
 0x5cf   : > { %v11650_v20 = vadd.f32 %v17944_v48, %v16607_v40  ;;  %v11653_v9 = vadd.f32 %v16253_v11, %v7646_v14  ;;  %v9659_v23 = vrot.slane %v9649_v37, %v16024_v57  ;;  %v16688_v24 = vrot.slane %v8705_v34, %v16024_v57 }
 0x5d0   : > { %v16691_v32 = vrot.slane %v8704_v45, %v16024_v57  ;;  %10393 = vmatprep.mubr.bf16.mxu0 %v9648_v28  ;;  %v7991_v13 = vmax.f32 %v11645_v3, 0.0  ;;  %v9666_v55 = vrot.slane %v11274_v63, %v16024_v57  ;;  %v7992_v33 = vmax.f32 %v11648_v38, 0.0  ;;  %v17949_v38 = vld [vmem:[#allocation130_spill] sm:$0xff] }
 0x5d1   : > { %10394 = vmatmul.mubr.bf16.gmra.mrb[236].mxu0 %v9647_v21  ;;  %v11651_v42 = vadd.f32 %v11650_v20, %v17945_v7  ;;  %v11654_v40 = vadd.f32 %v11653_v9, %v17946_v59  ;;  %v9673_v11 = vrot.slane %v9651_v2, %v16024_v57  ;;  %v9680_v37 = vrot.slane %v16628_v12, %v16024_v57  ;;  %v17950_v59 = vld [vmem:[#allocation131_spill] sm:$0xff] }
 0x5d2   : > { %v11251_v14 = vpack.c.bf16 %v7991_v13, %v7990_v30  ;;  %v9682_v62 = vcombine.high %v9659_v23, %v9666_v55  ;;  %v11656_v5 = vadd.f32 %v16264_v17, %v16631_v1  ;;  %v16702_v53 = vrot.slane %v8706_v4, %v16024_v57 }
 0x5d3   : > { %v7993_v63 = vmax.f32 %v11651_v42, 0.0  ;;  %v9681_v22 = vcombine.low %v9659_v23, %v9666_v55  ;;  %v11659_v36 = vadd.f32 %v16268_v51, %v16636_v58  ;;  %v7994_v45 = vmax.f32 %v11654_v40, 0.0 }
 0x5d4   : > { %v8746_v19 = vrot.slane %v11251_v14, %v16024_v57  ;;  %v9684_v2 = vcombine.high %v9673_v11, %v9680_v37  ;;  %v11657_v43 = vadd.f32 %v11656_v5, %v17947_v8  ;;  %v9698_v12 = vrot.slane %v9682_v62, %v16024_v57 }
 0x5d5   : > { %v11252_v50 = vpack.c.bf16 %v7993_v63, %v7992_v33  ;;  %v9683_v61 = vcombine.low %v9673_v11, %v9680_v37  ;;  %v11660_v17 = vadd.f32 %v11659_v36, %v17948_v31  ;;  %v9691_v58 = vrot.slane %v9681_v22, %v16024_v57  ;;  %v17952_v37 = vld [vmem:[#allocation133_spill] sm:$0xff] }
 0x5d6   : > { %v8754_v1 = vcombine.high %v8746_v19, %v8746_v19  ;;  %v8762_v29 = vrot.slane %v8746_v19, %v16024_v57  ;;  %v9712_v34 = vrot.slane %v9684_v2, %v16024_v57  ;;  %v7995_v25 = vmax.f32 %v11657_v43, 0.0 }
 0x5d7   : > { %v8753_v51 = vrot.slane %v11252_v50, %v16024_v57  ;;  %v9705_v56 = vrot.slane %v9683_v61, %v16024_v57  ;;  %v11662_v52 = vadd.f32 %v16273_v35, %v16644_v54  ;;  %v8735_v4 = vcombine.high %v16661_v27, %v16661_v27 }
 0x5d8   : > { %v8776_v28 = vrot.slane %v8754_v1, %v16024_v57  ;;  %v9714_v21 = vcombine.low %v9698_v12, %v9712_v34  ;;  %v11253_v30 = vpack.c.bf16 %v7995_v25, %v7994_v45  ;;  %v8784_v0 = vcombine.high %v8762_v29, %v8762_v29  ;;  %v17954_v34 = vld [vmem:[#allocation134_spill] sm:$0xff] }
 0x5d9   : > { %v9713_v3 = vcombine.low %v9691_v58, %v9705_v56  ;;  %v7996_v60 = vmax.f32 %v11660_v17, 0.0  ;;  %v11663_v48 = vadd.f32 %v11662_v52, %v17949_v38  ;;  %v16722_v20 = vrot.slane %v8753_v51, %v16024_v57 }
 0x5da   : > { %v8786_v9 = vcombine.high %v8776_v28, %v8776_v28  ;;  %10401 = vmatprep.mubr.bf16.mxu0 %v9714_v21  ;;  %v8796_v23 = vrot.slane %v11253_v30, %v16024_v57  ;;  %v11665_v35 = vadd.f32 %v16279_v39, %v16665_v46  ;;  %v9781_v54 = vcombine.low %v16691_v32, %v16702_v53  ;;  %v17951_v46 = vld [vmem:[#allocation132_spill] sm:$0xff] }
 0x5db   : > { %10402 = vmatmul.mubr.bf16.gmra.mrb[240].mxu0 %v9713_v3  ;;  %v7997_v27 = vmax.f32 %v11663_v48, 0.0  ;;  %v11668_v13 = vadd.f32 %v16283_v26, %v16670_v47  ;;  %v11671_v55 = vadd.f32 %v16301_v10, %v7660_v49  ;;  %v8755_v33 = vcombine.high %v8753_v51, %v8753_v51 }
 0x5dc   : > { %v9784_v7 = vcombine.low %v8786_v9, %v16722_v20  ;;  %v8804_v42 = vcombine.high %v8796_v23, %v8796_v23  ;;  %v11666_v40 = vadd.f32 %v11665_v35, %v17950_v59  ;;  %v11276_v11 = vcombine.high %v16691_v32, %v16702_v53 }
 0x5dd   : > { %v11254_v39 = vpack.c.bf16 %v7997_v27, %v7996_v60  ;;  %v11669_v14 = vadd.f32 %v11668_v13, %v17951_v46  ;;  %v11672_v62 = vadd.f32 %v11671_v55, %v17952_v37  ;;  %v9783_v5 = vcombine.low %v8776_v28, %v8784_v0 }
 0x5de   : > { %v8826_v63 = vrot.slane %v8804_v42, %v16024_v57  ;;  %v7998_v26 = vmax.f32 %v11666_v40, 0.0  ;;  %v9718_v10 = vcombine.low %v16688_v24, %v8735_v4  ;;  %v9725_v22 = vrot.slane %v11275_v44, %v16024_v57 }
 0x5df   : > { %v8803_v47 = vrot.slane %v11254_v39, %v16024_v57  ;;  %v7999_v49 = vmax.f32 %v11669_v14, 0.0  ;;  %v9732_v32 = vrot.slane %v16674_v6, %v16024_v57  ;;  %v8783_v53 = vrot.slane %v8755_v33, %v16024_v57 }
 0x5e0   : > { %v8835_v36 = vcombine.high %v8826_v63, %v8826_v63  ;;  %v9739_v19 = vrot.slane %v16677_v18, %v16024_v57  ;;  %v9746_v45 = vrot.slane %v9718_v10, %v16024_v57  ;;  %v11674_v16 = vadd.f32 %v17953_v15, %v16680_v41 }
 0x5e1   : > { %v8805_v24 = vcombine.high %v8803_v47, %v8803_v47  ;;  %v8819_v2 = vrot.slane %v8803_v47, %v16024_v57  ;;  %v11255_v8 = vpack.c.bf16 %v7999_v49, %v7998_v26  ;;  %v9748_v43 = vcombine.high %v9725_v22, %v9732_v32 }
 0x5e2   : > { %v9750_v50 = vcombine.high %v9739_v19, %v9746_v45  ;;  %v9747_v44 = vcombine.low %v9725_v22, %v9732_v32  ;;  %v9749_v12 = vcombine.low %v9739_v19, %v9746_v45  ;;  %v8812_v6 = vrot.slane %v8796_v23, %v16024_v57  ;;  %v17955_v32 = vld [vmem:[#allocation21_spill] sm:$0xff]  ;;  %v17957_v45 = vld [vmem:[#allocation135_spill] sm:$0xff] }
 0x5e3   : > { %v8833_v61 = vrot.slane %v8805_v24, %v16024_v57  ;;  %v8834_v31 = vcombine.high %v8819_v2, %v8819_v2  ;;  %v9849_v17 = vcombine.low %v8835_v36, %v8819_v2  ;;  %v8000_v18 = vmax.f32 %v11672_v62, 0.0  ;;  %v17958_v24 = vld [vmem:[#allocation81_spill] sm:$0xff] }
 0x5e4   : > { %v9764_v1 = vrot.slane %v9748_v43, %v16024_v57  ;;  %v9778_v29 = vrot.slane %v9750_v50, %v16024_v57  ;;  %v11675_v25 = vadd.f32 %v11674_v16, %v17954_v34  ;;  %v11277_v51 = vcombine.high %v16722_v20, %v8783_v53  ;;  %v17956_v53 = vld [vmem:[#allocation80_spill] sm:$0xff] }
 0x5e5   : > { %v9757_v58 = vrot.slane %v9747_v44, %v16024_v57  ;;  %v9771_v41 = vrot.slane %v9749_v12, %v16024_v57  ;;  %v9791_v56 = vrot.slane %v9781_v54, %v16024_v57  ;;  %v9848_v52 = vcombine.low %v8812_v6, %v8826_v63 }
 0x5e6   : > { %v9780_v4 = vcombine.low %v9764_v1, %v9778_v29  ;;  %v8001_v28 = vmax.f32 %v11675_v25, 0.0  ;;  %v9798_v21 = vrot.slane %v11276_v11, %v16024_v57  ;;  %v9805_v0 = vrot.slane %v9783_v5, %v16024_v57 }
 0x5e7   : > { %v9779_v30 = vcombine.low %v9757_v58, %v9771_v41  ;;  %v9812_v3 = vrot.slane %v9784_v7, %v16024_v57  ;;  %v9850_v60 = vcombine.low %v8833_v61, %v8834_v31  ;;  %v8844_v9 = vrot.slane %v11255_v8, %v16024_v57  ;;  %v17959_v8 = vld [vmem:[#allocation24_spill] sm:$0xff]  ;;  %v17960_v61 = vld [vmem:[#allocation82_spill] sm:$0xff]  ;;  %v17961_v58 = vld [vmem:[#allocation83_spill] sm:$0xff] }
 0x5e8   : > { %10409 = vmatprep.mubr.bf16.mxu0 %v9780_v4  ;;  %v11256_v38 = vpack.c.bf16 %v8001_v28, %v8000_v18  ;;  %v9814_v48 = vcombine.high %v9791_v56, %v9798_v21  ;;  %v9813_v20 = vcombine.low %v9791_v56, %v9798_v21  ;;  %v9857_v13 = vrot.slane %v11277_v51, %v16024_v57  ;;  %v17962_v56 = vld [vmem:[#allocation84_spill] sm:$0xff]  ;;  %v17963_v21 = vld [vmem:[#allocation85_spill] sm:$0xff] }
 0x5e9   : > { %10410 = vmatmul.mubr.bf16.gmra.mrb[244].mxu0 %v9779_v30  ;;  %v9816_v23 = vcombine.high %v9805_v0, %v9812_v3  ;;  %v9815_v35 = vcombine.low %v9805_v0, %v9812_v3  ;;  %v9864_v55 = vrot.slane %v9848_v52, %v16024_v57  ;;  %v9871_v42 = vrot.slane %v9849_v17, %v16024_v57 }
 0x5ea   : > { %v9830_v54 = vrot.slane %v9814_v48, %v16024_v57  ;;  %v9823_v27 = vrot.slane %v9813_v20, %v16024_v57  ;;  %v9878_v59 = vrot.slane %v9850_v60, %v16024_v57  ;;  %v8852_v62 = vcombine.high %v8844_v9, %v8844_v9  ;;  %v17965_v20 = vld [vmem:[#allocation86_spill] sm:$0xff] }
 0x5eb   : > { %v9844_v33 = vrot.slane %v9816_v23, %v16024_v57  ;;  %v9837_v7 = vrot.slane %v9815_v35, %v16024_v57  ;;  %v9880_v40 = vcombine.high %v9857_v13, %v9864_v55  ;;  %v9879_v11 = vcombine.low %v9857_v13, %v9864_v55  ;;  %v17967_v13 = vld [vmem:[#allocation34_spill] sm:$0xff] }
 0x5ec   : > { %v9882_v14 = vcombine.high %v9871_v42, %v9878_v59  ;;  %v9881_v37 = vcombine.low %v9871_v42, %v9878_v59  ;;  %v8851_v47 = vrot.slane %v11256_v38, %v16024_v57  ;;  %v11676_v36 = vadd.f32 %v17956_v53, %v17955_v32  ;;  %v17964_v38 = vld [vmem:[#allocation33_spill] sm:$0xff]  ;;  %v17968_v42 = vld [vmem:[#allocation88_spill] sm:$0xff] }
 0x5ed   : > { %v9846_v39 = vcombine.low %v9830_v54, %v9844_v33  ;;  %v9845_v46 = vcombine.low %v9823_v27, %v9837_v7  ;;  %v9896_v5 = vrot.slane %v9880_v40, %v16024_v57  ;;  %v9889_v26 = vrot.slane %v9879_v11, %v16024_v57  ;;  %v17966_v54 = vld [vmem:[#allocation87_spill] sm:$0xff]  ;;  %v17969_v40 = vld [vmem:[#allocation72_spill] sm:$0xff] }
 0x5ee   : > { %v9910_v63 = vrot.slane %v9882_v14, %v16024_v57  ;;  %v9903_v10 = vrot.slane %v9881_v37, %v16024_v57  ;;  %v8874_v19 = vrot.slane %v8852_v62, %v16024_v57  ;;  %v11678_v2 = vadd.f32 %v17958_v24, %v17957_v45  ;;  %v17970_v37 = vld [vmem:[#allocation89_spill] sm:$0xff] }
 0x5ef   : > { %10417 = vmatprep.mubr.bf16.mxu0 %v9846_v39  ;;  %v11680_v43 = vadd.f32 %v17959_v8, %v17955_v32  ;;  %v8860_v15 = vrot.slane %v8844_v9, %v16024_v57  ;;  %v8853_v16 = vcombine.high %v8851_v47, %v8851_v47  ;;  %v8867_v44 = vrot.slane %v8851_v47, %v16024_v57 }
 0x5f0   : > { %v9912_v49 = vcombine.low %v9896_v5, %v9910_v63  ;;  %v9911_v22 = vcombine.low %v9889_v26, %v9903_v10  ;;  %v11682_v31 = vadd.f32 %v17960_v61, %v17957_v45  ;;  %v11684_v41 = vadd.f32 %v17961_v58, %v17955_v32 }
 0x5f1   : > { %10418 = vmatmul.mubr.bf16.gmra.mrb[248].mxu0 %v9845_v46  ;;  %v9913_v1 = vcombine.low %v8860_v15, %v8874_v19  ;;  %v11278_v29 = vcombine.high %v8860_v15, %v8874_v19  ;;  %v11686_v52 = vadd.f32 %v17962_v56, %v17957_v45  ;;  %v11688_v30 = vadd.f32 %v17963_v21, %v17955_v32 }
 0x5f2   : > { %10425 = vmatprep.mubr.bf16.mxu0 %v9912_v49  ;;  %v8881_v0 = vrot.slane %v8853_v16, %v16024_v57  ;;  %v8883_v3 = vcombine.high %v8867_v44, %v8867_v44  ;;  %v11690_v48 = vadd.f32 %v17964_v38, %v17957_v45  ;;  %v11692_v9 = vadd.f32 %v17965_v20, %v17955_v32 }
 0x5f3   : > { %v7899_v50 = vpop.f32.mrb[64].mxu1  ;;  %v11694_v27 = vadd.f32 %v17966_v54, %v17957_v45  ;;  %v11696_v55 = vadd.f32 %v17967_v13, %v17955_v32  ;;  %v9923_v33 = vrot.slane %v9913_v1, %v16024_v57  ;;  %v9930_v7 = vrot.slane %v11278_v29, %v16024_v57 }
 0x5f4   : > { %v11677_v12 = vadd.f32 %v11676_v36, %v7899_v50  ;;  %v7901_v6 = vpop.f32.mrb[65].mxu1  ;;  %v11698_v59 = vadd.f32 %v17968_v42, %v17957_v45  ;;  %v16812_v11 = vadd.f32 %v17969_v40, %v17955_v32  ;;  %v16817_v62 = vadd.f32 %v17970_v37, %v17957_v45  ;;  %v17971_v50 = vld [vmem:[#allocation90_spill] sm:$0xff] }
 0x5f5   : > { %v11679_v17 = vadd.f32 %v11678_v2, %v7901_v6  ;;  %v7903_v18 = vpop.f32.mrb[66].mxu1  ;;  %v9915_v5 = vcombine.low %v8881_v0, %v8883_v3  ;;  %v8885_v63 = vcombine.high %v8881_v0, %v8881_v0  ;;  %v9945_v8 = vcombine.low %v9923_v33, %v9930_v7  ;;  %v17972_v6 = vld [vmem:[#allocation39_spill] sm:$0xff] }
 0x5f6   : > { %v8002_v34 = vmax.f32 %v11677_v12, 0.0  ;;  %v11681_v25 = vadd.f32 %v11680_v43, %v7903_v18  ;;  %v7905_v51 = vpop.f32.mrb[67].mxu1  ;;  %v9946_v43 = vcombine.high %v9923_v33, %v9930_v7  ;;  %v16823_v15 = vadd.f32 %v17971_v50, %v17955_v32 }
 0x5f7   : > { %v8003_v4 = vmax.f32 %v11679_v17, 0.0  ;;  %v11683_v28 = vadd.f32 %v11682_v31, %v7905_v51  ;;  %v16828_v61 = vadd.f32 %v17972_v6, %v17957_v45  ;;  %v9955_v58 = vrot.slane %v9945_v8, %v16024_v57 }
 0x5f8   : > { %v8004_v60 = vmax.f32 %v11681_v25, 0.0 }
 0x5f9   : > { %10426 = vmatmul.mubr.bf16.gmra.mrb[252].mxu0 %v9911_v22  ;;  %v11257_v23 = vpack.c.bf16 %v8003_v4, %v8002_v34  ;;  %v8005_v35 = vmax.f32 %v11683_v28, 0.0  ;;  %v9937_v34 = vrot.slane %v9915_v5, %v16024_v57 }
 0x5fb   : > { %v8894_v39 = vrot.slane %v11257_v23, %v16024_v57  ;;  %v11258_v46 = vpack.c.bf16 %v8005_v35, %v8004_v60  ;;  %v7909_v14 = vpop.f32.mrb[68].mxu1 }
 0x5fc   : > { %v11685_v26 = vadd.f32 %v11684_v41, %v7909_v14  ;;  %v7911_v10 = vpop.f32.mrb[69].mxu1  ;;  %v9962_v41 = vrot.slane %v9946_v43, %v16024_v57 }
 0x5fd   : > { %v8902_v47 = vcombine.high %v8894_v39, %v8894_v39  ;;  %v8910_v49 = vrot.slane %v8894_v39, %v16024_v57  ;;  %v8901_v22 = vrot.slane %v11258_v46, %v16024_v57  ;;  %v11687_v53 = vadd.f32 %v11686_v52, %v7911_v10  ;;  %v7913_v36 = vpop.f32.mrb[70].mxu1 }
 0x5fe   : > { %v8006_v19 = vmax.f32 %v11685_v26, 0.0  ;;  %v11689_v24 = vadd.f32 %v11688_v30, %v7913_v36  ;;  %v7915_v2 = vpop.f32.mrb[71].mxu1 }
 0x5ff   : > { %v8924_v16 = vrot.slane %v8902_v47, %v16024_v57  ;;  %v9916_v44 = vcombine.low %v8885_v63, %v8910_v49  ;;  %v8903_v12 = vcombine.high %v8901_v22, %v8901_v22  ;;  %v8007_v31 = vmax.f32 %v11687_v53, 0.0 }
 0x600   : > { %v8008_v17 = vmax.f32 %v11689_v24, 0.0  ;;  %v11691_v18 = vadd.f32 %v11690_v48, %v7915_v2  ;;  %v8917_v1 = vrot.slane %v8901_v22, %v16024_v57 }
 0x601   : > { %v8931_v29 = vrot.slane %v8903_v12, %v16024_v57  ;;  %v9944_v32 = vrot.slane %v9916_v44, %v16024_v57  ;;  %v11259_v25 = vpack.c.bf16 %v8007_v31, %v8006_v19  ;;  %v11279_v56 = vcombine.high %v8910_v49, %v8924_v16 }
 0x602   : > { %v8009_v51 = vmax.f32 %v11691_v18, 0.0 }
 0x603   : > { %v9980_v45 = vcombine.low %v8917_v1, %v8931_v29  ;;  %v7919_v52 = vpop.f32.mrb[72].mxu1  ;;  %v9947_v4 = vcombine.low %v9937_v34, %v9944_v32  ;;  %v9948_v28 = vcombine.high %v9937_v34, %v9944_v32  ;;  %v8934_v21 = vcombine.high %v8931_v29, %v8931_v29 }
 0x604   : > { %v8943_v30 = vrot.slane %v11259_v25, %v16024_v57  ;;  %v11260_v0 = vpack.c.bf16 %v8009_v51, %v8008_v17  ;;  %v11693_v3 = vadd.f32 %v11692_v9, %v7919_v52  ;;  %v7921_v60 = vpop.f32.mrb[73].mxu1  ;;  %v9989_v47 = vrot.slane %v11279_v56, %v16024_v57 }
 0x605   : > { %v11695_v38 = vadd.f32 %v11694_v27, %v7921_v60  ;;  %v7923_v48 = vpop.f32.mrb[74].mxu1  ;;  %v9969_v20 = vrot.slane %v9947_v4, %v16024_v57  ;;  %v9976_v23 = vrot.slane %v9948_v28, %v16024_v57  ;;  %v9996_v35 = vrot.slane %v9980_v45, %v16024_v57 }
 0x606   : > { %v8951_v54 = vcombine.high %v8943_v30, %v8943_v30  ;;  %v8959_v13 = vrot.slane %v8943_v30, %v16024_v57  ;;  %v8950_v33 = vrot.slane %v11260_v0, %v16024_v57  ;;  %v8010_v7 = vmax.f32 %v11693_v3, 0.0  ;;  %v7925_v42 = vpop.f32.mrb[75].mxu1 }
 0x607   : > { %v8011_v40 = vmax.f32 %v11695_v38, 0.0  ;;  %v11697_v39 = vadd.f32 %v11696_v55, %v7923_v48  ;;  %v11699_v46 = vadd.f32 %v11698_v59, %v7925_v42  ;;  %v9977_v9 = vcombine.low %v9955_v58, %v9969_v20 }
 0x608   : > { %v8973_v27 = vrot.slane %v8951_v54, %v16024_v57  ;;  %v8981_v14 = vcombine.high %v8959_v13, %v8959_v13  ;;  %v9981_v37 = vcombine.low %v8934_v21, %v8959_v13  ;;  %v8952_v5 = vcombine.high %v8950_v33, %v8950_v33 }
 0x609   : > { %v11261_v63 = vpack.c.bf16 %v8011_v40, %v8010_v7  ;;  %v8012_v26 = vmax.f32 %v11697_v39, 0.0  ;;  %v8013_v10 = vmax.f32 %v11699_v46, 0.0  ;;  %v8966_v22 = vrot.slane %v8950_v33, %v16024_v57 }
 0x60a   : > { %v9982_v49 = vcombine.low %v8973_v27, %v8981_v14  ;;  %v8980_v53 = vrot.slane %v8952_v5, %v16024_v57  ;;  %v9978_v36 = vcombine.low %v9962_v41, %v9976_v23  ;;  %v10011_v24 = vcombine.low %v9989_v47, %v9996_v35 }
 0x60b   : > { %v8992_v55 = vrot.slane %v11261_v63, %v16024_v57  ;;  %v11262_v59 = vpack.c.bf16 %v8013_v10, %v8012_v26  ;;  %v7929_v19 = vpop.f32.mrb[76].mxu1  ;;  %v10012_v2 = vcombine.high %v9989_v47, %v9996_v35  ;;  %v10003_v16 = vrot.slane %v9981_v37, %v16024_v57 }
 0x60c   : > { %v10045_v8 = vcombine.low %v8966_v22, %v8980_v53  ;;  %10433 = vmatprep.mubr.bf16.mxu0 %v9978_v36  ;;  %v11701_v43 = vadd.f32 %v16812_v11, %v7929_v19  ;;  %v7931_v50 = vpop.f32.mrb[77].mxu1  ;;  %v10010_v44 = vrot.slane %v9982_v49, %v16024_v57  ;;  %v11280_v25 = vcombine.high %v8966_v22, %v8980_v53 }
 0x60d   : > { %v9000_v12 = vcombine.high %v8992_v55, %v8992_v55  ;;  %v9008_v6 = vrot.slane %v8992_v55, %v16024_v57  ;;  %v8999_v31 = vrot.slane %v11262_v59, %v16024_v57  ;;  %10434 = vmatmul.mubr.bf16.gmra.mrb[0].mxu0 %v9977_v9  ;;  %v11703_v17 = vadd.f32 %v16817_v62, %v7931_v50  ;;  %v7933_v18 = vpop.f32.mrb[78].mxu1 }
 0x60e   : > { %v8014_v1 = vmax.f32 %v11701_v43, 0.0  ;;  %v11705_v29 = vadd.f32 %v16823_v15, %v7933_v18  ;;  %v7935_v34 = vpop.f32.mrb[79].mxu1  ;;  %v10013_v32 = vcombine.low %v10003_v16, %v10010_v44  ;;  %v10014_v11 = vcombine.high %v10003_v16, %v10010_v44 }
 0x60f   : > { %v9022_v51 = vrot.slane %v9000_v12, %v16024_v57  ;;  %v9030_v58 = vcombine.high %v9008_v6, %v9008_v6  ;;  %v9001_v41 = vcombine.high %v8999_v31, %v8999_v31  ;;  %v9015_v56 = vrot.slane %v8999_v31, %v16024_v57 }
 0x610   : > { %v8015_v45 = vmax.f32 %v11703_v17, 0.0  ;;  %v8016_v52 = vmax.f32 %v11705_v29, 0.0  ;;  %v11707_v4 = vadd.f32 %v16828_v61, %v7935_v34  ;;  %v10021_v21 = vrot.slane %v10011_v24, %v16024_v57 }
 0x611   : > { %v10047_v28 = vcombine.low %v9022_v51, %v9030_v58  ;;  %v9032_v62 = vcombine.high %v9022_v51, %v9022_v51  ;;  %v10028_v15 = vrot.slane %v10012_v2, %v16024_v57  ;;  %v10035_v3 = vrot.slane %v10013_v32, %v16024_v57  ;;  %v16884_v51 = vld [vmem:[#allocation14] ss:$0 sm:$0xff] }
 0x612   : > { %v11263_v30 = vpack.c.bf16 %v8015_v45, %v8014_v1  ;;  %v8017_v0 = vmax.f32 %v11707_v4, 0.0  ;;  %v10042_v60 = vrot.slane %v10014_v11, %v16024_v57  ;;  %v9029_v38 = vrot.slane %v9001_v41, %v16024_v57 }
 0x613   : > { %v10048_v48 = vcombine.low %v9032_v62, %v9015_v56  ;;  %v10055_v20 = vrot.slane %v10045_v8, %v16024_v57  ;;  %v10062_v23 = vrot.slane %v11280_v25, %v16024_v57  ;;  %v10043_v54 = vcombine.low %v10021_v21, %v10035_v3 }
 0x614   : > { %v9042_v61 = vrot.slane %v11263_v30, %v16024_v57  ;;  %v11264_v35 = vpack.c.bf16 %v8017_v0, %v8016_v52  ;;  %v10044_v13 = vcombine.low %v10028_v15, %v10042_v60  ;;  %v10069_v33 = vrot.slane %v10047_v28, %v16024_v57  ;;  %v12946_v28 = vld [vmem:[%s13582_s15] sm:$0xff]  ;;  %v12947_v15 = vld [vmem:[%s13582_s15 + $0x8] sm:$0xff] }
 0x615   : > { %v10076_v7 = vrot.slane %v10048_v48, %v16024_v57  ;;  %v10077_v42 = vcombine.low %v10055_v20, %v10062_v23  ;;  %v10078_v40 = vcombine.high %v10055_v20, %v10062_v23  ;;  %v11281_v9 = vcombine.high %v9015_v56, %v9029_v38 }
 0x616   : > { %v9050_v39 = vcombine.high %v9042_v61, %v9042_v61  ;;  %v9049_v46 = vrot.slane %v11264_v35, %v16024_v57  ;;  %10441 = vmatprep.mubr.bf16.mxu0 %v10044_v13  ;;  %v9058_v37 = vrot.slane %v9042_v61, %v16024_v57  ;;  %v12948_v35 = vld [vmem:[%s13582_s15 + $0x10] sm:$0xff] }
 0x617   : > { %10442 = vmatmul.mubr.bf16.gmra.mrb[4].mxu0 %v10043_v54  ;;  %v10079_v27 = vcombine.low %v10069_v33, %v10076_v7  ;;  %v10080_v14 = vcombine.high %v10069_v33, %v10076_v7  ;;  %v10087_v10 = vrot.slane %v10077_v42, %v16024_v57  ;;  %v10094_v47 = vrot.slane %v10078_v40, %v16024_v57  ;;  %v12949_v7 = vld [vmem:[%s13582_s15 + $0x18] sm:$0xff] }
 0x618   : > { %v9072_v5 = vrot.slane %v9050_v39, %v16024_v57  ;;  %v9051_v63 = vcombine.high %v9049_v46, %v9049_v46  ;;  %v9065_v26 = vrot.slane %v9049_v46, %v16024_v57  ;;  %v10121_v43 = vrot.slane %v11281_v9, %v16024_v57 }
 0x619   : > { %v10101_v49 = vrot.slane %v10079_v27, %v16024_v57  ;;  %v10108_v22 = vrot.slane %v10080_v14, %v16024_v57 }
 0x61a   : > { %v10112_v53 = vcombine.low %v9058_v37, %v9072_v5  ;;  %v9079_v36 = vrot.slane %v9051_v63, %v16024_v57  ;;  %v9080_v55 = vcombine.high %v9065_v26, %v9065_v26  ;;  %v9081_v59 = vcombine.high %v9072_v5, %v9072_v5  ;;  %v12950_v63 = vld [vmem:[%s13582_s15 + $0x20] sm:$0xff] }
 0x61b   : > { %v10109_v19 = vcombine.low %v10087_v10, %v10101_v49  ;;  %v10110_v24 = vcombine.low %v10094_v47, %v10108_v22  ;;  %v12951_v49 = vld [vmem:[%s13582_s15 + $0x28] sm:$0xff] }
 0x61c   : > { %v10113_v2 = vcombine.low %v9081_v59, %v9065_v26  ;;  %v10114_v8 = vcombine.low %v9079_v36, %v9080_v55  ;;  %v10128_v50 = vrot.slane %v10112_v53, %v16024_v57 }
 0x61d   : > { %10449 = vmatprep.mubr.bf16.mxu0 %v10110_v24 }
 0x61e   : > { %v10135_v16 = vrot.slane %v10113_v2, %v16024_v57  ;;  %v10142_v44 = vrot.slane %v10114_v8, %v16024_v57  ;;  %v10143_v12 = vcombine.low %v10121_v43, %v10128_v50  ;;  %v10144_v6 = vcombine.high %v10121_v43, %v10128_v50  ;;  %v12952_v43 = vld [vmem:[%s13582_s15 + $0x30] sm:$0xff] }
 0x61f   : > { %10450 = vmatmul.mubr.bf16.gmra.mrb[8].mxu0 %v10109_v19 }
 0x620   : > { %v10145_v31 = vcombine.low %v10135_v16, %v10142_v44  ;;  %v10146_v17 = vcombine.high %v10135_v16, %v10142_v44  ;;  %v10153_v18 = vrot.slane %v10143_v12, %v16024_v57  ;;  %v10160_v1 = vrot.slane %v10144_v6, %v16024_v57  ;;  %v12953_v12 = vld [vmem:[%s13582_s15 + $0x38] sm:$0xff] }
 0x622   : > { %v10167_v29 = vrot.slane %v10145_v31, %v16024_v57  ;;  %v10174_v34 = vrot.slane %v10146_v17, %v16024_v57 }
 0x624   : > { %v10175_v32 = vcombine.low %v10153_v18, %v10167_v29  ;;  %v10176_v11 = vcombine.low %v10160_v1, %v10174_v34 }
 0x626   : > { %10457 = vmatprep.mubr.bf16.mxu0 %v10176_v11 }
 0x627   : > { %10458 = vmatmul.mubr.bf16.gmra.mrb[12].mxu0 %v10175_v32 }
 0x64d   : > { %v11356_v25 = vpop.f32.mrb[208].mxu0 }
 0x64e   : > { %v11357_v58 = vpop.f32.mrb[209].mxu0 }
 0x64f   : > { %v11358_v41 = vadd.f32 %v11357_v58, %v11356_v25  ;;  %v11359_v56 = vpop.f32.mrb[210].mxu0  ;;  %v12954_v25 = vld [vmem:[%s13582_s15 + $0x40] sm:$0xff] }
 0x650   : > { %v11360_v45 = vpop.f32.mrb[211].mxu0 }
 0x651   : > { %v10340_v52 = vadd.f32 %v11358_v41, %v16884_v51  ;;  %v11361_v4 = vadd.f32 %v11360_v45, %v11359_v56  ;;  %v12955_v45 = vld [vmem:[%s13582_s15 + $0x48] sm:$0xff] }
 0x653   : > { %v10466_v62 = vadd.f32 %v12946_v28, %v10340_v52  ;;  %v10343_v57 = vadd.f32 %v11361_v4, %v16884_v51 }
 0x655   : > { %v10498_v21 = vmax.f32 %v10466_v62, 0.0  ;;  %v10467_v30 = vadd.f32 %v12947_v15, %v10343_v57 }
 0x657   : > { %10530 = vst [vmem:[%s16892_s8] sm:$0xff] %v10498_v21  ;;  %v10499_v0 = vmax.f32 %v10467_v30, 0.0 }
 0x659   : > { %10531 = vst [vmem:[%s16892_s8 + $0x8] sm:$0xff] %v10499_v0 }
 0x65d   : > { %v11362_v3 = vpop.f32.mrb[212].mxu0 }
 0x65e   : > { %v11363_v60 = vpop.f32.mrb[213].mxu0 }
 0x65f   : > { %v11364_v38 = vadd.f32 %v11363_v60, %v11362_v3  ;;  %v11365_v48 = vpop.f32.mrb[214].mxu0  ;;  %v12956_v3 = vld [vmem:[%s13582_s15 + $0x50] sm:$0xff] }
 0x660   : > { %v11366_v20 = vpop.f32.mrb[215].mxu0 }
 0x661   : > { %v10348_v23 = vadd.f32 %v11364_v38, %v16884_v51  ;;  %v11367_v61 = vadd.f32 %v11366_v20, %v11365_v48  ;;  %v12957_v20 = vld [vmem:[%s13582_s15 + $0x58] sm:$0xff] }
 0x663   : > { %v10468_v54 = vadd.f32 %v12948_v35, %v10348_v23  ;;  %v10351_v13 = vadd.f32 %v11367_v61, %v16884_v51 }
 0x665   : > { %v10500_v33 = vmax.f32 %v10468_v54, 0.0  ;;  %v10469_v42 = vadd.f32 %v12949_v7, %v10351_v13 }
 0x667   : > { %10532 = vst [vmem:[%s16892_s8 + $0x10] sm:$0xff] %v10500_v33  ;;  %v10501_v40 = vmax.f32 %v10469_v42, 0.0 }
 0x669   : > { %v11368_v39 = vpop.f32.mrb[216].mxu0  ;;  %10533 = vst [vmem:[%s16892_s8 + $0x18] sm:$0xff] %v10501_v40 }
 0x66a   : > { %v11369_v46 = vpop.f32.mrb[217].mxu0 }
 0x66b   : > { %v11370_v9 = vadd.f32 %v11369_v46, %v11368_v39  ;;  %v11371_v27 = vpop.f32.mrb[218].mxu0  ;;  %v12958_v39 = vld [vmem:[%s13582_s15 + $0x60] sm:$0xff] }
 0x66c   : > { %v11372_v14 = vpop.f32.mrb[219].mxu0 }
 0x66d   : > { %v10356_v37 = vadd.f32 %v11370_v9, %v16884_v51  ;;  %v11373_v5 = vadd.f32 %v11372_v14, %v11371_v27  ;;  %v12959_v14 = vld [vmem:[%s13582_s15 + $0x68] sm:$0xff] }
 0x66f   : > { %v10470_v26 = vadd.f32 %v12950_v63, %v10356_v37  ;;  %v10359_v10 = vadd.f32 %v11373_v5, %v16884_v51 }
 0x671   : > { %v10502_v47 = vmax.f32 %v10470_v26, 0.0  ;;  %v10471_v22 = vadd.f32 %v12951_v49, %v10359_v10 }
 0x673   : > { %10534 = vst [vmem:[%s16892_s8 + $0x20] sm:$0xff] %v10502_v47  ;;  %v10503_v53 = vmax.f32 %v10471_v22, 0.0  ;;  %v11374_v36 = vpop.f32.mrb[220].mxu0 }
 0x674   : > { %v11375_v55 = vpop.f32.mrb[221].mxu0 }
 0x675   : > { %10535 = vst [vmem:[%s16892_s8 + $0x28] sm:$0xff] %v10503_v53  ;;  %v11376_v59 = vadd.f32 %v11375_v55, %v11374_v36  ;;  %v11377_v19 = vpop.f32.mrb[222].mxu0  ;;  %v12960_v36 = vld [vmem:[%s13582_s15 + $0x70] sm:$0xff] }
 0x676   : > { %v11378_v24 = vpop.f32.mrb[223].mxu0 }
 0x677   : > { %v10364_v2 = vadd.f32 %v11376_v59, %v16884_v51  ;;  %v11379_v8 = vadd.f32 %v11378_v24, %v11377_v19  ;;  %v12961_v24 = vld [vmem:[%s13582_s15 + $0x78] sm:$0xff] }
 0x679   : > { %v10472_v50 = vadd.f32 %v12952_v43, %v10364_v2  ;;  %v10367_v16 = vadd.f32 %v11379_v8, %v16884_v51 }
 0x67b   : > { %v10504_v44 = vmax.f32 %v10472_v50, 0.0  ;;  %v10473_v6 = vadd.f32 %v12953_v12, %v10367_v16 }
 0x67d   : > { %10536 = vst [vmem:[%s16892_s8 + $0x30] sm:$0xff] %v10504_v44  ;;  %v10505_v31 = vmax.f32 %v10473_v6, 0.0 }
 0x67f   : > { %10537 = vst [vmem:[%s16892_s8 + $0x38] sm:$0xff] %v10505_v31  ;;  %v11380_v17 = vpop.f32.mrb[224].mxu0 }
 0x680   : > { %v11381_v18 = vpop.f32.mrb[225].mxu0 }
 0x681   : > { %v11382_v1 = vadd.f32 %v11381_v18, %v11380_v17  ;;  %v11383_v29 = vpop.f32.mrb[226].mxu0  ;;  %v12962_v17 = vld [vmem:[%s13582_s15 + $0x80] sm:$0xff] }
 0x682   : > { %v11384_v34 = vpop.f32.mrb[227].mxu0 }
 0x683   : > { %v10372_v32 = vadd.f32 %v11382_v1, %v16884_v51  ;;  %v11385_v11 = vadd.f32 %v11384_v34, %v11383_v29  ;;  %v12963_v34 = vld [vmem:[%s13582_s15 + $0x88] sm:$0xff] }
 0x685   : > { %v10474_v58 = vadd.f32 %v12954_v25, %v10372_v32  ;;  %v10375_v41 = vadd.f32 %v11385_v11, %v16884_v51 }
 0x687   : > { %v10506_v56 = vmax.f32 %v10474_v58, 0.0  ;;  %v10475_v52 = vadd.f32 %v12955_v45, %v10375_v41 }
 0x689   : > { %10538 = vst [vmem:[%s16892_s8 + $0x40] sm:$0xff] %v10506_v56  ;;  %v10507_v4 = vmax.f32 %v10475_v52, 0.0 }
 0x68b   : > { %10539 = vst [vmem:[%s16892_s8 + $0x48] sm:$0xff] %v10507_v4 }
 0x68c   : > { %v11386_v28 = vpop.f32.mrb[228].mxu0 }
 0x68d   : > { %v11387_v62 = vpop.f32.mrb[229].mxu0 }
 0x68e   : > { %v11388_v57 = vadd.f32 %v11387_v62, %v11386_v28  ;;  %v11389_v21 = vpop.f32.mrb[230].mxu0  ;;  %v12964_v28 = vld [vmem:[%s13582_s15 + $0x90] sm:$0xff] }
 0x68f   : > { %v11390_v15 = vpop.f32.mrb[231].mxu0 }
 0x690   : > { %v10380_v30 = vadd.f32 %v11388_v57, %v16884_v51  ;;  %v11391_v0 = vadd.f32 %v11390_v15, %v11389_v21  ;;  %v12965_v15 = vld [vmem:[%s13582_s15 + $0x98] sm:$0xff] }
 0x692   : > { %v10476_v60 = vadd.f32 %v12956_v3, %v10380_v30  ;;  %v10383_v38 = vadd.f32 %v11391_v0, %v16884_v51 }
 0x694   : > { %v10508_v48 = vmax.f32 %v10476_v60, 0.0  ;;  %v10477_v23 = vadd.f32 %v12957_v20, %v10383_v38 }
 0x696   : > { %10540 = vst [vmem:[%s16892_s8 + $0x50] sm:$0xff] %v10508_v48  ;;  %v10509_v61 = vmax.f32 %v10477_v23, 0.0 }
 0x697   : > { %v11392_v35 = vpop.f32.mrb[232].mxu0 }
 0x698   : > { %v11393_v54 = vpop.f32.mrb[233].mxu0  ;;  %10541 = vst [vmem:[%s16892_s8 + $0x58] sm:$0xff] %v10509_v61 }
 0x699   : > { %v11394_v13 = vadd.f32 %v11393_v54, %v11392_v35  ;;  %v11395_v33 = vpop.f32.mrb[234].mxu0  ;;  %v12966_v35 = vld [vmem:[%s13582_s15 + $0xa0] sm:$0xff] }
 0x69a   : > { %v11396_v7 = vpop.f32.mrb[235].mxu0 }
 0x69b   : > { %v10388_v42 = vadd.f32 %v11394_v13, %v16884_v51  ;;  %v11397_v40 = vadd.f32 %v11396_v7, %v11395_v33  ;;  %v12967_v7 = vld [vmem:[%s13582_s15 + $0xa8] sm:$0xff] }
 0x69d   : > { %v10478_v46 = vadd.f32 %v12958_v39, %v10388_v42  ;;  %v10391_v9 = vadd.f32 %v11397_v40, %v16884_v51 }
 0x69f   : > { %v10510_v27 = vmax.f32 %v10478_v46, 0.0  ;;  %v10479_v37 = vadd.f32 %v12959_v14, %v10391_v9 }
 0x6a1   : > { %10542 = vst [vmem:[%s16892_s8 + $0x60] sm:$0xff] %v10510_v27  ;;  %v10511_v5 = vmax.f32 %v10479_v37, 0.0 }
 0x6a3   : > { %10543 = vst [vmem:[%s16892_s8 + $0x68] sm:$0xff] %v10511_v5 }
 0x6a4   : > { %v11398_v63 = vpop.f32.mrb[236].mxu0 }
 0x6a5   : > { %v11399_v26 = vpop.f32.mrb[237].mxu0 }
 0x6a6   : > { %v11400_v10 = vadd.f32 %v11399_v26, %v11398_v63  ;;  %v11401_v47 = vpop.f32.mrb[238].mxu0  ;;  %v12968_v63 = vld [vmem:[%s13582_s15 + $0xb0] sm:$0xff] }
 0x6a7   : > { %v11402_v49 = vpop.f32.mrb[239].mxu0 }
 0x6a8   : > { %v10396_v22 = vadd.f32 %v11400_v10, %v16884_v51  ;;  %v11403_v53 = vadd.f32 %v11402_v49, %v11401_v47  ;;  %v12969_v49 = vld [vmem:[%s13582_s15 + $0xb8] sm:$0xff] }
 0x6aa   : > { %v10480_v55 = vadd.f32 %v12960_v36, %v10396_v22  ;;  %v10399_v59 = vadd.f32 %v11403_v53, %v16884_v51 }
 0x6ac   : > { %v10512_v19 = vmax.f32 %v10480_v55, 0.0  ;;  %v10481_v2 = vadd.f32 %v12961_v24, %v10399_v59 }
 0x6ae   : > { %10544 = vst [vmem:[%s16892_s8 + $0x70] sm:$0xff] %v10512_v19  ;;  %v10513_v8 = vmax.f32 %v10481_v2, 0.0  ;;  %v11404_v43 = vpop.f32.mrb[240].mxu0 }
 0x6af   : > { %v11405_v50 = vpop.f32.mrb[241].mxu0 }
 0x6b0   : > { %10545 = vst [vmem:[%s16892_s8 + $0x78] sm:$0xff] %v10513_v8  ;;  %v11406_v16 = vadd.f32 %v11405_v50, %v11404_v43  ;;  %v11407_v44 = vpop.f32.mrb[242].mxu0  ;;  %v12970_v43 = vld [vmem:[%s13582_s15 + $0xc0] sm:$0xff] }
 0x6b1   : > { %v11408_v12 = vpop.f32.mrb[243].mxu0 }
 0x6b2   : > { %v10404_v6 = vadd.f32 %v11406_v16, %v16884_v51  ;;  %v11409_v31 = vadd.f32 %v11408_v12, %v11407_v44  ;;  %v12971_v12 = vld [vmem:[%s13582_s15 + $0xc8] sm:$0xff] }
 0x6b4   : > { %v10482_v18 = vadd.f32 %v12962_v17, %v10404_v6  ;;  %v10407_v1 = vadd.f32 %v11409_v31, %v16884_v51 }
 0x6b6   : > { %v10514_v29 = vmax.f32 %v10482_v18, 0.0  ;;  %v10483_v32 = vadd.f32 %v12963_v34, %v10407_v1 }
 0x6b8   : > { %10546 = vst [vmem:[%s16892_s8 + $0x80] sm:$0xff] %v10514_v29  ;;  %v10515_v11 = vmax.f32 %v10483_v32, 0.0 }
 0x6ba   : > { %10547 = vst [vmem:[%s16892_s8 + $0x88] sm:$0xff] %v10515_v11 }
 0x6bc   : > { %v11410_v25 = vpop.f32.mrb[244].mxu0 }
 0x6bd   : > { %v11411_v58 = vpop.f32.mrb[245].mxu0 }
 0x6be   : > { %v11412_v41 = vadd.f32 %v11411_v58, %v11410_v25  ;;  %v11413_v56 = vpop.f32.mrb[246].mxu0  ;;  %v12972_v25 = vld [vmem:[%s13582_s15 + $0xd0] sm:$0xff] }
 0x6bf   : > { %v11414_v45 = vpop.f32.mrb[247].mxu0 }
 0x6c0   : > { %v10412_v52 = vadd.f32 %v11412_v41, %v16884_v51  ;;  %v11415_v4 = vadd.f32 %v11414_v45, %v11413_v56  ;;  %v12973_v45 = vld [vmem:[%s13582_s15 + $0xd8] sm:$0xff] }
 0x6c2   : > { %v10484_v62 = vadd.f32 %v12964_v28, %v10412_v52  ;;  %v10415_v57 = vadd.f32 %v11415_v4, %v16884_v51 }
 0x6c4   : > { %v10516_v21 = vmax.f32 %v10484_v62, 0.0  ;;  %v10485_v30 = vadd.f32 %v12965_v15, %v10415_v57  ;;  %v11416_v0 = vpop.f32.mrb[248].mxu0 }
 0x6c5   : > { %v11417_v3 = vpop.f32.mrb[249].mxu0 }
 0x6c6   : > { %10548 = vst [vmem:[%s16892_s8 + $0x90] sm:$0xff] %v10516_v21  ;;  %v10517_v60 = vmax.f32 %v10485_v30, 0.0  ;;  %v11418_v38 = vadd.f32 %v11417_v3, %v11416_v0  ;;  %v11419_v48 = vpop.f32.mrb[250].mxu0  ;;  %v12974_v3 = vld [vmem:[%s13582_s15 + $0xe0] sm:$0xff] }
 0x6c7   : > { %v11420_v20 = vpop.f32.mrb[251].mxu0 }
 0x6c8   : > { %10549 = vst [vmem:[%s16892_s8 + $0x98] sm:$0xff] %v10517_v60  ;;  %v10420_v23 = vadd.f32 %v11418_v38, %v16884_v51  ;;  %v11421_v61 = vadd.f32 %v11420_v20, %v11419_v48  ;;  %v12975_v20 = vld [vmem:[%s13582_s15 + $0xe8] sm:$0xff] }
 0x6ca   : > { %v10486_v54 = vadd.f32 %v12966_v35, %v10420_v23  ;;  %v10423_v13 = vadd.f32 %v11421_v61, %v16884_v51 }
 0x6cc   : > { %v10518_v33 = vmax.f32 %v10486_v54, 0.0  ;;  %v10487_v42 = vadd.f32 %v12967_v7, %v10423_v13  ;;  %v11422_v40 = vpop.f32.mrb[252].mxu0 }
 0x6cd   : > { %v11423_v39 = vpop.f32.mrb[253].mxu0 }
 0x6ce   : > { %10550 = vst [vmem:[%s16892_s8 + $0xa0] sm:$0xff] %v10518_v33  ;;  %v10519_v46 = vmax.f32 %v10487_v42, 0.0  ;;  %v11424_v9 = vadd.f32 %v11423_v39, %v11422_v40  ;;  %v11425_v27 = vpop.f32.mrb[254].mxu0  ;;  %v12976_v39 = vld [vmem:[%s13582_s15 + $0xf0] sm:$0xff] }
 0x6cf   : > { %v11426_v14 = vpop.f32.mrb[255].mxu0 }
 0x6d0   : > { %10551 = vst [vmem:[%s16892_s8 + $0xa8] sm:$0xff] %v10519_v46  ;;  %v10428_v37 = vadd.f32 %v11424_v9, %v16884_v51  ;;  %v11427_v5 = vadd.f32 %v11426_v14, %v11425_v27  ;;  %v12977_v14 = vld [vmem:[%s13582_s15 + $0xf8] sm:$0xff] }
 0x6d2   : > { %v10488_v26 = vadd.f32 %v12968_v63, %v10428_v37  ;;  %v10431_v10 = vadd.f32 %v11427_v5, %v16884_v51 }
 0x6d4   : > { %v10520_v47 = vmax.f32 %v10488_v26, 0.0  ;;  %v10489_v22 = vadd.f32 %v12969_v49, %v10431_v10 }
 0x6d6   : > { %10552 = vst [vmem:[%s16892_s8 + $0xb0] sm:$0xff] %v10520_v47  ;;  %v10521_v53 = vmax.f32 %v10489_v22, 0.0 }
 0x6d8   : > { %10553 = vst [vmem:[%s16892_s8 + $0xb8] sm:$0xff] %v10521_v53 }
 0x6e0   : > { %v11428_v36 = vpop.f32.mrb[0].mxu0 }
 0x6e1   : > { %v11429_v55 = vpop.f32.mrb[1].mxu0 }
 0x6e2   : > { %v11430_v59 = vadd.f32 %v11429_v55, %v11428_v36  ;;  %v11431_v19 = vpop.f32.mrb[2].mxu0 }
 0x6e3   : > { %v11432_v24 = vpop.f32.mrb[3].mxu0 }
 0x6e4   : > { %v10436_v2 = vadd.f32 %v11430_v59, %v16884_v51  ;;  %v11433_v8 = vadd.f32 %v11432_v24, %v11431_v19 }
 0x6e6   : > { %v10490_v50 = vadd.f32 %v12970_v43, %v10436_v2  ;;  %v10439_v16 = vadd.f32 %v11433_v8, %v16884_v51 }
 0x6e8   : > { %v10522_v44 = vmax.f32 %v10490_v50, 0.0  ;;  %v10491_v6 = vadd.f32 %v12971_v12, %v10439_v16 }
 0x6ea   : > { %10554 = vst [vmem:[%s16892_s8 + $0xc0] sm:$0xff] %v10522_v44  ;;  %v10523_v31 = vmax.f32 %v10491_v6, 0.0  ;;  %v11434_v17 = vpop.f32.mrb[4].mxu0 }
 0x6eb   : > { %v11435_v18 = vpop.f32.mrb[5].mxu0 }
 0x6ec   : > { %10555 = vst [vmem:[%s16892_s8 + $0xc8] sm:$0xff] %v10523_v31  ;;  %v11436_v1 = vadd.f32 %v11435_v18, %v11434_v17  ;;  %v11437_v29 = vpop.f32.mrb[6].mxu0 }
 0x6ed   : > { %v11438_v34 = vpop.f32.mrb[7].mxu0 }
 0x6ee   : > { %v10444_v32 = vadd.f32 %v11436_v1, %v16884_v51  ;;  %v11439_v11 = vadd.f32 %v11438_v34, %v11437_v29 }
 0x6f0   : > { %v10492_v58 = vadd.f32 %v12972_v25, %v10444_v32  ;;  %v10447_v41 = vadd.f32 %v11439_v11, %v16884_v51 }
 0x6f2   : > { %v10524_v56 = vmax.f32 %v10492_v58, 0.0  ;;  %v10493_v52 = vadd.f32 %v12973_v45, %v10447_v41  ;;  %v11440_v4 = vpop.f32.mrb[8].mxu0 }
 0x6f3   : > { %v11441_v28 = vpop.f32.mrb[9].mxu0 }
 0x6f4   : > { %10556 = vst [vmem:[%s16892_s8 + $0xd0] sm:$0xff] %v10524_v56  ;;  %v10525_v62 = vmax.f32 %v10493_v52, 0.0  ;;  %v11442_v57 = vadd.f32 %v11441_v28, %v11440_v4  ;;  %v11443_v21 = vpop.f32.mrb[10].mxu0 }
 0x6f5   : > { %v11444_v15 = vpop.f32.mrb[11].mxu0 }
 0x6f6   : > { %10557 = vst [vmem:[%s16892_s8 + $0xd8] sm:$0xff] %v10525_v62  ;;  %v10452_v30 = vadd.f32 %v11442_v57, %v16884_v51  ;;  %v11445_v0 = vadd.f32 %v11444_v15, %v11443_v21 }
 0x6f8   : > { %v10494_v60 = vadd.f32 %v12974_v3, %v10452_v30  ;;  %v10455_v38 = vadd.f32 %v11445_v0, %v16884_v51 }
 0x6fa   : > { %v10526_v48 = vmax.f32 %v10494_v60, 0.0  ;;  %v10495_v23 = vadd.f32 %v12975_v20, %v10455_v38  ;;  %v11446_v61 = vpop.f32.mrb[12].mxu0 }
 0x6fb   : > { %v11447_v35 = vpop.f32.mrb[13].mxu0 }
 0x6fc   : > { %10558 = vst [vmem:[%s16892_s8 + $0xe0] sm:$0xff] %v10526_v48  ;;  %v10527_v54 = vmax.f32 %v10495_v23, 0.0  ;;  %v11448_v13 = vadd.f32 %v11447_v35, %v11446_v61  ;;  %v11449_v33 = vpop.f32.mrb[14].mxu0 }
 0x6fd   : > { %v11450_v7 = vpop.f32.mrb[15].mxu0 }
 0x6fe   : > { %10559 = vst [vmem:[%s16892_s8 + $0xe8] sm:$0xff] %v10527_v54  ;;  %v10460_v42 = vadd.f32 %v11448_v13, %v16884_v51  ;;  %v11451_v40 = vadd.f32 %v11450_v7, %v11449_v33 }
 0x700   : > { %v10496_v46 = vadd.f32 %v12976_v39, %v10460_v42  ;;  %v10463_v9 = vadd.f32 %v11451_v40, %v16884_v51 }
 0x702   : > { %v10528_v27 = vmax.f32 %v10496_v46, 0.0  ;;  %v10497_v37 = vadd.f32 %v12977_v14, %v10463_v9 }
 0x704   : > { %10560 = vst [vmem:[%s16892_s8 + $0xf0] sm:$0xff] %v10528_v27  ;;  %v10529_v5 = vmax.f32 %v10497_v37, 0.0 }
 0x706   : > { %10561 = vst [vmem:[%s16892_s8 + $0xf8] sm:$0xff] %v10529_v5 }
 0x707   : > { %13189 = shalt.err (!%p13186_p8)
}
 0x708   : > { %s13190_s1 = scalar_lea.hbm %s16989_s13, 4096  ;;  %s13194_s15 = scalar_lea.hbm %s17044_s7, 8192 }
 0x709   : > { %p13191_p4 = scmp.ne.s32.totalorder %s16989_s13, %s13190_s1  ;;  %p13195_p0 = scmp.lt.u32.totalorder %s16989_s13, %s17044_s7 }
 0x70a   : > { %p13196_p5 = scmp.lt.u32.totalorder %s13194_s15, %s13190_s1  ;;  %p13198_p6 = scmp.lt.u32.totalorder %s13190_s1, %s16989_s13 }
 0x70b   : > { %p13192_p10 = pnand %p13191_p4, %p17973_p9 }
 0x70c   : > { %p13197_p7 = por %p13196_p5, %p13195_p0 }
 0x70d   : > { %p13193_p11 = pneg %p13192_p10 }
 0x70e   : > { %p13199_p12 = por %p13198_p6, %p13197_p7 }
 0x710   : > { %p13200_p13 = pnand %p13199_p12, %p13193_p11 }
 0x712   : > { %13203 = shalt.err (!%p13200_p13)
}
 0x713   : > { %s13270_s12 = smov 128   ;;  %s13271_s19 = smov 8  }
 0x714   : > { %12230 = dma.vmem_to_hbm [thread:$0]  (%p17973_p9), %s16991_s16, 4096, %s16989_s13, %s10563_s22, %s13270_s12, %s13270_s12, %s13271_s19  }
 0x715 PF: > { %s10592_s9 = sand.u32 1, %s13242_s24   ;;  %p17974_p1 = scmp.ne.s32.totalorder %s17285_s21, 0 }
 0x716   : > { %p17975_p3 = scmp.ge.s32.totalorder %s13254_s27, 2  ;;  %s10593_s30 = scalar_lea.sflag [#allocation5], %s10592_s9 }
 0x718   : > { %p12256_p2 = pnand %p17975_p3, %p17974_p1 }
 0x71a   : > { %13237 = dma.done.wait (!%p12256_p2), %s10593_s30, 4096  }
 0x71b   : > { %13239 = vsyncadd (!%p12256_p2), %s10593_s30, 4294963200  ;;  %p23_p8 = scmp.ge.s32.totalorder %s13494_s11, 4   ;;  %s17976_s24 = smov %s13246_s25 }
 0x71c   : > { %s17977_s25 = smov %s13250_s26  ;;  %s17978_s26 = smov %s13505_s18 }
 0x71d   : > { %s17979_s27 = smov %s13494_s11  ;;  %25 = sbr.rel (!%p23_p8) target bundleno = 10 (0xa), region = 117 }
 0x724   :  { %10598 = vsyncpa [#allocation4], 1 }
 0x725   :  { %10600 = vsyncpa [#allocation4 + $0x1], 1 }
 0x726   :  { %10601 = vsyncpa [#allocation7], 1 }
 0x727   :  { %10602 = vsyncpa [#allocation10], 1 }
 0x728   :  { %10603 = vsyncpa [#allocation13], 1 }
 0x729   :  { %10604 = vsyncpa [#allocation5], 1 }
 0x72a   :  { %10606 = vsyncpa [#allocation5 + $0x1], 1 }

</bundles_post_ra>
